<compile_context>
chip_gen: v7x
topology: tpu7x:2x2x1
jax: 0.10.0
libtpu: 0.0.40
codegen_flags: <defaults>
</compile_context>

<pallas_src>
import functools
import math

import jax
import jax.numpy as jnp
from jax import lax
from jax.experimental import pallas as pl
from jax.experimental.pallas import tpu as pltpu

LRELU_ALPHA = 0.1          # SModel uses nn.LeakyReLU(0.1)
LANE = 128

_CONV_CFG = (("conv1", 24, 5, 2), ("conv2", 36, 5, 2), ("conv3", 48, 5, 2),
             ("conv4", 64, 3, 1), ("conv5", 64, 3, 1))
_FC_CFG = (("fc1", 1152, 1164), ("fc2", 1164, 100), ("fc3", 100, 50),
           ("fc4", 50, 10), ("fc5", 10, 1))


def _round_up(x, m):
    return ((x + m - 1) // m) * m


# ---------------------------------------------------------------------------
# Pallas kernel: out = leaky_relu(x @ w + b)   (activation optional)
# x: bf16 (tm, K), w: bf16 (K, Np) with Np % 128 == 0, b: f32 (1, Np)
# ---------------------------------------------------------------------------
def _mm_bias_lrelu_kernel(x_ref, w_ref, b_ref, o_ref, *, alpha, apply_act):
    acc = jnp.dot(x_ref[...], w_ref[...], preferred_element_type=jnp.float32)
    acc = acc + b_ref[...]
    if apply_act:
        acc = jnp.maximum(acc, alpha * acc)        # LeakyReLU, single VALU op
    o_ref[...] = acc.astype(o_ref.dtype)


def matmul_bias_lrelu(x, w, b, *, alpha=LRELU_ALPHA, apply_act=True,
                      out_dtype=jnp.bfloat16, tile_m=1024):
    """x: (M, K) bf16, w: (K, Np) bf16 (lane-padded), b: (1, Np) f32 -> (M, Np)."""
    M, K = x.shape
    Kw, Np = w.shape
    assert K == Kw and Np % LANE == 0, (K, Kw, Np)

    # >=2 grid steps whenever possible (keeps both v7x TensorCores busy), large
    # tiles to amortize the per-step overhead on v5e/v6e.  The trailing partial
    # M block is handled by Pallas boundary masking (rows are independent).
    tm = min(tile_m, max(8, _round_up(pl.cdiv(M, 2), 8)))
    grid = (pl.cdiv(M, tm),)

    return pl.pallas_call(
        functools.partial(_mm_bias_lrelu_kernel, alpha=alpha, apply_act=apply_act),
        out_shape=jax.ShapeDtypeStruct((M, Np), out_dtype),
        grid_spec=pltpu.PrefetchScalarGridSpec(
            num_scalar_prefetch=0,
            grid=grid,
            in_specs=[
                pl.BlockSpec((tm, K), lambda i: (i, 0)),   # activation rows
                pl.BlockSpec((K, Np), lambda i: (0, 0)),   # full padded weight
                pl.BlockSpec((1, Np), lambda i: (0, 0)),   # bias row
            ],
            out_specs=pl.BlockSpec((tm, Np), lambda i: (i, 0)),   # lane-dense
        ),
        compiler_params=pltpu.CompilerParams(
            dimension_semantics=("parallel",)),
    )(x, w, b)


# ---------------------------------------------------------------------------
# Conv2d (valid padding) = patch extraction (NHWC) + fused Pallas matmul
# ---------------------------------------------------------------------------
def conv2d_lrelu(x_nhwc, w_pad, b_pad, *, oc, k, stride, alpha=LRELU_ALPHA):
    B, H, W, C = x_nhwc.shape
    oh = (H - k) // stride + 1
    ow = (W - k) // stride + 1
    # (B, oh, ow, C*k*k); patch features are channel-major then row-major
    # filter spatial -> matches the (OC, C, KH, KW) PyTorch weight flattening
    # used in prepare_params.
    patches = lax.conv_general_dilated_patches(
        x_nhwc, (k, k), (stride, stride), "VALID",
        dimension_numbers=("NHWC", "HWIO", "NHWC"))
    patches = patches.reshape(B * oh * ow, C * k * k)
    y = matmul_bias_lrelu(patches, w_pad, b_pad, alpha=alpha, apply_act=True)
    # drop the inert padded output channels, stay NHWC bf16
    return y[:, :oc].reshape(B, oh, ow, oc)


# ---------------------------------------------------------------------------
# Fused fc1..fc5 chain: one Pallas call, all weights resident in VMEM.
# All widths are pre-padded to multiples of 128 (padding columns/rows are zero
# so they contribute nothing); dropout(0.3) is identity at inference time.
# ---------------------------------------------------------------------------
def _fc_chain_kernel(x_ref, w1, b1, w2, b2, w3, b3, w4, b4, w5, b5, o_ref, *, alpha):
    def layer(h, w_ref, b_ref, act):
        acc = jnp.dot(h, w_ref[...], preferred_element_type=jnp.float32)
        acc = acc + b_ref[...]
        if act:
            acc = jnp.maximum(acc, alpha * acc)
        return acc

    h = layer(x_ref[...], w1, b1, True).astype(jnp.bfloat16)
    h = layer(h, w2, b2, True).astype(jnp.bfloat16)
    h = layer(h, w3, b3, True).astype(jnp.bfloat16)
    h = layer(h, w4, b4, True).astype(jnp.bfloat16)
    # Dropout(0.3) is identity in eval mode -> nothing to do here.
    o_ref[...] = layer(h, w5, b5, False)


def fc_chain(x_bf16, fc_params, *, alpha=LRELU_ALPHA):
    B = x_bf16.shape[0]
    flat = []
    for w_pad, b_pad in fc_params:
        flat += [w_pad, b_pad]
    out = pl.pallas_call(
        functools.partial(_fc_chain_kernel, alpha=alpha),
        out_shape=jax.ShapeDtypeStruct((B, LANE), jnp.float32),
    )(x_bf16, *flat)
    return out[:, :1]                                  # real fc5 width is 1


# ---------------------------------------------------------------------------
# Deterministic parameter init (PyTorch-equivalent shapes / init rules)
# ---------------------------------------------------------------------------
def init_params(key):
    keys = jax.random.split(key, 20)
    ki = iter(keys)

    def conv_init(oc, c, k):
        fan_in = c * k * k
        bound = 1.0 / math.sqrt(fan_in)          # PyTorch conv default init
        w = jax.random.uniform(next(ki), (oc, c, k, k), jnp.float32, -bound, bound)
        b = jax.random.uniform(next(ki), (oc,), jnp.float32, -bound, bound)
        return w, b

    def linear_init(out_f, in_f):
        wb = math.sqrt(6.0 / (in_f + out_f))     # weights_init() for Linear
        w = jax.random.uniform(next(ki), (out_f, in_f), jnp.float32, -wb, wb)
        b = jnp.zeros((out_f,), jnp.float32)
        return w, b

    p = {}
    p["conv1"] = conv_init(24, 3, 5)
    p["conv2"] = conv_init(36, 24, 5)
    p["conv3"] = conv_init(48, 36, 5)
    p["conv4"] = conv_init(64, 48, 3)
    p["conv5"] = conv_init(64, 64, 3)
    p["fc1"] = linear_init(1164, 1152)
    p["fc2"] = linear_init(100, 1164)
    p["fc3"] = linear_init(50, 100)
    p["fc4"] = linear_init(10, 50)
    p["fc5"] = linear_init(1, 10)
    return p


def prepare_params(params, input_hw):
    """One-time repack of PyTorch-layout params into kernel-ready form:
    pre-transposed, zero-padded to 128-lane widths, bf16 weights / f32 biases.
    Runs once outside the per-forward path (no per-call transposes/pads)."""
    prepped = {"convs": [], "fcs": []}

    h, w = input_hw
    for name, oc, k, s in _CONV_CFG:
        cw, cb = params[name]                            # (OC, C, K, K), (OC,)
        kdim = cw.shape[1] * k * k
        wt = cw.reshape(oc, kdim).T.astype(jnp.bfloat16)            # (K, OC)
        w_pad = jnp.zeros((kdim, LANE), jnp.bfloat16).at[:, :oc].set(wt)
        b_pad = jnp.zeros((1, LANE), jnp.float32).at[0, :oc].set(cb)
        prepped["convs"].append((w_pad, b_pad))
        h, w = (h - k) // s + 1, (w - k) // s + 1
    oh5, ow5 = h, w
    c5 = _CONV_CFG[-1][1]
    assert c5 * oh5 * ow5 == _FC_CFG[0][1], (c5, oh5, ow5)

    # fc1 column permutation: our activations flatten as NHWC, PyTorch's
    # x.view(B,-1) flattens NCHW.  Permute fc1's input columns once here so no
    # activation transpose is needed at runtime.
    perm = (jnp.arange(c5 * oh5 * ow5)
            .reshape(c5, oh5, ow5).transpose(1, 2, 0).reshape(-1))

    in_pads = (c5 * oh5 * ow5, 1280, 128, 128, 128)
    out_pads = (1280, 128, 128, 128, 128)
    for idx, (name, in_f, out_f) in enumerate(_FC_CFG):
        fw, fb = params[name]                            # (out_f, in_f)
        if idx == 0:
            fw = fw[:, perm]
        wt = fw.T.astype(jnp.bfloat16)                   # (in_f, out_f)
        w_pad = (jnp.zeros((in_pads[idx], out_pads[idx]), jnp.bfloat16)
                 .at[:in_f, :out_f].set(wt))
        b_pad = jnp.zeros((1, out_pads[idx]), jnp.float32).at[0, :out_f].set(fb)
        prepped["fcs"].append((w_pad, b_pad))
    return prepped


# ---------------------------------------------------------------------------
# Full forward pass (jittable; prepped contains arrays only)
# ---------------------------------------------------------------------------
def smodel_forward(prepped, x_nchw):
    # single layout change at the input; everything downstream is NHWC bf16
    x = jnp.transpose(x_nchw, (0, 2, 3, 1)).astype(jnp.bfloat16)
    for (w_pad, b_pad), (_, oc, k, s) in zip(prepped["convs"], _CONV_CFG):
        x = conv2d_lrelu(x, w_pad, b_pad, oc=oc, k=k, stride=s)
    B = x.shape[0]
    x = x.reshape(B, -1)            # NHWC flatten; fc1 columns were pre-permuted
    return fc_chain(x, prepped["fcs"])                   # (B, 1) float32


if __name__ == "__main__":
    key = jax.random.PRNGKey(0)
    k_params, k_input = jax.random.split(key)
    params = init_params(k_params)
    prepped = prepare_params(params, input_hw=(66, 200))
    # 66x200 spatial input makes the flattened feature size 1152 (= fc1 in),
    # as in the original PilotNet-style model.
    x = jax.random.normal(k_input, (2, 3, 66, 200), jnp.float32)

    fwd = jax.jit(smodel_forward)
    out = jax.block_until_ready(fwd(prepped, x))
    assert out.shape == (2, 1), out.shape
    print("KERNEL_OK")
</pallas_src>

<mosaic_0001>
module attributes {stable_mosaic.version = 11 : i64} {
  func.func @_mm_bias_lrelu_kernel(%arg0: i32, %arg1: memref<1024x75xbf16, #tpu.memory_space<vmem>>, %arg2: memref<75x128xbf16, #tpu.memory_space<vmem>>, %arg3: memref<1x128xf32, #tpu.memory_space<vmem>>, %arg4: memref<1024x128xbf16, #tpu.memory_space<vmem>>) attributes {dimension_semantics = [#tpu.dimension_semantics<parallel>], iteration_bounds = array<i64: 6>, scalar_prefetch = 0 : i64, scratch_operands = 0 : i64, tpu.core_type = #tpu.core_type<tc>, window_params = [{transform_indices = @transform_0, window_bounds = array<i64: 1024, 75>}, {pipeline_mode = #tpu.pipeline_mode<synchronous>, transform_indices = @transform_1, window_bounds = array<i64: 75, 128>}, {pipeline_mode = #tpu.pipeline_mode<synchronous>, transform_indices = @transform_2, window_bounds = array<i64: 1, 128>}, {transform_indices = @transform_3, window_bounds = array<i64: 1024, 128>}]} {
    %c0 = arith.constant 0 : index
    %c0_0 = arith.constant 0 : index
    %0 = vector.load %arg1[%c0, %c0_0] : memref<1024x75xbf16, #tpu.memory_space<vmem>>, vector<1024x75xbf16>
    %c0_1 = arith.constant 0 : index
    %c0_2 = arith.constant 0 : index
    %1 = vector.load %arg2[%c0_1, %c0_2] : memref<75x128xbf16, #tpu.memory_space<vmem>>, vector<75x128xbf16>
    %cst = arith.constant dense<0.000000e+00> : vector<1024x128xf32>
    %2 = tpu.matmul %0, %1, %cst {dimension_numbers = #tpu.dot_dimension_numbers<[1], [0], [0], [1], [0, 0, 1, 1], [], []>} : vector<1024x75xbf16>, vector<75x128xbf16>, vector<1024x128xf32> -> vector<1024x128xf32>
    %c0_3 = arith.constant 0 : index
    %c0_4 = arith.constant 0 : index
    %3 = vector.load %arg3[%c0_3, %c0_4] : memref<1x128xf32, #tpu.memory_space<vmem>>, vector<1x128xf32>
    %4 = vector.broadcast %3 : vector<1x128xf32> to vector<1024x128xf32>
    %5 = arith.addf %2, %4 : vector<1024x128xf32>
    %cst_5 = arith.constant 1.000000e-01 : f32
    %6 = vector.broadcast %cst_5 : f32 to vector<1024x128xf32>
    %7 = arith.mulf %6, %5 : vector<1024x128xf32>
    %8 = arith.maximumf %5, %7 : vector<1024x128xf32>
    %9 = arith.truncf %8 : vector<1024x128xf32> to vector<1024x128xbf16>
    %c0_6 = arith.constant 0 : index
    %c0_7 = arith.constant 0 : index
    %10 = vector.load %arg4[%c0_6, %c0_7] : memref<1024x128xbf16, #tpu.memory_space<vmem>>, vector<1024x128xbf16>
    tpu.vector_store %arg4[%c0_6, %c0_7], %9 {strides = array<i32>} : memref<1024x128xbf16, #tpu.memory_space<vmem>>, vector<1024x128xbf16>,
    return
  }
  func.func @transform_0(%arg0: i32) -> (i32, i32) {
    %c0_i32 = arith.constant 0 : i32
    %c0_i32_0 = arith.constant 0 : i32
    return %arg0, %c0_i32 : i32, i32
  }
  func.func @transform_1(%arg0: i32) -> (i32, i32) {
    %c0_i32 = arith.constant 0 : i32
    %c0_i32_0 = arith.constant 0 : i32
    %c0_i32_1 = arith.constant 0 : i32
    return %c0_i32, %c0_i32_0 : i32, i32
  }
  func.func @transform_2(%arg0: i32) -> (i32, i32) {
    %c0_i32 = arith.constant 0 : i32
    %c0_i32_0 = arith.constant 0 : i32
    %c0_i32_1 = arith.constant 0 : i32
    return %c0_i32, %c0_i32_0 : i32, i32
  }
  func.func @transform_3(%arg0: i32) -> (i32, i32) {
    %c0_i32 = arith.constant 0 : i32
    %c0_i32_0 = arith.constant 0 : i32
    return %arg0, %c0_i32 : i32, i32
  }
}

module attributes {stable_mosaic.version = 11 : i64} {
  func.func @_mm_bias_lrelu_kernel(%arg0: i32, %arg1: memref<664x600xbf16, #tpu.memory_space<vmem>>, %arg2: memref<600x128xbf16, #tpu.memory_space<vmem>>, %arg3: memref<1x128xf32, #tpu.memory_space<vmem>>, %arg4: memref<664x128xbf16, #tpu.memory_space<vmem>>) attributes {dimension_semantics = [#tpu.dimension_semantics<parallel>], iteration_bounds = array<i64: 2>, scalar_prefetch = 0 : i64, scratch_operands = 0 : i64, tpu.core_type = #tpu.core_type<tc>, window_params = [{transform_indices = @transform_0, window_bounds = array<i64: 664, 600>}, {pipeline_mode = #tpu.pipeline_mode<synchronous>, transform_indices = @transform_1, window_bounds = array<i64: 600, 128>}, {pipeline_mode = #tpu.pipeline_mode<synchronous>, transform_indices = @transform_2, window_bounds = array<i64: 1, 128>}, {transform_indices = @transform_3, window_bounds = array<i64: 664, 128>}]} {
    %c0 = arith.constant 0 : index
    %c0_0 = arith.constant 0 : index
    %0 = vector.load %arg1[%c0, %c0_0] : memref<664x600xbf16, #tpu.memory_space<vmem>>, vector<664x600xbf16>
    %c0_1 = arith.constant 0 : index
    %c0_2 = arith.constant 0 : index
    %1 = vector.load %arg2[%c0_1, %c0_2] : memref<600x128xbf16, #tpu.memory_space<vmem>>, vector<600x128xbf16>
    %cst = arith.constant dense<0.000000e+00> : vector<664x128xf32>
    %2 = tpu.matmul %0, %1, %cst {dimension_numbers = #tpu.dot_dimension_numbers<[1], [0], [0], [1], [0, 0, 1, 1], [], []>} : vector<664x600xbf16>, vector<600x128xbf16>, vector<664x128xf32> -> vector<664x128xf32>
    %c0_3 = arith.constant 0 : index
    %c0_4 = arith.constant 0 : index
    %3 = vector.load %arg3[%c0_3, %c0_4] : memref<1x128xf32, #tpu.memory_space<vmem>>, vector<1x128xf32>
    %4 = vector.broadcast %3 : vector<1x128xf32> to vector<664x128xf32>
    %5 = arith.addf %2, %4 : vector<664x128xf32>
    %cst_5 = arith.constant 1.000000e-01 : f32
    %6 = vector.broadcast %cst_5 : f32 to vector<664x128xf32>
    %7 = arith.mulf %6, %5 : vector<664x128xf32>
    %8 = arith.maximumf %5, %7 : vector<664x128xf32>
    %9 = arith.truncf %8 : vector<664x128xf32> to vector<664x128xbf16>
    %c0_6 = arith.constant 0 : index
    %c0_7 = arith.constant 0 : index
    %10 = vector.load %arg4[%c0_6, %c0_7] : memref<664x128xbf16, #tpu.memory_space<vmem>>, vector<664x128xbf16>
    tpu.vector_store %arg4[%c0_6, %c0_7], %9 {strides = array<i32>} : memref<664x128xbf16, #tpu.memory_space<vmem>>, vector<664x128xbf16>,
    return
  }
  func.func @transform_0(%arg0: i32) -> (i32, i32) {
    %c0_i32 = arith.constant 0 : i32
    %c0_i32_0 = arith.constant 0 : i32
    return %arg0, %c0_i32 : i32, i32
  }
  func.func @transform_1(%arg0: i32) -> (i32, i32) {
    %c0_i32 = arith.constant 0 : i32
    %c0_i32_0 = arith.constant 0 : i32
    %c0_i32_1 = arith.constant 0 : i32
    return %c0_i32, %c0_i32_0 : i32, i32
  }
  func.func @transform_2(%arg0: i32) -> (i32, i32) {
    %c0_i32 = arith.constant 0 : i32
    %c0_i32_0 = arith.constant 0 : i32
    %c0_i32_1 = arith.constant 0 : i32
    return %c0_i32, %c0_i32_0 : i32, i32
  }
  func.func @transform_3(%arg0: i32) -> (i32, i32) {
    %c0_i32 = arith.constant 0 : i32
    %c0_i32_0 = arith.constant 0 : i32
    return %arg0, %c0_i32 : i32, i32
  }
}

module attributes {stable_mosaic.version = 11 : i64} {
  func.func @_mm_bias_lrelu_kernel(%arg0: i32, %arg1: memref<112x900xbf16, #tpu.memory_space<vmem>>, %arg2: memref<900x128xbf16, #tpu.memory_space<vmem>>, %arg3: memref<1x128xf32, #tpu.memory_space<vmem>>, %arg4: memref<112x128xbf16, #tpu.memory_space<vmem>>) attributes {dimension_semantics = [#tpu.dimension_semantics<parallel>], iteration_bounds = array<i64: 2>, scalar_prefetch = 0 : i64, scratch_operands = 0 : i64, tpu.core_type = #tpu.core_type<tc>, window_params = [{transform_indices = @transform_0, window_bounds = array<i64: 112, 900>}, {pipeline_mode = #tpu.pipeline_mode<synchronous>, transform_indices = @transform_1, window_bounds = array<i64: 900, 128>}, {pipeline_mode = #tpu.pipeline_mode<synchronous>, transform_indices = @transform_2, window_bounds = array<i64: 1, 128>}, {transform_indices = @transform_3, window_bounds = array<i64: 112, 128>}]} {
    %c0 = arith.constant 0 : index
    %c0_0 = arith.constant 0 : index
    %0 = vector.load %arg1[%c0, %c0_0] : memref<112x900xbf16, #tpu.memory_space<vmem>>, vector<112x900xbf16>
    %c0_1 = arith.constant 0 : index
    %c0_2 = arith.constant 0 : index
    %1 = vector.load %arg2[%c0_1, %c0_2] : memref<900x128xbf16, #tpu.memory_space<vmem>>, vector<900x128xbf16>
    %cst = arith.constant dense<0.000000e+00> : vector<112x128xf32>
    %2 = tpu.matmul %0, %1, %cst {dimension_numbers = #tpu.dot_dimension_numbers<[1], [0], [0], [1], [0, 0, 1, 1], [], []>} : vector<112x900xbf16>, vector<900x128xbf16>, vector<112x128xf32> -> vector<112x128xf32>
    %c0_3 = arith.constant 0 : index
    %c0_4 = arith.constant 0 : index
    %3 = vector.load %arg3[%c0_3, %c0_4] : memref<1x128xf32, #tpu.memory_space<vmem>>, vector<1x128xf32>
    %4 = vector.broadcast %3 : vector<1x128xf32> to vector<112x128xf32>
    %5 = arith.addf %2, %4 : vector<112x128xf32>
    %cst_5 = arith.constant 1.000000e-01 : f32
    %6 = vector.broadcast %cst_5 : f32 to vector<112x128xf32>
    %7 = arith.mulf %6, %5 : vector<112x128xf32>
    %8 = arith.maximumf %5, %7 : vector<112x128xf32>
    %9 = arith.truncf %8 : vector<112x128xf32> to vector<112x128xbf16>
    %c0_6 = arith.constant 0 : index
    %c0_7 = arith.constant 0 : index
    %10 = vector.load %arg4[%c0_6, %c0_7] : memref<112x128xbf16, #tpu.memory_space<vmem>>, vector<112x128xbf16>
    tpu.vector_store %arg4[%c0_6, %c0_7], %9 {strides = array<i32>} : memref<112x128xbf16, #tpu.memory_space<vmem>>, vector<112x128xbf16>,
    return
  }
  func.func @transform_0(%arg0: i32) -> (i32, i32) {
    %c0_i32 = arith.constant 0 : i32
    %c0_i32_0 = arith.constant 0 : i32
    return %arg0, %c0_i32 : i32, i32
  }
  func.func @transform_1(%arg0: i32) -> (i32, i32) {
    %c0_i32 = arith.constant 0 : i32
    %c0_i32_0 = arith.constant 0 : i32
    %c0_i32_1 = arith.constant 0 : i32
    return %c0_i32, %c0_i32_0 : i32, i32
  }
  func.func @transform_2(%arg0: i32) -> (i32, i32) {
    %c0_i32 = arith.constant 0 : i32
    %c0_i32_0 = arith.constant 0 : i32
    %c0_i32_1 = arith.constant 0 : i32
    return %c0_i32, %c0_i32_0 : i32, i32
  }
  func.func @transform_3(%arg0: i32) -> (i32, i32) {
    %c0_i32 = arith.constant 0 : i32
    %c0_i32_0 = arith.constant 0 : i32
    return %arg0, %c0_i32 : i32, i32
  }
}

module attributes {stable_mosaic.version = 11 : i64} {
  func.func @_mm_bias_lrelu_kernel(%arg0: i32, %arg1: memref<64x432xbf16, #tpu.memory_space<vmem>>, %arg2: memref<432x128xbf16, #tpu.memory_space<vmem>>, %arg3: memref<1x128xf32, #tpu.memory_space<vmem>>, %arg4: memref<64x128xbf16, #tpu.memory_space<vmem>>) attributes {dimension_semantics = [#tpu.dimension_semantics<parallel>], iteration_bounds = array<i64: 2>, scalar_prefetch = 0 : i64, scratch_operands = 0 : i64, tpu.core_type = #tpu.core_type<tc>, window_params = [{transform_indices = @transform_0, window_bounds = array<i64: 64, 432>}, {pipeline_mode = #tpu.pipeline_mode<synchronous>, transform_indices = @transform_1, window_bounds = array<i64: 432, 128>}, {pipeline_mode = #tpu.pipeline_mode<synchronous>, transform_indices = @transform_2, window_bounds = array<i64: 1, 128>}, {transform_indices = @transform_3, window_bounds = array<i64: 64, 128>}]} {
    %c0 = arith.constant 0 : index
    %c0_0 = arith.constant 0 : index
    %0 = vector.load %arg1[%c0, %c0_0] : memref<64x432xbf16, #tpu.memory_space<vmem>>, vector<64x432xbf16>
    %c0_1 = arith.constant 0 : index
    %c0_2 = arith.constant 0 : index
    %1 = vector.load %arg2[%c0_1, %c0_2] : memref<432x128xbf16, #tpu.memory_space<vmem>>, vector<432x128xbf16>
    %cst = arith.constant dense<0.000000e+00> : vector<64x128xf32>
    %2 = tpu.matmul %0, %1, %cst {dimension_numbers = #tpu.dot_dimension_numbers<[1], [0], [0], [1], [0, 0, 1, 1], [], []>} : vector<64x432xbf16>, vector<432x128xbf16>, vector<64x128xf32> -> vector<64x128xf32>
    %c0_3 = arith.constant 0 : index
    %c0_4 = arith.constant 0 : index
    %3 = vector.load %arg3[%c0_3, %c0_4] : memref<1x128xf32, #tpu.memory_space<vmem>>, vector<1x128xf32>
    %4 = vector.broadcast %3 : vector<1x128xf32> to vector<64x128xf32>
    %5 = arith.addf %2, %4 : vector<64x128xf32>
    %cst_5 = arith.constant 1.000000e-01 : f32
    %6 = vector.broadcast %cst_5 : f32 to vector<64x128xf32>
    %7 = arith.mulf %6, %5 : vector<64x128xf32>
    %8 = arith.maximumf %5, %7 : vector<64x128xf32>
    %9 = arith.truncf %8 : vector<64x128xf32> to vector<64x128xbf16>
    %c0_6 = arith.constant 0 : index
    %c0_7 = arith.constant 0 : index
    %10 = vector.load %arg4[%c0_6, %c0_7] : memref<64x128xbf16, #tpu.memory_space<vmem>>, vector<64x128xbf16>
    tpu.vector_store %arg4[%c0_6, %c0_7], %9 {strides = array<i32>} : memref<64x128xbf16, #tpu.memory_space<vmem>>, vector<64x128xbf16>,
    return
  }
  func.func @transform_0(%arg0: i32) -> (i32, i32) {
    %c0_i32 = arith.constant 0 : i32
    %c0_i32_0 = arith.constant 0 : i32
    return %arg0, %c0_i32 : i32, i32
  }
  func.func @transform_1(%arg0: i32) -> (i32, i32) {
    %c0_i32 = arith.constant 0 : i32
    %c0_i32_0 = arith.constant 0 : i32
    %c0_i32_1 = arith.constant 0 : i32
    return %c0_i32, %c0_i32_0 : i32, i32
  }
  func.func @transform_2(%arg0: i32) -> (i32, i32) {
    %c0_i32 = arith.constant 0 : i32
    %c0_i32_0 = arith.constant 0 : i32
    %c0_i32_1 = arith.constant 0 : i32
    return %c0_i32, %c0_i32_0 : i32, i32
  }
  func.func @transform_3(%arg0: i32) -> (i32, i32) {
    %c0_i32 = arith.constant 0 : i32
    %c0_i32_0 = arith.constant 0 : i32
    return %arg0, %c0_i32 : i32, i32
  }
}

module attributes {stable_mosaic.version = 11 : i64} {
  func.func @_mm_bias_lrelu_kernel(%arg0: i32, %arg1: memref<24x576xbf16, #tpu.memory_space<vmem>>, %arg2: memref<576x128xbf16, #tpu.memory_space<vmem>>, %arg3: memref<1x128xf32, #tpu.memory_space<vmem>>, %arg4: memref<24x128xbf16, #tpu.memory_space<vmem>>) attributes {dimension_semantics = [#tpu.dimension_semantics<parallel>], iteration_bounds = array<i64: 2>, scalar_prefetch = 0 : i64, scratch_operands = 0 : i64, tpu.core_type = #tpu.core_type<tc>, window_params = [{transform_indices = @transform_0, window_bounds = array<i64: 24, 576>}, {pipeline_mode = #tpu.pipeline_mode<synchronous>, transform_indices = @transform_1, window_bounds = array<i64: 576, 128>}, {pipeline_mode = #tpu.pipeline_mode<synchronous>, transform_indices = @transform_2, window_bounds = array<i64: 1, 128>}, {transform_indices = @transform_3, window_bounds = array<i64: 24, 128>}]} {
    %c0 = arith.constant 0 : index
    %c0_0 = arith.constant 0 : index
    %0 = vector.load %arg1[%c0, %c0_0] : memref<24x576xbf16, #tpu.memory_space<vmem>>, vector<24x576xbf16>
    %c0_1 = arith.constant 0 : index
    %c0_2 = arith.constant 0 : index
    %1 = vector.load %arg2[%c0_1, %c0_2] : memref<576x128xbf16, #tpu.memory_space<vmem>>, vector<576x128xbf16>
    %cst = arith.constant dense<0.000000e+00> : vector<24x128xf32>
    %2 = tpu.matmul %0, %1, %cst {dimension_numbers = #tpu.dot_dimension_numbers<[1], [0], [0], [1], [0, 0, 1, 1], [], []>} : vector<24x576xbf16>, vector<576x128xbf16>, vector<24x128xf32> -> vector<24x128xf32>
    %c0_3 = arith.constant 0 : index
    %c0_4 = arith.constant 0 : index
    %3 = vector.load %arg3[%c0_3, %c0_4] : memref<1x128xf32, #tpu.memory_space<vmem>>, vector<1x128xf32>
    %4 = vector.broadcast %3 : vector<1x128xf32> to vector<24x128xf32>
    %5 = arith.addf %2, %4 : vector<24x128xf32>
    %cst_5 = arith.constant 1.000000e-01 : f32
    %6 = vector.broadcast %cst_5 : f32 to vector<24x128xf32>
    %7 = arith.mulf %6, %5 : vector<24x128xf32>
    %8 = arith.maximumf %5, %7 : vector<24x128xf32>
    %9 = arith.truncf %8 : vector<24x128xf32> to vector<24x128xbf16>
    %c0_6 = arith.constant 0 : index
    %c0_7 = arith.constant 0 : index
    %10 = vector.load %arg4[%c0_6, %c0_7] : memref<24x128xbf16, #tpu.memory_space<vmem>>, vector<24x128xbf16>
    tpu.vector_store %arg4[%c0_6, %c0_7], %9 {strides = array<i32>} : memref<24x128xbf16, #tpu.memory_space<vmem>>, vector<24x128xbf16>,
    return
  }
  func.func @transform_0(%arg0: i32) -> (i32, i32) {
    %c0_i32 = arith.constant 0 : i32
    %c0_i32_0 = arith.constant 0 : i32
    return %arg0, %c0_i32 : i32, i32
  }
  func.func @transform_1(%arg0: i32) -> (i32, i32) {
    %c0_i32 = arith.constant 0 : i32
    %c0_i32_0 = arith.constant 0 : i32
    %c0_i32_1 = arith.constant 0 : i32
    return %c0_i32, %c0_i32_0 : i32, i32
  }
  func.func @transform_2(%arg0: i32) -> (i32, i32) {
    %c0_i32 = arith.constant 0 : i32
    %c0_i32_0 = arith.constant 0 : i32
    %c0_i32_1 = arith.constant 0 : i32
    return %c0_i32, %c0_i32_0 : i32, i32
  }
  func.func @transform_3(%arg0: i32) -> (i32, i32) {
    %c0_i32 = arith.constant 0 : i32
    %c0_i32_0 = arith.constant 0 : i32
    return %arg0, %c0_i32 : i32, i32
  }
}

module attributes {stable_mosaic.version = 11 : i64} {
  func.func @_fc_chain_kernel(%arg0: memref<2x1152xbf16, #tpu.memory_space<vmem>>, %arg1: memref<1152x1280xbf16, #tpu.memory_space<vmem>>, %arg2: memref<1x1280xf32, #tpu.memory_space<vmem>>, %arg3: memref<1280x128xbf16, #tpu.memory_space<vmem>>, %arg4: memref<1x128xf32, #tpu.memory_space<vmem>>, %arg5: memref<128x128xbf16, #tpu.memory_space<vmem>>, %arg6: memref<1x128xf32, #tpu.memory_space<vmem>>, %arg7: memref<128x128xbf16, #tpu.memory_space<vmem>>, %arg8: memref<1x128xf32, #tpu.memory_space<vmem>>, %arg9: memref<128x128xbf16, #tpu.memory_space<vmem>>, %arg10: memref<1x128xf32, #tpu.memory_space<vmem>>, %arg11: memref<2x128xf32, #tpu.memory_space<vmem>>) attributes {dimension_semantics = [], scalar_prefetch = 0 : i64, scratch_operands = 0 : i64, tpu.core_type = #tpu.core_type<tc>} {
    %c0 = arith.constant 0 : index
    %c0_0 = arith.constant 0 : index
    %0 = vector.load %arg0[%c0, %c0_0] : memref<2x1152xbf16, #tpu.memory_space<vmem>>, vector<2x1152xbf16>
    %c0_1 = arith.constant 0 : index
    %c0_2 = arith.constant 0 : index
    %1 = vector.load %arg1[%c0_1, %c0_2] : memref<1152x1280xbf16, #tpu.memory_space<vmem>>, vector<1152x1280xbf16>
    %cst = arith.constant dense<0.000000e+00> : vector<2x1280xf32>
    %2 = tpu.matmul %0, %1, %cst {dimension_numbers = #tpu.dot_dimension_numbers<[1], [0], [0], [1], [0, 0, 1, 1], [], []>} : vector<2x1152xbf16>, vector<1152x1280xbf16>, vector<2x1280xf32> -> vector<2x1280xf32>
    %c0_3 = arith.constant 0 : index
    %c0_4 = arith.constant 0 : index
    %3 = vector.load %arg2[%c0_3, %c0_4] : memref<1x1280xf32, #tpu.memory_space<vmem>>, vector<1x1280xf32>
    %4 = vector.broadcast %3 : vector<1x1280xf32> to vector<2x1280xf32>
    %5 = arith.addf %2, %4 : vector<2x1280xf32>
    %cst_5 = arith.constant 1.000000e-01 : f32
    %6 = vector.broadcast %cst_5 : f32 to vector<2x1280xf32>
    %7 = arith.mulf %6, %5 : vector<2x1280xf32>
    %8 = arith.maximumf %5, %7 : vector<2x1280xf32>
    %9 = arith.truncf %8 : vector<2x1280xf32> to vector<2x1280xbf16>
    %c0_6 = arith.constant 0 : index
    %c0_7 = arith.constant 0 : index
    %10 = vector.load %arg3[%c0_6, %c0_7] : memref<1280x128xbf16, #tpu.memory_space<vmem>>, vector<1280x128xbf16>
    %cst_8 = arith.constant dense<0.000000e+00> : vector<2x128xf32>
    %11 = tpu.matmul %9, %10, %cst_8 {dimension_numbers = #tpu.dot_dimension_numbers<[1], [0], [0], [1], [0, 0, 1, 1], [], []>} : vector<2x1280xbf16>, vector<1280x128xbf16>, vector<2x128xf32> -> vector<2x128xf32>
    %c0_9 = arith.constant 0 : index
    %c0_10 = arith.constant 0 : index
    %12 = vector.load %arg4[%c0_9, %c0_10] : memref<1x128xf32, #tpu.memory_space<vmem>>, vector<1x128xf32>
    %13 = vector.broadcast %12 : vector<1x128xf32> to vector<2x128xf32>
    %14 = arith.addf %11, %13 : vector<2x128xf32>
    %cst_11 = arith.constant 1.000000e-01 : f32
    %15 = vector.broadcast %cst_11 : f32 to vector<2x128xf32>
    %16 = arith.mulf %15, %14 : vector<2x128xf32>
    %17 = arith.maximumf %14, %16 : vector<2x128xf32>
    %18 = arith.truncf %17 : vector<2x128xf32> to vector<2x128xbf16>
    %c0_12 = arith.constant 0 : index
    %c0_13 = arith.constant 0 : index
    %19 = vector.load %arg5[%c0_12, %c0_13] : memref<128x128xbf16, #tpu.memory_space<vmem>>, vector<128x128xbf16>
    %cst_14 = arith.constant dense<0.000000e+00> : vector<2x128xf32>
    %20 = tpu.matmul %18, %19, %cst_14 {dimension_numbers = #tpu.dot_dimension_numbers<[1], [0], [0], [1], [0, 0, 1, 1], [], []>} : vector<2x128xbf16>, vector<128x128xbf16>, vector<2x128xf32> -> vector<2x128xf32>
    %c0_15 = arith.constant 0 : index
    %c0_16 = arith.constant 0 : index
    %21 = vector.load %arg6[%c0_15, %c0_16] : memref<1x128xf32, #tpu.memory_space<vmem>>, vector<1x128xf32>
    %22 = vector.broadcast %21 : vector<1x128xf32> to vector<2x128xf32>
    %23 = arith.addf %20, %22 : vector<2x128xf32>
    %cst_17 = arith.constant 1.000000e-01 : f32
    %24 = vector.broadcast %cst_17 : f32 to vector<2x128xf32>
    %25 = arith.mulf %24, %23 : vector<2x128xf32>
    %26 = arith.maximumf %23, %25 : vector<2x128xf32>
    %27 = arith.truncf %26 : vector<2x128xf32> to vector<2x128xbf16>
    %c0_18 = arith.constant 0 : index
    %c0_19 = arith.constant 0 : index
    %28 = vector.load %arg7[%c0_18, %c0_19] : memref<128x128xbf16, #tpu.memory_space<vmem>>, vector<128x128xbf16>
    %cst_20 = arith.constant dense<0.000000e+00> : vector<2x128xf32>
    %29 = tpu.matmul %27, %28, %cst_20 {dimension_numbers = #tpu.dot_dimension_numbers<[1], [0], [0], [1], [0, 0, 1, 1], [], []>} : vector<2x128xbf16>, vector<128x128xbf16>, vector<2x128xf32> -> vector<2x128xf32>
    %c0_21 = arith.constant 0 : index
    %c0_22 = arith.constant 0 : index
    %30 = vector.load %arg8[%c0_21, %c0_22] : memref<1x128xf32, #tpu.memory_space<vmem>>, vector<1x128xf32>
    %31 = vector.broadcast %30 : vector<1x128xf32> to vector<2x128xf32>
    %32 = arith.addf %29, %31 : vector<2x128xf32>
    %cst_23 = arith.constant 1.000000e-01 : f32
    %33 = vector.broadcast %cst_23 : f32 to vector<2x128xf32>
    %34 = arith.mulf %33, %32 : vector<2x128xf32>
    %35 = arith.maximumf %32, %34 : vector<2x128xf32>
    %36 = arith.truncf %35 : vector<2x128xf32> to vector<2x128xbf16>
    %c0_24 = arith.constant 0 : index
    %c0_25 = arith.constant 0 : index
    %37 = vector.load %arg9[%c0_24, %c0_25] : memref<128x128xbf16, #tpu.memory_space<vmem>>, vector<128x128xbf16>
    %cst_26 = arith.constant dense<0.000000e+00> : vector<2x128xf32>
    %38 = tpu.matmul %36, %37, %cst_26 {dimension_numbers = #tpu.dot_dimension_numbers<[1], [0], [0], [1], [0, 0, 1, 1], [], []>} : vector<2x128xbf16>, vector<128x128xbf16>, vector<2x128xf32> -> vector<2x128xf32>
    %c0_27 = arith.constant 0 : index
    %c0_28 = arith.constant 0 : index
    %39 = vector.load %arg10[%c0_27, %c0_28] : memref<1x128xf32, #tpu.memory_space<vmem>>, vector<1x128xf32>
    %40 = vector.broadcast %39 : vector<1x128xf32> to vector<2x128xf32>
    %41 = arith.addf %38, %40 : vector<2x128xf32>
    %c0_29 = arith.constant 0 : index
    %c0_30 = arith.constant 0 : index
    %42 = vector.load %arg11[%c0_29, %c0_30] : memref<2x128xf32, #tpu.memory_space<vmem>>, vector<2x128xf32>
    tpu.vector_store %arg11[%c0_29, %c0_30], %41 {strides = array<i32>} : memref<2x128xf32, #tpu.memory_space<vmem>>, vector<2x128xf32>,
    return
  }
}

</mosaic_0001>

<bundles_post_ra>
// kernel: smodel_forward.6
= control target key start
LH: loop header
LB: loop body
LE: loop exit
PB: predicated region body
PF: predicated region fallthrough
CT: control target
= control target key end

     0   :  { %s4079_s12 = smov 0   ;;  %s4081_s13 = smov 0   ;;  %s4665_s0 = inlined_call_operand.vmem [shape: bf16[6076,75], index: 0, kind: input, shape index: {}]   ;;  %s4666_s1 = inlined_call_operand.vmem [shape: bf16[75,128], index: 1, kind: input, shape index: {}]   ;;  %s4667_s2 = inlined_call_operand.vmem [shape: f32[1,128], index: 2, kind: input, shape index: {}]   ;;  %s4668_s3 = inlined_call_operand.vmem [shape: bf16[6076,128], index: 3, kind: output, shape index: {}]  }
   0x1   :  { %s4083_s14 = smov 0  }
   0x2 LB: > { %s4092_s15 = sadd.s32 4294967295, %s4024_s14   ;;  %s4094_s16 = sadd.s32 1, %s4024_s14   ;;  %s4024_s14 = sphi %s4083_s14, %s4675_s14   ;;  %s4020_s13 = sphi %s4081_s13, %s4674_s13   ;;  %s4016_s12 = sphi %s4079_s12, %s4673_s12  }
   0x3   : > { %s85_s17 = ssub.s32 %s4024_s14, %s4094_s16  ;;  %s88_s18 = sadd.s32 1, %s4020_s13 }
   0x4   : > { %p86_p0 = scmp.eq.s32.totalorder %s85_s17, 0  ;;  %p98_p1 = scmp.ne.s32.totalorder %s4020_s13, %s4016_s12 }
   0x5   : > { %p99_p2 = scmp.eq.s32.totalorder %s4092_s15, 5  ;;  %p2797_p3 = scmp.ge.s32.totalorder %s4024_s14, 1 }
   0x6   : > { %s4102_s19 = scalar_select %p86_p0, %s4020_s13, %s88_s18  }
   0x7   : > { %p4104_p4 = por %p99_p2, %p98_p1  ;;  %p146_p5 = scmp.lt.s32.totalorder %s4024_s14, 7 }
   0x9   : > { %p147_p6 = pnand %p2797_p3, %p146_p5 }
   0xa   : > { %v3900_v0 = vld [vmem:[%s4666_s1] sm:$0xff] (!%p147_p6)   ;;  %v3901_v1 = vld [vmem:[%s4666_s1 + $0x8] sm:$0xff] (!%p147_p6)   ;;  %vm880_vm0 = vcmask (!%p147_p6), 1044480   ;;  %v3902_v2 = vld [vmem:[%s4666_s1 + $0x10] sm:$0xff] (!%p147_p6)   ;;  %s4118_s27 = sshll.u32 (!%p147_p6), %s4092_s15, 7  ;;  %vm881_vm1 = vcmask (!%p147_p6), 1045504  }
   0xb   : > { %150 = sbr.rel (%p147_p6) target bundleno = 467 (0x1d3), region = 32  ;;  %3663 = vmatprep.subr.bf16.mxu0 (!%p147_p6), %v3900_v0  ;;  %3801 = vmatprep.subr.bf16.mxu1 (!%p147_p6), %v3900_v0  ;;  %v4058_v3 = vmov (!%p147_p6), 65535   ;;  %p178_p7 = scmp.lt.s32.totalorder (!%p147_p6), %s4118_s27, 759  ;;  %v3903_v5 = vld [vmem:[%s4666_s1 + $0x18] sm:$0xff] (!%p147_p6)   ;;  %v3904_v6 = vld [vmem:[%s4666_s1 + $0x20] sm:$0x3f] (!%p147_p6)  }
   0xc   : > { %3664 = vmatpush3.bf16.msra.mxu0 (!%p147_p6), %v3900_v0  ;;  %3806 = vmatpush3.bf16.msra.mxu1 (!%p147_p6), %v3900_v0  ;;  %v882_v4 = vsel (!%p147_p6), %vm880_vm0, 4294967295, %v4058_v3  ;;  %vm687_vm2 = vcmask (!%p147_p6), 613376   ;;  %s170_s14 = sand.u32 (!%p147_p6), 1, %s4016_s12  }
   0xd   : > { %3665 = vmatprep.subr.bf16.mxu0 (!%p147_p6), %v3901_v1  ;;  %3802 = vmatprep.subr.bf16.mxu1 (!%p147_p6), %v3901_v1  ;;  %v883_v7 = vsel (!%p147_p6), %vm881_vm1, %v882_v4, 0  ;;  %s2798_s17 = sshll.u32 (!%p147_p6), %s170_s14, 9 }
   0xe   : > { %v885_v8 = vand.u32 (!%p147_p6), %v3904_v6, %v883_v7  ;;  %s4279_s12 = scalar_lea.vmem (!%p147_p6), [#allocation2], %s2798_s17  }
  0x10   : > { %3666 = vmatpush3.bf16.msra.mxu0 (!%p147_p6), %v3901_v1  ;;  %3807 = vmatpush3.bf16.msra.mxu1 (!%p147_p6), %v3901_v1 }
  0x11   : > { %3667 = vmatprep.subr.bf16.mxu0 (!%p147_p6), %v3902_v2  ;;  %3803 = vmatprep.subr.bf16.mxu1 (!%p147_p6), %v3902_v2 }
  0x12   : > { %s179_s5 = scalar_select %p178_p7, %s4118_s27, 759 }
  0x13   : > { %s2336_s22 = ssub.s32 (%p4104_p4), 760, %s4118_s27  ;;  %s3208_s23 = sshll.u32 (%p4104_p4), %s4092_s15, 9 }
  0x14   : > { %s2800_s6 = sshll.u32 %s179_s5, 2  ;;  %3668 = vmatpush3.bf16.msra.mxu0 %v3902_v2  ;;  %3808 = vmatpush3.bf16.msra.mxu1 %v3902_v2  ;;  %p2337_p8 = scmp.lt.s32.totalorder (%p4104_p4), %s2336_s22, 128 }
  0x15   : > { %s4131_s9 = scalar_lea.vmem %s4665_s0, %s2800_s6  ;;  %3669 = vmatprep.subr.bf16.mxu0 %v3903_v5  ;;  %3804 = vmatprep.subr.bf16.mxu1 %v3903_v5  ;;  %s4473_s26 = scalar_lea.vmem (%p4104_p4), %s4668_s3, %s3208_s23  }
  0x16   : > { %v3905_v9 = vld [vmem:[%s4131_s9] sm:$0xff]   ;;  %v3907_v11 = vld [vmem:[%s4131_s9 + $0x8] sm:$0xff]   ;;  %v3909_v13 = vld [vmem:[%s4131_s9 + $0x10] sm:$0xff]  }
  0x17   : > { %v3906_v10 = vld [vmem:[%s4131_s9 + $0x100] sm:$0xff]   ;;  %3673 = vmatprep.mubr.msk.bf16.mxu0 %vm687_vm2, %v3905_v9  ;;  %v3908_v12 = vld [vmem:[%s4131_s9 + $0x108] sm:$0xff]   ;;  %v3910_v14 = vld [vmem:[%s4131_s9 + $0x110] sm:$0xff]  }
  0x18   : > { %3670 = vmatpush3.bf16.msra.mxu0 %v3903_v5  ;;  %3809 = vmatpush3.bf16.msra.mxu1 %v3903_v5  ;;  %v3911_v15 = vld [vmem:[%s4131_s9 + $0x18] sm:$0xff]   ;;  %v3913_v17 = vld [vmem:[%s4131_s9 + $0x20] sm:$0xff]   ;;  %v3915_v19 = vld [vmem:[%s4131_s9 + $0x28] sm:$0xff]  }
  0x19   : > { %3671 = vmatprep.subr.bf16.mxu0 %v885_v8  ;;  %3805 = vmatprep.subr.bf16.mxu1 %v885_v8  ;;  %v3912_v16 = vld [vmem:[%s4131_s9 + $0x118] sm:$0xff]   ;;  %v3914_v18 = vld [vmem:[%s4131_s9 + $0x120] sm:$0xff]   ;;  %v3916_v20 = vld [vmem:[%s4131_s9 + $0x128] sm:$0xff]  }
  0x1a   : > { %3737 = vmatprep.mubr.msk.bf16.mxu1 %vm687_vm2, %v3906_v10  ;;  %v3917_v21 = vld [vmem:[%s4131_s9 + $0x30] sm:$0xff]   ;;  %v3919_v23 = vld [vmem:[%s4131_s9 + $0x38] sm:$0xff]   ;;  %v3921_v25 = vld [vmem:[%s4131_s9 + $0x40] sm:$0xff]  }
  0x1b   : > { %v3918_v22 = vld [vmem:[%s4131_s9 + $0x130] sm:$0xff]   ;;  %v3920_v24 = vld [vmem:[%s4131_s9 + $0x138] sm:$0xff]   ;;  %v3922_v26 = vld [vmem:[%s4131_s9 + $0x140] sm:$0xff]  }
  0x1c   : > { %3672 = vmatpush3.bf16.msra.mxu0 %v885_v8  ;;  %3810 = vmatpush3.bf16.msra.mxu1 %v885_v8  ;;  %v3923_v27 = vld [vmem:[%s4131_s9 + $0x48] sm:$0xff]   ;;  %v3925_v29 = vld [vmem:[%s4131_s9 + $0x50] sm:$0xff]   ;;  %v3927_v31 = vld [vmem:[%s4131_s9 + $0x58] sm:$0xff]  }
  0x1d   : > { %v3924_v28 = vld [vmem:[%s4131_s9 + $0x148] sm:$0xff]   ;;  %v3926_v30 = vld [vmem:[%s4131_s9 + $0x150] sm:$0xff]   ;;  %v3928_v32 = vld [vmem:[%s4131_s9 + $0x158] sm:$0xff]  }
  0x1e   : > { %v3929_v33 = vld [vmem:[%s4131_s9 + $0x60] sm:$0xff]   ;;  %v3931_v35 = vld [vmem:[%s4131_s9 + $0x68] sm:$0xff]   ;;  %v3933_v37 = vld [vmem:[%s4131_s9 + $0x70] sm:$0xff]  }
  0x1f   : > { %3674 = vmatmul.mubr.msk.bf16.vlgmr.msra.gmra.mrb[0].mxu0 %vm687_vm2, %v3907_v11  ;;  %3738 = vmatmul.mubr.msk.bf16.vlgmr.msra.gmra.mrb[0].mxu1 %vm687_vm2, %v3908_v12  ;;  %v3930_v34 = vld [vmem:[%s4131_s9 + $0x160] sm:$0xff]   ;;  %v3932_v36 = vld [vmem:[%s4131_s9 + $0x168] sm:$0xff]   ;;  %v3934_v38 = vld [vmem:[%s4131_s9 + $0x170] sm:$0xff]  }
  0x20   : > { %3677 = vmatprep.mubr.msk.bf16.mxu0 %vm687_vm2, %v3909_v13  ;;  %3741 = vmatprep.mubr.msk.bf16.mxu1 %vm687_vm2, %v3910_v14  ;;  %v3935_v39 = vld [vmem:[%s4131_s9 + $0x78] sm:$0xff]   ;;  %v3937_v41 = vld [vmem:[%s4131_s9 + $0x80] sm:$0xff]   ;;  %v3939_v43 = vld [vmem:[%s4131_s9 + $0x88] sm:$0xff]  }
  0x21   : > { %v3936_v40 = vld [vmem:[%s4131_s9 + $0x178] sm:$0xff]   ;;  %v3938_v42 = vld [vmem:[%s4131_s9 + $0x180] sm:$0xff]   ;;  %v3940_v44 = vld [vmem:[%s4131_s9 + $0x188] sm:$0xff]  }
  0x22   : > { %v3941_v45 = vld [vmem:[%s4131_s9 + $0x90] sm:$0xff]   ;;  %v3943_v47 = vld [vmem:[%s4131_s9 + $0x98] sm:$0xff]   ;;  %v3945_v49 = vld [vmem:[%s4131_s9 + $0xa0] sm:$0xff]  }
  0x23   : > { %v3942_v46 = vld [vmem:[%s4131_s9 + $0x190] sm:$0xff]   ;;  %v3944_v48 = vld [vmem:[%s4131_s9 + $0x198] sm:$0xff]   ;;  %v3946_v50 = vld [vmem:[%s4131_s9 + $0x1a0] sm:$0xff]  }
  0x24   : > { %v3947_v51 = vld [vmem:[%s4131_s9 + $0xa8] sm:$0xff]   ;;  %v3949_v53 = vld [vmem:[%s4131_s9 + $0xb0] sm:$0xff]   ;;  %v3951_v55 = vld [vmem:[%s4131_s9 + $0xb8] sm:$0xff]  }
  0x25   : > { %v3948_v52 = vld [vmem:[%s4131_s9 + $0x1a8] sm:$0xff]   ;;  %v3950_v54 = vld [vmem:[%s4131_s9 + $0x1b0] sm:$0xff]   ;;  %v3952_v56 = vld [vmem:[%s4131_s9 + $0x1b8] sm:$0xff]  }
  0x26   : > { %v3953_v57 = vld [vmem:[%s4131_s9 + $0xc0] sm:$0xff]   ;;  %v3955_v59 = vld [vmem:[%s4131_s9 + $0xc8] sm:$0xff]   ;;  %v3957_v61 = vld [vmem:[%s4131_s9 + $0xd0] sm:$0xff]  }
  0x27   : > { %3678 = vmatmul.mubr.msk.bf16.gmra.mrb[4].mxu0 %vm687_vm2, %v3911_v15  ;;  %3742 = vmatmul.mubr.msk.bf16.gmra.mrb[4].mxu1 %vm687_vm2, %v3912_v16  ;;  %v3954_v58 = vld [vmem:[%s4131_s9 + $0x1c0] sm:$0xff]   ;;  %v3956_v60 = vld [vmem:[%s4131_s9 + $0x1c8] sm:$0xff]   ;;  %v3958_v62 = vld [vmem:[%s4131_s9 + $0x1d0] sm:$0xff]  }
  0x28   : > { %3681 = vmatprep.mubr.msk.bf16.mxu0 %vm687_vm2, %v3913_v17  ;;  %3745 = vmatprep.mubr.msk.bf16.mxu1 %vm687_vm2, %v3914_v18  ;;  %v3959_v63 = vld [vmem:[%s4131_s9 + $0xd8] sm:$0xff]   ;;  %v3961_v1 = vld [vmem:[%s4131_s9 + $0xe0] sm:$0xff]   ;;  %v3963_v3 = vld [vmem:[%s4131_s9 + $0xe8] sm:$0xff]  }
  0x29   : > { %v3960_v0 = vld [vmem:[%s4131_s9 + $0x1d8] sm:$0xff]   ;;  %v3962_v2 = vld [vmem:[%s4131_s9 + $0x1e0] sm:$0xff]   ;;  %v3964_v4 = vld [vmem:[%s4131_s9 + $0x1e8] sm:$0xff]  }
  0x2a   : > { %v3965_v5 = vld [vmem:[%s4131_s9 + $0xf0] sm:$0xff]   ;;  %v3967_v7 = vld [vmem:[%s4131_s9 + $0xf8] sm:$0xff]   ;;  %v4264_v9 = vld [vmem:[%s4667_s2] ss:$0 sm:$0xff] }
  0x2b   : > { %v3966_v6 = vld [vmem:[%s4131_s9 + $0x1f0] sm:$0xff]   ;;  %v3968_v8 = vld [vmem:[%s4131_s9 + $0x1f8] sm:$0xff]  }
  0x2f   : > { %3682 = vmatmul.mubr.msk.bf16.gmra.mrb[8].mxu0 %vm687_vm2, %v3915_v19  ;;  %3746 = vmatmul.mubr.msk.bf16.gmra.mrb[8].mxu1 %vm687_vm2, %v3916_v20 }
  0x30   : > { %3685 = vmatprep.mubr.msk.bf16.mxu0 %vm687_vm2, %v3917_v21  ;;  %3749 = vmatprep.mubr.msk.bf16.mxu1 %vm687_vm2, %v3918_v22 }
  0x37   : > { %3686 = vmatmul.mubr.msk.bf16.gmra.mrb[12].mxu0 %vm687_vm2, %v3919_v23  ;;  %3750 = vmatmul.mubr.msk.bf16.gmra.mrb[12].mxu1 %vm687_vm2, %v3920_v24 }
  0x38   : > { %3689 = vmatprep.mubr.msk.bf16.mxu0 %vm687_vm2, %v3921_v25  ;;  %3753 = vmatprep.mubr.msk.bf16.mxu1 %vm687_vm2, %v3922_v26 }
  0x3f   : > { %3690 = vmatmul.mubr.msk.bf16.gmra.mrb[16].mxu0 %vm687_vm2, %v3923_v27  ;;  %3754 = vmatmul.mubr.msk.bf16.gmra.mrb[16].mxu1 %vm687_vm2, %v3924_v28 }
  0x40   : > { %3693 = vmatprep.mubr.msk.bf16.mxu0 %vm687_vm2, %v3925_v29  ;;  %3757 = vmatprep.mubr.msk.bf16.mxu1 %vm687_vm2, %v3926_v30 }
  0x47   : > { %3694 = vmatmul.mubr.msk.bf16.gmra.mrb[20].mxu0 %vm687_vm2, %v3927_v31  ;;  %3758 = vmatmul.mubr.msk.bf16.gmra.mrb[20].mxu1 %vm687_vm2, %v3928_v32 }
  0x48   : > { %3697 = vmatprep.mubr.msk.bf16.mxu0 %vm687_vm2, %v3929_v33  ;;  %3761 = vmatprep.mubr.msk.bf16.mxu1 %vm687_vm2, %v3930_v34 }
  0x4f   : > { %3698 = vmatmul.mubr.msk.bf16.gmra.mrb[24].mxu0 %vm687_vm2, %v3931_v35  ;;  %3762 = vmatmul.mubr.msk.bf16.gmra.mrb[24].mxu1 %vm687_vm2, %v3932_v36 }
  0x50   : > { %3701 = vmatprep.mubr.msk.bf16.mxu0 %vm687_vm2, %v3933_v37  ;;  %3765 = vmatprep.mubr.msk.bf16.mxu1 %vm687_vm2, %v3934_v38 }
  0x57   : > { %3702 = vmatmul.mubr.msk.bf16.gmra.mrb[28].mxu0 %vm687_vm2, %v3935_v39  ;;  %3766 = vmatmul.mubr.msk.bf16.gmra.mrb[28].mxu1 %vm687_vm2, %v3936_v40 }
  0x58   : > { %3705 = vmatprep.mubr.msk.bf16.mxu0 %vm687_vm2, %v3937_v41  ;;  %3769 = vmatprep.mubr.msk.bf16.mxu1 %vm687_vm2, %v3938_v42 }
  0x5f   : > { %3706 = vmatmul.mubr.msk.bf16.gmra.mrb[32].mxu0 %vm687_vm2, %v3939_v43  ;;  %3770 = vmatmul.mubr.msk.bf16.gmra.mrb[32].mxu1 %vm687_vm2, %v3940_v44 }
  0x60   : > { %3709 = vmatprep.mubr.msk.bf16.mxu0 %vm687_vm2, %v3941_v45  ;;  %3773 = vmatprep.mubr.msk.bf16.mxu1 %vm687_vm2, %v3942_v46 }
  0x67   : > { %3710 = vmatmul.mubr.msk.bf16.gmra.mrb[36].mxu0 %vm687_vm2, %v3943_v47  ;;  %3774 = vmatmul.mubr.msk.bf16.gmra.mrb[36].mxu1 %vm687_vm2, %v3944_v48 }
  0x68   : > { %3713 = vmatprep.mubr.msk.bf16.mxu0 %vm687_vm2, %v3945_v49  ;;  %3777 = vmatprep.mubr.msk.bf16.mxu1 %vm687_vm2, %v3946_v50 }
  0x6f   : > { %3714 = vmatmul.mubr.msk.bf16.gmra.mrb[40].mxu0 %vm687_vm2, %v3947_v51  ;;  %3778 = vmatmul.mubr.msk.bf16.gmra.mrb[40].mxu1 %vm687_vm2, %v3948_v52 }
  0x70   : > { %3717 = vmatprep.mubr.msk.bf16.mxu0 %vm687_vm2, %v3949_v53  ;;  %3781 = vmatprep.mubr.msk.bf16.mxu1 %vm687_vm2, %v3950_v54 }
  0x77   : > { %3718 = vmatmul.mubr.msk.bf16.gmra.mrb[44].mxu0 %vm687_vm2, %v3951_v55  ;;  %3782 = vmatmul.mubr.msk.bf16.gmra.mrb[44].mxu1 %vm687_vm2, %v3952_v56 }
  0x78   : > { %3721 = vmatprep.mubr.msk.bf16.mxu0 %vm687_vm2, %v3953_v57  ;;  %3785 = vmatprep.mubr.msk.bf16.mxu1 %vm687_vm2, %v3954_v58 }
  0x7f   : > { %3722 = vmatmul.mubr.msk.bf16.gmra.mrb[48].mxu0 %vm687_vm2, %v3955_v59  ;;  %3786 = vmatmul.mubr.msk.bf16.gmra.mrb[48].mxu1 %vm687_vm2, %v3956_v60 }
  0x80   : > { %3725 = vmatprep.mubr.msk.bf16.mxu0 %vm687_vm2, %v3957_v61  ;;  %3789 = vmatprep.mubr.msk.bf16.mxu1 %vm687_vm2, %v3958_v62 }
  0x87   : > { %3726 = vmatmul.mubr.msk.bf16.gmra.mrb[52].mxu0 %vm687_vm2, %v3959_v63  ;;  %3790 = vmatmul.mubr.msk.bf16.gmra.mrb[52].mxu1 %vm687_vm2, %v3960_v0 }
  0x88   : > { %3729 = vmatprep.mubr.msk.bf16.mxu0 %vm687_vm2, %v3961_v1  ;;  %3793 = vmatprep.mubr.msk.bf16.mxu1 %vm687_vm2, %v3962_v2 }
  0x8f   : > { %3730 = vmatmul.mubr.msk.bf16.gmra.mrb[56].mxu0 %vm687_vm2, %v3963_v3  ;;  %3794 = vmatmul.mubr.msk.bf16.gmra.mrb[56].mxu1 %vm687_vm2, %v3964_v4 }
  0x90   : > { %3733 = vmatprep.mubr.msk.bf16.mxu0 %vm687_vm2, %v3965_v5  ;;  %3797 = vmatprep.mubr.msk.bf16.mxu1 %vm687_vm2, %v3966_v6 }
  0x97   : > { %3734 = vmatmul.mubr.msk.bf16.gmra.mrb[60].mxu0 %vm687_vm2, %v3967_v7  ;;  %3798 = vmatmul.mubr.msk.bf16.gmra.mrb[60].mxu1 %vm687_vm2, %v3968_v8 }
  0xf2   : > { %v3675_v10 = vpop.f32.mrb[0].mxu0  ;;  %v3739_v11 = vpop.f32.mrb[0].mxu1 }
  0xf3   : > { %v930_v12 = vadd.f32 %v3675_v10, %v4264_v9  ;;  %v1186_v13 = vadd.f32 %v3739_v11, %v4264_v9  ;;  %v921_v14 = vpop.f32.mrb[1].mxu0  ;;  %v1177_v15 = vpop.f32.mrb[1].mxu1 }
  0xf4   : > { %v922_v16 = vadd.f32 %v4264_v9, %v921_v14  ;;  %v1178_v17 = vadd.f32 %v4264_v9, %v1177_v15  ;;  %v3676_v18 = vpop.f32.mrb[2].mxu0  ;;  %v3740_v19 = vpop.f32.mrb[2].mxu1 }
  0xf5   : > { %v1434_v20 = vmul.f32 0.1, %v930_v12  ;;  %v1498_v21 = vmul.f32 0.1, %v1186_v13  ;;  %v933_v22 = vadd.f32 %v3676_v18, %v4264_v9  ;;  %v1189_v23 = vadd.f32 %v3740_v19, %v4264_v9  ;;  %v924_v24 = vpop.f32.mrb[3].mxu0  ;;  %v1180_v25 = vpop.f32.mrb[3].mxu1 }
  0xf6   : > { %v1432_v26 = vmul.f32 0.1, %v922_v16  ;;  %v1496_v27 = vmul.f32 0.1, %v1178_v17  ;;  %v925_v28 = vadd.f32 %v4264_v9, %v924_v24  ;;  %v1181_v29 = vadd.f32 %v4264_v9, %v1180_v25 }
  0xf7   : > { %v1435_v30 = vmul.f32 0.1, %v933_v22  ;;  %v1499_v31 = vmul.f32 0.1, %v1189_v23  ;;  %v1562_v34 = vmax.f32 %v930_v12, %v1434_v20  ;;  %v1626_v35 = vmax.f32 %v1186_v13, %v1498_v21 }
  0xf8   : > { %v1433_v32 = vmul.f32 0.1, %v925_v28  ;;  %v1497_v33 = vmul.f32 0.1, %v1181_v29  ;;  %v1560_v38 = vmax.f32 %v922_v16, %v1432_v26  ;;  %v1624_v39 = vmax.f32 %v1178_v17, %v1496_v27 }
  0xf9   : > { %v1563_v36 = vmax.f32 %v933_v22, %v1435_v30  ;;  %v1627_v37 = vmax.f32 %v1189_v23, %v1499_v31 }
  0xfa   : > { %v1561_v40 = vmax.f32 %v925_v28, %v1433_v32  ;;  %v1625_v41 = vmax.f32 %v1181_v29, %v1497_v33  ;;  %v3679_v42 = vpop.f32.mrb[4].mxu0  ;;  %v3743_v43 = vpop.f32.mrb[4].mxu1 }
  0xfb   : > { %v3219_v44 = vpack.c.bf16 %v1563_v36, %v1562_v34  ;;  %v3379_v45 = vpack.c.bf16 %v1627_v37, %v1626_v35  ;;  %v946_v46 = vadd.f32 %v3679_v42, %v4264_v9  ;;  %v1202_v47 = vadd.f32 %v3743_v43, %v4264_v9  ;;  %v937_v48 = vpop.f32.mrb[5].mxu0  ;;  %v1193_v49 = vpop.f32.mrb[5].mxu1 }
  0xfc   : > { %v3214_v50 = vpack.c.bf16 %v1561_v40, %v1560_v38  ;;  %v3374_v51 = vpack.c.bf16 %v1625_v41, %v1624_v39  ;;  %v938_v52 = vadd.f32 %v4264_v9, %v937_v48  ;;  %v1194_v53 = vadd.f32 %v4264_v9, %v1193_v49  ;;  %v3680_v54 = vpop.f32.mrb[6].mxu0  ;;  %v3744_v55 = vpop.f32.mrb[6].mxu1 }
  0xfd   : > { %3531 = vst [vmem:[%s4279_s12 + $0x8] sm:$0xff] %v3219_v44   ;;  %3563 = vst [vmem:[%s4279_s12 + $0x108] sm:$0xff] %v3379_v45   ;;  %v1438_v56 = vmul.f32 0.1, %v946_v46  ;;  %v1502_v57 = vmul.f32 0.1, %v1202_v47  ;;  %v949_v58 = vadd.f32 %v3680_v54, %v4264_v9  ;;  %v1205_v59 = vadd.f32 %v3744_v55, %v4264_v9 }
  0xfe   : > { %v940_v60 = vpop.f32.mrb[7].mxu0  ;;  %v1196_v61 = vpop.f32.mrb[7].mxu1  ;;  %3215 = vst [vmem:[%s4279_s12] sm:$0xff] %v3214_v50   ;;  %3562 = vst [vmem:[%s4279_s12 + $0x100] sm:$0xff] %v3374_v51   ;;  %v1436_v62 = vmul.f32 0.1, %v938_v52 }
  0xff   : > { %v1500_v63 = vmul.f32 0.1, %v1194_v53  ;;  %v941_v0 = vadd.f32 %v4264_v9, %v940_v60  ;;  %v1197_v1 = vadd.f32 %v4264_v9, %v1196_v61  ;;  %v1439_v2 = vmul.f32 0.1, %v949_v58 }
 0x100   : > { %v1503_v3 = vmul.f32 0.1, %v1205_v59  ;;  %v1566_v6 = vmax.f32 %v946_v46, %v1438_v56  ;;  %v1630_v7 = vmax.f32 %v1202_v47, %v1502_v57  ;;  %v1564_v11 = vmax.f32 %v938_v52, %v1436_v62 }
 0x101   : > { %v1437_v4 = vmul.f32 0.1, %v941_v0  ;;  %v1501_v5 = vmul.f32 0.1, %v1197_v1  ;;  %v1567_v8 = vmax.f32 %v949_v58, %v1439_v2  ;;  %v1628_v12 = vmax.f32 %v1194_v53, %v1500_v63 }
 0x102   : > { %v1631_v10 = vmax.f32 %v1205_v59, %v1503_v3  ;;  %v3683_v15 = vpop.f32.mrb[8].mxu0  ;;  %v3747_v16 = vpop.f32.mrb[8].mxu1 }
 0x103   : > { %v1565_v13 = vmax.f32 %v941_v0, %v1437_v4  ;;  %v1629_v14 = vmax.f32 %v1197_v1, %v1501_v5  ;;  %v3229_v17 = vpack.c.bf16 %v1567_v8, %v1566_v6  ;;  %v962_v19 = vadd.f32 %v3683_v15, %v4264_v9  ;;  %v953_v21 = vpop.f32.mrb[9].mxu0  ;;  %v1209_v22 = vpop.f32.mrb[9].mxu1 }
 0x104   : > { %v3389_v18 = vpack.c.bf16 %v1631_v10, %v1630_v7  ;;  %v1218_v20 = vadd.f32 %v3747_v16, %v4264_v9  ;;  %v954_v25 = vadd.f32 %v4264_v9, %v953_v21  ;;  %v1210_v26 = vadd.f32 %v4264_v9, %v1209_v22  ;;  %v3684_v27 = vpop.f32.mrb[10].mxu0  ;;  %v3748_v28 = vpop.f32.mrb[10].mxu1 }
 0x105   : > { %v3224_v23 = vpack.c.bf16 %v1565_v13, %v1564_v11  ;;  %v3384_v24 = vpack.c.bf16 %v1629_v14, %v1628_v12  ;;  %3533 = vst [vmem:[%s4279_s12 + $0x18] sm:$0xff] %v3229_v17   ;;  %v1442_v29 = vmul.f32 0.1, %v962_v19  ;;  %v965_v31 = vadd.f32 %v3684_v27, %v4264_v9  ;;  %v956_v33 = vpop.f32.mrb[11].mxu0  ;;  %v1212_v34 = vpop.f32.mrb[11].mxu1 }
 0x106   : > { %3565 = vst [vmem:[%s4279_s12 + $0x118] sm:$0xff] %v3389_v18   ;;  %v1506_v30 = vmul.f32 0.1, %v1218_v20  ;;  %v1221_v32 = vadd.f32 %v3748_v28, %v4264_v9  ;;  %v1440_v35 = vmul.f32 0.1, %v954_v25  ;;  %v957_v37 = vadd.f32 %v4264_v9, %v956_v33 }
 0x107   : > { %3532 = vst [vmem:[%s4279_s12 + $0x10] sm:$0xff] %v3224_v23   ;;  %3564 = vst [vmem:[%s4279_s12 + $0x110] sm:$0xff] %v3384_v24   ;;  %v1504_v36 = vmul.f32 0.1, %v1210_v26  ;;  %v1213_v38 = vadd.f32 %v4264_v9, %v1212_v34  ;;  %v1443_v39 = vmul.f32 0.1, %v965_v31  ;;  %v1570_v43 = vmax.f32 %v962_v19, %v1442_v29 }
 0x108   : > { %v1507_v40 = vmul.f32 0.1, %v1221_v32  ;;  %v1441_v41 = vmul.f32 0.1, %v957_v37  ;;  %v1634_v44 = vmax.f32 %v1218_v20, %v1506_v30  ;;  %v1568_v47 = vmax.f32 %v954_v25, %v1440_v35 }
 0x109   : > { %v1505_v42 = vmul.f32 0.1, %v1213_v38  ;;  %v1571_v45 = vmax.f32 %v965_v31, %v1443_v39  ;;  %v1632_v48 = vmax.f32 %v1210_v26, %v1504_v36 }
 0x10a   : > { %v1635_v46 = vmax.f32 %v1221_v32, %v1507_v40  ;;  %v1569_v49 = vmax.f32 %v957_v37, %v1441_v41  ;;  %v3687_v51 = vpop.f32.mrb[12].mxu0  ;;  %v3751_v52 = vpop.f32.mrb[12].mxu1 }
 0x10b   : > { %v1633_v50 = vmax.f32 %v1213_v38, %v1505_v42  ;;  %v3239_v53 = vpack.c.bf16 %v1571_v45, %v1570_v43  ;;  %v978_v55 = vadd.f32 %v3687_v51, %v4264_v9  ;;  %v1234_v56 = vadd.f32 %v3751_v52, %v4264_v9  ;;  %v969_v57 = vpop.f32.mrb[13].mxu0  ;;  %v1225_v58 = vpop.f32.mrb[13].mxu1 }
 0x10c   : > { %v3399_v54 = vpack.c.bf16 %v1635_v46, %v1634_v44  ;;  %v3234_v59 = vpack.c.bf16 %v1569_v49, %v1568_v47  ;;  %v970_v61 = vadd.f32 %v4264_v9, %v969_v57  ;;  %v1226_v62 = vadd.f32 %v4264_v9, %v1225_v58  ;;  %v3688_v63 = vpop.f32.mrb[14].mxu0  ;;  %v3752_v0 = vpop.f32.mrb[14].mxu1 }
 0x10d   : > { %v3394_v60 = vpack.c.bf16 %v1633_v50, %v1632_v48  ;;  %3535 = vst [vmem:[%s4279_s12 + $0x28] sm:$0xff] %v3239_v53   ;;  %v1446_v1 = vmul.f32 0.1, %v978_v55  ;;  %v1510_v2 = vmul.f32 0.1, %v1234_v56  ;;  %v981_v3 = vadd.f32 %v3688_v63, %v4264_v9  ;;  %v972_v5 = vpop.f32.mrb[15].mxu0 }
 0x10e   : > { %3567 = vst [vmem:[%s4279_s12 + $0x128] sm:$0xff] %v3399_v54   ;;  %v1237_v4 = vadd.f32 %v3752_v0, %v4264_v9  ;;  %v1228_v6 = vpop.f32.mrb[15].mxu1  ;;  %3534 = vst [vmem:[%s4279_s12 + $0x20] sm:$0xff] %v3234_v59   ;;  %v1444_v7 = vmul.f32 0.1, %v970_v61  ;;  %v973_v10 = vadd.f32 %v4264_v9, %v972_v5 }
 0x10f   : > { %3566 = vst [vmem:[%s4279_s12 + $0x120] sm:$0xff] %v3394_v60   ;;  %v1508_v8 = vmul.f32 0.1, %v1226_v62  ;;  %v1229_v11 = vadd.f32 %v4264_v9, %v1228_v6  ;;  %v1447_v12 = vmul.f32 0.1, %v981_v3  ;;  %v1574_v16 = vmax.f32 %v978_v55, %v1446_v1 }
 0x110   : > { %v1511_v13 = vmul.f32 0.1, %v1237_v4  ;;  %v1445_v14 = vmul.f32 0.1, %v973_v10  ;;  %v1638_v17 = vmax.f32 %v1234_v56, %v1510_v2  ;;  %v1572_v20 = vmax.f32 %v970_v61, %v1444_v7 }
 0x111   : > { %v1509_v15 = vmul.f32 0.1, %v1229_v11  ;;  %v1575_v18 = vmax.f32 %v981_v3, %v1447_v12  ;;  %v1636_v21 = vmax.f32 %v1226_v62, %v1508_v8 }
 0x112   : > { %v1639_v19 = vmax.f32 %v1237_v4, %v1511_v13  ;;  %v1573_v22 = vmax.f32 %v973_v10, %v1445_v14  ;;  %v3691_v24 = vpop.f32.mrb[16].mxu0  ;;  %v3755_v25 = vpop.f32.mrb[16].mxu1 }
 0x113   : > { %v1637_v23 = vmax.f32 %v1229_v11, %v1509_v15  ;;  %v3249_v26 = vpack.c.bf16 %v1575_v18, %v1574_v16  ;;  %v994_v28 = vadd.f32 %v3691_v24, %v4264_v9  ;;  %v1250_v29 = vadd.f32 %v3755_v25, %v4264_v9  ;;  %v985_v30 = vpop.f32.mrb[17].mxu0  ;;  %v1241_v31 = vpop.f32.mrb[17].mxu1 }
 0x114   : > { %v3409_v27 = vpack.c.bf16 %v1639_v19, %v1638_v17  ;;  %v3244_v32 = vpack.c.bf16 %v1573_v22, %v1572_v20  ;;  %v986_v34 = vadd.f32 %v4264_v9, %v985_v30  ;;  %v1242_v35 = vadd.f32 %v4264_v9, %v1241_v31  ;;  %v3692_v36 = vpop.f32.mrb[18].mxu0  ;;  %v3756_v37 = vpop.f32.mrb[18].mxu1 }
 0x115   : > { %v3404_v33 = vpack.c.bf16 %v1637_v23, %v1636_v21  ;;  %3537 = vst [vmem:[%s4279_s12 + $0x38] sm:$0xff] %v3249_v26   ;;  %v1450_v38 = vmul.f32 0.1, %v994_v28  ;;  %v1514_v39 = vmul.f32 0.1, %v1250_v29  ;;  %v997_v40 = vadd.f32 %v3692_v36, %v4264_v9  ;;  %v988_v42 = vpop.f32.mrb[19].mxu0 }
 0x116   : > { %3569 = vst [vmem:[%s4279_s12 + $0x138] sm:$0xff] %v3409_v27   ;;  %v1253_v41 = vadd.f32 %v3756_v37, %v4264_v9  ;;  %v1244_v43 = vpop.f32.mrb[19].mxu1  ;;  %3536 = vst [vmem:[%s4279_s12 + $0x30] sm:$0xff] %v3244_v32   ;;  %v1448_v44 = vmul.f32 0.1, %v986_v34  ;;  %v989_v46 = vadd.f32 %v4264_v9, %v988_v42 }
 0x117   : > { %3568 = vst [vmem:[%s4279_s12 + $0x130] sm:$0xff] %v3404_v33   ;;  %v1512_v45 = vmul.f32 0.1, %v1242_v35  ;;  %v1245_v47 = vadd.f32 %v4264_v9, %v1244_v43  ;;  %v1451_v48 = vmul.f32 0.1, %v997_v40  ;;  %v1578_v52 = vmax.f32 %v994_v28, %v1450_v38 }
 0x118   : > { %v1515_v49 = vmul.f32 0.1, %v1253_v41  ;;  %v1449_v50 = vmul.f32 0.1, %v989_v46  ;;  %v1642_v53 = vmax.f32 %v1250_v29, %v1514_v39  ;;  %v1576_v56 = vmax.f32 %v986_v34, %v1448_v44 }
 0x119   : > { %v1513_v51 = vmul.f32 0.1, %v1245_v47  ;;  %v1579_v54 = vmax.f32 %v997_v40, %v1451_v48  ;;  %v1640_v57 = vmax.f32 %v1242_v35, %v1512_v45 }
 0x11a   : > { %v1643_v55 = vmax.f32 %v1253_v41, %v1515_v49  ;;  %v1577_v58 = vmax.f32 %v989_v46, %v1449_v50  ;;  %v3695_v60 = vpop.f32.mrb[20].mxu0  ;;  %v3759_v61 = vpop.f32.mrb[20].mxu1 }
 0x11b   : > { %v1641_v59 = vmax.f32 %v1245_v47, %v1513_v51  ;;  %v3259_v62 = vpack.c.bf16 %v1579_v54, %v1578_v52  ;;  %v1010_v0 = vadd.f32 %v3695_v60, %v4264_v9  ;;  %v1266_v1 = vadd.f32 %v3759_v61, %v4264_v9  ;;  %v1001_v2 = vpop.f32.mrb[21].mxu0  ;;  %v1257_v3 = vpop.f32.mrb[21].mxu1 }
 0x11c   : > { %v3419_v63 = vpack.c.bf16 %v1643_v55, %v1642_v53  ;;  %v3254_v4 = vpack.c.bf16 %v1577_v58, %v1576_v56  ;;  %v1002_v6 = vadd.f32 %v4264_v9, %v1001_v2  ;;  %v1258_v7 = vadd.f32 %v4264_v9, %v1257_v3  ;;  %v3696_v8 = vpop.f32.mrb[22].mxu0  ;;  %v3760_v10 = vpop.f32.mrb[22].mxu1 }
 0x11d   : > { %v3414_v5 = vpack.c.bf16 %v1641_v59, %v1640_v57  ;;  %3539 = vst [vmem:[%s4279_s12 + $0x48] sm:$0xff] %v3259_v62   ;;  %v1454_v11 = vmul.f32 0.1, %v1010_v0  ;;  %v1518_v12 = vmul.f32 0.1, %v1266_v1  ;;  %v1013_v13 = vadd.f32 %v3696_v8, %v4264_v9  ;;  %v1004_v15 = vpop.f32.mrb[23].mxu0 }
 0x11e   : > { %3571 = vst [vmem:[%s4279_s12 + $0x148] sm:$0xff] %v3419_v63   ;;  %v1269_v14 = vadd.f32 %v3760_v10, %v4264_v9  ;;  %v1260_v16 = vpop.f32.mrb[23].mxu1  ;;  %3538 = vst [vmem:[%s4279_s12 + $0x40] sm:$0xff] %v3254_v4   ;;  %v1452_v17 = vmul.f32 0.1, %v1002_v6  ;;  %v1005_v19 = vadd.f32 %v4264_v9, %v1004_v15 }
 0x11f   : > { %3570 = vst [vmem:[%s4279_s12 + $0x140] sm:$0xff] %v3414_v5   ;;  %v1516_v18 = vmul.f32 0.1, %v1258_v7  ;;  %v1261_v20 = vadd.f32 %v4264_v9, %v1260_v16  ;;  %v1455_v21 = vmul.f32 0.1, %v1013_v13  ;;  %v1582_v25 = vmax.f32 %v1010_v0, %v1454_v11 }
 0x120   : > { %v1519_v22 = vmul.f32 0.1, %v1269_v14  ;;  %v1453_v23 = vmul.f32 0.1, %v1005_v19  ;;  %v1646_v26 = vmax.f32 %v1266_v1, %v1518_v12  ;;  %v1580_v29 = vmax.f32 %v1002_v6, %v1452_v17 }
 0x121   : > { %v1517_v24 = vmul.f32 0.1, %v1261_v20  ;;  %v1583_v27 = vmax.f32 %v1013_v13, %v1455_v21  ;;  %v1644_v30 = vmax.f32 %v1258_v7, %v1516_v18 }
 0x122   : > { %v1647_v28 = vmax.f32 %v1269_v14, %v1519_v22  ;;  %v1581_v31 = vmax.f32 %v1005_v19, %v1453_v23  ;;  %v3699_v33 = vpop.f32.mrb[24].mxu0  ;;  %v3763_v34 = vpop.f32.mrb[24].mxu1 }
 0x123   : > { %v1645_v32 = vmax.f32 %v1261_v20, %v1517_v24  ;;  %v3269_v35 = vpack.c.bf16 %v1583_v27, %v1582_v25  ;;  %v1026_v37 = vadd.f32 %v3699_v33, %v4264_v9  ;;  %v1282_v38 = vadd.f32 %v3763_v34, %v4264_v9  ;;  %v1017_v39 = vpop.f32.mrb[25].mxu0  ;;  %v1273_v40 = vpop.f32.mrb[25].mxu1 }
 0x124   : > { %v3429_v36 = vpack.c.bf16 %v1647_v28, %v1646_v26  ;;  %v3264_v41 = vpack.c.bf16 %v1581_v31, %v1580_v29  ;;  %v1018_v43 = vadd.f32 %v4264_v9, %v1017_v39  ;;  %v1274_v44 = vadd.f32 %v4264_v9, %v1273_v40  ;;  %v3700_v45 = vpop.f32.mrb[26].mxu0  ;;  %v3764_v46 = vpop.f32.mrb[26].mxu1 }
 0x125   : > { %v3424_v42 = vpack.c.bf16 %v1645_v32, %v1644_v30  ;;  %3541 = vst [vmem:[%s4279_s12 + $0x58] sm:$0xff] %v3269_v35   ;;  %v1458_v47 = vmul.f32 0.1, %v1026_v37  ;;  %v1522_v48 = vmul.f32 0.1, %v1282_v38  ;;  %v1029_v49 = vadd.f32 %v3700_v45, %v4264_v9  ;;  %v1020_v51 = vpop.f32.mrb[27].mxu0 }
 0x126   : > { %3573 = vst [vmem:[%s4279_s12 + $0x158] sm:$0xff] %v3429_v36   ;;  %v1285_v50 = vadd.f32 %v3764_v46, %v4264_v9  ;;  %v1276_v52 = vpop.f32.mrb[27].mxu1  ;;  %3540 = vst [vmem:[%s4279_s12 + $0x50] sm:$0xff] %v3264_v41   ;;  %v1456_v53 = vmul.f32 0.1, %v1018_v43  ;;  %v1021_v55 = vadd.f32 %v4264_v9, %v1020_v51 }
 0x127   : > { %3572 = vst [vmem:[%s4279_s12 + $0x150] sm:$0xff] %v3424_v42   ;;  %v1520_v54 = vmul.f32 0.1, %v1274_v44  ;;  %v1277_v56 = vadd.f32 %v4264_v9, %v1276_v52  ;;  %v1459_v57 = vmul.f32 0.1, %v1029_v49  ;;  %v1586_v61 = vmax.f32 %v1026_v37, %v1458_v47 }
 0x128   : > { %v1523_v58 = vmul.f32 0.1, %v1285_v50  ;;  %v1457_v59 = vmul.f32 0.1, %v1021_v55  ;;  %v1650_v62 = vmax.f32 %v1282_v38, %v1522_v48  ;;  %v1584_v1 = vmax.f32 %v1018_v43, %v1456_v53 }
 0x129   : > { %v1521_v60 = vmul.f32 0.1, %v1277_v56  ;;  %v1587_v63 = vmax.f32 %v1029_v49, %v1459_v57  ;;  %v1648_v2 = vmax.f32 %v1274_v44, %v1520_v54 }
 0x12a   : > { %v1651_v0 = vmax.f32 %v1285_v50, %v1523_v58  ;;  %v1585_v3 = vmax.f32 %v1021_v55, %v1457_v59  ;;  %v3703_v5 = vpop.f32.mrb[28].mxu0  ;;  %v3767_v6 = vpop.f32.mrb[28].mxu1 }
 0x12b   : > { %v1649_v4 = vmax.f32 %v1277_v56, %v1521_v60  ;;  %v3279_v7 = vpack.c.bf16 %v1587_v63, %v1586_v61  ;;  %v1042_v10 = vadd.f32 %v3703_v5, %v4264_v9  ;;  %v1298_v11 = vadd.f32 %v3767_v6, %v4264_v9  ;;  %v1033_v12 = vpop.f32.mrb[29].mxu0  ;;  %v1289_v13 = vpop.f32.mrb[29].mxu1 }
 0x12c   : > { %v3439_v8 = vpack.c.bf16 %v1651_v0, %v1650_v62  ;;  %v3274_v14 = vpack.c.bf16 %v1585_v3, %v1584_v1  ;;  %v1034_v16 = vadd.f32 %v4264_v9, %v1033_v12  ;;  %v1290_v17 = vadd.f32 %v4264_v9, %v1289_v13  ;;  %v3704_v18 = vpop.f32.mrb[30].mxu0  ;;  %v3768_v19 = vpop.f32.mrb[30].mxu1 }
 0x12d   : > { %v3434_v15 = vpack.c.bf16 %v1649_v4, %v1648_v2  ;;  %3543 = vst [vmem:[%s4279_s12 + $0x68] sm:$0xff] %v3279_v7   ;;  %v1462_v20 = vmul.f32 0.1, %v1042_v10  ;;  %v1526_v21 = vmul.f32 0.1, %v1298_v11  ;;  %v1045_v22 = vadd.f32 %v3704_v18, %v4264_v9  ;;  %v1036_v24 = vpop.f32.mrb[31].mxu0 }
 0x12e   : > { %3575 = vst [vmem:[%s4279_s12 + $0x168] sm:$0xff] %v3439_v8   ;;  %v1301_v23 = vadd.f32 %v3768_v19, %v4264_v9  ;;  %v1292_v25 = vpop.f32.mrb[31].mxu1  ;;  %3542 = vst [vmem:[%s4279_s12 + $0x60] sm:$0xff] %v3274_v14   ;;  %v1460_v26 = vmul.f32 0.1, %v1034_v16  ;;  %v1037_v28 = vadd.f32 %v4264_v9, %v1036_v24 }
 0x12f   : > { %3574 = vst [vmem:[%s4279_s12 + $0x160] sm:$0xff] %v3434_v15   ;;  %v1524_v27 = vmul.f32 0.1, %v1290_v17  ;;  %v1293_v29 = vadd.f32 %v4264_v9, %v1292_v25  ;;  %v1463_v30 = vmul.f32 0.1, %v1045_v22  ;;  %v1590_v34 = vmax.f32 %v1042_v10, %v1462_v20 }
 0x130   : > { %v1527_v31 = vmul.f32 0.1, %v1301_v23  ;;  %v1461_v32 = vmul.f32 0.1, %v1037_v28  ;;  %v1654_v35 = vmax.f32 %v1298_v11, %v1526_v21  ;;  %v1588_v38 = vmax.f32 %v1034_v16, %v1460_v26 }
 0x131   : > { %v1525_v33 = vmul.f32 0.1, %v1293_v29  ;;  %v1591_v36 = vmax.f32 %v1045_v22, %v1463_v30  ;;  %v1652_v39 = vmax.f32 %v1290_v17, %v1524_v27 }
 0x132   : > { %v1655_v37 = vmax.f32 %v1301_v23, %v1527_v31  ;;  %v1589_v40 = vmax.f32 %v1037_v28, %v1461_v32  ;;  %v3707_v42 = vpop.f32.mrb[32].mxu0  ;;  %v3771_v43 = vpop.f32.mrb[32].mxu1 }
 0x133   : > { %v1653_v41 = vmax.f32 %v1293_v29, %v1525_v33  ;;  %v3289_v44 = vpack.c.bf16 %v1591_v36, %v1590_v34  ;;  %v1058_v46 = vadd.f32 %v3707_v42, %v4264_v9  ;;  %v1314_v47 = vadd.f32 %v3771_v43, %v4264_v9  ;;  %v1049_v48 = vpop.f32.mrb[33].mxu0  ;;  %v1305_v49 = vpop.f32.mrb[33].mxu1 }
 0x134   : > { %v3449_v45 = vpack.c.bf16 %v1655_v37, %v1654_v35  ;;  %v3284_v50 = vpack.c.bf16 %v1589_v40, %v1588_v38  ;;  %v1050_v52 = vadd.f32 %v4264_v9, %v1049_v48  ;;  %v1306_v53 = vadd.f32 %v4264_v9, %v1305_v49  ;;  %v3708_v54 = vpop.f32.mrb[34].mxu0  ;;  %v3772_v55 = vpop.f32.mrb[34].mxu1 }
 0x135   : > { %v3444_v51 = vpack.c.bf16 %v1653_v41, %v1652_v39  ;;  %3545 = vst [vmem:[%s4279_s12 + $0x78] sm:$0xff] %v3289_v44   ;;  %v1466_v56 = vmul.f32 0.1, %v1058_v46  ;;  %v1530_v57 = vmul.f32 0.1, %v1314_v47  ;;  %v1061_v58 = vadd.f32 %v3708_v54, %v4264_v9  ;;  %v1052_v60 = vpop.f32.mrb[35].mxu0 }
 0x136   : > { %3577 = vst [vmem:[%s4279_s12 + $0x178] sm:$0xff] %v3449_v45   ;;  %v1317_v59 = vadd.f32 %v3772_v55, %v4264_v9  ;;  %v1308_v61 = vpop.f32.mrb[35].mxu1  ;;  %3544 = vst [vmem:[%s4279_s12 + $0x70] sm:$0xff] %v3284_v50   ;;  %v1464_v62 = vmul.f32 0.1, %v1050_v52  ;;  %v1053_v0 = vadd.f32 %v4264_v9, %v1052_v60 }
 0x137   : > { %3576 = vst [vmem:[%s4279_s12 + $0x170] sm:$0xff] %v3444_v51   ;;  %v1528_v63 = vmul.f32 0.1, %v1306_v53  ;;  %v1309_v1 = vadd.f32 %v4264_v9, %v1308_v61  ;;  %v1467_v2 = vmul.f32 0.1, %v1061_v58  ;;  %v1594_v6 = vmax.f32 %v1058_v46, %v1466_v56 }
 0x138   : > { %v1531_v3 = vmul.f32 0.1, %v1317_v59  ;;  %v1465_v4 = vmul.f32 0.1, %v1053_v0  ;;  %v1658_v7 = vmax.f32 %v1314_v47, %v1530_v57  ;;  %v1592_v11 = vmax.f32 %v1050_v52, %v1464_v62 }
 0x139   : > { %v1529_v5 = vmul.f32 0.1, %v1309_v1  ;;  %v1595_v8 = vmax.f32 %v1061_v58, %v1467_v2  ;;  %v1656_v12 = vmax.f32 %v1306_v53, %v1528_v63 }
 0x13a   : > { %v1659_v10 = vmax.f32 %v1317_v59, %v1531_v3  ;;  %v1593_v13 = vmax.f32 %v1053_v0, %v1465_v4  ;;  %v3711_v15 = vpop.f32.mrb[36].mxu0  ;;  %v3775_v16 = vpop.f32.mrb[36].mxu1 }
 0x13b   : > { %v1657_v14 = vmax.f32 %v1309_v1, %v1529_v5  ;;  %v3299_v17 = vpack.c.bf16 %v1595_v8, %v1594_v6  ;;  %v1074_v19 = vadd.f32 %v3711_v15, %v4264_v9  ;;  %v1330_v20 = vadd.f32 %v3775_v16, %v4264_v9  ;;  %v1065_v21 = vpop.f32.mrb[37].mxu0  ;;  %v1321_v22 = vpop.f32.mrb[37].mxu1 }
 0x13c   : > { %v3459_v18 = vpack.c.bf16 %v1659_v10, %v1658_v7  ;;  %v3294_v23 = vpack.c.bf16 %v1593_v13, %v1592_v11  ;;  %v1066_v25 = vadd.f32 %v4264_v9, %v1065_v21  ;;  %v1322_v26 = vadd.f32 %v4264_v9, %v1321_v22  ;;  %v3712_v27 = vpop.f32.mrb[38].mxu0  ;;  %v3776_v28 = vpop.f32.mrb[38].mxu1 }
 0x13d   : > { %v3454_v24 = vpack.c.bf16 %v1657_v14, %v1656_v12  ;;  %3547 = vst [vmem:[%s4279_s12 + $0x88] sm:$0xff] %v3299_v17   ;;  %v1470_v29 = vmul.f32 0.1, %v1074_v19  ;;  %v1534_v30 = vmul.f32 0.1, %v1330_v20  ;;  %v1077_v31 = vadd.f32 %v3712_v27, %v4264_v9  ;;  %v1068_v33 = vpop.f32.mrb[39].mxu0 }
 0x13e   : > { %3579 = vst [vmem:[%s4279_s12 + $0x188] sm:$0xff] %v3459_v18   ;;  %v1333_v32 = vadd.f32 %v3776_v28, %v4264_v9  ;;  %v1324_v34 = vpop.f32.mrb[39].mxu1  ;;  %3546 = vst [vmem:[%s4279_s12 + $0x80] sm:$0xff] %v3294_v23   ;;  %v1468_v35 = vmul.f32 0.1, %v1066_v25  ;;  %v1069_v37 = vadd.f32 %v4264_v9, %v1068_v33 }
 0x13f   : > { %3578 = vst [vmem:[%s4279_s12 + $0x180] sm:$0xff] %v3454_v24   ;;  %v1532_v36 = vmul.f32 0.1, %v1322_v26  ;;  %v1325_v38 = vadd.f32 %v4264_v9, %v1324_v34  ;;  %v1471_v39 = vmul.f32 0.1, %v1077_v31  ;;  %v1598_v43 = vmax.f32 %v1074_v19, %v1470_v29 }
 0x140   : > { %v1535_v40 = vmul.f32 0.1, %v1333_v32  ;;  %v1469_v41 = vmul.f32 0.1, %v1069_v37  ;;  %v1662_v44 = vmax.f32 %v1330_v20, %v1534_v30  ;;  %v1596_v47 = vmax.f32 %v1066_v25, %v1468_v35 }
 0x141   : > { %v1533_v42 = vmul.f32 0.1, %v1325_v38  ;;  %v1599_v45 = vmax.f32 %v1077_v31, %v1471_v39  ;;  %v1660_v48 = vmax.f32 %v1322_v26, %v1532_v36 }
 0x142   : > { %v1663_v46 = vmax.f32 %v1333_v32, %v1535_v40  ;;  %v1597_v49 = vmax.f32 %v1069_v37, %v1469_v41  ;;  %v3715_v51 = vpop.f32.mrb[40].mxu0  ;;  %v3779_v52 = vpop.f32.mrb[40].mxu1 }
 0x143   : > { %v1661_v50 = vmax.f32 %v1325_v38, %v1533_v42  ;;  %v3309_v53 = vpack.c.bf16 %v1599_v45, %v1598_v43  ;;  %v1090_v55 = vadd.f32 %v3715_v51, %v4264_v9  ;;  %v1346_v56 = vadd.f32 %v3779_v52, %v4264_v9  ;;  %v1081_v57 = vpop.f32.mrb[41].mxu0  ;;  %v1337_v58 = vpop.f32.mrb[41].mxu1 }
 0x144   : > { %v3469_v54 = vpack.c.bf16 %v1663_v46, %v1662_v44  ;;  %v3304_v59 = vpack.c.bf16 %v1597_v49, %v1596_v47  ;;  %v1082_v61 = vadd.f32 %v4264_v9, %v1081_v57  ;;  %v1338_v62 = vadd.f32 %v4264_v9, %v1337_v58  ;;  %v3716_v63 = vpop.f32.mrb[42].mxu0  ;;  %v3780_v0 = vpop.f32.mrb[42].mxu1 }
 0x145   : > { %v3464_v60 = vpack.c.bf16 %v1661_v50, %v1660_v48  ;;  %3549 = vst [vmem:[%s4279_s12 + $0x98] sm:$0xff] %v3309_v53   ;;  %v1474_v1 = vmul.f32 0.1, %v1090_v55  ;;  %v1538_v2 = vmul.f32 0.1, %v1346_v56  ;;  %v1093_v3 = vadd.f32 %v3716_v63, %v4264_v9  ;;  %v1084_v5 = vpop.f32.mrb[43].mxu0 }
 0x146   : > { %3581 = vst [vmem:[%s4279_s12 + $0x198] sm:$0xff] %v3469_v54   ;;  %v1349_v4 = vadd.f32 %v3780_v0, %v4264_v9  ;;  %v1340_v6 = vpop.f32.mrb[43].mxu1  ;;  %3548 = vst [vmem:[%s4279_s12 + $0x90] sm:$0xff] %v3304_v59   ;;  %v1472_v7 = vmul.f32 0.1, %v1082_v61  ;;  %v1085_v10 = vadd.f32 %v4264_v9, %v1084_v5 }
 0x147   : > { %3580 = vst [vmem:[%s4279_s12 + $0x190] sm:$0xff] %v3464_v60   ;;  %v1536_v8 = vmul.f32 0.1, %v1338_v62  ;;  %v1341_v11 = vadd.f32 %v4264_v9, %v1340_v6  ;;  %v1475_v12 = vmul.f32 0.1, %v1093_v3  ;;  %v1602_v16 = vmax.f32 %v1090_v55, %v1474_v1 }
 0x148   : > { %v1539_v13 = vmul.f32 0.1, %v1349_v4  ;;  %v1473_v14 = vmul.f32 0.1, %v1085_v10  ;;  %v1666_v17 = vmax.f32 %v1346_v56, %v1538_v2  ;;  %v1600_v20 = vmax.f32 %v1082_v61, %v1472_v7 }
 0x149   : > { %v1537_v15 = vmul.f32 0.1, %v1341_v11  ;;  %v1603_v18 = vmax.f32 %v1093_v3, %v1475_v12  ;;  %v1664_v21 = vmax.f32 %v1338_v62, %v1536_v8 }
 0x14a   : > { %v1667_v19 = vmax.f32 %v1349_v4, %v1539_v13  ;;  %v1601_v22 = vmax.f32 %v1085_v10, %v1473_v14  ;;  %v3719_v24 = vpop.f32.mrb[44].mxu0  ;;  %v3783_v25 = vpop.f32.mrb[44].mxu1 }
 0x14b   : > { %v1665_v23 = vmax.f32 %v1341_v11, %v1537_v15  ;;  %v3319_v26 = vpack.c.bf16 %v1603_v18, %v1602_v16  ;;  %v1106_v28 = vadd.f32 %v3719_v24, %v4264_v9  ;;  %v1362_v29 = vadd.f32 %v3783_v25, %v4264_v9  ;;  %v1097_v30 = vpop.f32.mrb[45].mxu0  ;;  %v1353_v31 = vpop.f32.mrb[45].mxu1 }
 0x14c   : > { %v3479_v27 = vpack.c.bf16 %v1667_v19, %v1666_v17  ;;  %v3314_v32 = vpack.c.bf16 %v1601_v22, %v1600_v20  ;;  %v1098_v34 = vadd.f32 %v4264_v9, %v1097_v30  ;;  %v1354_v35 = vadd.f32 %v4264_v9, %v1353_v31  ;;  %v3720_v36 = vpop.f32.mrb[46].mxu0  ;;  %v3784_v37 = vpop.f32.mrb[46].mxu1 }
 0x14d   : > { %v3474_v33 = vpack.c.bf16 %v1665_v23, %v1664_v21  ;;  %3551 = vst [vmem:[%s4279_s12 + $0xa8] sm:$0xff] %v3319_v26   ;;  %v1478_v38 = vmul.f32 0.1, %v1106_v28  ;;  %v1542_v39 = vmul.f32 0.1, %v1362_v29  ;;  %v1109_v40 = vadd.f32 %v3720_v36, %v4264_v9  ;;  %v1100_v42 = vpop.f32.mrb[47].mxu0 }
 0x14e   : > { %3583 = vst [vmem:[%s4279_s12 + $0x1a8] sm:$0xff] %v3479_v27   ;;  %v1365_v41 = vadd.f32 %v3784_v37, %v4264_v9  ;;  %v1356_v43 = vpop.f32.mrb[47].mxu1  ;;  %3550 = vst [vmem:[%s4279_s12 + $0xa0] sm:$0xff] %v3314_v32   ;;  %v1476_v44 = vmul.f32 0.1, %v1098_v34  ;;  %v1101_v46 = vadd.f32 %v4264_v9, %v1100_v42 }
 0x14f   : > { %3582 = vst [vmem:[%s4279_s12 + $0x1a0] sm:$0xff] %v3474_v33   ;;  %v1540_v45 = vmul.f32 0.1, %v1354_v35  ;;  %v1357_v47 = vadd.f32 %v4264_v9, %v1356_v43  ;;  %v1479_v48 = vmul.f32 0.1, %v1109_v40  ;;  %v1606_v52 = vmax.f32 %v1106_v28, %v1478_v38 }
 0x150   : > { %v1543_v49 = vmul.f32 0.1, %v1365_v41  ;;  %v1477_v50 = vmul.f32 0.1, %v1101_v46  ;;  %v1670_v53 = vmax.f32 %v1362_v29, %v1542_v39  ;;  %v1604_v56 = vmax.f32 %v1098_v34, %v1476_v44 }
 0x151   : > { %v1541_v51 = vmul.f32 0.1, %v1357_v47  ;;  %v1607_v54 = vmax.f32 %v1109_v40, %v1479_v48  ;;  %v1668_v57 = vmax.f32 %v1354_v35, %v1540_v45 }
 0x152   : > { %v1671_v55 = vmax.f32 %v1365_v41, %v1543_v49  ;;  %v1605_v58 = vmax.f32 %v1101_v46, %v1477_v50  ;;  %v3723_v60 = vpop.f32.mrb[48].mxu0  ;;  %v3787_v61 = vpop.f32.mrb[48].mxu1 }
 0x153   : > { %v1669_v59 = vmax.f32 %v1357_v47, %v1541_v51  ;;  %v3329_v62 = vpack.c.bf16 %v1607_v54, %v1606_v52  ;;  %v1122_v0 = vadd.f32 %v3723_v60, %v4264_v9  ;;  %v1378_v1 = vadd.f32 %v3787_v61, %v4264_v9  ;;  %v1113_v2 = vpop.f32.mrb[49].mxu0  ;;  %v1369_v3 = vpop.f32.mrb[49].mxu1 }
 0x154   : > { %v3489_v63 = vpack.c.bf16 %v1671_v55, %v1670_v53  ;;  %v3324_v4 = vpack.c.bf16 %v1605_v58, %v1604_v56  ;;  %v1114_v6 = vadd.f32 %v4264_v9, %v1113_v2  ;;  %v1370_v7 = vadd.f32 %v4264_v9, %v1369_v3  ;;  %v3724_v8 = vpop.f32.mrb[50].mxu0  ;;  %v3788_v10 = vpop.f32.mrb[50].mxu1 }
 0x155   : > { %v3484_v5 = vpack.c.bf16 %v1669_v59, %v1668_v57  ;;  %3553 = vst [vmem:[%s4279_s12 + $0xb8] sm:$0xff] %v3329_v62   ;;  %v1482_v11 = vmul.f32 0.1, %v1122_v0  ;;  %v1546_v12 = vmul.f32 0.1, %v1378_v1  ;;  %v1125_v13 = vadd.f32 %v3724_v8, %v4264_v9  ;;  %v1116_v15 = vpop.f32.mrb[51].mxu0 }
 0x156   : > { %3585 = vst [vmem:[%s4279_s12 + $0x1b8] sm:$0xff] %v3489_v63   ;;  %v1381_v14 = vadd.f32 %v3788_v10, %v4264_v9  ;;  %v1372_v16 = vpop.f32.mrb[51].mxu1  ;;  %3552 = vst [vmem:[%s4279_s12 + $0xb0] sm:$0xff] %v3324_v4   ;;  %v1480_v17 = vmul.f32 0.1, %v1114_v6  ;;  %v1117_v19 = vadd.f32 %v4264_v9, %v1116_v15 }
 0x157   : > { %3584 = vst [vmem:[%s4279_s12 + $0x1b0] sm:$0xff] %v3484_v5   ;;  %v1544_v18 = vmul.f32 0.1, %v1370_v7  ;;  %v1373_v20 = vadd.f32 %v4264_v9, %v1372_v16  ;;  %v1483_v21 = vmul.f32 0.1, %v1125_v13  ;;  %v1610_v25 = vmax.f32 %v1122_v0, %v1482_v11 }
 0x158   : > { %v1547_v22 = vmul.f32 0.1, %v1381_v14  ;;  %v1481_v23 = vmul.f32 0.1, %v1117_v19  ;;  %v1674_v26 = vmax.f32 %v1378_v1, %v1546_v12  ;;  %v1608_v29 = vmax.f32 %v1114_v6, %v1480_v17  ;;  %v4424_v9 = vld [vmem:[%s4667_s2] ss:$0 sm:$0xff] }
 0x159   : > { %v1545_v24 = vmul.f32 0.1, %v1373_v20  ;;  %v1611_v27 = vmax.f32 %v1125_v13, %v1483_v21  ;;  %v1672_v30 = vmax.f32 %v1370_v7, %v1544_v18 }
 0x15a   : > { %v1675_v28 = vmax.f32 %v1381_v14, %v1547_v22  ;;  %v1609_v31 = vmax.f32 %v1117_v19, %v1481_v23  ;;  %v3727_v33 = vpop.f32.mrb[52].mxu0  ;;  %v3791_v34 = vpop.f32.mrb[52].mxu1 }
 0x15b   : > { %v1673_v32 = vmax.f32 %v1373_v20, %v1545_v24  ;;  %v3339_v35 = vpack.c.bf16 %v1611_v27, %v1610_v25  ;;  %v1138_v37 = vadd.f32 %v4424_v9, %v3727_v33  ;;  %v1394_v38 = vadd.f32 %v4424_v9, %v3791_v34  ;;  %v1129_v39 = vpop.f32.mrb[53].mxu0  ;;  %v1385_v40 = vpop.f32.mrb[53].mxu1 }
 0x15c   : > { %v3499_v36 = vpack.c.bf16 %v1675_v28, %v1674_v26  ;;  %v3334_v41 = vpack.c.bf16 %v1609_v31, %v1608_v29  ;;  %v1130_v43 = vadd.f32 %v4424_v9, %v1129_v39  ;;  %v1386_v44 = vadd.f32 %v4424_v9, %v1385_v40  ;;  %v3728_v45 = vpop.f32.mrb[54].mxu0  ;;  %v3792_v46 = vpop.f32.mrb[54].mxu1 }
 0x15d   : > { %v3494_v42 = vpack.c.bf16 %v1673_v32, %v1672_v30  ;;  %3555 = vst [vmem:[%s4279_s12 + $0xc8] sm:$0xff] %v3339_v35   ;;  %v1486_v47 = vmul.f32 0.1, %v1138_v37  ;;  %v1550_v48 = vmul.f32 0.1, %v1394_v38  ;;  %v1141_v49 = vadd.f32 %v4424_v9, %v3728_v45  ;;  %v1132_v51 = vpop.f32.mrb[55].mxu0 }
 0x15e   : > { %3587 = vst [vmem:[%s4279_s12 + $0x1c8] sm:$0xff] %v3499_v36   ;;  %v1397_v50 = vadd.f32 %v4424_v9, %v3792_v46  ;;  %v1388_v52 = vpop.f32.mrb[55].mxu1  ;;  %3554 = vst [vmem:[%s4279_s12 + $0xc0] sm:$0xff] %v3334_v41   ;;  %v1484_v53 = vmul.f32 0.1, %v1130_v43  ;;  %v1133_v55 = vadd.f32 %v4424_v9, %v1132_v51 }
 0x15f   : > { %3586 = vst [vmem:[%s4279_s12 + $0x1c0] sm:$0xff] %v3494_v42   ;;  %v1548_v54 = vmul.f32 0.1, %v1386_v44  ;;  %v1389_v56 = vadd.f32 %v4424_v9, %v1388_v52  ;;  %v1487_v57 = vmul.f32 0.1, %v1141_v49  ;;  %v1614_v61 = vmax.f32 %v1138_v37, %v1486_v47 }
 0x160   : > { %v1551_v58 = vmul.f32 0.1, %v1397_v50  ;;  %v1485_v59 = vmul.f32 0.1, %v1133_v55  ;;  %v1678_v62 = vmax.f32 %v1394_v38, %v1550_v48  ;;  %v1612_v1 = vmax.f32 %v1130_v43, %v1484_v53 }
 0x161   : > { %v1549_v60 = vmul.f32 0.1, %v1389_v56  ;;  %v1615_v63 = vmax.f32 %v1141_v49, %v1487_v57  ;;  %v1676_v2 = vmax.f32 %v1386_v44, %v1548_v54 }
 0x162   : > { %v1679_v0 = vmax.f32 %v1397_v50, %v1551_v58  ;;  %v1613_v3 = vmax.f32 %v1133_v55, %v1485_v59  ;;  %v3731_v5 = vpop.f32.mrb[56].mxu0  ;;  %v3795_v6 = vpop.f32.mrb[56].mxu1 }
 0x163   : > { %v1677_v4 = vmax.f32 %v1389_v56, %v1549_v60  ;;  %v3349_v7 = vpack.c.bf16 %v1615_v63, %v1614_v61  ;;  %v1154_v10 = vadd.f32 %v4424_v9, %v3731_v5  ;;  %v1410_v11 = vadd.f32 %v4424_v9, %v3795_v6  ;;  %v1145_v12 = vpop.f32.mrb[57].mxu0  ;;  %v1401_v13 = vpop.f32.mrb[57].mxu1 }
 0x164   : > { %v3509_v8 = vpack.c.bf16 %v1679_v0, %v1678_v62  ;;  %v3344_v14 = vpack.c.bf16 %v1613_v3, %v1612_v1  ;;  %v1146_v16 = vadd.f32 %v4424_v9, %v1145_v12  ;;  %v1402_v17 = vadd.f32 %v4424_v9, %v1401_v13  ;;  %v3732_v18 = vpop.f32.mrb[58].mxu0  ;;  %v3796_v19 = vpop.f32.mrb[58].mxu1 }
 0x165   : > { %v3504_v15 = vpack.c.bf16 %v1677_v4, %v1676_v2  ;;  %3557 = vst [vmem:[%s4279_s12 + $0xd8] sm:$0xff] %v3349_v7   ;;  %v1490_v20 = vmul.f32 0.1, %v1154_v10  ;;  %v1554_v21 = vmul.f32 0.1, %v1410_v11  ;;  %v1157_v22 = vadd.f32 %v4424_v9, %v3732_v18  ;;  %v1148_v24 = vpop.f32.mrb[59].mxu0 }
 0x166   : > { %3589 = vst [vmem:[%s4279_s12 + $0x1d8] sm:$0xff] %v3509_v8   ;;  %v1413_v23 = vadd.f32 %v4424_v9, %v3796_v19  ;;  %v1404_v25 = vpop.f32.mrb[59].mxu1  ;;  %3556 = vst [vmem:[%s4279_s12 + $0xd0] sm:$0xff] %v3344_v14   ;;  %v1488_v26 = vmul.f32 0.1, %v1146_v16  ;;  %v1149_v28 = vadd.f32 %v4424_v9, %v1148_v24 }
 0x167   : > { %3588 = vst [vmem:[%s4279_s12 + $0x1d0] sm:$0xff] %v3504_v15   ;;  %v1552_v27 = vmul.f32 0.1, %v1402_v17  ;;  %v1405_v29 = vadd.f32 %v4424_v9, %v1404_v25  ;;  %v1491_v30 = vmul.f32 0.1, %v1157_v22  ;;  %v1618_v34 = vmax.f32 %v1154_v10, %v1490_v20 }
 0x168   : > { %v1555_v31 = vmul.f32 0.1, %v1413_v23  ;;  %v1489_v32 = vmul.f32 0.1, %v1149_v28  ;;  %v1682_v35 = vmax.f32 %v1410_v11, %v1554_v21  ;;  %v1616_v38 = vmax.f32 %v1146_v16, %v1488_v26 }
 0x169   : > { %v1553_v33 = vmul.f32 0.1, %v1405_v29  ;;  %v1619_v36 = vmax.f32 %v1157_v22, %v1491_v30  ;;  %v1680_v39 = vmax.f32 %v1402_v17, %v1552_v27 }
 0x16a   : > { %v1683_v37 = vmax.f32 %v1413_v23, %v1555_v31  ;;  %v1617_v40 = vmax.f32 %v1149_v28, %v1489_v32  ;;  %v3735_v42 = vpop.f32.mrb[60].mxu0  ;;  %v3799_v43 = vpop.f32.mrb[60].mxu1 }
 0x16b   : > { %v1681_v41 = vmax.f32 %v1405_v29, %v1553_v33  ;;  %v3359_v44 = vpack.c.bf16 %v1619_v36, %v1618_v34  ;;  %v1170_v46 = vadd.f32 %v4424_v9, %v3735_v42  ;;  %v1426_v47 = vadd.f32 %v4424_v9, %v3799_v43  ;;  %v1161_v48 = vpop.f32.mrb[61].mxu0  ;;  %v1417_v49 = vpop.f32.mrb[61].mxu1 }
 0x16c   : > { %v3519_v45 = vpack.c.bf16 %v1683_v37, %v1682_v35  ;;  %v3354_v50 = vpack.c.bf16 %v1617_v40, %v1616_v38  ;;  %v1162_v52 = vadd.f32 %v4424_v9, %v1161_v48  ;;  %v1418_v53 = vadd.f32 %v4424_v9, %v1417_v49  ;;  %v3736_v54 = vpop.f32.mrb[62].mxu0  ;;  %v3800_v55 = vpop.f32.mrb[62].mxu1 }
 0x16d   : > { %v3514_v51 = vpack.c.bf16 %v1681_v41, %v1680_v39  ;;  %3559 = vst [vmem:[%s4279_s12 + $0xe8] sm:$0xff] %v3359_v44   ;;  %v1494_v56 = vmul.f32 0.1, %v1170_v46  ;;  %v1558_v57 = vmul.f32 0.1, %v1426_v47  ;;  %v1173_v58 = vadd.f32 %v4424_v9, %v3736_v54  ;;  %v1164_v60 = vpop.f32.mrb[63].mxu0 }
 0x16e   : > { %3591 = vst [vmem:[%s4279_s12 + $0x1e8] sm:$0xff] %v3519_v45   ;;  %v1429_v59 = vadd.f32 %v4424_v9, %v3800_v55  ;;  %v1420_v61 = vpop.f32.mrb[63].mxu1  ;;  %3558 = vst [vmem:[%s4279_s12 + $0xe0] sm:$0xff] %v3354_v50   ;;  %v1492_v62 = vmul.f32 0.1, %v1162_v52  ;;  %v1165_v0 = vadd.f32 %v4424_v9, %v1164_v60 }
 0x16f   : > { %3590 = vst [vmem:[%s4279_s12 + $0x1e0] sm:$0xff] %v3514_v51   ;;  %v1556_v63 = vmul.f32 0.1, %v1418_v53  ;;  %v1421_v1 = vadd.f32 %v4424_v9, %v1420_v61  ;;  %v1495_v2 = vmul.f32 0.1, %v1173_v58  ;;  %v1622_v6 = vmax.f32 %v1170_v46, %v1494_v56 }
 0x170   : > { %v1559_v3 = vmul.f32 0.1, %v1429_v59  ;;  %v1493_v4 = vmul.f32 0.1, %v1165_v0  ;;  %v1686_v7 = vmax.f32 %v1426_v47, %v1558_v57  ;;  %v1620_v11 = vmax.f32 %v1162_v52, %v1492_v62 }
 0x171   : > { %v1557_v5 = vmul.f32 0.1, %v1421_v1  ;;  %v1623_v8 = vmax.f32 %v1173_v58, %v1495_v2  ;;  %v1684_v12 = vmax.f32 %v1418_v53, %v1556_v63  ;;  %2334 = sbr.rel (!%p4104_p4) target bundleno = 467 (0x1d3), region = 36 }
 0x172   : > { %v1687_v10 = vmax.f32 %v1429_v59, %v1559_v3  ;;  %v1621_v13 = vmax.f32 %v1165_v0, %v1493_v4 }
 0x173   : > { %v1685_v14 = vmax.f32 %v1421_v1, %v1557_v5  ;;  %v3369_v15 = vpack.c.bf16 %v1623_v8, %v1622_v6 }
 0x174   : > { %v3529_v16 = vpack.c.bf16 %v1687_v10, %v1686_v7  ;;  %v3364_v17 = vpack.c.bf16 %v1621_v13, %v1620_v11 }
 0x175   : > { %v3524_v9 = vpack.c.bf16 %v1685_v14, %v1684_v12  ;;  %3561 = vst [vmem:[%s4279_s12 + $0xf8] sm:$0xff] %v3369_v15  }
 0x176   : > { %3593 = vst [vmem:[%s4279_s12 + $0x1f8] sm:$0xff] %v3529_v16   ;;  %3560 = vst [vmem:[%s4279_s12 + $0xf0] sm:$0xff] %v3364_v17  }
 0x177   : > { %3592 = vst [vmem:[%s4279_s12 + $0x1f0] sm:$0xff] %v3524_v9  }
 0x178   : > { %s4677_s22 = smov (!%p2337_p8, %s2336_s22), 128 }
 0x179   : > { %s3065_s28 = sshll.u32 %s4677_s22, 6 }
 0x17a   : > { %p3068_p9 = scmp.eq.s32.totalorder %s3065_s28, 0 }
 0x17b   : > { %s4479_s29 = sshrl.u32 (!%p3068_p9), %s4677_s22, 6 }
 0x17c   : > { %2345 = sbr.rel (%p3068_p9) target bundleno = 467 (0x1d3), region = 40  ;;  %p3069_p10 = scmp.le.s32.totalorder (!%p3068_p9), %s4479_s29, 0 }
 0x183   : > { %2750 = sbr.rel (%p3069_p10) target bundleno = 446 (0x1be), region = 112  ;;  %s4670_s15 = smov (!%p3069_p10), %s4473_s26 }
 0x184   : > { %s4671_s20 = smov (!%p3069_p10), %s4279_s12  ;;  %s4488_s27 = smov (!%p3069_p10), 0  }
 0x185   : > { %s4490_s30 = smov (!%p3069_p10), 0  }
 0x18a LB: >> { %v2361_v18 = vld [vmem:[%s4032_s20] sm:$0xf]  ;;  %v2363_v19 = vld [vmem:[%s4032_s20 + $0x4] sm:$0xf]  ;;  %v2365_v20 = vld [vmem:[%s4032_s20 + $0x8] sm:$0xf]  ;;  %s4040_s30 = sphi %s4490_s30, %s2355_s30   ;;  %s4036_s27 = sphi %s4488_s27, %s4672_s27   ;;  %s4032_s20 = sphi %s4671_s20, %s2494_s20   ;;  %s4028_s15 = sphi %s4670_s15, %s2495_s15  }
 0x18b   : >> { %2362 = vst [vmem:[%s4028_s15] sm:$0xf] %v2361_v18  ;;  %2364 = vst [vmem:[%s4028_s15 + $0x4] sm:$0xf] %v2363_v19  ;;  %v2367_v21 = vld [vmem:[%s4032_s20 + $0xc] sm:$0xf]  ;;  %s2489_s4 = sadd.s32 1, %s4036_s27 }
 0x18c   : >> { %2366 = vst [vmem:[%s4028_s15 + $0x8] sm:$0xf] %v2365_v20  ;;  %v2369_v22 = vld [vmem:[%s4032_s20 + $0x10] sm:$0xf]  ;;  %v2371_v23 = vld [vmem:[%s4032_s20 + $0x14] sm:$0xf]  ;;  %p2490_p11 = scmp.ge.s32.totalorder %s2489_s4, %s4479_s29 }
 0x18d   : >> { %2368 = vst [vmem:[%s4028_s15 + $0xc] sm:$0xf] %v2367_v21  ;;  %2370 = vst [vmem:[%s4028_s15 + $0x10] sm:$0xf] %v2369_v22  ;;  %v2373_v24 = vld [vmem:[%s4032_s20 + $0x18] sm:$0xf] }
 0x18e   : >> { %2372 = vst [vmem:[%s4028_s15 + $0x14] sm:$0xf] %v2371_v23  ;;  %v2375_v25 = vld [vmem:[%s4032_s20 + $0x1c] sm:$0xf]  ;;  %v2377_v26 = vld [vmem:[%s4032_s20 + $0x20] sm:$0xf] }
 0x18f   : >> { %2374 = vst [vmem:[%s4028_s15 + $0x18] sm:$0xf] %v2373_v24  ;;  %2376 = vst [vmem:[%s4028_s15 + $0x1c] sm:$0xf] %v2375_v25  ;;  %v2379_v27 = vld [vmem:[%s4032_s20 + $0x24] sm:$0xf] }
 0x190   : >> { %2378 = vst [vmem:[%s4028_s15 + $0x20] sm:$0xf] %v2377_v26  ;;  %v2381_v28 = vld [vmem:[%s4032_s20 + $0x28] sm:$0xf]  ;;  %v2383_v29 = vld [vmem:[%s4032_s20 + $0x2c] sm:$0xf] }
 0x191   : >> { %2380 = vst [vmem:[%s4028_s15 + $0x24] sm:$0xf] %v2379_v27  ;;  %2382 = vst [vmem:[%s4028_s15 + $0x28] sm:$0xf] %v2381_v28  ;;  %v2385_v30 = vld [vmem:[%s4032_s20 + $0x30] sm:$0xf] }
 0x192   : >> { %2384 = vst [vmem:[%s4028_s15 + $0x2c] sm:$0xf] %v2383_v29  ;;  %v2387_v31 = vld [vmem:[%s4032_s20 + $0x34] sm:$0xf]  ;;  %v2389_v32 = vld [vmem:[%s4032_s20 + $0x38] sm:$0xf] }
 0x193   : >> { %2386 = vst [vmem:[%s4028_s15 + $0x30] sm:$0xf] %v2385_v30  ;;  %2388 = vst [vmem:[%s4028_s15 + $0x34] sm:$0xf] %v2387_v31  ;;  %v2391_v33 = vld [vmem:[%s4032_s20 + $0x3c] sm:$0xf] }
 0x194   : >> { %2390 = vst [vmem:[%s4028_s15 + $0x38] sm:$0xf] %v2389_v32  ;;  %v2393_v34 = vld [vmem:[%s4032_s20 + $0x40] sm:$0xf]  ;;  %v2395_v35 = vld [vmem:[%s4032_s20 + $0x44] sm:$0xf] }
 0x195   : >> { %2392 = vst [vmem:[%s4028_s15 + $0x3c] sm:$0xf] %v2391_v33  ;;  %2394 = vst [vmem:[%s4028_s15 + $0x40] sm:$0xf] %v2393_v34  ;;  %v2397_v36 = vld [vmem:[%s4032_s20 + $0x48] sm:$0xf] }
 0x196   : >> { %2396 = vst [vmem:[%s4028_s15 + $0x44] sm:$0xf] %v2395_v35  ;;  %v2399_v37 = vld [vmem:[%s4032_s20 + $0x4c] sm:$0xf]  ;;  %v2401_v38 = vld [vmem:[%s4032_s20 + $0x50] sm:$0xf] }
 0x197   : >> { %2398 = vst [vmem:[%s4028_s15 + $0x48] sm:$0xf] %v2397_v36  ;;  %2400 = vst [vmem:[%s4028_s15 + $0x4c] sm:$0xf] %v2399_v37  ;;  %v2403_v39 = vld [vmem:[%s4032_s20 + $0x54] sm:$0xf] }
 0x198   : >> { %2402 = vst [vmem:[%s4028_s15 + $0x50] sm:$0xf] %v2401_v38  ;;  %v2405_v40 = vld [vmem:[%s4032_s20 + $0x58] sm:$0xf]  ;;  %v2407_v41 = vld [vmem:[%s4032_s20 + $0x5c] sm:$0xf] }
 0x199   : >> { %2404 = vst [vmem:[%s4028_s15 + $0x54] sm:$0xf] %v2403_v39  ;;  %2406 = vst [vmem:[%s4028_s15 + $0x58] sm:$0xf] %v2405_v40  ;;  %v2409_v42 = vld [vmem:[%s4032_s20 + $0x60] sm:$0xf] }
 0x19a   : >> { %2408 = vst [vmem:[%s4028_s15 + $0x5c] sm:$0xf] %v2407_v41  ;;  %v2411_v43 = vld [vmem:[%s4032_s20 + $0x64] sm:$0xf]  ;;  %v2413_v44 = vld [vmem:[%s4032_s20 + $0x68] sm:$0xf] }
 0x19b   : >> { %2410 = vst [vmem:[%s4028_s15 + $0x60] sm:$0xf] %v2409_v42  ;;  %2412 = vst [vmem:[%s4028_s15 + $0x64] sm:$0xf] %v2411_v43  ;;  %v2415_v45 = vld [vmem:[%s4032_s20 + $0x6c] sm:$0xf] }
 0x19c   : >> { %2414 = vst [vmem:[%s4028_s15 + $0x68] sm:$0xf] %v2413_v44  ;;  %v2417_v46 = vld [vmem:[%s4032_s20 + $0x70] sm:$0xf]  ;;  %v2419_v47 = vld [vmem:[%s4032_s20 + $0x74] sm:$0xf] }
 0x19d   : >> { %2416 = vst [vmem:[%s4028_s15 + $0x6c] sm:$0xf] %v2415_v45  ;;  %2418 = vst [vmem:[%s4028_s15 + $0x70] sm:$0xf] %v2417_v46  ;;  %v2421_v48 = vld [vmem:[%s4032_s20 + $0x78] sm:$0xf] }
 0x19e   : >> { %2420 = vst [vmem:[%s4028_s15 + $0x74] sm:$0xf] %v2419_v47  ;;  %v2423_v49 = vld [vmem:[%s4032_s20 + $0x7c] sm:$0xf]  ;;  %v2425_v50 = vld [vmem:[%s4032_s20 + $0x80] sm:$0xf] }
 0x19f   : >> { %2422 = vst [vmem:[%s4028_s15 + $0x78] sm:$0xf] %v2421_v48  ;;  %2424 = vst [vmem:[%s4028_s15 + $0x7c] sm:$0xf] %v2423_v49  ;;  %v2427_v51 = vld [vmem:[%s4032_s20 + $0x84] sm:$0xf] }
 0x1a0   : >> { %2426 = vst [vmem:[%s4028_s15 + $0x80] sm:$0xf] %v2425_v50  ;;  %v2429_v52 = vld [vmem:[%s4032_s20 + $0x88] sm:$0xf]  ;;  %v2431_v53 = vld [vmem:[%s4032_s20 + $0x8c] sm:$0xf] }
 0x1a1   : >> { %2428 = vst [vmem:[%s4028_s15 + $0x84] sm:$0xf] %v2427_v51  ;;  %2430 = vst [vmem:[%s4028_s15 + $0x88] sm:$0xf] %v2429_v52  ;;  %v2433_v54 = vld [vmem:[%s4032_s20 + $0x90] sm:$0xf] }
 0x1a2   : >> { %2432 = vst [vmem:[%s4028_s15 + $0x8c] sm:$0xf] %v2431_v53  ;;  %v2435_v55 = vld [vmem:[%s4032_s20 + $0x94] sm:$0xf]  ;;  %v2437_v56 = vld [vmem:[%s4032_s20 + $0x98] sm:$0xf] }
 0x1a3   : >> { %2434 = vst [vmem:[%s4028_s15 + $0x90] sm:$0xf] %v2433_v54  ;;  %2436 = vst [vmem:[%s4028_s15 + $0x94] sm:$0xf] %v2435_v55  ;;  %v2439_v57 = vld [vmem:[%s4032_s20 + $0x9c] sm:$0xf] }
 0x1a4   : >> { %2438 = vst [vmem:[%s4028_s15 + $0x98] sm:$0xf] %v2437_v56  ;;  %v2441_v58 = vld [vmem:[%s4032_s20 + $0xa0] sm:$0xf]  ;;  %v2443_v59 = vld [vmem:[%s4032_s20 + $0xa4] sm:$0xf] }
 0x1a5   : >> { %2440 = vst [vmem:[%s4028_s15 + $0x9c] sm:$0xf] %v2439_v57  ;;  %2442 = vst [vmem:[%s4028_s15 + $0xa0] sm:$0xf] %v2441_v58  ;;  %v2445_v60 = vld [vmem:[%s4032_s20 + $0xa8] sm:$0xf] }
 0x1a6   : >> { %2444 = vst [vmem:[%s4028_s15 + $0xa4] sm:$0xf] %v2443_v59  ;;  %v2447_v61 = vld [vmem:[%s4032_s20 + $0xac] sm:$0xf]  ;;  %v2449_v62 = vld [vmem:[%s4032_s20 + $0xb0] sm:$0xf] }
 0x1a7   : >> { %2446 = vst [vmem:[%s4028_s15 + $0xa8] sm:$0xf] %v2445_v60  ;;  %2448 = vst [vmem:[%s4028_s15 + $0xac] sm:$0xf] %v2447_v61  ;;  %v2451_v63 = vld [vmem:[%s4032_s20 + $0xb4] sm:$0xf] }
 0x1a8   : >> { %2450 = vst [vmem:[%s4028_s15 + $0xb0] sm:$0xf] %v2449_v62  ;;  %v2453_v0 = vld [vmem:[%s4032_s20 + $0xb8] sm:$0xf]  ;;  %v2455_v1 = vld [vmem:[%s4032_s20 + $0xbc] sm:$0xf] }
 0x1a9   : >> { %2452 = vst [vmem:[%s4028_s15 + $0xb4] sm:$0xf] %v2451_v63  ;;  %2454 = vst [vmem:[%s4028_s15 + $0xb8] sm:$0xf] %v2453_v0  ;;  %v2457_v2 = vld [vmem:[%s4032_s20 + $0xc0] sm:$0xf] }
 0x1aa   : >> { %2456 = vst [vmem:[%s4028_s15 + $0xbc] sm:$0xf] %v2455_v1  ;;  %v2459_v3 = vld [vmem:[%s4032_s20 + $0xc4] sm:$0xf]  ;;  %v2461_v4 = vld [vmem:[%s4032_s20 + $0xc8] sm:$0xf] }
 0x1ab   : >> { %2458 = vst [vmem:[%s4028_s15 + $0xc0] sm:$0xf] %v2457_v2  ;;  %2460 = vst [vmem:[%s4028_s15 + $0xc4] sm:$0xf] %v2459_v3  ;;  %v2463_v5 = vld [vmem:[%s4032_s20 + $0xcc] sm:$0xf] }
 0x1ac   : >> { %2462 = vst [vmem:[%s4028_s15 + $0xc8] sm:$0xf] %v2461_v4  ;;  %v2465_v6 = vld [vmem:[%s4032_s20 + $0xd0] sm:$0xf]  ;;  %v2467_v7 = vld [vmem:[%s4032_s20 + $0xd4] sm:$0xf] }
 0x1ad   : >> { %2464 = vst [vmem:[%s4028_s15 + $0xcc] sm:$0xf] %v2463_v5  ;;  %2466 = vst [vmem:[%s4028_s15 + $0xd0] sm:$0xf] %v2465_v6  ;;  %v2469_v8 = vld [vmem:[%s4032_s20 + $0xd8] sm:$0xf] }
 0x1ae   : >> { %2468 = vst [vmem:[%s4028_s15 + $0xd4] sm:$0xf] %v2467_v7  ;;  %v2471_v10 = vld [vmem:[%s4032_s20 + $0xdc] sm:$0xf]  ;;  %v2473_v11 = vld [vmem:[%s4032_s20 + $0xe0] sm:$0xf] }
 0x1af   : >> { %2470 = vst [vmem:[%s4028_s15 + $0xd8] sm:$0xf] %v2469_v8  ;;  %2472 = vst [vmem:[%s4028_s15 + $0xdc] sm:$0xf] %v2471_v10  ;;  %v2475_v12 = vld [vmem:[%s4032_s20 + $0xe4] sm:$0xf] }
 0x1b0   : >> { %2474 = vst [vmem:[%s4028_s15 + $0xe0] sm:$0xf] %v2473_v11  ;;  %v2477_v13 = vld [vmem:[%s4032_s20 + $0xe8] sm:$0xf]  ;;  %v2479_v14 = vld [vmem:[%s4032_s20 + $0xec] sm:$0xf] }
 0x1b1   : >> { %2476 = vst [vmem:[%s4028_s15 + $0xe4] sm:$0xf] %v2475_v12  ;;  %2478 = vst [vmem:[%s4028_s15 + $0xe8] sm:$0xf] %v2477_v13  ;;  %v2481_v15 = vld [vmem:[%s4032_s20 + $0xf0] sm:$0xf] }
 0x1b2   : >> { %2480 = vst [vmem:[%s4028_s15 + $0xec] sm:$0xf] %v2479_v14  ;;  %v2483_v16 = vld [vmem:[%s4032_s20 + $0xf4] sm:$0xf]  ;;  %v2485_v17 = vld [vmem:[%s4032_s20 + $0xf8] sm:$0xf] }
 0x1b3   : >> { %2482 = vst [vmem:[%s4028_s15 + $0xf0] sm:$0xf] %v2481_v15  ;;  %2484 = vst [vmem:[%s4028_s15 + $0xf4] sm:$0xf] %v2483_v16  ;;  %v2487_v9 = vld [vmem:[%s4032_s20 + $0xfc] sm:$0xf] }
 0x1b4   : >> { %2486 = vst [vmem:[%s4028_s15 + $0xf8] sm:$0xf] %v2485_v17  ;;  %2488 = vst [vmem:[%s4028_s15 + $0xfc] sm:$0xf] %v2487_v9  ;;  %s4679_s4 = smov (%p2490_p11, %s2489_s4), 0  ;;  %s2355_s30 = sadd.s32 1, %s4040_s30  }
 0x1b5   : >> { %s3070_s5 = sshll.u32 %s4679_s4, 8  ;;  %p2354_p12 = scmp.ge.s32.totalorder %s2355_s30, %s4479_s29 }
 0x1b6   : >> { %s2494_s20 = scalar_lea.vmem %s4279_s12, %s3070_s5 [#allocation2]   ;;  %s2495_s15 = scalar_lea.vmem %s4473_s26, %s3070_s5  }
 0x1b7   : >> { %s4672_s27 = smov %s4679_s4  ;;  %2357 = sbr.rel (!%p2354_p12) target bundleno = 394 (0x18a), region = 118 }
 0x1be PF: > { %s4647_s6 = sand.u32 63, %s4677_s22   ;;  %s3209_s7 = sshll.u32 %s4479_s29, 8 }
 0x1bf   : > { %s2500_s8 = scalar_lea.vmem %s4279_s12, %s3209_s7 [#allocation2]   ;;  %s2502_s9 = scalar_lea.vmem %s4473_s26, %s3209_s7  }
 0x1c0   : > { %p3075_p13 = scmp.le.s32.totalorder %s4647_s6, 0 }
 0x1c1   : > { %s4042_s10 = smov (!%p3075_p13), %s2502_s9   ;;  %s4046_s11 = smov (!%p3075_p13), %s2500_s8  }
 0x1c2   : > { %2764 = sbr.rel (%p3075_p13) target bundleno = 467 (0x1d3), region = 123  ;;  %s4050_s14 = smov (!%p3075_p13), 0  }
 0x1c3   : > { %s4054_s17 = smov (!%p3075_p13), 0  }
 0x1c9 LB: >> { %v2512_v18 = vld [vmem:[%s4048_s11] sm:$0xf]  ;;  %s2514_s18 = sadd.s32 1, %s4052_s14  ;;  %s2506_s17 = sadd.s32 1, %s4056_s17   ;;  %s4056_s17 = sphi %s4054_s17, %s2506_s17   ;;  %s4052_s14 = sphi %s4050_s14, %s4051_s14   ;;  %s4048_s11 = sphi %s4046_s11, %s2519_s11   ;;  %s4044_s10 = sphi %s4042_s10, %s2520_s10  }
 0x1ca   : >> { %2513 = vst [vmem:[%s4044_s10] sm:$0xf] %v2512_v18  ;;  %p2515_p0 = scmp.ge.s32.totalorder %s2514_s18, %s4647_s6  ;;  %p2505_p1 = scmp.ge.s32.totalorder %s2506_s17, %s4647_s6 }
 0x1cc   : >> { %s4681_s18 = smov (%p2515_p0, %s2514_s18), 0  ;;  %2508 = sbr.rel (!%p2505_p1) target bundleno = 457 (0x1c9), region = 129 }
 0x1cd   : >> { %s3076_s12 = sshll.u32 %s4681_s18, 2  ;;  %s4051_s14 = smov %s4681_s18  }
 0x1ce   : >> { %s2519_s11 = scalar_lea.vmem %s2500_s8, %s3076_s12 [#allocation2]   ;;  %s2520_s10 = scalar_lea.vmem %s2502_s9, %s3076_s12  }
 0x1d3 PF: > { %p10_p2 = scmp.ge.s32.totalorder %s4094_s16, 8   ;;  %s4673_s12 = smov %s4020_s13 }
 0x1d4   : > { %s4674_s13 = smov %s4102_s19  ;;  %s4675_s14 = smov %s4094_s16 }
 0x1d5   :  { %12 = sbr.rel (!%p10_p2) target bundleno = 2 (0x2), region = 140 }

// kernel: smodel_forward.7
= control target key start
LH: loop header
LB: loop body
LE: loop exit
PB: predicated region body
PF: predicated region fallthrough
CT: control target
= control target key end

     0   :  { %s5701_s12 = smov 0   ;;  %s5703_s13 = smov 0   ;;  %s6882_s0 = inlined_call_operand.vmem [shape: bf16[1316,600], index: 0, kind: input, shape index: {}]   ;;  %s6883_s1 = inlined_call_operand.vmem [shape: bf16[600,128], index: 1, kind: input, shape index: {}]   ;;  %s6884_s2 = inlined_call_operand.vmem [shape: f32[1,128], index: 2, kind: input, shape index: {}]   ;;  %s6885_s3 = inlined_call_operand.vmem [shape: bf16[1316,128], index: 3, kind: output, shape index: {}]  }
   0x1   :  { %s5705_s14 = smov 0  }
   0x2 LB: > { %s5714_s15 = sadd.s32 4294967295, %s5646_s14   ;;  %s5716_s16 = sadd.s32 1, %s5646_s14   ;;  %s5646_s14 = sphi %s5705_s14, %s6966_s14   ;;  %s5642_s13 = sphi %s5703_s13, %s6965_s13   ;;  %s5638_s12 = sphi %s5701_s12, %s6964_s12  }
   0x3   : > { %s85_s17 = ssub.s32 %s5646_s14, %s5716_s16  ;;  %s88_s18 = sadd.s32 1, %s5642_s13 }
   0x4   : > { %p86_p0 = scmp.eq.s32.totalorder %s85_s17, 0  ;;  %p98_p1 = scmp.ne.s32.totalorder %s5642_s13, %s5638_s12 }
   0x5   : > { %p99_p2 = scmp.eq.s32.totalorder %s5714_s15, 1  ;;  %p4085_p3 = scmp.ge.s32.totalorder %s5646_s14, 1 }
   0x6   : > { %s5724_s19 = scalar_select %p86_p0, %s5642_s13, %s88_s18  }
   0x7   : > { %p5726_p4 = por %p99_p2, %p98_p1  ;;  %p149_p5 = scmp.lt.s32.totalorder %s5646_s14, 3 }
   0x9   : > { %p150_p6 = pnand %p4085_p3, %p149_p5 }
   0xb   : > { %153 = sbr.rel (%p150_p6) target bundleno = 813 (0x32d), region = 32 }
  0x12   : > { %v5261_v0 = vld [vmem:[%s6883_s1] sm:$0xff]   ;;  %v5680_v1 = vmov 0   ;;  %s5736_s23 = smul.u32 83, %s5714_s15  ;;  %v5262_v2 = vld [vmem:[%s6883_s1 + $0x8] sm:$0xff]   ;;  %v5263_v3 = vld [vmem:[%s6883_s1 + $0x10] sm:$0xff]   ;;  %vm1926_vm0 = vcmask 1043456  }
  0x13   : > { %1930 = vmatprep.subr.bf16.mxu0 %v5680_v1  ;;  %4951 = vmatprep.subr.bf16.mxu1 %v5680_v1  ;;  %v5264_v4 = vld [vmem:[%s6883_s1 + $0x18] sm:$0xff]   ;;  %v5265_v5 = vld [vmem:[%s6883_s1 + $0x20] sm:$0xff]   ;;  %v5266_v7 = vld [vmem:[%s6883_s1 + $0x28] sm:$0xff]   ;;  %vm1799_vm1 = vcmask 719872   ;;  %s4559_s5 = smul.u32 (%p5726_p4), 332, %s5714_s15 }
  0x14   : > { %1931 = vmatpush1.bf16.msra.mxu0 %v5261_v0  ;;  %4967 = vmatpush1.bf16.msra.mxu1 %v5261_v0  ;;  %p184_p7 = scmp.lt.s32.totalorder %s5736_s23, 164  ;;  %v5267_v9 = vld [vmem:[%s6883_s1 + $0x30] sm:$0xff]   ;;  %v5268_v10 = vld [vmem:[%s6883_s1 + $0x38] sm:$0xff]   ;;  %v5269_v11 = vld [vmem:[%s6883_s1 + $0x40] sm:$0xff]  }
  0x15   : > { %1932 = vmatprep.subr.bf16.mxu0 %v5680_v1  ;;  %4952 = vmatprep.subr.bf16.mxu1 %v5680_v1  ;;  %v5270_v12 = vld [vmem:[%s6883_s1 + $0x48] sm:$0xff]   ;;  %v5271_v13 = vld [vmem:[%s6883_s1 + $0x50] sm:$0xff]   ;;  %v5272_v14 = vld [vmem:[%s6883_s1 + $0x58] sm:$0xff]   ;;  %s6690_s8 = scalar_lea.vmem (%p5726_p4), %s6885_s3, %s4559_s5  }
  0x16   : > { %s185_s28 = scalar_select %p184_p7, %s5736_s23, 164  ;;  %v5273_v15 = vld [vmem:[%s6883_s1 + $0x60] sm:$0xff]   ;;  %v5274_v16 = vld [vmem:[%s6883_s1 + $0x68] sm:$0xff]   ;;  %v5275_v17 = vld [vmem:[%s6883_s1 + $0x70] sm:$0xff]  }
  0x17   : > { %v5276_v18 = vld [vmem:[%s6883_s1 + $0x78] sm:$0xff]   ;;  %v5289_v19 = vld [vmem:[%s6883_s1 + $0x100] sm:$0xff]   ;;  %v5329_v25 = vld [vmem:[%s6883_s1 + $0x108] sm:$0xff]  }
  0x18   : > { %1933 = vmatpush1.bf16.msra.mxu0 %v5262_v2  ;;  %4968 = vmatpush1.bf16.msra.mxu1 %v5262_v2  ;;  %s5171_s4 = smul.u32 20, %s185_s28  ;;  %v5283_v22 = vld [vmem:[%s6883_s1 + $0x80] sm:$0xff]   ;;  %v5288_v26 = vld [vmem:[%s6883_s1 + $0x88] sm:$0xff]   ;;  %v5292_v29 = vld [vmem:[%s6883_s1 + $0x90] sm:$0xff]  }
  0x19   : > { %1934 = vmatprep.subr.bf16.mxu0 %v5680_v1  ;;  %4953 = vmatprep.subr.bf16.mxu1 %v5680_v1  ;;  %v5367_v32 = vld [vmem:[%s6883_s1 + $0x110] sm:$0xff]   ;;  %v5299_v33 = vld [vmem:[%s6883_s1 + $0x98] sm:$0xff]   ;;  %v5304_v38 = vld [vmem:[%s6883_s1 + $0xa0] sm:$0xff]  }
  0x1a   : > { %s5761_s9 = scalar_lea.vmem %s6882_s0, %s5171_s4  ;;  %v5398_v39 = vld [vmem:[%s6883_s1 + $0x118] sm:$0xff]   ;;  %v5307_v40 = vld [vmem:[%s6883_s1 + $0xa8] sm:$0xff]   ;;  %v5314_v45 = vld [vmem:[%s6883_s1 + $0xb0] sm:$0xff]   ;;  %s3624_s4 = ssub.s32 (%p5726_p4), 165, %s5736_s23 }
  0x1b   : > { %v5279_v6 = vld [vmem:[%s5761_s9 + $0x4] ss:$20 sps:$4 sm:$0xff]   ;;  %v5282_v8 = vld [vmem:[%s5761_s9 + $0x1bc] ss:$20 sps:$4 sm:$0xff]   ;;  %v5277_v20 = vld [vmem:[%s5761_s9] ss:$20 sps:$4 sm:$0xff]  }
  0x1c   : > { %1935 = vmatpush1.bf16.msra.mxu0 %v5263_v3  ;;  %4969 = vmatpush1.bf16.msra.mxu1 %v5263_v3  ;;  %v5280_v21 = vld [vmem:[%s5761_s9 + $0x1b8] ss:$20 sps:$4 sm:$0xff]   ;;  %v5290_v27 = vld [vmem:[%s5761_s9 + $0x28] ss:$20 sps:$4 sm:$0xff]   ;;  %v5291_v28 = vld [vmem:[%s5761_s9 + $0x1e0] ss:$20 sps:$4 sm:$0xff]  }
  0x1d   : > { %1936 = vmatprep.subr.bf16.mxu0 %v5680_v1  ;;  %4954 = vmatprep.subr.bf16.mxu1 %v5680_v1  ;;  %v5284_v23 = vld [vmem:[%s5761_s9 + $0x2c] ss:$20 sps:$4 sm:$0xff]   ;;  %v5286_v24 = vld [vmem:[%s5761_s9 + $0x1e4] ss:$20 sps:$4 sm:$0xff]   ;;  %v5293_v30 = vld [vmem:[%s5761_s9 + $0x54] ss:$20 sps:$4 sm:$0xff]  }
  0x1e   : > { %1962 = vmatprep.mubr.bf16.mxu0 %v5279_v6  ;;  %2050 = vmatprep.mubr.bf16.mxu1 %v5282_v8  ;;  %v5295_v31 = vld [vmem:[%s5761_s9 + $0x20c] ss:$20 sps:$4 sm:$0xff]   ;;  %v5297_v34 = vld [vmem:[%s5761_s9 + $0x50] ss:$20 sps:$4 sm:$0xff]   ;;  %v5298_v35 = vld [vmem:[%s5761_s9 + $0x208] ss:$20 sps:$4 sm:$0xff]  }
  0x1f   : > { %v5300_v36 = vld [vmem:[%s5761_s9 + $0x7c] ss:$20 sps:$4 sm:$0xff]   ;;  %v5302_v37 = vld [vmem:[%s5761_s9 + $0x234] ss:$20 sps:$4 sm:$0xff]   ;;  %v5305_v41 = vld [vmem:[%s5761_s9 + $0x78] ss:$20 sps:$4 sm:$0xff]  }
  0x20   : > { %1937 = vmatpush1.bf16.msra.mxu0 %v5264_v4  ;;  %4970 = vmatpush1.bf16.msra.mxu1 %v5264_v4  ;;  %v5306_v42 = vld [vmem:[%s5761_s9 + $0x230] ss:$20 sps:$4 sm:$0xff]   ;;  %v5312_v46 = vld [vmem:[%s5761_s9 + $0xa0] ss:$20 sps:$4 sm:$0xff]   ;;  %v5313_v47 = vld [vmem:[%s5761_s9 + $0x258] ss:$20 sps:$4 sm:$0xff]  }
  0x21   : > { %1938 = vmatprep.subr.bf16.mxu0 %v5680_v1  ;;  %4955 = vmatprep.subr.bf16.mxu1 %v5680_v1  ;;  %v5308_v43 = vld [vmem:[%s5761_s9 + $0xa4] ss:$20 sps:$4 sm:$0xff]   ;;  %v5310_v44 = vld [vmem:[%s5761_s9 + $0x25c] ss:$20 sps:$4 sm:$0xff]   ;;  %v5315_v49 = vld [vmem:[%s5761_s9 + $0xcc] ss:$20 sps:$4 sm:$0xff]  }
  0x22   : > { %v5321_v48 = vld [vmem:[%s6883_s1 + $0xb8] sm:$0xff]   ;;  %v5322_v51 = vld [vmem:[%s6883_s1 + $0xc0] sm:$0xff]   ;;  %v5330_v52 = vld [vmem:[%s6883_s1 + $0xc8] sm:$0xff]   ;;  %p3625_p8 = scmp.lt.s32.totalorder (%p5726_p4), %s3624_s4, 83 }
  0x23   : > { %v5317_v50 = vld [vmem:[%s5761_s9 + $0x284] ss:$20 sps:$4 sm:$0xff]   ;;  %v5319_v53 = vld [vmem:[%s5761_s9 + $0xc8] ss:$20 sps:$4 sm:$0xff]   ;;  %v5320_v54 = vld [vmem:[%s5761_s9 + $0x280] ss:$20 sps:$4 sm:$0xff]  }
  0x24   : > { %1939 = vmatpush1.bf16.msra.mxu0 %v5265_v5  ;;  %4971 = vmatpush1.bf16.msra.mxu1 %v5265_v5  ;;  %v5323_v55 = vld [vmem:[%s5761_s9 + $0xf4] ss:$20 sps:$4 sm:$0xff]   ;;  %v5325_v56 = vld [vmem:[%s5761_s9 + $0x2ac] ss:$20 sps:$4 sm:$0xff]   ;;  %v5338_v59 = vld [vmem:[%s6883_s1 + $0xd8] sm:$0xff]  }
  0x25   : > { %1940 = vmatprep.subr.bf16.mxu0 %v5680_v1  ;;  %4956 = vmatprep.subr.bf16.mxu1 %v5680_v1  ;;  %v5337_v57 = vld [vmem:[%s6883_s1 + $0xd0] sm:$0xff]   ;;  %v5429_v58 = vld [vmem:[%s6883_s1 + $0x120] sm:$0xff]   ;;  %v5328_v61 = vld [vmem:[%s5761_s9 + $0x2a8] ss:$20 sps:$4 sm:$0xff]  }
  0x26   : > { %v5327_v60 = vld [vmem:[%s5761_s9 + $0xf0] ss:$20 sps:$4 sm:$0xff]   ;;  %v5333_v63 = vld [vmem:[%s5761_s9 + $0x2d4] ss:$20 sps:$4 sm:$0xff]   ;;  %v5335_v3 = vld [vmem:[%s5761_s9 + $0x118] ss:$20 sps:$4 sm:$0xff]  }
  0x27   : > { %v5331_v62 = vld [vmem:[%s5761_s9 + $0x11c] ss:$20 sps:$4 sm:$0xff]   ;;  %v5345_v0 = vld [vmem:[%s6883_s1 + $0xe0] sm:$0xff]   ;;  %v5352_v2 = vld [vmem:[%s6883_s1 + $0xe8] sm:$0xff]  }
  0x28   : > { %1941 = vmatpush1.bf16.msra.mxu0 %v5266_v7  ;;  %4972 = vmatpush1.bf16.msra.mxu1 %v5266_v7  ;;  %v5336_v4 = vld [vmem:[%s5761_s9 + $0x2d0] ss:$20 sps:$4 sm:$0xff]   ;;  %v5360_v8 = vld [vmem:[%s6883_s1 + $0xf8] sm:$0xff]  }
  0x29   : > { %1942 = vmatprep.subr.bf16.mxu0 %v5680_v1  ;;  %4957 = vmatprep.subr.bf16.mxu1 %v5680_v1  ;;  %v5339_v5 = vld [vmem:[%s5761_s9 + $0x144] ss:$20 sps:$4 sm:$0xff]   ;;  %v5341_v6 = vld [vmem:[%s5761_s9 + $0x2fc] ss:$20 sps:$4 sm:$0xff]  }
  0x2a   : > { %v5353_v7 = vld [vmem:[%s6883_s1 + $0xf0] sm:$0xff]  }
  0x2c   : > { %1943 = vmatpush1.bf16.msra.mxu0 %v5267_v9  ;;  %4973 = vmatpush1.bf16.msra.mxu1 %v5267_v9  ;;  %v5343_v9 = vld [vmem:[%s5761_s9 + $0x140] ss:$20 sps:$4 sm:$0xff]  }
  0x2d   : > { %1944 = vmatprep.subr.bf16.mxu0 %v5680_v1  ;;  %4958 = vmatprep.subr.bf16.mxu1 %v5680_v1 }
  0x30   : > { %1945 = vmatpush1.bf16.msra.mxu0 %v5268_v10  ;;  %4974 = vmatpush1.bf16.msra.mxu1 %v5268_v10  ;;  %v5344_v10 = vld [vmem:[%s5761_s9 + $0x2f8] ss:$20 sps:$4 sm:$0xff]  }
  0x31   : > { %1946 = vmatprep.subr.bf16.mxu0 %v5680_v1  ;;  %4959 = vmatprep.subr.bf16.mxu1 %v5680_v1 }
  0x34   : > { %1947 = vmatpush1.bf16.msra.mxu0 %v5269_v11  ;;  %4975 = vmatpush1.bf16.msra.mxu1 %v5269_v11  ;;  %v5346_v11 = vld [vmem:[%s5761_s9 + $0x16c] ss:$20 sps:$4 sm:$0xff]  }
  0x35   : > { %1948 = vmatprep.subr.bf16.mxu0 %v5680_v1  ;;  %4960 = vmatprep.subr.bf16.mxu1 %v5680_v1 }
  0x38   : > { %1949 = vmatpush1.bf16.msra.mxu0 %v5270_v12  ;;  %4976 = vmatpush1.bf16.msra.mxu1 %v5270_v12  ;;  %v5348_v12 = vld [vmem:[%s5761_s9 + $0x324] ss:$20 sps:$4 sm:$0xff]  }
  0x39   : > { %1950 = vmatprep.subr.bf16.mxu0 %v5680_v1  ;;  %4961 = vmatprep.subr.bf16.mxu1 %v5680_v1 }
  0x3c   : > { %1951 = vmatpush1.bf16.msra.mxu0 %v5271_v13  ;;  %4977 = vmatpush1.bf16.msra.mxu1 %v5271_v13  ;;  %v5350_v13 = vld [vmem:[%s5761_s9 + $0x168] ss:$20 sps:$4 sm:$0xff]  }
  0x3d   : > { %1952 = vmatprep.subr.bf16.mxu0 %v5680_v1  ;;  %4962 = vmatprep.subr.bf16.mxu1 %v5680_v1 }
  0x40   : > { %1953 = vmatpush1.bf16.msra.mxu0 %v5272_v14  ;;  %4978 = vmatpush1.bf16.msra.mxu1 %v5272_v14  ;;  %v5351_v14 = vld [vmem:[%s5761_s9 + $0x320] ss:$20 sps:$4 sm:$0xff]  }
  0x41   : > { %1954 = vmatprep.subr.bf16.mxu0 %v5680_v1  ;;  %4963 = vmatprep.subr.bf16.mxu1 %v5680_v1 }
  0x44   : > { %1955 = vmatpush1.bf16.msra.mxu0 %v5273_v15  ;;  %4979 = vmatpush1.bf16.msra.mxu1 %v5273_v15  ;;  %v5354_v15 = vld [vmem:[%s5761_s9 + $0x194] ss:$20 sps:$4 sm:$0xff]  }
  0x45   : > { %1956 = vmatprep.subr.bf16.mxu0 %v5680_v1  ;;  %4964 = vmatprep.subr.bf16.mxu1 %v5680_v1 }
  0x48   : > { %1957 = vmatpush1.bf16.msra.mxu0 %v5274_v16  ;;  %4980 = vmatpush1.bf16.msra.mxu1 %v5274_v16  ;;  %v5356_v16 = vld [vmem:[%s5761_s9 + $0x34c] ss:$20 sps:$4 sm:$0xff]  }
  0x49   : > { %1958 = vmatprep.subr.bf16.mxu0 %v5680_v1  ;;  %4965 = vmatprep.subr.bf16.mxu1 %v5680_v1 }
  0x4c   : > { %1959 = vmatpush1.bf16.msra.mxu0 %v5275_v17  ;;  %4981 = vmatpush1.bf16.msra.mxu1 %v5275_v17  ;;  %v5358_v17 = vld [vmem:[%s5761_s9 + $0x190] ss:$20 sps:$4 sm:$0xff]  }
  0x4d   : > { %1960 = vmatprep.subr.bf16.mxu0 %v5680_v1  ;;  %4966 = vmatprep.subr.bf16.mxu1 %v5680_v1 }
  0x50   : > { %1961 = vmatpush1.bf16.msra.mxu0 %v5276_v18  ;;  %4982 = vmatpush1.bf16.msra.mxu1 %v5276_v18  ;;  %v5361_v18 = vld [vmem:[%s5761_s9 + $0x374] ss:$20 sps:$4 sm:$0xff]  }
  0x51   : > { %2298 = vmatprep.subr.bf16.mxu0 %v5680_v1  ;;  %4855 = vmatprep.subr.bf16.mxu1 %v5289_v19 }
  0x53   : > { %1963 = vmatmul.mubr.bf16.vlgmr.msra.gmra.mrb[0].mxu0 %v5277_v20  ;;  %2051 = vmatmul.mubr.bf16.vlgmr.msra.gmra.mrb[0].mxu1 %v5280_v21  ;;  %v5460_v20 = vld [vmem:[%s6883_s1 + $0x128] ss:$0 sps:$4 sm:$0xff]  }
  0x54   : > { %2299 = vmatpush1.bf16.msra.mxu0 %v5283_v22  ;;  %1970 = vmatprep.mubr.bf16.mxu0 %v5284_v23  ;;  %v5363_v21 = vld [vmem:[%s5761_s9 + $0x8] ss:$20 sps:$4 sm:$0xff]   ;;  %v5366_v22 = vld [vmem:[%s5761_s9 + $0x370] ss:$20 sps:$4 sm:$0xff]   ;;  %v1928_v23 = vsel %vm1926_vm0, %v5460_v20, 0 }
  0x55   : > { %2300 = vmatprep.subr.bf16.mxu0 %v5680_v1  ;;  %2058 = vmatprep.mubr.bf16.mxu1 %v5286_v24  ;;  %v5368_v24 = vld [vmem:[%s5761_s9 + $0x39c] ss:$20 sps:$4 sm:$0xff]  }
  0x56   : > { %4856 = vmatpush3.bf16.msra.mxu1 %v5289_v19  ;;  %v5365_v19 = vld [vmem:[%s5761_s9 + $0xc] ss:$20 sps:$4 sm:$0xff]  }
  0x57   : > { %4857 = vmatprep.subr.bf16.mxu1 %v5329_v25 }
  0x58   : > { %2301 = vmatpush1.bf16.msra.mxu0 %v5288_v26  ;;  %v5372_v26 = vld [vmem:[%s5761_s9 + $0x398] ss:$20 sps:$4 sm:$0xff]  }
  0x59   : > { %2302 = vmatprep.subr.bf16.mxu0 %v5680_v1 }
  0x5a   : > { %4858 = vmatpush3.bf16.msra.mxu1 %v5329_v25  ;;  %v5370_v25 = vld [vmem:[%s5761_s9 + $0x34] ss:$20 sps:$4 sm:$0xff]  }
  0x5b   : > { %1971 = vmatmul.mubr.bf16.gmra.mrb[4].mxu0 %v5290_v27  ;;  %2059 = vmatmul.mubr.bf16.gmra.mrb[4].mxu1 %v5291_v28  ;;  %v5373_v27 = vld [vmem:[%s5761_s9 + $0x30] ss:$20 sps:$4 sm:$0xff]  }
  0x5c   : > { %2303 = vmatpush1.bf16.msra.mxu0 %v5292_v29  ;;  %1978 = vmatprep.mubr.bf16.mxu0 %v5293_v30  ;;  %v5374_v28 = vld [vmem:[%s5761_s9 + $0x3c4] ss:$20 sps:$4 sm:$0xff]   ;;  %v5376_v29 = vld [vmem:[%s5761_s9 + $0x5c] ss:$20 sps:$4 sm:$0xff]   ;;  %v5378_v30 = vld [vmem:[%s5761_s9 + $0x3c0] ss:$20 sps:$4 sm:$0xff]  }
  0x5d   : > { %2066 = vmatprep.mubr.bf16.mxu1 %v5295_v31  ;;  %2304 = vmatprep.subr.bf16.mxu0 %v5680_v1  ;;  %v5379_v31 = vld [vmem:[%s5761_s9 + $0x58] ss:$20 sps:$4 sm:$0xff]  }
  0x5e   : > { %4859 = vmatprep.subr.bf16.mxu1 %v5367_v32 }
  0x5f   : > { %4860 = vmatpush3.bf16.msra.mxu1 %v5367_v32  ;;  %v5380_v32 = vld [vmem:[%s5761_s9 + $0x3ec] ss:$20 sps:$4 sm:$0xff]  }
  0x60   : > { %2305 = vmatpush1.bf16.msra.mxu0 %v5299_v33  ;;  %4861 = vmatprep.subr.bf16.mxu1 %v5398_v39  ;;  %v5382_v33 = vld [vmem:[%s5761_s9 + $0x84] ss:$20 sps:$4 sm:$0xff]  }
  0x61   : > { %2306 = vmatprep.subr.bf16.mxu0 %v5680_v1 }
  0x63   : > { %1979 = vmatmul.mubr.bf16.gmra.mrb[8].mxu0 %v5297_v34  ;;  %2067 = vmatmul.mubr.bf16.gmra.mrb[8].mxu1 %v5298_v35  ;;  %v5384_v34 = vld [vmem:[%s5761_s9 + $0x3e8] ss:$20 sps:$4 sm:$0xff]   ;;  %v5385_v35 = vld [vmem:[%s5761_s9 + $0x80] ss:$20 sps:$4 sm:$0xff]  }
  0x64   : > { %1986 = vmatprep.mubr.bf16.mxu0 %v5300_v36  ;;  %2074 = vmatprep.mubr.bf16.mxu1 %v5302_v37  ;;  %v5386_v36 = vld [vmem:[%s5761_s9 + $0x414] ss:$20 sps:$4 sm:$0xff]   ;;  %v5388_v37 = vld [vmem:[%s5761_s9 + $0xac] ss:$20 sps:$4 sm:$0xff]  }
  0x65   : > { %2307 = vmatpush1.bf16.msra.mxu0 %v5304_v38  ;;  %4862 = vmatpush3.bf16.msra.mxu1 %v5398_v39  ;;  %v5390_v38 = vld [vmem:[%s5761_s9 + $0x410] ss:$20 sps:$4 sm:$0xff]   ;;  %v5391_v39 = vld [vmem:[%s5761_s9 + $0xa8] ss:$20 sps:$4 sm:$0xff]  }
  0x66   : > { %2308 = vmatprep.subr.bf16.mxu0 %v5680_v1  ;;  %4863 = vmatprep.subr.bf16.mxu1 %v5429_v58 }
  0x69   : > { %2309 = vmatpush1.bf16.msra.mxu0 %v5307_v40  ;;  %4864 = vmatpush3.bf16.msra.mxu1 %v5429_v58  ;;  %v5392_v40 = vld [vmem:[%s5761_s9 + $0x43c] ss:$20 sps:$4 sm:$0xff]   ;;  %v5421_v58 = vld [vmem:[%s5761_s9 + $0x4d8] ss:$20 sps:$4 sm:$0xff]  }
  0x6a   : > { %2310 = vmatprep.subr.bf16.mxu0 %v5680_v1  ;;  %5169 = vmatprep.subr.msk.bf16.mxu1 %vm1926_vm0, %v5460_v20  ;;  %v5461_v20 = vld [vmem:[%s5761_s9 + $0x5f4] ss:$20 sps:$4 sm:$0xff]  }
  0x6b   : > { %1987 = vmatmul.mubr.bf16.gmra.mrb[12].mxu0 %v5305_v41  ;;  %2075 = vmatmul.mubr.bf16.gmra.mrb[12].mxu1 %v5306_v42  ;;  %v5394_v41 = vld [vmem:[%s5761_s9 + $0xd4] ss:$20 sps:$4 sm:$0xff]   ;;  %v5396_v42 = vld [vmem:[%s5761_s9 + $0x438] ss:$20 sps:$4 sm:$0xff]  }
  0x6c   : > { %1994 = vmatprep.mubr.bf16.mxu0 %v5308_v43  ;;  %2082 = vmatprep.mubr.bf16.mxu1 %v5310_v44  ;;  %v5397_v43 = vld [vmem:[%s5761_s9 + $0xd0] ss:$20 sps:$4 sm:$0xff]  }
  0x6d   : > { %2311 = vmatpush1.bf16.msra.mxu0 %v5314_v45  ;;  %4866 = vmatpush3.bf16.msra.mxu1 %v1928_v23  ;;  %v5399_v44 = vld [vmem:[%s5761_s9 + $0x464] ss:$20 sps:$4 sm:$0xff]   ;;  %v5401_v45 = vld [vmem:[%s5761_s9 + $0xfc] ss:$20 sps:$4 sm:$0xff]  }
  0x6e   : > { %2312 = vmatprep.subr.bf16.mxu0 %v5680_v1  ;;  %v5465_v23 = vld [vmem:[%s5761_s9 + $0x5f0] ss:$20 sps:$4 sm:$0xff]  }
  0x71   : > { %2313 = vmatpush1.bf16.msra.mxu0 %v5321_v48  ;;  %v5405_v48 = vld [vmem:[%s5761_s9 + $0x48c] ss:$20 sps:$4 sm:$0xff]  }
  0x72   : > { %2314 = vmatprep.subr.bf16.mxu0 %v5680_v1 }
  0x73   : > { %1995 = vmatmul.mubr.bf16.gmra.mrb[16].mxu0 %v5312_v46  ;;  %2083 = vmatmul.mubr.bf16.gmra.mrb[16].mxu1 %v5313_v47  ;;  %v5403_v46 = vld [vmem:[%s5761_s9 + $0x460] ss:$20 sps:$4 sm:$0xff]   ;;  %v5404_v47 = vld [vmem:[%s5761_s9 + $0xf8] ss:$20 sps:$4 sm:$0xff]  }
  0x74   : > { %2002 = vmatprep.mubr.bf16.mxu0 %v5315_v49  ;;  %2090 = vmatprep.mubr.bf16.mxu1 %v5317_v50  ;;  %v5407_v49 = vld [vmem:[%s5761_s9 + $0x124] ss:$20 sps:$4 sm:$0xff]   ;;  %v5409_v50 = vld [vmem:[%s5761_s9 + $0x488] ss:$20 sps:$4 sm:$0xff]  }
  0x75   : > { %2315 = vmatpush1.bf16.msra.mxu0 %v5322_v51  ;;  %v5410_v51 = vld [vmem:[%s5761_s9 + $0x120] ss:$20 sps:$4 sm:$0xff]  }
  0x76   : > { %2316 = vmatprep.subr.bf16.mxu0 %v5680_v1 }
  0x79   : > { %2317 = vmatpush1.bf16.msra.mxu0 %v5330_v52  ;;  %v5411_v52 = vld [vmem:[%s5761_s9 + $0x4b4] ss:$20 sps:$4 sm:$0xff]  }
  0x7a   : > { %2318 = vmatprep.subr.bf16.mxu0 %v5680_v1 }
  0x7b   : > { %2003 = vmatmul.mubr.bf16.gmra.mrb[20].mxu0 %v5319_v53  ;;  %2091 = vmatmul.mubr.bf16.gmra.mrb[20].mxu1 %v5320_v54  ;;  %v5413_v53 = vld [vmem:[%s5761_s9 + $0x14c] ss:$20 sps:$4 sm:$0xff]   ;;  %v5415_v54 = vld [vmem:[%s5761_s9 + $0x4b0] ss:$20 sps:$4 sm:$0xff]  }
  0x7c   : > { %2010 = vmatprep.mubr.bf16.mxu0 %v5323_v55  ;;  %2098 = vmatprep.mubr.bf16.mxu1 %v5325_v56  ;;  %v5416_v55 = vld [vmem:[%s5761_s9 + $0x148] ss:$20 sps:$4 sm:$0xff]  }
  0x7d   : > { %2319 = vmatpush1.bf16.msra.mxu0 %v5337_v57  ;;  %v5417_v56 = vld [vmem:[%s5761_s9 + $0x4dc] ss:$20 sps:$4 sm:$0xff]   ;;  %v5419_v57 = vld [vmem:[%s5761_s9 + $0x174] ss:$20 sps:$4 sm:$0xff]  }
  0x7e   : > { %2320 = vmatprep.subr.bf16.mxu0 %v5680_v1 }
  0x81   : > { %2321 = vmatpush1.bf16.msra.mxu0 %v5338_v59  ;;  %v5422_v59 = vld [vmem:[%s5761_s9 + $0x170] ss:$20 sps:$4 sm:$0xff]  }
  0x82   : > { %2322 = vmatprep.subr.bf16.mxu0 %v5680_v1 }
  0x83   : > { %2011 = vmatmul.mubr.bf16.gmra.mrb[24].mxu0 %v5327_v60  ;;  %2099 = vmatmul.mubr.bf16.gmra.mrb[24].mxu1 %v5328_v61  ;;  %v5423_v60 = vld [vmem:[%s5761_s9 + $0x504] ss:$20 sps:$4 sm:$0xff]   ;;  %v5425_v61 = vld [vmem:[%s5761_s9 + $0x19c] ss:$20 sps:$4 sm:$0xff]  }
  0x84   : > { %2018 = vmatprep.mubr.bf16.mxu0 %v5331_v62  ;;  %2106 = vmatprep.mubr.bf16.mxu1 %v5333_v63  ;;  %v5427_v62 = vld [vmem:[%s5761_s9 + $0x500] ss:$20 sps:$4 sm:$0xff]   ;;  %v5428_v63 = vld [vmem:[%s5761_s9 + $0x198] ss:$20 sps:$4 sm:$0xff]  }
  0x85   : > { %2323 = vmatpush1.bf16.msra.mxu0 %v5345_v0  ;;  %v5430_v0 = vld [vmem:[%s5761_s9 + $0x52c] ss:$20 sps:$4 sm:$0xff]  }
  0x86   : > { %2324 = vmatprep.subr.bf16.mxu0 %v5680_v1 }
  0x89   : > { %2325 = vmatpush1.bf16.msra.mxu0 %v5352_v2  ;;  %v5432_v2 = vld [vmem:[%s5761_s9 + $0x1c4] ss:$20 sps:$4 sm:$0xff]  }
  0x8a   : > { %2326 = vmatprep.subr.bf16.mxu0 %v5680_v1 }
  0x8b   : > { %2019 = vmatmul.mubr.bf16.gmra.mrb[28].mxu0 %v5335_v3  ;;  %2107 = vmatmul.mubr.bf16.gmra.mrb[28].mxu1 %v5336_v4  ;;  %v5434_v3 = vld [vmem:[%s5761_s9 + $0x528] ss:$20 sps:$4 sm:$0xff]   ;;  %v5435_v4 = vld [vmem:[%s5761_s9 + $0x1c0] ss:$20 sps:$4 sm:$0xff]  }
  0x8c   : > { %2026 = vmatprep.mubr.bf16.mxu0 %v5339_v5  ;;  %2114 = vmatprep.mubr.bf16.mxu1 %v5341_v6  ;;  %v5436_v5 = vld [vmem:[%s5761_s9 + $0x554] ss:$20 sps:$4 sm:$0xff]   ;;  %v5438_v6 = vld [vmem:[%s5761_s9 + $0x1ec] ss:$20 sps:$4 sm:$0xff]  }
  0x8d   : > { %2327 = vmatpush1.bf16.msra.mxu0 %v5353_v7  ;;  %v5440_v7 = vld [vmem:[%s5761_s9 + $0x550] ss:$20 sps:$4 sm:$0xff]  }
  0x8e   : > { %2328 = vmatprep.subr.bf16.mxu0 %v5680_v1  ;;  %v5359_v1 = vld [vmem:[%s5761_s9 + $0x348] ss:$20 sps:$4 sm:$0xff]  }
  0x91   : > { %2329 = vmatpush1.bf16.msra.mxu0 %v5360_v8  ;;  %v5441_v8 = vld [vmem:[%s5761_s9 + $0x1e8] ss:$20 sps:$4 sm:$0xff]  }
  0x93   : > { %2027 = vmatmul.mubr.bf16.gmra.mrb[32].mxu0 %v5343_v9  ;;  %2115 = vmatmul.mubr.bf16.gmra.mrb[32].mxu1 %v5344_v10  ;;  %v5442_v9 = vld [vmem:[%s5761_s9 + $0x57c] ss:$20 sps:$4 sm:$0xff]   ;;  %v5444_v10 = vld [vmem:[%s5761_s9 + $0x214] ss:$20 sps:$4 sm:$0xff]  }
  0x94   : > { %2034 = vmatprep.mubr.bf16.mxu0 %v5346_v11  ;;  %2122 = vmatprep.mubr.bf16.mxu1 %v5348_v12  ;;  %v5446_v11 = vld [vmem:[%s5761_s9 + $0x578] ss:$20 sps:$4 sm:$0xff]   ;;  %v5447_v12 = vld [vmem:[%s5761_s9 + $0x210] ss:$20 sps:$4 sm:$0xff]  }
  0x9b   : > { %2035 = vmatmul.mubr.bf16.gmra.mrb[36].mxu0 %v5350_v13  ;;  %2123 = vmatmul.mubr.bf16.gmra.mrb[36].mxu1 %v5351_v14  ;;  %v5448_v13 = vld [vmem:[%s5761_s9 + $0x5a4] ss:$20 sps:$4 sm:$0xff]   ;;  %v5450_v14 = vld [vmem:[%s5761_s9 + $0x23c] ss:$20 sps:$4 sm:$0xff]  }
  0x9c   : > { %2042 = vmatprep.mubr.bf16.mxu0 %v5354_v15  ;;  %2130 = vmatprep.mubr.bf16.mxu1 %v5356_v16  ;;  %v5452_v15 = vld [vmem:[%s5761_s9 + $0x5a0] ss:$20 sps:$4 sm:$0xff]   ;;  %v5453_v16 = vld [vmem:[%s5761_s9 + $0x238] ss:$20 sps:$4 sm:$0xff]  }
  0xa3   : > { %2043 = vmatmul.mubr.bf16.gmra.mrb[40].mxu0 %v5358_v17  ;;  %2131 = vmatmul.mubr.bf16.gmra.mrb[40].mxu1 %v5359_v1  ;;  %v5454_v17 = vld [vmem:[%s5761_s9 + $0x5cc] ss:$20 sps:$4 sm:$0xff]   ;;  %v5456_v1 = vld [vmem:[%s5761_s9 + $0x264] ss:$20 sps:$4 sm:$0xff]  }
  0xa4   : > { %2138 = vmatprep.mubr.bf16.mxu1 %v5361_v18  ;;  %2330 = vmatprep.mubr.bf16.mxu0 %v5365_v19  ;;  %v5458_v18 = vld [vmem:[%s5761_s9 + $0x5c8] ss:$20 sps:$4 sm:$0xff]   ;;  %v5459_v19 = vld [vmem:[%s5761_s9 + $0x260] ss:$20 sps:$4 sm:$0xff]  }
  0xab   : > { %2139 = vmatmul.mubr.bf16.gmra.mrb[44].mxu1 %v5366_v22  ;;  %2331 = vmatmul.mubr.bf16.vlgmr.msra.gmra.mrb[0].mxu0 %v5363_v21  ;;  %v5463_v21 = vld [vmem:[%s5761_s9 + $0x28c] ss:$20 sps:$4 sm:$0xff]  }
  0xac   : > { %2146 = vmatprep.mubr.bf16.mxu1 %v5368_v24  ;;  %2338 = vmatprep.mubr.bf16.mxu0 %v5370_v25  ;;  %v5466_v24 = vld [vmem:[%s5761_s9 + $0x288] ss:$20 sps:$4 sm:$0xff]  }
  0xb3   : > { %2147 = vmatmul.mubr.bf16.gmra.mrb[48].mxu1 %v5372_v26  ;;  %2339 = vmatmul.mubr.bf16.gmra.mrb[4].mxu0 %v5373_v27  ;;  %v5467_v27 = vld [vmem:[%s5761_s9 + $0x61c] ss:$20 sps:$4 sm:$0xff]  }
  0xb4   : > { %2154 = vmatprep.mubr.bf16.mxu1 %v5374_v28  ;;  %2346 = vmatprep.mubr.bf16.mxu0 %v5376_v29  ;;  %v5469_v28 = vld [vmem:[%s5761_s9 + $0x2b4] ss:$20 sps:$4 sm:$0xff]  }
  0xbb   : > { %2155 = vmatmul.mubr.bf16.gmra.mrb[52].mxu1 %v5378_v30  ;;  %2347 = vmatmul.mubr.bf16.gmra.mrb[8].mxu0 %v5379_v31  ;;  %v5471_v31 = vld [vmem:[%s5761_s9 + $0x618] ss:$20 sps:$4 sm:$0xff]  }
  0xbc   : > { %2162 = vmatprep.mubr.bf16.mxu1 %v5380_v32  ;;  %2354 = vmatprep.mubr.bf16.mxu0 %v5382_v33  ;;  %v5472_v32 = vld [vmem:[%s5761_s9 + $0x2b0] ss:$20 sps:$4 sm:$0xff]  }
  0xc3   : > { %2163 = vmatmul.mubr.bf16.gmra.mrb[56].mxu1 %v5384_v34  ;;  %2355 = vmatmul.mubr.bf16.gmra.mrb[12].mxu0 %v5385_v35  ;;  %v5473_v35 = vld [vmem:[%s5761_s9 + $0x644] ss:$20 sps:$4 sm:$0xff]  }
  0xc4   : > { %2170 = vmatprep.mubr.bf16.mxu1 %v5386_v36  ;;  %2362 = vmatprep.mubr.bf16.mxu0 %v5388_v37  ;;  %v5475_v36 = vld [vmem:[%s5761_s9 + $0x2dc] ss:$20 sps:$4 sm:$0xff]  }
  0xcb   : > { %2171 = vmatmul.mubr.bf16.gmra.mrb[60].mxu1 %v5390_v38  ;;  %2363 = vmatmul.mubr.bf16.gmra.mrb[16].mxu0 %v5391_v39  ;;  %v447_v38 = vld [vmem:[%s5761_s9 + $0x668] sm:$0xff] }
  0xcc   : > { %2178 = vmatprep.mubr.bf16.mxu1 %v5392_v40  ;;  %2370 = vmatprep.mubr.bf16.mxu0 %v5394_v41  ;;  %v5477_v40 = vld [vmem:[%s5761_s9 + $0x640] ss:$20 sps:$4 sm:$0xff]   ;;  %v5478_v41 = vld [vmem:[%s5761_s9 + $0x2d8] ss:$20 sps:$4 sm:$0xff]  }
  0xd3   : > { %2179 = vmatmul.mubr.bf16.gmra.mrb[64].mxu1 %v5396_v42  ;;  %2371 = vmatmul.mubr.bf16.gmra.mrb[20].mxu0 %v5397_v43 }
  0xd4   : > { %2186 = vmatprep.mubr.bf16.mxu1 %v5399_v44  ;;  %2378 = vmatprep.mubr.bf16.mxu0 %v5401_v45  ;;  %v4294_v44 = vcombine.high %v447_v38, %v447_v38  ;;  %v5480_v45 = vld [vmem:[%s5761_s9 + $0x304] ss:$20 sps:$4 sm:$0xff]  }
  0xdb   : > { %2187 = vmatmul.mubr.bf16.gmra.mrb[68].mxu1 %v5403_v46  ;;  %2379 = vmatmul.mubr.bf16.gmra.mrb[24].mxu0 %v5404_v47 }
  0xdc   : > { %2194 = vmatprep.mubr.bf16.mxu1 %v5405_v48  ;;  %2386 = vmatprep.mubr.bf16.mxu0 %v5407_v49  ;;  %v4293_v48 = vcombine.low %v447_v38, %v447_v38  ;;  %v5483_v49 = vld [vmem:[%s5761_s9 + $0x300] ss:$20 sps:$4 sm:$0xff]  }
  0xe3   : > { %2195 = vmatmul.mubr.bf16.gmra.mrb[72].mxu1 %v5409_v50  ;;  %2387 = vmatmul.mubr.bf16.gmra.mrb[28].mxu0 %v5410_v51 }
  0xe4   : > { %2202 = vmatprep.mubr.bf16.mxu1 %v5411_v52  ;;  %2394 = vmatprep.mubr.bf16.mxu0 %v5413_v53  ;;  %v5484_v52 = vld [vmem:[%s5761_s9 + $0x32c] ss:$20 sps:$4 sm:$0xff]   ;;  %v5486_v53 = vld [vmem:[%s5761_s9 + $0x10] ss:$20 sps:$4 sm:$0xff]  }
  0xeb   : > { %2203 = vmatmul.mubr.bf16.gmra.mrb[76].mxu1 %v5415_v54  ;;  %2395 = vmatmul.mubr.bf16.gmra.mrb[32].mxu0 %v5416_v55 }
  0xec   : > { %2210 = vmatprep.mubr.bf16.mxu1 %v5417_v56  ;;  %2402 = vmatprep.mubr.bf16.mxu0 %v5419_v57  ;;  %v5487_v56 = vld [vmem:[%s5761_s9 + $0x328] ss:$20 sps:$4 sm:$0xff]   ;;  %v5488_v57 = vld [vmem:[%s5761_s9 + $0x38] ss:$20 sps:$4 sm:$0xff]  }
  0xf3   : > { %2211 = vmatmul.mubr.bf16.gmra.mrb[80].mxu1 %v5421_v58  ;;  %2403 = vmatmul.mubr.bf16.gmra.mrb[36].mxu0 %v5422_v59 }
  0xf4   : > { %2218 = vmatprep.mubr.bf16.mxu1 %v5423_v60  ;;  %2410 = vmatprep.mubr.bf16.mxu0 %v5425_v61  ;;  %v5489_v60 = vld [vmem:[%s5761_s9 + $0x354] ss:$20 sps:$4 sm:$0xff]  }
  0xf5   : > { %v5491_v61 = vld [vmem:[%s5761_s9 + $0x60] ss:$20 sps:$4 sm:$0xff]  }
  0xfb   : > { %2219 = vmatmul.mubr.bf16.gmra.mrb[84].mxu1 %v5427_v62  ;;  %2411 = vmatmul.mubr.bf16.gmra.mrb[40].mxu0 %v5428_v63 }
  0xfc   : > { %2226 = vmatprep.mubr.bf16.mxu1 %v5430_v0  ;;  %2418 = vmatprep.mubr.bf16.mxu0 %v5432_v2  ;;  %v5492_v0 = vld [vmem:[%s5761_s9 + $0x350] ss:$20 sps:$4 sm:$0xff]   ;;  %v5493_v2 = vld [vmem:[%s5761_s9 + $0x88] ss:$20 sps:$4 sm:$0xff]  }
 0x103   : > { %2227 = vmatmul.mubr.bf16.gmra.mrb[88].mxu1 %v5434_v3  ;;  %2419 = vmatmul.mubr.bf16.gmra.mrb[44].mxu0 %v5435_v4 }
 0x104   : > { %2234 = vmatprep.mubr.bf16.mxu1 %v5436_v5  ;;  %2426 = vmatprep.mubr.bf16.mxu0 %v5438_v6  ;;  %v5494_v5 = vld [vmem:[%s5761_s9 + $0x37c] ss:$20 sps:$4 sm:$0xff]  }
 0x105   : > { %v5496_v6 = vld [vmem:[%s5761_s9 + $0xb0] ss:$20 sps:$4 sm:$0xff]  }
 0x10b   : > { %2235 = vmatmul.mubr.bf16.gmra.mrb[92].mxu1 %v5440_v7  ;;  %2427 = vmatmul.mubr.bf16.gmra.mrb[48].mxu0 %v5441_v8 }
 0x10c   : > { %2242 = vmatprep.mubr.bf16.mxu1 %v5442_v9  ;;  %2434 = vmatprep.mubr.bf16.mxu0 %v5444_v10  ;;  %v5497_v9 = vld [vmem:[%s5761_s9 + $0x378] ss:$20 sps:$4 sm:$0xff]  }
 0x10d   : > { %v5498_v10 = vld [vmem:[%s5761_s9 + $0xd8] ss:$20 sps:$4 sm:$0xff]  }
 0x113   : > { %2243 = vmatmul.mubr.bf16.gmra.mrb[96].mxu1 %v5446_v11  ;;  %2435 = vmatmul.mubr.bf16.gmra.mrb[52].mxu0 %v5447_v12 }
 0x114   : > { %2250 = vmatprep.mubr.bf16.mxu1 %v5448_v13  ;;  %2442 = vmatprep.mubr.bf16.mxu0 %v5450_v14  ;;  %v5499_v13 = vld [vmem:[%s5761_s9 + $0x3a4] ss:$20 sps:$4 sm:$0xff]   ;;  %v5501_v14 = vld [vmem:[%s5761_s9 + $0x100] ss:$20 sps:$4 sm:$0xff]  }
 0x11b   : > { %2251 = vmatmul.mubr.bf16.gmra.mrb[100].mxu1 %v5452_v15  ;;  %2443 = vmatmul.mubr.bf16.gmra.mrb[56].mxu0 %v5453_v16 }
 0x11c   : > { %2258 = vmatprep.mubr.bf16.mxu1 %v5454_v17  ;;  %2450 = vmatprep.mubr.bf16.mxu0 %v5456_v1  ;;  %v5502_v17 = vld [vmem:[%s5761_s9 + $0x3a0] ss:$20 sps:$4 sm:$0xff]   ;;  %v5503_v1 = vld [vmem:[%s5761_s9 + $0x128] ss:$20 sps:$4 sm:$0xff]  }
 0x123   : > { %2259 = vmatmul.mubr.bf16.gmra.mrb[104].mxu1 %v5458_v18  ;;  %2451 = vmatmul.mubr.bf16.gmra.mrb[60].mxu0 %v5459_v19 }
 0x124   : > { %2266 = vmatprep.mubr.bf16.mxu1 %v5461_v20  ;;  %2458 = vmatprep.mubr.bf16.mxu0 %v5463_v21  ;;  %v5504_v20 = vld [vmem:[%s5761_s9 + $0x3cc] ss:$20 sps:$4 sm:$0xff]   ;;  %v5506_v21 = vld [vmem:[%s5761_s9 + $0x150] ss:$20 sps:$4 sm:$0xff]  }
 0x126   : > { %v6012_v22 = vpop.f32.mrb[0].mxu1 }
 0x127   : > { %v2054_v25 = vpop.f32.mrb[1].mxu1 }
 0x128   : > { %v6016_v26 = vpop.f32.mrb[2].mxu1  ;;  %v5507_v25 = vld [vmem:[%s5761_s9 + $0x3c8] ss:$20 sps:$4 sm:$0xff]  }
 0x129   : > { %v2057_v29 = vpop.f32.mrb[3].mxu1 }
 0x12b   : > { %2267 = vmatmul.mubr.bf16.gmra.mrb[108].mxu1 %v5465_v23  ;;  %2459 = vmatmul.mubr.bf16.gmra.mrb[64].mxu0 %v5466_v24 }
 0x12c   : > { %2274 = vmatprep.mubr.bf16.mxu1 %v5467_v27  ;;  %2466 = vmatprep.mubr.bf16.mxu0 %v5469_v28  ;;  %v5508_v27 = vld [vmem:[%s5761_s9 + $0x178] ss:$20 sps:$4 sm:$0xff]  }
 0x12e   : > { %v6020_v30 = vpop.f32.mrb[4].mxu1 }
 0x12f   : > { %v2062_v33 = vpop.f32.mrb[5].mxu1 }
 0x130   : > { %v6024_v34 = vpop.f32.mrb[6].mxu1 }
 0x131   : > { %v2065_v37 = vpop.f32.mrb[7].mxu1 }
 0x132   : > { %v5513_v37 = vld [vmem:[%s5761_s9 + $0x1c8] ss:$20 sps:$4 sm:$0xff]  }
 0x133   : > { %2275 = vmatmul.mubr.bf16.gmra.mrb[112].mxu1 %v5471_v31  ;;  %2467 = vmatmul.mubr.bf16.gmra.mrb[68].mxu0 %v5472_v32  ;;  %v5509_v31 = vld [vmem:[%s5761_s9 + $0x3f4] ss:$20 sps:$4 sm:$0xff]  }
 0x134   : > { %2282 = vmatprep.mubr.bf16.mxu1 %v5473_v35  ;;  %2474 = vmatprep.mubr.bf16.mxu0 %v5475_v36  ;;  %v5511_v32 = vld [vmem:[%s5761_s9 + $0x1a0] ss:$20 sps:$4 sm:$0xff]   ;;  %v5512_v36 = vld [vmem:[%s5761_s9 + $0x3f0] ss:$20 sps:$4 sm:$0xff]  }
 0x136   : > { %v6029_v39 = vpop.f32.mrb[8].mxu1 }
 0x137   : > { %v2070_v42 = vpop.f32.mrb[9].mxu1 }
 0x138   : > { %v6033_v43 = vpop.f32.mrb[10].mxu1  ;;  %v5516_v42 = vld [vmem:[%s5761_s9 + $0x1f0] ss:$20 sps:$4 sm:$0xff]  }
 0x139   : > { %v2073_v46 = vpop.f32.mrb[11].mxu1 }
 0x13a   : > { %v5517_v46 = vld [vmem:[%s5761_s9 + $0x418] ss:$20 sps:$4 sm:$0xff]  }
 0x13b   : > { %2283 = vmatmul.mubr.bf16.gmra.mrb[116].mxu1 %v5477_v40  ;;  %2475 = vmatmul.mubr.bf16.gmra.mrb[72].mxu0 %v5478_v41  ;;  %v5514_v41 = vld [vmem:[%s5761_s9 + $0x41c] ss:$20 sps:$4 sm:$0xff]  }
 0x13c   : > { %2290 = vmatprep.mubr.bf16.mxu1 %v4294_v44  ;;  %2482 = vmatprep.mubr.bf16.mxu0 %v5480_v45 }
 0x13e   : > { %v6036_v47 = vpop.f32.mrb[12].mxu1 }
 0x13f   : > { %v2078_v50 = vpop.f32.mrb[13].mxu1 }
 0x140   : > { %v6039_v51 = vpop.f32.mrb[14].mxu1 }
 0x141   : > { %v2081_v54 = vpop.f32.mrb[15].mxu1 }
 0x143   : > { %2291 = vmatmul.mubr.bf16.gmra.mrb[120].mxu1 %v4293_v48  ;;  %2483 = vmatmul.mubr.bf16.gmra.mrb[76].mxu0 %v5483_v49  ;;  %v5518_v48 = vld [vmem:[%s5761_s9 + $0x218] ss:$20 sps:$4 sm:$0xff]  }
 0x144   : > { %2490 = vmatprep.mubr.bf16.mxu0 %v5484_v52  ;;  %4867 = vmatprep.mubr.msk.bf16.mxu1 %vm1799_vm1, %v5486_v53  ;;  %v5519_v52 = vld [vmem:[%s5761_s9 + $0x444] ss:$20 sps:$4 sm:$0xff]   ;;  %v5521_v53 = vld [vmem:[%s5761_s9 + $0x240] ss:$20 sps:$4 sm:$0xff]  }
 0x146   : > { %v6044_v55 = vpop.f32.mrb[16].mxu1 }
 0x147   : > { %v2086_v58 = vpop.f32.mrb[17].mxu1 }
 0x148   : > { %v6048_v59 = vpop.f32.mrb[18].mxu1 }
 0x149   : > { %v2089_v62 = vpop.f32.mrb[19].mxu1 }
 0x14b   : > { %2491 = vmatmul.mubr.bf16.gmra.mrb[80].mxu0 %v5487_v56  ;;  %4868 = vmatmul.mubr.msk.bf16.vlgmr.msra.gmra.mrb[124].mxu1 %vm1799_vm1, %v5488_v57 }
 0x14c   : > { %2498 = vmatprep.mubr.bf16.mxu0 %v5489_v60  ;;  %4871 = vmatprep.mubr.msk.bf16.mxu1 %vm1799_vm1, %v5491_v61  ;;  %v5522_v60 = vld [vmem:[%s5761_s9 + $0x440] ss:$20 sps:$4 sm:$0xff]   ;;  %v5523_v61 = vld [vmem:[%s5761_s9 + $0x268] ss:$20 sps:$4 sm:$0xff]  }
 0x14e   : > { %v6054_v63 = vpop.f32.mrb[20].mxu1 }
 0x14f   : > { %v2094_v3 = vpop.f32.mrb[21].mxu1 }
 0x150   : > { %v6058_v4 = vpop.f32.mrb[22].mxu1  ;;  %v5524_v3 = vld [vmem:[%s5761_s9 + $0x46c] ss:$20 sps:$4 sm:$0xff]  }
 0x151   : > { %v2097_v7 = vpop.f32.mrb[23].mxu1 }
 0x153   : > { %2499 = vmatmul.mubr.bf16.gmra.mrb[84].mxu0 %v5492_v0  ;;  %4872 = vmatmul.mubr.msk.bf16.gmra.mrb[128].mxu1 %vm1799_vm1, %v5493_v2 }
 0x154   : > { %2506 = vmatprep.mubr.bf16.mxu0 %v5494_v5  ;;  %4875 = vmatprep.mubr.msk.bf16.mxu1 %vm1799_vm1, %v5496_v6  ;;  %v5526_v5 = vld [vmem:[%s5761_s9 + $0x290] ss:$20 sps:$4 sm:$0xff]  }
 0x156   : > { %v6064_v8 = vpop.f32.mrb[24].mxu1 }
 0x157   : > { %v2102_v11 = vpop.f32.mrb[25].mxu1 }
 0x158   : > { %v6068_v12 = vpop.f32.mrb[26].mxu1 }
 0x159   : > { %v2105_v15 = vpop.f32.mrb[27].mxu1 }
 0x15b   : > { %2507 = vmatmul.mubr.bf16.gmra.mrb[88].mxu0 %v5497_v9  ;;  %4876 = vmatmul.mubr.msk.bf16.gmra.mrb[132].mxu1 %vm1799_vm1, %v5498_v10 }
 0x15c   : > { %2514 = vmatprep.mubr.bf16.mxu0 %v5499_v13  ;;  %4879 = vmatprep.mubr.msk.bf16.mxu1 %vm1799_vm1, %v5501_v14  ;;  %v5527_v13 = vld [vmem:[%s5761_s9 + $0x468] ss:$20 sps:$4 sm:$0xff]   ;;  %v5528_v14 = vld [vmem:[%s5761_s9 + $0x2b8] ss:$20 sps:$4 sm:$0xff]  }
 0x15e   : > { %v6074_v16 = vpop.f32.mrb[28].mxu1 }
 0x15f   : > { %v2110_v18 = vpop.f32.mrb[29].mxu1 }
 0x160   : > { %v6078_v19 = vpop.f32.mrb[30].mxu1  ;;  %v5529_v18 = vld [vmem:[%s5761_s9 + $0x494] ss:$20 sps:$4 sm:$0xff]  }
 0x161   : > { %v2113_v23 = vpop.f32.mrb[31].mxu1 }
 0x163   : > { %2515 = vmatmul.mubr.bf16.gmra.mrb[92].mxu0 %v5502_v17  ;;  %4880 = vmatmul.mubr.msk.bf16.gmra.mrb[136].mxu1 %vm1799_vm1, %v5503_v1 }
 0x164   : > { %2522 = vmatprep.mubr.bf16.mxu0 %v5504_v20  ;;  %4883 = vmatprep.mubr.msk.bf16.mxu1 %vm1799_vm1, %v5506_v21  ;;  %v5531_v20 = vld [vmem:[%s5761_s9 + $0x2e0] ss:$20 sps:$4 sm:$0xff]  }
 0x166   : > { %v6084_v24 = vpop.f32.mrb[32].mxu1 }
 0x167   : > { %v2118_v28 = vpop.f32.mrb[33].mxu1 }
 0x168   : > { %v6088_v29 = vpop.f32.mrb[34].mxu1 }
 0x169   : > { %v2121_v33 = vpop.f32.mrb[35].mxu1 }
 0x16b   : > { %2523 = vmatmul.mubr.bf16.gmra.mrb[96].mxu0 %v5507_v25  ;;  %4884 = vmatmul.mubr.msk.bf16.gmra.mrb[140].mxu1 %vm1799_vm1, %v5508_v27 }
 0x16c   : > { %2530 = vmatprep.mubr.bf16.mxu0 %v5509_v31  ;;  %4887 = vmatprep.mubr.msk.bf16.mxu1 %vm1799_vm1, %v5511_v32  ;;  %v5532_v31 = vld [vmem:[%s5761_s9 + $0x490] ss:$20 sps:$4 sm:$0xff]   ;;  %v5533_v32 = vld [vmem:[%s5761_s9 + $0x308] ss:$20 sps:$4 sm:$0xff]  }
 0x16e   : > { %v6094_v35 = vpop.f32.mrb[36].mxu1 }
 0x16f   : > { %v2126_v38 = vpop.f32.mrb[37].mxu1 }
 0x170   : > { %v6098_v40 = vpop.f32.mrb[38].mxu1  ;;  %v5534_v38 = vld [vmem:[%s5761_s9 + $0x4bc] ss:$20 sps:$4 sm:$0xff]  }
 0x171   : > { %v2129_v44 = vpop.f32.mrb[39].mxu1 }
 0x173   : > { %2531 = vmatmul.mubr.bf16.gmra.mrb[100].mxu0 %v5512_v36  ;;  %4888 = vmatmul.mubr.msk.bf16.gmra.mrb[144].mxu1 %vm1799_vm1, %v5513_v37 }
 0x174   : > { %2538 = vmatprep.mubr.bf16.mxu0 %v5514_v41  ;;  %4891 = vmatprep.mubr.msk.bf16.mxu1 %vm1799_vm1, %v5516_v42  ;;  %v5536_v41 = vld [vmem:[%s5761_s9 + $0x330] ss:$20 sps:$4 sm:$0xff]  }
 0x176   : > { %v6104_v45 = vpop.f32.mrb[40].mxu1 }
 0x177   : > { %v2134_v49 = vpop.f32.mrb[41].mxu1 }
 0x178   : > { %v6108_v50 = vpop.f32.mrb[42].mxu1 }
 0x179   : > { %v2137_v54 = vpop.f32.mrb[43].mxu1 }
 0x17b   : > { %2539 = vmatmul.mubr.bf16.gmra.mrb[104].mxu0 %v5517_v46  ;;  %4892 = vmatmul.mubr.msk.bf16.gmra.mrb[148].mxu1 %vm1799_vm1, %v5518_v48 }
 0x17c   : > { %2546 = vmatprep.mubr.bf16.mxu0 %v5519_v52  ;;  %4895 = vmatprep.mubr.msk.bf16.mxu1 %vm1799_vm1, %v5521_v53  ;;  %v5537_v52 = vld [vmem:[%s5761_s9 + $0x4b8] ss:$20 sps:$4 sm:$0xff]  }
 0x17d   : > { %v5538_v53 = vld [vmem:[%s5761_s9 + $0x358] ss:$20 sps:$4 sm:$0xff]  }
 0x17e   : > { %v6114_v56 = vpop.f32.mrb[0].mxu0  ;;  %v6116_v57 = vpop.f32.mrb[44].mxu1 }
 0x17f   : > { %v2334_v58 = vpop.f32.mrb[1].mxu0  ;;  %v2142_v62 = vpop.f32.mrb[45].mxu1 }
 0x180   : > { %v6120_v0 = vpop.f32.mrb[2].mxu0  ;;  %v6122_v2 = vpop.f32.mrb[46].mxu1  ;;  %v5541_v62 = vld [vmem:[%s5761_s9 + $0x380] ss:$20 sps:$4 sm:$0xff]  }
 0x181   : > { %v2337_v6 = vpop.f32.mrb[3].mxu0  ;;  %v2145_v7 = vpop.f32.mrb[47].mxu1 }
 0x183   : > { %2547 = vmatmul.mubr.bf16.gmra.mrb[108].mxu0 %v5522_v60  ;;  %4896 = vmatmul.mubr.msk.bf16.gmra.mrb[152].mxu1 %vm1799_vm1, %v5523_v61  ;;  %v5539_v61 = vld [vmem:[%s5761_s9 + $0x4e4] ss:$20 sps:$4 sm:$0xff]  }
 0x184   : > { %2554 = vmatprep.mubr.bf16.mxu0 %v5524_v3  ;;  %4899 = vmatprep.mubr.msk.bf16.mxu1 %vm1799_vm1, %v5526_v5 }
 0x186   : > { %v6128_v9 = vpop.f32.mrb[4].mxu0  ;;  %v6130_v10 = vpop.f32.mrb[48].mxu1 }
 0x187   : > { %v2342_v11 = vpop.f32.mrb[5].mxu0  ;;  %v2150_v15 = vpop.f32.mrb[49].mxu1 }
 0x188   : > { %v6134_v17 = vpop.f32.mrb[6].mxu0  ;;  %v6136_v1 = vpop.f32.mrb[50].mxu1 }
 0x189   : > { %v2345_v21 = vpop.f32.mrb[7].mxu0  ;;  %v2153_v23 = vpop.f32.mrb[51].mxu1 }
 0x18a   : > { %v5544_v21 = vld [vmem:[%s5761_s9 + $0x50c] ss:$20 sps:$4 sm:$0xff]   ;;  %v5546_v23 = vld [vmem:[%s5761_s9 + $0x3d0] ss:$20 sps:$4 sm:$0xff]  }
 0x18b   : > { %2555 = vmatmul.mubr.bf16.gmra.mrb[112].mxu0 %v5527_v13  ;;  %4900 = vmatmul.mubr.msk.bf16.gmra.mrb[156].mxu1 %vm1799_vm1, %v5528_v14  ;;  %v5542_v13 = vld [vmem:[%s5761_s9 + $0x4e0] ss:$20 sps:$4 sm:$0xff]   ;;  %v5543_v14 = vld [vmem:[%s5761_s9 + $0x3a8] ss:$20 sps:$4 sm:$0xff]  }
 0x18c   : > { %2562 = vmatprep.mubr.bf16.mxu0 %v5529_v18  ;;  %4903 = vmatprep.mubr.msk.bf16.mxu1 %vm1799_vm1, %v5531_v20 }
 0x18e   : > { %v6142_v25 = vpop.f32.mrb[8].mxu0  ;;  %v6144_v27 = vpop.f32.mrb[52].mxu1 }
 0x18f   : > { %v2350_v28 = vpop.f32.mrb[9].mxu0  ;;  %v2158_v33 = vpop.f32.mrb[53].mxu1 }
 0x190   : > { %v6148_v36 = vpop.f32.mrb[10].mxu0  ;;  %v6150_v37 = vpop.f32.mrb[54].mxu1 }
 0x191   : > { %v2353_v42 = vpop.f32.mrb[11].mxu0  ;;  %v2161_v44 = vpop.f32.mrb[55].mxu1 }
 0x192   : > { %v5548_v42 = vld [vmem:[%s5761_s9 + $0x3f8] ss:$20 sps:$4 sm:$0xff]  }
 0x193   : > { %2563 = vmatmul.mubr.bf16.gmra.mrb[116].mxu0 %v5532_v31  ;;  %4904 = vmatmul.mubr.msk.bf16.gmra.mrb[160].mxu1 %vm1799_vm1, %v5533_v32 }
 0x194   : > { %2570 = vmatprep.mubr.bf16.mxu0 %v5534_v38  ;;  %4907 = vmatprep.mubr.msk.bf16.mxu1 %vm1799_vm1, %v5536_v41  ;;  %v5547_v41 = vld [vmem:[%s5761_s9 + $0x508] ss:$20 sps:$4 sm:$0xff]  }
 0x196   : > { %v6156_v46 = vpop.f32.mrb[12].mxu0  ;;  %v6158_v48 = vpop.f32.mrb[56].mxu1 }
 0x197   : > { %v2358_v49 = vpop.f32.mrb[13].mxu0  ;;  %v2166_v54 = vpop.f32.mrb[57].mxu1 }
 0x198   : > { %v6162_v58 = vpop.f32.mrb[14].mxu0  ;;  %v6164_v60 = vpop.f32.mrb[58].mxu1  ;;  %v5551_v54 = vld [vmem:[%s5761_s9 + $0x420] ss:$20 sps:$4 sm:$0xff]  }
 0x199   : > { %6887 = vst [vmem:[#allocation3_spill] sm:$0xff] %v6164_v60  ;;  %v2361_v3 = vpop.f32.mrb[15].mxu0  ;;  %v2169_v5 = vpop.f32.mrb[59].mxu1 }
 0x19b   : > { %2571 = vmatmul.mubr.bf16.gmra.mrb[120].mxu0 %v5537_v52  ;;  %4908 = vmatmul.mubr.msk.bf16.gmra.mrb[164].mxu1 %vm1799_vm1, %v5538_v53  ;;  %v5549_v53 = vld [vmem:[%s5761_s9 + $0x534] ss:$20 sps:$4 sm:$0xff]  }
 0x19c   : > { %2578 = vmatprep.mubr.bf16.mxu0 %v5539_v61  ;;  %4911 = vmatprep.mubr.msk.bf16.mxu1 %vm1799_vm1, %v5541_v62 }
 0x19e   : > { %v6170_v6 = vpop.f32.mrb[16].mxu0  ;;  %v6172_v7 = vpop.f32.mrb[60].mxu1 }
 0x19f   : > { %6888 = vst [vmem:[#allocation4_spill] sm:$0xff] %v6172_v7  ;;  %v2366_v11 = vpop.f32.mrb[17].mxu0  ;;  %v2174_v15 = vpop.f32.mrb[61].mxu1 }
 0x1a0   : > { %v6176_v18 = vpop.f32.mrb[18].mxu0  ;;  %v6178_v20 = vpop.f32.mrb[62].mxu1 }
 0x1a1   : > { %6889 = vst [vmem:[#allocation5_spill] sm:$0xff] %v6178_v20  ;;  %v2369_v28 = vpop.f32.mrb[19].mxu0  ;;  %v2177_v31 = vpop.f32.mrb[63].mxu1 }
 0x1a2   : > { %v5554_v28 = vld [vmem:[%s5761_s9 + $0x55c] ss:$20 sps:$4 sm:$0xff]  }
 0x1a3   : > { %2579 = vmatmul.mubr.bf16.gmra.mrb[124].mxu0 %v5542_v13  ;;  %4912 = vmatmul.mubr.msk.bf16.gmra.mrb[168].mxu1 %vm1799_vm1, %v5543_v14  ;;  %v5552_v13 = vld [vmem:[%s5761_s9 + $0x530] ss:$20 sps:$4 sm:$0xff]   ;;  %v5553_v14 = vld [vmem:[%s5761_s9 + $0x448] ss:$20 sps:$4 sm:$0xff]  }
 0x1a4   : > { %2586 = vmatprep.mubr.bf16.mxu0 %v5544_v21  ;;  %4915 = vmatprep.mubr.msk.bf16.mxu1 %vm1799_vm1, %v5546_v23  ;;  %v5556_v31 = vld [vmem:[%s5761_s9 + $0x470] ss:$20 sps:$4 sm:$0xff]  }
 0x1a6   : > { %v6184_v32 = vpop.f32.mrb[20].mxu0  ;;  %v6186_v33 = vpop.f32.mrb[64].mxu1 }
 0x1a7   : > { %6890 = vst [vmem:[#allocation6_spill] sm:$0xff] %v6186_v33  ;;  %v2374_v38 = vpop.f32.mrb[21].mxu0  ;;  %v2182_v44 = vpop.f32.mrb[65].mxu1  ;;  %v5573_v33 = vld [vmem:[%s5761_s9 + $0x588] ss:$20 sps:$4 sm:$0xff]  }
 0x1a8   : > { %v6190_v49 = vpop.f32.mrb[22].mxu0  ;;  %v6192_v52 = vpop.f32.mrb[66].mxu1 }
 0x1a9   : > { %6891 = vst [vmem:[#allocation7_spill] sm:$0xff] %v6192_v52  ;;  %v2377_v61 = vpop.f32.mrb[23].mxu0  ;;  %v2185_v62 = vpop.f32.mrb[67].mxu1 }
 0x1aa   : > { %v5558_v61 = vld [vmem:[%s5761_s9 + $0x498] ss:$20 sps:$4 sm:$0xff]  }
 0x1ab   : > { %2587 = vmatmul.mubr.bf16.gmra.mrb[128].mxu0 %v5547_v41  ;;  %4916 = vmatmul.mubr.msk.bf16.gmra.mrb[172].mxu1 %vm1799_vm1, %v5548_v42 }
 0x1ac   : > { %2594 = vmatprep.mubr.bf16.mxu0 %v5549_v53  ;;  %4919 = vmatprep.mubr.msk.bf16.mxu1 %vm1799_vm1, %v5551_v54  ;;  %v5557_v54 = vld [vmem:[%s5761_s9 + $0x558] ss:$20 sps:$4 sm:$0xff]  }
 0x1ae   : > { %v6198_v3 = vpop.f32.mrb[24].mxu0  ;;  %v6200_v5 = vpop.f32.mrb[68].mxu1 }
 0x1af   : > { %6892 = vst [vmem:[#allocation8_spill] sm:$0xff] %v6200_v5  ;;  %v2382_v11 = vpop.f32.mrb[25].mxu0  ;;  %v2190_v15 = vpop.f32.mrb[69].mxu1 }
 0x1b0   : > { %v6204_v21 = vpop.f32.mrb[26].mxu0  ;;  %v6206_v23 = vpop.f32.mrb[70].mxu1 }
 0x1b1   : > { %6893 = vst [vmem:[#allocation9_spill] sm:$0xff] %v6206_v23  ;;  %v2385_v38 = vpop.f32.mrb[27].mxu0  ;;  %v2193_v41 = vpop.f32.mrb[71].mxu1 }
 0x1b3   : > { %2595 = vmatmul.mubr.bf16.gmra.mrb[132].mxu0 %v5552_v13  ;;  %4920 = vmatmul.mubr.msk.bf16.gmra.mrb[176].mxu1 %vm1799_vm1, %v5553_v14  ;;  %v5559_v13 = vld [vmem:[%s5761_s9 + $0x584] ss:$20 sps:$4 sm:$0xff]   ;;  %v5561_v14 = vld [vmem:[%s5761_s9 + $0x4c0] ss:$20 sps:$4 sm:$0xff]  }
 0x1b4   : > { %2602 = vmatprep.mubr.bf16.mxu0 %v5554_v28  ;;  %4923 = vmatprep.mubr.msk.bf16.mxu1 %vm1799_vm1, %v5556_v31 }
 0x1b6   : > { %v6212_v42 = vpop.f32.mrb[28].mxu0  ;;  %v6214_v44 = vpop.f32.mrb[72].mxu1 }
 0x1b7   : > { %6894 = vst [vmem:[#allocation10_spill] sm:$0xff] %v6214_v44  ;;  %v2390_v53 = vpop.f32.mrb[29].mxu0  ;;  %v2198_v62 = vpop.f32.mrb[73].mxu1 }
 0x1b8   : > { %v6218_v11 = vpop.f32.mrb[30].mxu0  ;;  %v6220_v15 = vpop.f32.mrb[74].mxu1  ;;  %v5562_v62 = vld [vmem:[%s5761_s9 + $0x580] ss:$20 sps:$4 sm:$0xff]  }
 0x1b9   : > { %6895 = vst [vmem:[#allocation11_spill] sm:$0xff] %v6220_v15  ;;  %v2393_v28 = vpop.f32.mrb[31].mxu0  ;;  %v2201_v31 = vpop.f32.mrb[75].mxu1  ;;  %v5563_v15 = vld [vmem:[%s5761_s9 + $0x4e8] ss:$20 sps:$4 sm:$0xff]  }
 0x1bb   : > { %2603 = vmatmul.mubr.bf16.gmra.mrb[136].mxu0 %v5557_v54  ;;  %4924 = vmatmul.mubr.msk.bf16.gmra.mrb[180].mxu1 %vm1799_vm1, %v5558_v61  ;;  %v5564_v54 = vld [vmem:[%s5761_s9 + $0x5ac] ss:$20 sps:$4 sm:$0xff]   ;;  %v5566_v61 = vld [vmem:[%s5761_s9 + $0x510] ss:$20 sps:$4 sm:$0xff]  }
 0x1bc   : > { %2610 = vmatprep.mubr.bf16.mxu0 %v5559_v13  ;;  %4927 = vmatprep.mubr.msk.bf16.mxu1 %vm1799_vm1, %v5561_v14 }
 0x1be   : > { %v6226_v38 = vpop.f32.mrb[32].mxu0  ;;  %v6228_v41 = vpop.f32.mrb[76].mxu1 }
 0x1bf   : > { %6896 = vst [vmem:[#allocation12_spill] sm:$0xff] %v6228_v41  ;;  %v2398_v53 = vpop.f32.mrb[33].mxu0  ;;  %v2206_v44 = vpop.f32.mrb[77].mxu1  ;;  %v5567_v41 = vld [vmem:[%s5761_s9 + $0x5a8] ss:$20 sps:$4 sm:$0xff]  }
 0x1c0   : > { %v6232_v23 = vpop.f32.mrb[34].mxu0  ;;  %v6234_v28 = vpop.f32.mrb[78].mxu1 }
 0x1c1   : > { %6897 = vst [vmem:[#allocation13_spill] sm:$0xff] %v6234_v28  ;;  %v2401_v13 = vpop.f32.mrb[35].mxu0  ;;  %v2209_v14 = vpop.f32.mrb[79].mxu1  ;;  %v5568_v28 = vld [vmem:[%s5761_s9 + $0x538] ss:$20 sps:$4 sm:$0xff]  }
 0x1c3   : > { %2611 = vmatmul.mubr.bf16.gmra.mrb[140].mxu0 %v5562_v62  ;;  %4928 = vmatmul.mubr.msk.bf16.gmra.mrb[184].mxu1 %vm1799_vm1, %v5563_v15  ;;  %v5569_v62 = vld [vmem:[%s5761_s9 + $0x5d4] ss:$20 sps:$4 sm:$0xff]  }
 0x1c4   : > { %2618 = vmatprep.mubr.bf16.mxu0 %v5564_v54  ;;  %4931 = vmatprep.mubr.msk.bf16.mxu1 %vm1799_vm1, %v5566_v61  ;;  %v5571_v15 = vld [vmem:[%s5761_s9 + $0x560] ss:$20 sps:$4 sm:$0xff]  }
 0x1c6   : > { %v6240_v31 = vpop.f32.mrb[36].mxu0  ;;  %v6242_v53 = vpop.f32.mrb[80].mxu1 }
 0x1c7   : > { %6898 = vst [vmem:[#allocation14_spill] sm:$0xff] %v6242_v53  ;;  %v2406_v44 = vpop.f32.mrb[37].mxu0  ;;  %v2214_v5 = vpop.f32.mrb[81].mxu1  ;;  %v5572_v53 = vld [vmem:[%s5761_s9 + $0x5d0] ss:$20 sps:$4 sm:$0xff]  }
 0x1c8   : > { %v6246_v52 = vpop.f32.mrb[38].mxu0  ;;  %v6248_v13 = vpop.f32.mrb[82].mxu1 }
 0x1c9   : > { %6899 = vst [vmem:[#allocation15_spill] sm:$0xff] %v6248_v13  ;;  %v2409_v54 = vpop.f32.mrb[39].mxu0  ;;  %v2217_v61 = vpop.f32.mrb[83].mxu1 }
 0x1ca   : > { %v5574_v54 = vld [vmem:[%s5761_s9 + $0x5fc] ss:$20 sps:$4 sm:$0xff]  }
 0x1cb   : > { %2619 = vmatmul.mubr.bf16.gmra.mrb[144].mxu0 %v5567_v41  ;;  %4932 = vmatmul.mubr.msk.bf16.gmra.mrb[188].mxu1 %vm1799_vm1, %v5568_v28  ;;  %v5576_v41 = vld [vmem:[%s5761_s9 + $0x5b0] ss:$20 sps:$4 sm:$0xff]  }
 0x1cc   : > { %2626 = vmatprep.mubr.bf16.mxu0 %v5569_v62  ;;  %4935 = vmatprep.mubr.msk.bf16.mxu1 %vm1799_vm1, %v5571_v15  ;;  %v6269_v15 = vld [vmem:[%s6884_s2] ss:$0 sm:$0xff] }
 0x1ce   : > { %v6254_v14 = vpop.f32.mrb[40].mxu0  ;;  %v6256_v44 = vpop.f32.mrb[84].mxu1 }
 0x1cf   : > { %6900 = vst [vmem:[#allocation16_spill] sm:$0xff] %v6254_v14  ;;  %6901 = vst [vmem:[#allocation17_spill] sm:$0xff] %v6256_v44  ;;  %v2414_v5 = vpop.f32.mrb[41].mxu0  ;;  %v2222_v13 = vpop.f32.mrb[85].mxu1  ;;  %v5577_v44 = vld [vmem:[%s5761_s9 + $0x5f8] ss:$20 sps:$4 sm:$0xff]  }
 0x1d0   : > { %v6260_v20 = vpop.f32.mrb[42].mxu0  ;;  %v6262_v7 = vpop.f32.mrb[86].mxu1  ;;  %v2053_v13 = vadd.f32 %v6269_v15, %v6012_v22 }
 0x1d1   : > { %6902 = vst [vmem:[#allocation18_spill] sm:$0xff] %v6260_v20  ;;  %6903 = vst [vmem:[#allocation19_spill] sm:$0xff] %v6262_v7  ;;  %v2417_v28 = vpop.f32.mrb[43].mxu0  ;;  %v2225_v62 = vpop.f32.mrb[87].mxu1 }
 0x1d2   : > { %v2056_v28 = vadd.f32 %v6269_v15, %v6016_v26  ;;  %v2061_v26 = vadd.f32 %v6269_v15, %v6020_v30 }
 0x1d3   : > { %2627 = vmatmul.mubr.bf16.gmra.mrb[148].mxu0 %v5572_v53  ;;  %4936 = vmatmul.mubr.msk.bf16.gmra.mrb[192].mxu1 %vm1799_vm1, %v5573_v33  ;;  %v5578_v53 = vld [vmem:[%s5761_s9 + $0x5d8] ss:$20 sps:$4 sm:$0xff]  }
 0x1d4   : > { %2634 = vmatprep.mubr.bf16.mxu0 %v5574_v54  ;;  %4939 = vmatprep.mubr.msk.bf16.mxu1 %vm1799_vm1, %v5576_v41  ;;  %v5579_v54 = vld [vmem:[%s5761_s9 + $0x624] ss:$20 sps:$4 sm:$0xff]   ;;  %v5581_v41 = vld [vmem:[%s5761_s9 + $0x600] ss:$20 sps:$4 sm:$0xff]  }
 0x1d6   : > { %v2420_v61 = vpop.f32.mrb[44].mxu0  ;;  %v6275_v5 = vpop.f32.mrb[88].mxu1 }
 0x1d7   : > { %6904 = vst [vmem:[#allocation20_spill] sm:$0xff] %v6275_v5  ;;  %v6279_v62 = vadd.f32 %v2420_v61, %v2053_v13  ;;  %v2422_v7 = vpop.f32.mrb[45].mxu0  ;;  %v2230_v20 = vpop.f32.mrb[89].mxu1  ;;  %v5583_v61 = vld [vmem:[%s5761_s9 + $0x628] ss:$20 sps:$4 sm:$0xff]  }
 0x1d8   : > { %v2423_v60 = vpop.f32.mrb[46].mxu0  ;;  %v6283_v33 = vpop.f32.mrb[90].mxu1 }
 0x1d9   : > { %6905 = vst [vmem:[#allocation21_spill] sm:$0xff] %v6283_v33  ;;  %v6287_v22 = vadd.f32 %v2423_v60, %v2056_v28  ;;  %v2425_v14 = vpop.f32.mrb[47].mxu0  ;;  %v2233_v5 = vpop.f32.mrb[91].mxu1  ;;  %v2064_v60 = vadd.f32 %v6269_v15, %v6024_v34  ;;  %v2069_v34 = vadd.f32 %v6269_v15, %v6029_v39 }
 0x1db   : > { %2635 = vmatmul.mubr.bf16.gmra.mrb[152].mxu0 %v5577_v44  ;;  %4940 = vmatmul.mubr.msk.bf16.gmra.mrb[196].mxu1 %vm1799_vm1, %v5578_v53  ;;  %v5582_v44 = vld [vmem:[%s5761_s9 + $0x620] ss:$20 sps:$4 sm:$0xff]  }
 0x1dc   : > { %2642 = vmatprep.mubr.bf16.mxu0 %v5579_v54  ;;  %4943 = vmatprep.mubr.msk.bf16.mxu1 %vm1799_vm1, %v5581_v41  ;;  %v5584_v54 = vld [vmem:[%s5761_s9 + $0x64c] ss:$20 sps:$4 sm:$0xff]   ;;  %v5587_v41 = vld [vmem:[%s5761_s9 + $0x650] ss:$20 sps:$4 sm:$0xff]  }
 0x1de   : > { %v2428_v7 = vpop.f32.mrb[48].mxu0  ;;  %v6293_v20 = vpop.f32.mrb[92].mxu1 }
 0x1df   : > { %6906 = vst [vmem:[#allocation22_spill] sm:$0xff] %v6293_v20  ;;  %v6297_v13 = vadd.f32 %v2428_v7, %v2061_v26  ;;  %v2430_v14 = vpop.f32.mrb[49].mxu0  ;;  %v2238_v5 = vpop.f32.mrb[93].mxu1  ;;  %v448_v26 = vld [vmem:[%s5761_s9 + $0x670] sm:$0xff] }
 0x1e0   : > { %v2431_v28 = vpop.f32.mrb[50].mxu0  ;;  %v6301_v53 = vpop.f32.mrb[94].mxu1 }
 0x1e1   : > { %6907 = vst [vmem:[#allocation23_spill] sm:$0xff] %v6301_v53  ;;  %v6305_v30 = vadd.f32 %v2431_v28, %v2064_v60  ;;  %v2433_v20 = vpop.f32.mrb[51].mxu0  ;;  %v2241_v33 = vpop.f32.mrb[95].mxu1  ;;  %v2072_v60 = vadd.f32 %v6269_v15, %v6033_v43  ;;  %v5588_v28 = vld [vmem:[%s5761_s9 + $0x678] ss:$0 sps:$4 sm:$0xff]   ;;  %v2077_v43 = vadd.f32 %v6269_v15, %v6036_v47  ;;  %v2085_v47 = vadd.f32 %v6269_v15, %v6044_v55 }
 0x1e2   : > { %v5586_v33 = vld [vmem:[%s5761_s9 + $0x648] ss:$20 sps:$4 sm:$0xff]   ;;  %v2093_v55 = vadd.f32 %v6269_v15, %v6054_v63  ;;  %v2101_v63 = vadd.f32 %v6269_v15, %v6064_v8  ;;  %v2109_v8 = vadd.f32 %v6269_v15, %v6074_v16  ;;  %v2117_v16 = vadd.f32 %v6269_v15, %v6084_v24  ;;  %s175_s9 = sand.u32 1, %s5638_s12  }
 0x1e3   : > { %6908 = vst [vmem:[#allocation24_spill] sm:$0xff] %v6305_v30  ;;  %2643 = vmatmul.mubr.bf16.gmra.mrb[156].mxu0 %v5582_v44  ;;  %4944 = vmatmul.mubr.msk.bf16.gmra.mrb[200].mxu1 %vm1799_vm1, %v5583_v61  ;;  %v2125_v24 = vadd.f32 %v6269_v15, %v6094_v35  ;;  %v4984_v35 = vadd.f32 %v6269_v15, %v6120_v0  ;;  %s5170_s28 = smul.u32 332, %s175_s9 }
 0x1e4   : > { %2650 = vmatprep.mubr.bf16.mxu0 %v5584_v54  ;;  %4947 = vmatprep.mubr.msk.bf16.mxu1 %vm1799_vm1, %v5587_v41  ;;  %v4296_v41 = vcombine.high %v448_v26, %v448_v26  ;;  %v4989_v0 = vadd.f32 %v6269_v15, %v6156_v46 }
 0x1e5   : > { %s6426_s12 = scalar_lea.vmem [#allocation2], %s5170_s28  }
 0x1e6   : > { %v2436_v7 = vpop.f32.mrb[52].mxu0  ;;  %v6312_v14 = vpop.f32.mrb[96].mxu1 }
 0x1e7   : > { %6909 = vst [vmem:[#allocation25_spill] sm:$0xff] %v6312_v14  ;;  %v6316_v5 = vadd.f32 %v2436_v7, %v2069_v34  ;;  %v2438_v20 = vpop.f32.mrb[53].mxu0  ;;  %v2246_v44 = vpop.f32.mrb[97].mxu1 }
 0x1e8   : > { %v2439_v61 = vpop.f32.mrb[54].mxu0  ;;  %v6320_v54 = vpop.f32.mrb[98].mxu1  ;;  %v2080_v20 = vadd.f32 %v6269_v15, %v6039_v51  ;;  %v2088_v51 = vadd.f32 %v6269_v15, %v6048_v59  ;;  %v2096_v59 = vadd.f32 %v6269_v15, %v6058_v4  ;;  %v2104_v4 = vadd.f32 %v6269_v15, %v6068_v12 }
 0x1e9   : > { %6910 = vst [vmem:[#allocation26_spill] sm:$0xff] %v6320_v54  ;;  %v6322_v53 = vadd.f32 %v2439_v61, %v2072_v60  ;;  %v2441_v39 = vpop.f32.mrb[55].mxu0  ;;  %v2249_v30 = vpop.f32.mrb[99].mxu1  ;;  %v4295_v60 = vcombine.low %v448_v26, %v448_v26  ;;  %v2112_v12 = vadd.f32 %v6269_v15, %v6078_v19  ;;  %v2120_v19 = vadd.f32 %v6269_v15, %v6088_v29 }
 0x1ea   : > { %v4983_v29 = vadd.f32 %v6269_v15, %v6114_v56 }
 0x1eb   : > { %2651 = vmatmul.mubr.bf16.gmra.mrb[160].mxu0 %v5586_v33  ;;  %4948 = vmatmul.mubr.msk.bf16.gmra.mrb[204].mxu1 %vm1799_vm1, %v5588_v28 }
 0x1ec   : > { %2658 = vmatprep.mubr.bf16.mxu0 %v4296_v41 }
 0x1ee   : > { %v2444_v34 = vpop.f32.mrb[56].mxu0  ;;  %v6327_v7 = vpop.f32.mrb[100].mxu1 }
 0x1ef   : > { %6911 = vst [vmem:[#allocation27_spill] sm:$0xff] %v6327_v7  ;;  %v6331_v44 = vadd.f32 %v2444_v34, %v2077_v43  ;;  %v2446_v54 = vpop.f32.mrb[57].mxu0  ;;  %v2254_v61 = vpop.f32.mrb[101].mxu1 }
 0x1f0   : > { %v2447_v39 = vpop.f32.mrb[58].mxu0  ;;  %v6333_v30 = vpop.f32.mrb[102].mxu1 }
 0x1f1   : > { %6912 = vst [vmem:[#allocation28_spill] sm:$0xff] %v6333_v30  ;;  %v6335_v33 = vadd.f32 %v2447_v39, %v2080_v20  ;;  %v2449_v28 = vpop.f32.mrb[59].mxu0  ;;  %v2257_v41 = vpop.f32.mrb[103].mxu1 }
 0x1f3   : > { %2659 = vmatmul.mubr.bf16.gmra.mrb[164].mxu0 %v4295_v60 }
 0x1f6   : > { %v2452_v7 = vpop.f32.mrb[60].mxu0  ;;  %v6339_v14 = vpop.f32.mrb[104].mxu1 }
 0x1f7   : > { %6913 = vst [vmem:[#allocation29_spill] sm:$0xff] %v6339_v14  ;;  %v6343_v54 = vadd.f32 %v2452_v7, %v2085_v47  ;;  %v2454_v26 = vpop.f32.mrb[61].mxu0  ;;  %v2262_v43 = vpop.f32.mrb[105].mxu1 }
 0x1f8   : > { %v2455_v34 = vpop.f32.mrb[62].mxu0  ;;  %v6345_v61 = vpop.f32.mrb[106].mxu1 }
 0x1f9   : > { %6914 = vst [vmem:[#allocation30_spill] sm:$0xff] %v6345_v61  ;;  %v6347_v20 = vadd.f32 %v2455_v34, %v2088_v51  ;;  %v2457_v39 = vpop.f32.mrb[63].mxu0  ;;  %v2265_v60 = vpop.f32.mrb[107].mxu1 }
 0x1fe   : > { %v2460_v28 = vpop.f32.mrb[64].mxu0  ;;  %v6351_v41 = vpop.f32.mrb[108].mxu1 }
 0x1ff   : > { %6915 = vst [vmem:[#allocation31_spill] sm:$0xff] %v6351_v41  ;;  %v6355_v7 = vadd.f32 %v2460_v28, %v2093_v55  ;;  %v2462_v47 = vpop.f32.mrb[65].mxu0  ;;  %v2270_v26 = vpop.f32.mrb[109].mxu1 }
 0x200   : > { %v2463_v43 = vpop.f32.mrb[66].mxu0  ;;  %v6357_v14 = vpop.f32.mrb[110].mxu1 }
 0x201   : > { %6916 = vst [vmem:[#allocation32_spill] sm:$0xff] %v6357_v14  ;;  %v6359_v51 = vadd.f32 %v2463_v43, %v2096_v59  ;;  %v2465_v34 = vpop.f32.mrb[67].mxu0  ;;  %v2273_v39 = vpop.f32.mrb[111].mxu1 }
 0x206   : > { %v2468_v60 = vpop.f32.mrb[68].mxu0  ;;  %v6363_v61 = vpop.f32.mrb[112].mxu1 }
 0x207   : > { %6917 = vst [vmem:[#allocation33_spill] sm:$0xff] %v6363_v61  ;;  %v6367_v55 = vadd.f32 %v2468_v60, %v2101_v63  ;;  %v2470_v28 = vpop.f32.mrb[69].mxu0  ;;  %v2278_v47 = vpop.f32.mrb[113].mxu1 }
 0x208   : > { %v2471_v26 = vpop.f32.mrb[70].mxu0  ;;  %v6369_v41 = vpop.f32.mrb[114].mxu1 }
 0x209   : > { %6918 = vst [vmem:[#allocation34_spill] sm:$0xff] %v6369_v41  ;;  %v6371_v59 = vadd.f32 %v2471_v26, %v2104_v4  ;;  %v2473_v43 = vpop.f32.mrb[71].mxu0  ;;  %v2281_v34 = vpop.f32.mrb[115].mxu1 }
 0x20e   : > { %v2476_v39 = vpop.f32.mrb[72].mxu0  ;;  %v6375_v14 = vpop.f32.mrb[116].mxu1 }
 0x20f   : > { %6919 = vst [vmem:[#allocation35_spill] sm:$0xff] %v6375_v14  ;;  %v6379_v63 = vadd.f32 %v2476_v39, %v2109_v8  ;;  %v2478_v60 = vpop.f32.mrb[73].mxu0  ;;  %v2286_v28 = vpop.f32.mrb[117].mxu1 }
 0x210   : > { %v2479_v47 = vpop.f32.mrb[74].mxu0  ;;  %v6381_v61 = vpop.f32.mrb[118].mxu1 }
 0x211   : > { %6920 = vst [vmem:[#allocation36_spill] sm:$0xff] %v6381_v61  ;;  %v6383_v4 = vadd.f32 %v2479_v47, %v2112_v12  ;;  %v2481_v26 = vpop.f32.mrb[75].mxu0  ;;  %v2289_v43 = vpop.f32.mrb[119].mxu1 }
 0x212   : > { %v4985_v43 = vadd.f32 %v6269_v15, %v6128_v9 }
 0x213   : > { %6921 = vst [vmem:[#allocation37_spill] sm:$0xff] %v6383_v4 }
 0x216   : > { %v2484_v34 = vpop.f32.mrb[76].mxu0  ;;  %v6387_v41 = vpop.f32.mrb[120].mxu1 }
 0x217   : > { %6922 = vst [vmem:[#allocation38_spill] sm:$0xff] %v6387_v41  ;;  %v6391_v8 = vadd.f32 %v2484_v34, %v2117_v16  ;;  %v2486_v39 = vpop.f32.mrb[77].mxu0  ;;  %v2294_v60 = vpop.f32.mrb[121].mxu1 }
 0x218   : > { %v2487_v28 = vpop.f32.mrb[78].mxu0  ;;  %v2295_v61 = vpop.f32.mrb[122].mxu1  ;;  %v2128_v39 = vadd.f32 %v6269_v15, %v6098_v40 }
 0x219   : > { %v6393_v12 = vadd.f32 %v2487_v28, %v2120_v19  ;;  %v2489_v47 = vpop.f32.mrb[79].mxu0  ;;  %v2296_v26 = vpop.f32.mrb[123].mxu1  ;;  %v4986_v61 = vadd.f32 %v6269_v15, %v6134_v17 }
 0x21b   : > { %6923 = vst [vmem:[#allocation39_spill] sm:$0xff] %v6393_v12 }
 0x21e   : > { %v2492_v16 = vpop.f32.mrb[80].mxu0  ;;  %v4869_v34 = vpop.f32.mrb[124].mxu1 }
 0x21f   : > { %v6405_v19 = vadd.f32 %v2492_v16, %v2125_v24  ;;  %v2709_v60 = vadd.f32 %v4985_v43, %v4869_v34  ;;  %v2494_v28 = vpop.f32.mrb[81].mxu0  ;;  %v2700_v47 = vpop.f32.mrb[125].mxu1  ;;  %v2133_v16 = vadd.f32 %v6269_v15, %v6104_v45 }
 0x220   : > { %v2701_v9 = vadd.f32 %v4983_v29, %v2700_v47  ;;  %v2495_v26 = vpop.f32.mrb[82].mxu0  ;;  %v4870_v56 = vpop.f32.mrb[126].mxu1 }
 0x221   : > { %v3036_v41 = vmul.f32 0.1, %v2709_v60  ;;  %v6410_v14 = vadd.f32 %v2495_v26, %v2128_v39  ;;  %v2712_v30 = vadd.f32 %v4986_v61, %v4870_v56  ;;  %v2497_v40 = vpop.f32.mrb[83].mxu0  ;;  %v2703_v4 = vpop.f32.mrb[127].mxu1  ;;  %v2136_v39 = vadd.f32 %v6269_v15, %v6108_v50 }
 0x222   : > { %v3034_v12 = vmul.f32 0.1, %v2701_v9  ;;  %v2704_v17 = vadd.f32 %v4984_v35, %v2703_v4  ;;  %v4987_v61 = vadd.f32 %v6269_v15, %v6142_v25  ;;  %v4990_v35 = vadd.f32 %v6269_v15, %v6162_v58 }
 0x223   : > { %v3037_v24 = vmul.f32 0.1, %v2712_v30  ;;  %v3119_v29 = vmax.f32 %v2709_v60, %v3036_v41 }
 0x224   : > { %v3035_v43 = vmul.f32 0.1, %v2704_v17  ;;  %v3117_v28 = vmax.f32 %v2701_v9, %v3034_v12 }
 0x225   : > { %v3120_v34 = vmax.f32 %v2712_v30, %v3037_v24  ;;  %v4988_v30 = vadd.f32 %v6269_v15, %v6148_v36 }
 0x226   : > { %v3118_v47 = vmax.f32 %v2704_v17, %v3035_v43  ;;  %v2500_v26 = vpop.f32.mrb[84].mxu0  ;;  %v4873_v4 = vpop.f32.mrb[128].mxu1 }
 0x227   : > { %v4570_v56 = vpack.c.bf16 %v3120_v34, %v3119_v29  ;;  %v6422_v45 = vadd.f32 %v2500_v26, %v2133_v16  ;;  %v2725_v40 = vadd.f32 %v4989_v0, %v4873_v4  ;;  %v2502_v46 = vpop.f32.mrb[85].mxu0  ;;  %v2716_v41 = vpop.f32.mrb[129].mxu1  ;;  %v2141_v34 = vadd.f32 %v6269_v15, %v6116_v57 }
 0x228   : > { %v4565_v50 = vpack.c.bf16 %v3118_v47, %v3117_v28  ;;  %v2717_v60 = vadd.f32 %v4987_v61, %v2716_v41  ;;  %v2503_v24 = vpop.f32.mrb[86].mxu0  ;;  %v4874_v25 = vpop.f32.mrb[130].mxu1  ;;  %v4993_v61 = vadd.f32 %v6269_v15, %v6184_v32  ;;  %v4991_v26 = vadd.f32 %v6269_v15, %v6170_v6 }
 0x229   : > { %4767 = vst [vmem:[%s6426_s12 + $0x8] sm:$0xff] %v4570_v56   ;;  %v3040_v12 = vmul.f32 0.1, %v2725_v40  ;;  %v6429_v58 = vadd.f32 %v2503_v24, %v2136_v39  ;;  %v2728_v9 = vadd.f32 %v4990_v35, %v4874_v25  ;;  %v2505_v17 = vpop.f32.mrb[87].mxu0  ;;  %v2719_v43 = vpop.f32.mrb[131].mxu1  ;;  %v2144_v39 = vadd.f32 %v6269_v15, %v6122_v2 }
 0x22a   : > { %4566 = vst [vmem:[%s6426_s12] sm:$0xff] %v4565_v50   ;;  %v3038_v16 = vmul.f32 0.1, %v2717_v60  ;;  %v2720_v0 = vadd.f32 %v4988_v30, %v2719_v43  ;;  %v4994_v41 = vadd.f32 %v6269_v15, %v6190_v49  ;;  %v4992_v2 = vadd.f32 %v6269_v15, %v6176_v18 }
 0x22b   : > { %v3041_v29 = vmul.f32 0.1, %v2728_v9  ;;  %v3123_v28 = vmax.f32 %v2725_v40, %v3040_v12  ;;  %v4997_v18 = vadd.f32 %v6269_v15, %v6212_v42 }
 0x22c   : > { %v3039_v36 = vmul.f32 0.1, %v2720_v0  ;;  %v3121_v4 = vmax.f32 %v2717_v60, %v3038_v16 }
 0x22d   : > { %v3124_v47 = vmax.f32 %v2728_v9, %v3041_v29 }
 0x22e   : > { %v3122_v35 = vmax.f32 %v2720_v0, %v3039_v36  ;;  %v2508_v56 = vpop.f32.mrb[88].mxu0  ;;  %v4877_v46 = vpop.f32.mrb[132].mxu1 }
 0x22f   : > { %v4580_v57 = vpack.c.bf16 %v3124_v47, %v3123_v28  ;;  %v6442_v30 = vadd.f32 %v2508_v56, %v2141_v34  ;;  %v2741_v32 = vadd.f32 %v4993_v61, %v4877_v46  ;;  %v2510_v40 = vpop.f32.mrb[89].mxu0  ;;  %v2732_v50 = vpop.f32.mrb[133].mxu1  ;;  %v2149_v34 = vadd.f32 %v6269_v15, %v6130_v10 }
 0x230   : > { %v4575_v24 = vpack.c.bf16 %v3122_v35, %v3121_v4  ;;  %v2733_v6 = vadd.f32 %v4991_v26, %v2732_v50  ;;  %v2511_v25 = vpop.f32.mrb[90].mxu0  ;;  %v4878_v60 = vpop.f32.mrb[134].mxu1  ;;  %v2152_v47 = vadd.f32 %v6269_v15, %v6136_v1  ;;  %v4998_v46 = vadd.f32 %v6269_v15, %v6218_v11 }
 0x231   : > { %4769 = vst [vmem:[%s6426_s12 + $0x18] sm:$0xff] %v4580_v57   ;;  %v3044_v12 = vmul.f32 0.1, %v2741_v32  ;;  %v6447_v9 = vadd.f32 %v2511_v25, %v2144_v39  ;;  %v2744_v17 = vadd.f32 %v4994_v41, %v4878_v60  ;;  %v2513_v49 = vpop.f32.mrb[91].mxu0  ;;  %v2735_v43 = vpop.f32.mrb[135].mxu1  ;;  %v4995_v39 = vadd.f32 %v6269_v15, %v6198_v3 }
 0x232   : > { %4768 = vst [vmem:[%s6426_s12 + $0x10] sm:$0xff] %v4575_v24   ;;  %v3042_v16 = vmul.f32 0.1, %v2733_v6  ;;  %v2736_v0 = vadd.f32 %v4992_v2, %v2735_v43  ;;  %v4996_v1 = vadd.f32 %v6269_v15, %v6204_v21  ;;  %v5001_v21 = vadd.f32 %v6269_v15, %v6240_v31 }
 0x233   : > { %v3045_v29 = vmul.f32 0.1, %v2744_v17  ;;  %v3127_v61 = vmax.f32 %v2741_v32, %v3044_v12 }
 0x234   : > { %v3043_v36 = vmul.f32 0.1, %v2736_v0  ;;  %v3125_v26 = vmax.f32 %v2733_v6, %v3042_v16  ;;  %v2157_v16 = vadd.f32 %v6269_v15, %v6144_v27 }
 0x235   : > { %v3128_v28 = vmax.f32 %v2744_v17, %v3045_v29 }
 0x236   : > { %v3126_v4 = vmax.f32 %v2736_v0, %v3043_v36  ;;  %v2516_v35 = vpop.f32.mrb[92].mxu0  ;;  %v4881_v56 = vpop.f32.mrb[136].mxu1  ;;  %v2160_v36 = vadd.f32 %v6269_v15, %v6150_v37  ;;  %v5000_v37 = vadd.f32 %v6269_v15, %v6232_v23 }
 0x237   : > { %v4590_v10 = vpack.c.bf16 %v3128_v28, %v3127_v61  ;;  %v6460_v41 = vadd.f32 %v2516_v35, %v2149_v34  ;;  %v2757_v42 = vadd.f32 %v4997_v18, %v4881_v56  ;;  %v2518_v57 = vpop.f32.mrb[93].mxu0  ;;  %v2748_v32 = vpop.f32.mrb[137].mxu1  ;;  %v4999_v34 = vadd.f32 %v6269_v15, %v6226_v38 }
 0x238   : > { %v4585_v40 = vpack.c.bf16 %v3126_v4, %v3125_v26  ;;  %v2749_v3 = vadd.f32 %v4995_v39, %v2748_v32  ;;  %v2519_v50 = vpop.f32.mrb[94].mxu0  ;;  %v4882_v2 = vpop.f32.mrb[138].mxu1  ;;  %v5002_v39 = vadd.f32 %v6269_v15, %v6246_v52 }
 0x239   : > { %4771 = vst [vmem:[%s6426_s12 + $0x28] sm:$0xff] %v4590_v10   ;;  %v3048_v24 = vmul.f32 0.1, %v2757_v42  ;;  %v6465_v6 = vadd.f32 %v2519_v50, %v2152_v47  ;;  %v2760_v25 = vadd.f32 %v4998_v46, %v4882_v2  ;;  %v2521_v11 = vpop.f32.mrb[95].mxu0  ;;  %v2751_v60 = vpop.f32.mrb[139].mxu1 }
 0x23a   : > { %4770 = vst [vmem:[%s6426_s12 + $0x20] sm:$0xff] %v4585_v40   ;;  %v3046_v12 = vmul.f32 0.1, %v2749_v3  ;;  %v2752_v17 = vadd.f32 %v4996_v1, %v2751_v60  ;;  %v6924_v11 = vld [vmem:[#allocation16_spill] sm:$0xff] }
 0x23b   : > { %v3049_v49 = vmul.f32 0.1, %v2760_v25  ;;  %v3131_v0 = vmax.f32 %v2757_v42, %v3048_v24  ;;  %v2165_v24 = vadd.f32 %v6269_v15, %v6158_v48  ;;  %v5003_v60 = vadd.f32 %v6269_v15, %v6924_v11 }
 0x23c   : > { %v3047_v43 = vmul.f32 0.1, %v2752_v17  ;;  %v3129_v18 = vmax.f32 %v2749_v3, %v3046_v12 }
 0x23d   : > { %v3132_v29 = vmax.f32 %v2760_v25, %v3049_v49 }
 0x23e   : > { %v3130_v61 = vmax.f32 %v2752_v17, %v3047_v43  ;;  %v2524_v28 = vpop.f32.mrb[96].mxu0  ;;  %v4885_v47 = vpop.f32.mrb[140].mxu1 }
 0x23f   : > { %v4600_v27 = vpack.c.bf16 %v3132_v29, %v3131_v0  ;;  %v6478_v26 = vadd.f32 %v2524_v28, %v2157_v16  ;;  %v2773_v31 = vadd.f32 %v5001_v21, %v4885_v47  ;;  %v2526_v4 = vpop.f32.mrb[97].mxu0  ;;  %v2764_v35 = vpop.f32.mrb[141].mxu1  ;;  %v6925_v16 = vld [vmem:[#allocation3_spill] sm:$0xff] }
 0x240   : > { %v4595_v56 = vpack.c.bf16 %v3130_v61, %v3129_v18  ;;  %v2765_v38 = vadd.f32 %v4999_v34, %v2764_v35  ;;  %v2527_v46 = vpop.f32.mrb[98].mxu0  ;;  %v4886_v10 = vpop.f32.mrb[142].mxu1  ;;  %v2168_v21 = vadd.f32 %v6269_v15, %v6925_v16  ;;  %v6926_v18 = vld [vmem:[#allocation18_spill] sm:$0xff] }
 0x241   : > { %4773 = vst [vmem:[%s6426_s12 + $0x38] sm:$0xff] %v4600_v27   ;;  %v3052_v42 = vmul.f32 0.1, %v2773_v31  ;;  %v6483_v57 = vadd.f32 %v2527_v46, %v2160_v36  ;;  %v2776_v32 = vadd.f32 %v5002_v39, %v4886_v10  ;;  %v2529_v52 = vpop.f32.mrb[99].mxu0  ;;  %v2767_v1 = vpop.f32.mrb[143].mxu1  ;;  %v5004_v61 = vadd.f32 %v6269_v15, %v6926_v18 }
 0x242   : > { %4772 = vst [vmem:[%s6426_s12 + $0x30] sm:$0xff] %v4595_v56   ;;  %v3050_v40 = vmul.f32 0.1, %v2765_v38  ;;  %v2768_v3 = vadd.f32 %v5000_v37, %v2767_v1 }
 0x243   : > { %v3053_v50 = vmul.f32 0.1, %v2776_v32  ;;  %v3135_v23 = vmax.f32 %v2773_v31, %v3052_v42  ;;  %v6927_v42 = vld [vmem:[#allocation4_spill] sm:$0xff] }
 0x244   : > { %v3051_v2 = vmul.f32 0.1, %v2768_v3  ;;  %v3133_v12 = vmax.f32 %v2765_v38, %v3050_v40 }
 0x245   : > { %v3136_v25 = vmax.f32 %v2776_v32, %v3053_v50  ;;  %v2173_v32 = vadd.f32 %v6269_v15, %v6927_v42 }
 0x246   : > { %v3134_v17 = vmax.f32 %v2768_v3, %v3051_v2  ;;  %v2532_v49 = vpop.f32.mrb[100].mxu0  ;;  %v4889_v43 = vpop.f32.mrb[144].mxu1 }
 0x247   : > { %v4610_v0 = vpack.c.bf16 %v3136_v25, %v3135_v23  ;;  %v6492_v29 = vadd.f32 %v2532_v49, %v2165_v24  ;;  %v2789_v36 = vadd.f32 %v4889_v43, %v6279_v62  ;;  %v2534_v48 = vpop.f32.mrb[101].mxu0  ;;  %v2780_v34 = vpop.f32.mrb[145].mxu1  ;;  %v6928_v24 = vld [vmem:[#allocation5_spill] sm:$0xff] }
 0x248   : > { %v4605_v28 = vpack.c.bf16 %v3134_v17, %v3133_v12  ;;  %v2781_v47 = vadd.f32 %v5003_v60, %v2780_v34  ;;  %v2535_v39 = vpop.f32.mrb[102].mxu0  ;;  %v4890_v27 = vpop.f32.mrb[146].mxu1 }
 0x249   : > { %4775 = vst [vmem:[%s6426_s12 + $0x48] sm:$0xff] %v4610_v0   ;;  %v3056_v31 = vmul.f32 0.1, %v2789_v36  ;;  %v6498_v4 = vadd.f32 %v2535_v39, %v2168_v21  ;;  %v2792_v35 = vadd.f32 %v4890_v27, %v6287_v22  ;;  %v2537_v37 = vpop.f32.mrb[103].mxu0  ;;  %v2783_v56 = vpop.f32.mrb[147].mxu1  ;;  %v2176_v22 = vadd.f32 %v6269_v15, %v6928_v24  ;;  %v6930_v39 = vld [vmem:[#allocation6_spill] sm:$0xff] }
 0x24a   : > { %4774 = vst [vmem:[%s6426_s12 + $0x40] sm:$0xff] %v4605_v28   ;;  %v3054_v38 = vmul.f32 0.1, %v2781_v47  ;;  %v2784_v62 = vadd.f32 %v5004_v61, %v2783_v56  ;;  %v6929_v61 = vld [vmem:[#allocation24_spill] sm:$0xff]  ;;  %v2181_v27 = vadd.f32 %v6269_v15, %v6930_v39 }
 0x24b   : > { %v3057_v46 = vmul.f32 0.1, %v2792_v35  ;;  %v3139_v52 = vmax.f32 %v2789_v36, %v3056_v31 }
 0x24c   : > { %v3055_v10 = vmul.f32 0.1, %v2784_v62  ;;  %v3137_v40 = vmax.f32 %v2781_v47, %v3054_v38 }
 0x24d   : > { %v3140_v1 = vmax.f32 %v2792_v35, %v3057_v46 }
 0x24e   : > { %v3138_v3 = vmax.f32 %v2784_v62, %v3055_v10  ;;  %v2540_v50 = vpop.f32.mrb[104].mxu0  ;;  %v4893_v2 = vpop.f32.mrb[148].mxu1  ;;  %v6931_v62 = vld [vmem:[#allocation7_spill] sm:$0xff] }
 0x24f   : > { %v4620_v23 = vpack.c.bf16 %v3140_v1, %v3139_v52  ;;  %v6506_v25 = vadd.f32 %v2540_v50, %v2173_v32  ;;  %v2805_v11 = vadd.f32 %v4893_v2, %v6316_v5  ;;  %v2542_v60 = vpop.f32.mrb[105].mxu0  ;;  %v2796_v12 = vpop.f32.mrb[149].mxu1 }
 0x250   : > { %v4615_v17 = vpack.c.bf16 %v3138_v3, %v3137_v40  ;;  %v2797_v49 = vadd.f32 %v2796_v12, %v6297_v13  ;;  %v2543_v43 = vpop.f32.mrb[106].mxu0  ;;  %v4894_v16 = vpop.f32.mrb[150].mxu1 }
 0x251   : > { %4777 = vst [vmem:[%s6426_s12 + $0x58] sm:$0xff] %v4620_v23   ;;  %v3060_v21 = vmul.f32 0.1, %v2805_v11  ;;  %v6511_v0 = vadd.f32 %v2543_v43, %v2176_v22  ;;  %v2808_v36 = vadd.f32 %v4894_v16, %v6322_v53  ;;  %v2545_v48 = vpop.f32.mrb[107].mxu0  ;;  %v2799_v34 = vpop.f32.mrb[151].mxu1  ;;  %v2184_v53 = vadd.f32 %v6269_v15, %v6931_v62 }
 0x252   : > { %4776 = vst [vmem:[%s6426_s12 + $0x50] sm:$0xff] %v4615_v17   ;;  %v3058_v18 = vmul.f32 0.1, %v2797_v49  ;;  %v2800_v28 = vadd.f32 %v2799_v34, %v6929_v61 }
 0x253   : > { %v3061_v5 = vmul.f32 0.1, %v2808_v36  ;;  %v3143_v13 = vmax.f32 %v2805_v11, %v3060_v21 }
 0x254   : > { %v3059_v47 = vmul.f32 0.1, %v2800_v28  ;;  %v3141_v35 = vmax.f32 %v2797_v49, %v3058_v18  ;;  %v6932_v49 = vld [vmem:[#allocation8_spill] sm:$0xff]  ;;  %v6933_v18 = vld [vmem:[#allocation9_spill] sm:$0xff] }
 0x255   : > { %v3144_v31 = vmax.f32 %v2808_v36, %v3061_v5  ;;  %v2189_v43 = vadd.f32 %v6269_v15, %v6932_v49 }
 0x256   : > { %v3142_v37 = vmax.f32 %v2800_v28, %v3059_v47  ;;  %v2548_v56 = vpop.f32.mrb[108].mxu0  ;;  %v4897_v38 = vpop.f32.mrb[152].mxu1 }
 0x257   : > { %v4630_v46 = vpack.c.bf16 %v3144_v31, %v3143_v13  ;;  %v6520_v10 = vadd.f32 %v2548_v56, %v2181_v27  ;;  %v2821_v42 = vadd.f32 %v4897_v38, %v6343_v54  ;;  %v2550_v32 = vpop.f32.mrb[109].mxu0  ;;  %v2812_v52 = vpop.f32.mrb[153].mxu1 }
 0x258   : > { %v4625_v1 = vpack.c.bf16 %v3142_v37, %v3141_v35  ;;  %v2813_v40 = vadd.f32 %v2812_v52, %v6331_v44  ;;  %v2551_v3 = vpop.f32.mrb[110].mxu0  ;;  %v4898_v50 = vpop.f32.mrb[154].mxu1  ;;  %v6934_v32 = vld [vmem:[#allocation10_spill] sm:$0xff] }
 0x259   : > { %4779 = vst [vmem:[%s6426_s12 + $0x68] sm:$0xff] %v4630_v46   ;;  %v3064_v2 = vmul.f32 0.1, %v2821_v42  ;;  %v6525_v24 = vadd.f32 %v2551_v3, %v2184_v53  ;;  %v2824_v22 = vadd.f32 %v4898_v50, %v6347_v20  ;;  %v2553_v23 = vpop.f32.mrb[111].mxu0  ;;  %v2815_v11 = vpop.f32.mrb[155].mxu1  ;;  %v2192_v20 = vadd.f32 %v6269_v15, %v6933_v18 }
 0x25a   : > { %4778 = vst [vmem:[%s6426_s12 + $0x60] sm:$0xff] %v4625_v1   ;;  %v3062_v60 = vmul.f32 0.1, %v2813_v40  ;;  %v2816_v12 = vadd.f32 %v2815_v11, %v6335_v33  ;;  %v2197_v52 = vadd.f32 %v6269_v15, %v6934_v32 }
 0x25b   : > { %v3065_v54 = vmul.f32 0.1, %v2824_v22  ;;  %v3147_v44 = vmax.f32 %v2821_v42, %v3064_v2 }
 0x25c   : > { %v3063_v17 = vmul.f32 0.1, %v2816_v12  ;;  %v3145_v21 = vmax.f32 %v2813_v40, %v3062_v60 }
 0x25d   : > { %v3148_v16 = vmax.f32 %v2824_v22, %v3065_v54  ;;  %v6935_v22 = vld [vmem:[#allocation11_spill] sm:$0xff] }
 0x25e   : > { %v3146_v36 = vmax.f32 %v2816_v12, %v3063_v17  ;;  %v2556_v48 = vpop.f32.mrb[112].mxu0  ;;  %v4901_v34 = vpop.f32.mrb[156].mxu1 }
 0x25f   : > { %v4640_v61 = vpack.c.bf16 %v3148_v16, %v3147_v44  ;;  %v6534_v28 = vadd.f32 %v2556_v48, %v2189_v43  ;;  %v2837_v33 = vadd.f32 %v4901_v34, %v6367_v55  ;;  %v2558_v5 = vpop.f32.mrb[113].mxu0  ;;  %v2828_v47 = vpop.f32.mrb[157].mxu1 }
 0x260   : > { %v4635_v39 = vpack.c.bf16 %v3146_v36, %v3145_v21  ;;  %v2829_v27 = vadd.f32 %v2828_v47, %v6355_v7  ;;  %v2559_v13 = vpop.f32.mrb[114].mxu0  ;;  %v4902_v31 = vpop.f32.mrb[158].mxu1  ;;  %v6936_v21 = vld [vmem:[#allocation39_spill] sm:$0xff]  ;;  %v6938_v5 = vld [vmem:[#allocation12_spill] sm:$0xff] }
 0x261   : > { %4781 = vst [vmem:[%s6426_s12 + $0x78] sm:$0xff] %v4640_v61   ;;  %v3068_v35 = vmul.f32 0.1, %v2837_v33  ;;  %v6539_v37 = vadd.f32 %v2559_v13, %v2192_v20  ;;  %v2840_v56 = vadd.f32 %v4902_v31, %v6371_v59  ;;  %v2561_v38 = vpop.f32.mrb[115].mxu0  ;;  %v2831_v62 = vpop.f32.mrb[159].mxu1  ;;  %v2200_v59 = vadd.f32 %v6269_v15, %v6935_v22  ;;  %v6937_v20 = vld [vmem:[#allocation37_spill] sm:$0xff] }
 0x262   : > { %4780 = vst [vmem:[%s6426_s12 + $0x70] sm:$0xff] %v4635_v39   ;;  %v3066_v53 = vmul.f32 0.1, %v2829_v27  ;;  %v2832_v46 = vadd.f32 %v2831_v62, %v6359_v51  ;;  %v2205_v47 = vadd.f32 %v6269_v15, %v6938_v5 }
 0x263   : > { %v3069_v55 = vmul.f32 0.1, %v2840_v56  ;;  %v3151_v7 = vmax.f32 %v2837_v33, %v3068_v35 }
 0x264   : > { %v3067_v42 = vmul.f32 0.1, %v2832_v46  ;;  %v3149_v40 = vmax.f32 %v2829_v27, %v3066_v53 }
 0x265   : > { %v3152_v1 = vmax.f32 %v2840_v56, %v3069_v55  ;;  %v6939_v56 = vld [vmem:[#allocation13_spill] sm:$0xff] }
 0x266   : > { %v3150_v3 = vmax.f32 %v2832_v46, %v3067_v42  ;;  %v2564_v50 = vpop.f32.mrb[116].mxu0  ;;  %v4905_v2 = vpop.f32.mrb[160].mxu1  ;;  %v2208_v38 = vadd.f32 %v6269_v15, %v6939_v56  ;;  %v6942_v56 = vld [vmem:[#allocation17_spill] sm:$0xff] }
 0x267   : > { %v4650_v23 = vpack.c.bf16 %v3152_v1, %v3151_v7  ;;  %v6548_v11 = vadd.f32 %v2564_v50, %v2197_v52  ;;  %v2853_v51 = vadd.f32 %v4905_v2, %v6391_v8  ;;  %v2566_v60 = vpop.f32.mrb[117].mxu0  ;;  %v2844_v12 = vpop.f32.mrb[161].mxu1 }
 0x268   : > { %v4645_v54 = vpack.c.bf16 %v3150_v3, %v3149_v40  ;;  %v2845_v17 = vadd.f32 %v2844_v12, %v6379_v63  ;;  %v2567_v49 = vpop.f32.mrb[118].mxu0  ;;  %v4906_v43 = vpop.f32.mrb[162].mxu1  ;;  %v6940_v60 = vld [vmem:[#allocation14_spill] sm:$0xff] }
 0x269   : > { %4783 = vst [vmem:[%s6426_s12 + $0x88] sm:$0xff] %v4650_v23   ;;  %v3072_v44 = vmul.f32 0.1, %v2853_v51  ;;  %v6553_v16 = vadd.f32 %v2567_v49, %v2200_v59  ;;  %v2856_v36 = vadd.f32 %v4906_v43, %v6936_v21  ;;  %v2569_v48 = vpop.f32.mrb[119].mxu0  ;;  %v2847_v34 = vpop.f32.mrb[163].mxu1  ;;  %v2213_v12 = vadd.f32 %v6269_v15, %v6940_v60  ;;  %v6941_v21 = vld [vmem:[#allocation15_spill] sm:$0xff] }
 0x26a   : > { %4782 = vst [vmem:[%s6426_s12 + $0x80] sm:$0xff] %v4645_v54   ;;  %v3070_v18 = vmul.f32 0.1, %v2845_v17  ;;  %v2848_v61 = vadd.f32 %v2847_v34, %v6937_v20 }
 0x26b   : > { %v3073_v8 = vmul.f32 0.1, %v2856_v36  ;;  %v3155_v63 = vmax.f32 %v2853_v51, %v3072_v44 }
 0x26c   : > { %v3071_v33 = vmul.f32 0.1, %v2848_v61  ;;  %v3153_v27 = vmax.f32 %v2845_v17, %v3070_v18 }
 0x26d   : > { %v3156_v39 = vmax.f32 %v2856_v36, %v3073_v8 }
 0x26e   : > { %v3154_v13 = vmax.f32 %v2848_v61, %v3071_v33  ;;  %v2572_v31 = vpop.f32.mrb[120].mxu0  ;;  %v4909_v35 = vpop.f32.mrb[164].mxu1 }
 0x26f   : > { %v4660_v62 = vpack.c.bf16 %v3156_v39, %v3155_v63  ;;  %v6562_v53 = vadd.f32 %v2572_v31, %v2205_v47  ;;  %v2869_v46 = vadd.f32 %v4909_v35, %v6422_v45  ;;  %v2574_v55 = vpop.f32.mrb[121].mxu0  ;;  %v2860_v42 = vpop.f32.mrb[165].mxu1 }
 0x270   : > { %v4655_v32 = vpack.c.bf16 %v3154_v13, %v3153_v27  ;;  %v2861_v52 = vadd.f32 %v2860_v42, %v6405_v19  ;;  %v2575_v7 = vpop.f32.mrb[122].mxu0  ;;  %v4910_v1 = vpop.f32.mrb[166].mxu1 }
 0x271   : > { %4785 = vst [vmem:[%s6426_s12 + $0x98] sm:$0xff] %v4660_v62   ;;  %v3076_v40 = vmul.f32 0.1, %v2869_v46  ;;  %v6567_v3 = vadd.f32 %v2575_v7, %v2208_v38  ;;  %v2872_v50 = vadd.f32 %v4910_v1, %v6429_v58  ;;  %v2577_v2 = vpop.f32.mrb[123].mxu0  ;;  %v2863_v22 = vpop.f32.mrb[167].mxu1  ;;  %v2216_v58 = vadd.f32 %v6269_v15, %v6941_v21 }
 0x272   : > { %4784 = vst [vmem:[%s6426_s12 + $0x90] sm:$0xff] %v4655_v32   ;;  %v3074_v59 = vmul.f32 0.1, %v2861_v52  ;;  %v2864_v23 = vadd.f32 %v2863_v22, %v6410_v14  ;;  %v2221_v38 = vadd.f32 %v6269_v15, %v6942_v56 }
 0x273   : > { %v3077_v45 = vmul.f32 0.1, %v2872_v50  ;;  %v3159_v19 = vmax.f32 %v2869_v46, %v3076_v40 }
 0x274   : > { %v3075_v51 = vmul.f32 0.1, %v2864_v23  ;;  %v3157_v17 = vmax.f32 %v2861_v52, %v3074_v59  ;;  %v6943_v52 = vld [vmem:[#allocation19_spill] sm:$0xff] }
 0x275   : > { %v3160_v54 = vmax.f32 %v2872_v50, %v3077_v45 }
 0x276   : > { %v3158_v49 = vmax.f32 %v2864_v23, %v3075_v51  ;;  %v2580_v43 = vpop.f32.mrb[124].mxu0  ;;  %v4913_v44 = vpop.f32.mrb[168].mxu1 }
 0x277   : > { %v4670_v36 = vpack.c.bf16 %v3160_v54, %v3159_v19  ;;  %v6576_v48 = vadd.f32 %v2580_v43, %v2213_v12  ;;  %v2885_v14 = vadd.f32 %v4913_v44, %v6460_v41  ;;  %v2582_v34 = vpop.f32.mrb[125].mxu0  ;;  %v2876_v18 = vpop.f32.mrb[169].mxu1 }
 0x278   : > { %v4665_v20 = vpack.c.bf16 %v3158_v49, %v3157_v17  ;;  %v2877_v61 = vadd.f32 %v2876_v18, %v6442_v30  ;;  %v2583_v8 = vpop.f32.mrb[126].mxu0  ;;  %v4914_v33 = vpop.f32.mrb[170].mxu1  ;;  %v6944_v49 = vld [vmem:[#allocation20_spill] sm:$0xff]  ;;  %v6945_v34 = vld [vmem:[#allocation21_spill] sm:$0xff] }
 0x279   : > { %4787 = vst [vmem:[%s6426_s12 + $0xa8] sm:$0xff] %v4670_v36   ;;  %v3080_v5 = vmul.f32 0.1, %v2885_v14  ;;  %v6581_v47 = vadd.f32 %v2583_v8, %v2216_v58  ;;  %v2888_v63 = vadd.f32 %v4914_v33, %v6465_v6  ;;  %v2585_v39 = vpop.f32.mrb[127].mxu0  ;;  %v2879_v27 = vpop.f32.mrb[171].mxu1  ;;  %v2224_v6 = vadd.f32 %v6269_v15, %v6943_v52 }
 0x27a   : > { %4786 = vst [vmem:[%s6426_s12 + $0xa0] sm:$0xff] %v4665_v20   ;;  %v3078_v13 = vmul.f32 0.1, %v2877_v61  ;;  %v2880_v31 = vadd.f32 %v2879_v27, %v6447_v9 }
 0x27b   : > { %v3081_v41 = vmul.f32 0.1, %v2888_v63  ;;  %v3163_v30 = vmax.f32 %v2885_v14, %v3080_v5 }
 0x27c   : > { %v3079_v35 = vmul.f32 0.1, %v2880_v31  ;;  %v3161_v46 = vmax.f32 %v2877_v61, %v3078_v13 }
 0x27d   : > { %v3164_v62 = vmax.f32 %v2888_v63, %v3081_v41 }
 0x27e   : > { %v3162_v55 = vmax.f32 %v2880_v31, %v3079_v35  ;;  %v2588_v42 = vpop.f32.mrb[128].mxu0  ;;  %v4917_v32 = vpop.f32.mrb[172].mxu1 }
 0x27f   : > { %v4680_v7 = vpack.c.bf16 %v3164_v62, %v3163_v30  ;;  %v6590_v1 = vadd.f32 %v2588_v42, %v2221_v38  ;;  %v2901_v9 = vadd.f32 %v4917_v32, %v6492_v29  ;;  %v2590_v40 = vpop.f32.mrb[129].mxu0  ;;  %v2892_v50 = vpop.f32.mrb[173].mxu1 }
 0x280   : > { %v4675_v2 = vpack.c.bf16 %v3162_v55, %v3161_v46  ;;  %v2893_v22 = vadd.f32 %v2892_v50, %v6478_v26  ;;  %v2591_v59 = vpop.f32.mrb[130].mxu0  ;;  %v4918_v23 = vpop.f32.mrb[174].mxu1  ;;  %v6603_v26 = vld [vmem:[%s6884_s2] ss:$0 sm:$0xff]  ;;  %v6946_v46 = vld [vmem:[#allocation22_spill] sm:$0xff] }
 0x281   : > { %4789 = vst [vmem:[%s6426_s12 + $0xb8] sm:$0xff] %v4680_v7   ;;  %v3084_v45 = vmul.f32 0.1, %v2901_v9  ;;  %v6595_v51 = vadd.f32 %v2591_v59, %v2224_v6  ;;  %v2904_v60 = vadd.f32 %v4918_v23, %v6498_v4  ;;  %v2593_v15 = vpop.f32.mrb[131].mxu0  ;;  %v2895_v12 = vpop.f32.mrb[175].mxu1  ;;  %v2229_v43 = vadd.f32 %v6603_v26, %v6944_v49 }
 0x282   : > { %4788 = vst [vmem:[%s6426_s12 + $0xb0] sm:$0xff] %v4675_v2   ;;  %v3082_v19 = vmul.f32 0.1, %v2893_v22  ;;  %v2896_v54 = vadd.f32 %v2895_v12, %v6483_v57  ;;  %v2232_v57 = vadd.f32 %v6603_v26, %v6945_v34  ;;  %v2237_v55 = vadd.f32 %v6603_v26, %v6946_v46  ;;  %v6950_v46 = vld [vmem:[#allocation27_spill] sm:$0xff] }
 0x283   : > { %v3085_v29 = vmul.f32 0.1, %v2904_v60  ;;  %v3167_v44 = vmax.f32 %v2901_v9, %v3084_v45  ;;  %v6947_v9 = vld [vmem:[#allocation23_spill] sm:$0xff] }
 0x284   : > { %v3083_v17 = vmul.f32 0.1, %v2896_v54  ;;  %v3165_v4 = vmax.f32 %v2893_v22, %v3082_v19 }
 0x285   : > { %v3168_v21 = vmax.f32 %v2904_v60, %v3085_v29 }
 0x286   : > { %v3166_v58 = vmax.f32 %v2896_v54, %v3083_v17  ;;  %v2596_v36 = vpop.f32.mrb[132].mxu0  ;;  %v4921_v14 = vpop.f32.mrb[176].mxu1 }
 0x287   : > { %v4690_v18 = vpack.c.bf16 %v3168_v21, %v3167_v44  ;;  %v6609_v20 = vadd.f32 %v2596_v36, %v2229_v43  ;;  %v2917_v61 = vadd.f32 %v4921_v14, %v6520_v10  ;;  %v2598_v8 = vpop.f32.mrb[133].mxu0  ;;  %v2908_v33 = vpop.f32.mrb[177].mxu1  ;;  %v6948_v44 = vld [vmem:[#allocation25_spill] sm:$0xff] }
 0x288   : > { %v4685_v5 = vpack.c.bf16 %v3166_v58, %v3165_v4  ;;  %v2909_v63 = vadd.f32 %v2908_v33, %v6506_v25  ;;  %v2599_v39 = vpop.f32.mrb[134].mxu0  ;;  %v4922_v27 = vpop.f32.mrb[178].mxu1  ;;  %v2245_v21 = vadd.f32 %v6603_v26, %v6948_v44 }
 0x289   : > { %4791 = vst [vmem:[%s6426_s12 + $0xc8] sm:$0xff] %v4690_v18   ;;  %v3088_v13 = vmul.f32 0.1, %v2917_v61  ;;  %v6614_v31 = vadd.f32 %v2599_v39, %v2232_v57  ;;  %v2920_v41 = vadd.f32 %v4922_v27, %v6525_v24  ;;  %v2601_v35 = vpop.f32.mrb[135].mxu0  ;;  %v2911_v56 = vpop.f32.mrb[179].mxu1  ;;  %v2240_v24 = vadd.f32 %v6603_v26, %v6947_v9  ;;  %v6949_v57 = vld [vmem:[#allocation26_spill] sm:$0xff] }
 0x28a   : > { %4790 = vst [vmem:[%s6426_s12 + $0xc0] sm:$0xff] %v4685_v5   ;;  %v3086_v38 = vmul.f32 0.1, %v2909_v63  ;;  %v2912_v30 = vadd.f32 %v2911_v56, %v6511_v0 }
 0x28b   : > { %v3089_v10 = vmul.f32 0.1, %v2920_v41  ;;  %v3171_v25 = vmax.f32 %v2917_v61, %v3088_v13 }
 0x28c   : > { %v3087_v62 = vmul.f32 0.1, %v2912_v30  ;;  %v3169_v32 = vmax.f32 %v2909_v63, %v3086_v38 }
 0x28d   : > { %v3172_v42 = vmax.f32 %v2920_v41, %v3089_v10 }
 0x28e   : > { %v3170_v52 = vmax.f32 %v2912_v30, %v3087_v62  ;;  %v2604_v6 = vpop.f32.mrb[136].mxu0  ;;  %v4925_v7 = vpop.f32.mrb[180].mxu1 }
 0x28f   : > { %v4700_v40 = vpack.c.bf16 %v3172_v42, %v3171_v25  ;;  %v6623_v50 = vadd.f32 %v2604_v6, %v2237_v55  ;;  %v2933_v0 = vadd.f32 %v4925_v7, %v6548_v11  ;;  %v2606_v2 = vpop.f32.mrb[137].mxu0  ;;  %v2924_v22 = vpop.f32.mrb[181].mxu1  ;;  %v2253_v55 = vadd.f32 %v6603_v26, %v6950_v46  ;;  %v6951_v7 = vld [vmem:[#allocation28_spill] sm:$0xff] }
 0x290   : > { %v4695_v59 = vpack.c.bf16 %v3170_v52, %v3169_v32  ;;  %v2925_v23 = vadd.f32 %v2924_v22, %v6534_v28  ;;  %v2607_v45 = vpop.f32.mrb[138].mxu0  ;;  %v4926_v60 = vpop.f32.mrb[182].mxu1 }
 0x291   : > { %4793 = vst [vmem:[%s6426_s12 + $0xd8] sm:$0xff] %v4700_v40   ;;  %v3092_v15 = vmul.f32 0.1, %v2933_v0  ;;  %v6628_v12 = vadd.f32 %v2607_v45, %v2240_v24  ;;  %v2936_v19 = vadd.f32 %v4926_v60, %v6553_v16  ;;  %v2609_v54 = vpop.f32.mrb[139].mxu0  ;;  %v2927_v29 = vpop.f32.mrb[183].mxu1  ;;  %v2248_v16 = vadd.f32 %v6603_v26, %v6949_v57 }
 0x292   : > { %4792 = vst [vmem:[%s6426_s12 + $0xd0] sm:$0xff] %v4695_v59   ;;  %v3090_v17 = vmul.f32 0.1, %v2925_v23  ;;  %v2928_v49 = vadd.f32 %v2927_v29, %v6539_v37 }
 0x293   : > { %v3093_v11 = vmul.f32 0.1, %v2936_v19  ;;  %v3175_v28 = vmax.f32 %v2933_v0, %v3092_v15 }
 0x294   : > { %v3091_v43 = vmul.f32 0.1, %v2928_v49  ;;  %v3173_v58 = vmax.f32 %v2925_v23, %v3090_v17 }
 0x295   : > { %v3176_v4 = vmax.f32 %v2936_v19, %v3093_v11  ;;  %v6952_v11 = vld [vmem:[#allocation29_spill] sm:$0xff] }
 0x296   : > { %v3174_v36 = vmax.f32 %v2928_v49, %v3091_v43  ;;  %v2612_v14 = vpop.f32.mrb[140].mxu0  ;;  %v4929_v34 = vpop.f32.mrb[184].mxu1  ;;  %v2261_v43 = vadd.f32 %v6603_v26, %v6952_v11 }
 0x297   : > { %v4710_v18 = vpack.c.bf16 %v3176_v4, %v3175_v28  ;;  %v2613_v61 = vadd.f32 %v2612_v14, %v2245_v21  ;;  %v2949_v37 = vadd.f32 %v4929_v34, %v6576_v48  ;;  %v2614_v8 = vpop.f32.mrb[141].mxu0  ;;  %v2940_v33 = vpop.f32.mrb[185].mxu1 }
 0x298   : > { %v4705_v5 = vpack.c.bf16 %v3174_v36, %v3173_v58  ;;  %v2941_v63 = vadd.f32 %v2940_v33, %v6562_v53  ;;  %v2615_v39 = vpop.f32.mrb[142].mxu0  ;;  %v4930_v27 = vpop.f32.mrb[186].mxu1  ;;  %v6953_v36 = vld [vmem:[#allocation30_spill] sm:$0xff] }
 0x299   : > { %4795 = vst [vmem:[%s6426_s12 + $0xe8] sm:$0xff] %v4710_v18   ;;  %v3096_v13 = vmul.f32 0.1, %v2949_v37  ;;  %v2616_v41 = vadd.f32 %v2615_v39, %v2248_v16  ;;  %v2952_v35 = vadd.f32 %v4930_v27, %v6581_v47  ;;  %v2617_v56 = vpop.f32.mrb[143].mxu0  ;;  %v2943_v38 = vpop.f32.mrb[187].mxu1  ;;  %v2256_v47 = vadd.f32 %v6603_v26, %v6951_v7 }
 0x29a   : > { %4794 = vst [vmem:[%s6426_s12 + $0xe0] sm:$0xff] %v4705_v5   ;;  %v3094_v30 = vmul.f32 0.1, %v2941_v63  ;;  %v2944_v10 = vadd.f32 %v2943_v38, %v6567_v3 }
 0x29b   : > { %v3097_v62 = vmul.f32 0.1, %v2952_v35  ;;  %v3179_v25 = vmax.f32 %v2949_v37, %v3096_v13 }
 0x29c   : > { %v3095_v48 = vmul.f32 0.1, %v2944_v10  ;;  %v3177_v42 = vmax.f32 %v2941_v63, %v3094_v30 }
 0x29d   : > { %v3180_v53 = vmax.f32 %v2952_v35, %v3097_v62 }
 0x29e   : > { %v3178_v32 = vmax.f32 %v2944_v10, %v3095_v48  ;;  %v2620_v52 = vpop.f32.mrb[144].mxu0  ;;  %v4933_v6 = vpop.f32.mrb[188].mxu1 }
 0x29f   : > { %v4720_v9 = vpack.c.bf16 %v3180_v53, %v3179_v25  ;;  %v2621_v24 = vadd.f32 %v2620_v52, %v2253_v55  ;;  %v2965_v3 = vadd.f32 %v4933_v6, %v6609_v20  ;;  %v2622_v40 = vpop.f32.mrb[145].mxu0  ;;  %v2956_v0 = vpop.f32.mrb[189].mxu1  ;;  %v6955_v53 = vld [vmem:[#allocation32_spill] sm:$0xff] }
 0x2a0   : > { %v4715_v2 = vpack.c.bf16 %v3178_v32, %v3177_v42  ;;  %v2957_v22 = vadd.f32 %v2956_v0, %v6590_v1  ;;  %v2623_v59 = vpop.f32.mrb[146].mxu0  ;;  %v4934_v23 = vpop.f32.mrb[190].mxu1 }
 0x2a1   : > { %4797 = vst [vmem:[%s6426_s12 + $0xf8] sm:$0xff] %v4720_v9   ;;  %v3100_v45 = vmul.f32 0.1, %v2965_v3  ;;  %v2624_v60 = vadd.f32 %v2623_v59, %v2256_v47  ;;  %v2968_v15 = vadd.f32 %v4934_v23, %v6614_v31  ;;  %v2625_v19 = vpop.f32.mrb[147].mxu0  ;;  %v2959_v54 = vpop.f32.mrb[191].mxu1  ;;  %v2264_v31 = vadd.f32 %v6603_v26, %v6953_v36 }
 0x2a2   : > { %4796 = vst [vmem:[%s6426_s12 + $0xf0] sm:$0xff] %v4715_v2   ;;  %v3098_v29 = vmul.f32 0.1, %v2957_v22  ;;  %v2960_v17 = vadd.f32 %v2959_v54, %v6595_v51  ;;  %v6956_v54 = vld [vmem:[#allocation33_spill] sm:$0xff] }
 0x2a3   : > { %v3101_v49 = vmul.f32 0.1, %v2968_v15  ;;  %v3183_v44 = vmax.f32 %v2965_v3, %v3100_v45 }
 0x2a4   : > { %v3099_v20 = vmul.f32 0.1, %v2960_v17  ;;  %v3181_v21 = vmax.f32 %v2957_v22, %v3098_v29  ;;  %v2277_v29 = vadd.f32 %v6603_v26, %v6956_v54 }
 0x2a5   : > { %v3184_v1 = vmax.f32 %v2968_v15, %v3101_v49 }
 0x2a6   : > { %v3182_v28 = vmax.f32 %v2960_v17, %v3099_v20  ;;  %v2628_v4 = vpop.f32.mrb[148].mxu0  ;;  %v4937_v58 = vpop.f32.mrb[192].mxu1 }
 0x2a7   : > { %v4730_v14 = vpack.c.bf16 %v3184_v1, %v3183_v44  ;;  %v2629_v34 = vadd.f32 %v2628_v4, %v2261_v43  ;;  %v2981_v57 = vadd.f32 %v4937_v58, %v2613_v61  ;;  %v2630_v51 = vpop.f32.mrb[149].mxu0  ;;  %v2972_v16 = vpop.f32.mrb[193].mxu1  ;;  %v6954_v61 = vld [vmem:[#allocation31_spill] sm:$0xff]  ;;  %v6957_v44 = vld [vmem:[#allocation34_spill] sm:$0xff] }
 0x2a8   : > { %v4725_v18 = vpack.c.bf16 %v3182_v28, %v3181_v21  ;;  %v2973_v37 = vadd.f32 %v2972_v16, %v6623_v50  ;;  %v2631_v8 = vpop.f32.mrb[150].mxu0  ;;  %v4938_v33 = vpop.f32.mrb[194].mxu1  ;;  %v2269_v10 = vadd.f32 %v6603_v26, %v6954_v61  ;;  %v2280_v1 = vadd.f32 %v6603_v26, %v6957_v44 }
 0x2a9   : > { %4799 = vst [vmem:[%s6426_s12 + $0x108] sm:$0xff] %v4730_v14   ;;  %v3104_v5 = vmul.f32 0.1, %v2981_v57  ;;  %v2632_v63 = vadd.f32 %v2631_v8, %v2264_v31  ;;  %v2984_v39 = vadd.f32 %v4938_v33, %v2616_v41  ;;  %v2633_v27 = vpop.f32.mrb[151].mxu0  ;;  %v2975_v13 = vpop.f32.mrb[195].mxu1  ;;  %v2272_v41 = vadd.f32 %v6603_v26, %v6955_v53 }
 0x2aa   : > { %4798 = vst [vmem:[%s6426_s12 + $0x100] sm:$0xff] %v4725_v18   ;;  %v3102_v35 = vmul.f32 0.1, %v2973_v37  ;;  %v2976_v56 = vadd.f32 %v2975_v13, %v6628_v12 }
 0x2ab   : > { %v3105_v38 = vmul.f32 0.1, %v2984_v39  ;;  %v3187_v62 = vmax.f32 %v2981_v57, %v3104_v5 }
 0x2ac   : > { %v3103_v30 = vmul.f32 0.1, %v2976_v56  ;;  %v3185_v48 = vmax.f32 %v2973_v37, %v3102_v35 }
 0x2ad   : > { %v3188_v50 = vmax.f32 %v2984_v39, %v3105_v38 }
 0x2ae   : > { %v3186_v46 = vmax.f32 %v2976_v56, %v3103_v30  ;;  %v2636_v55 = vpop.f32.mrb[152].mxu0  ;;  %v4941_v25 = vpop.f32.mrb[196].mxu1  ;;  %v6959_v30 = vld [vmem:[#allocation36_spill] sm:$0xff] }
 0x2af   : > { %v4740_v42 = vpack.c.bf16 %v3188_v50, %v3187_v62  ;;  %v2637_v32 = vadd.f32 %v2636_v55, %v2269_v10  ;;  %v2997_v52 = vadd.f32 %v4941_v25, %v2629_v34  ;;  %v2638_v12 = vpop.f32.mrb[153].mxu0  ;;  %v2988_v6 = vpop.f32.mrb[197].mxu1  ;;  %v2288_v61 = vadd.f32 %v6603_v26, %v6959_v30 }
 0x2b0   : > { %v4735_v7 = vpack.c.bf16 %v3186_v46, %v3185_v48  ;;  %v2989_v47 = vadd.f32 %v2988_v6, %v2621_v24  ;;  %v2639_v9 = vpop.f32.mrb[154].mxu0  ;;  %v4942_v3 = vpop.f32.mrb[198].mxu1 }
 0x2b1   : > { %4801 = vst [vmem:[%s6426_s12 + $0x118] sm:$0xff] %v4740_v42   ;;  %v3108_v40 = vmul.f32 0.1, %v2997_v52  ;;  %v2640_v0 = vadd.f32 %v2639_v9, %v2272_v41  ;;  %v3000_v2 = vadd.f32 %v4942_v3, %v2632_v63  ;;  %v2641_v22 = vpop.f32.mrb[155].mxu0  ;;  %v2991_v59 = vpop.f32.mrb[199].mxu1  ;;  %v6958_v63 = vld [vmem:[#allocation35_spill] sm:$0xff] }
 0x2b2   : > { %4800 = vst [vmem:[%s6426_s12 + $0x110] sm:$0xff] %v4735_v7   ;;  %v3106_v23 = vmul.f32 0.1, %v2989_v47  ;;  %v2992_v45 = vadd.f32 %v2991_v59, %v2624_v60  ;;  %v2285_v39 = vadd.f32 %v6603_v26, %v6958_v63 }
 0x2b3   : > { %v3109_v15 = vmul.f32 0.1, %v3000_v2  ;;  %v3191_v17 = vmax.f32 %v2997_v52, %v3108_v40 }
 0x2b4   : > { %v3107_v19 = vmul.f32 0.1, %v2992_v45  ;;  %v3189_v24 = vmax.f32 %v2989_v47, %v3106_v23  ;;  %v6960_v47 = vld [vmem:[#allocation38_spill] sm:$0xff] }
 0x2b5   : > { %v3192_v49 = vmax.f32 %v3000_v2, %v3109_v15  ;;  %v2293_v9 = vadd.f32 %v6603_v26, %v6960_v47 }
 0x2b6   : > { %v3190_v20 = vmax.f32 %v2992_v45, %v3107_v19  ;;  %v2644_v11 = vpop.f32.mrb[156].mxu0  ;;  %v4945_v43 = vpop.f32.mrb[200].mxu1 }
 0x2b7   : > { %v4750_v21 = vpack.c.bf16 %v3192_v49, %v3191_v17  ;;  %v2645_v28 = vadd.f32 %v2644_v11, %v2277_v29  ;;  %v2646_v4 = vpop.f32.mrb[157].mxu0  ;;  %v3004_v60 = vpop.f32.mrb[201].mxu1 }
 0x2b8   : > { %v4745_v58 = vpack.c.bf16 %v3190_v20, %v3189_v24  ;;  %v3005_v36 = vadd.f32 %v3004_v60, %v2637_v32  ;;  %v2647_v31 = vpop.f32.mrb[158].mxu0  ;;  %v4946_v14 = vpop.f32.mrb[202].mxu1 }
 0x2b9   : > { %4803 = vst [vmem:[%s6426_s12 + $0x128] sm:$0xff] %v4750_v21   ;;  %v3013_v34 = vadd.f32 %v4945_v43, %v2645_v28  ;;  %v2648_v57 = vadd.f32 %v2647_v31, %v2280_v1  ;;  %v2649_v51 = vpop.f32.mrb[159].mxu0  ;;  %v3007_v16 = vpop.f32.mrb[203].mxu1 }
 0x2ba   : > { %4802 = vst [vmem:[%s6426_s12 + $0x120] sm:$0xff] %v4745_v58   ;;  %v3110_v18 = vmul.f32 0.1, %v3005_v36  ;;  %v3008_v37 = vadd.f32 %v3007_v16, %v2640_v0 }
 0x2bb   : > { %v3112_v8 = vmul.f32 0.1, %v3013_v34  ;;  %v3016_v33 = vadd.f32 %v4946_v14, %v2648_v57 }
 0x2bc   : > { %v3111_v5 = vmul.f32 0.1, %v3008_v37  ;;  %v3193_v13 = vmax.f32 %v3005_v36, %v3110_v18 }
 0x2bd   : > { %v3113_v27 = vmul.f32 0.1, %v3016_v33  ;;  %v3195_v10 = vmax.f32 %v3013_v34, %v3112_v8 }
 0x2be   : > { %v3194_v35 = vmax.f32 %v3008_v37, %v3111_v5  ;;  %v2652_v56 = vpop.f32.mrb[160].mxu0  ;;  %v4949_v38 = vpop.f32.mrb[204].mxu1 }
 0x2bf   : > { %v3196_v62 = vmax.f32 %v3016_v33, %v3113_v27  ;;  %v2653_v50 = vadd.f32 %v2652_v56, %v2285_v39  ;;  %v2654_v48 = vpop.f32.mrb[161].mxu0  ;;  %v3020_v46 = vpop.f32.mrb[205].mxu1 }
 0x2c0   : > { %v4755_v55 = vpack.c.bf16 %v3194_v35, %v3193_v13  ;;  %v2655_v25 = vpop.f32.mrb[162].mxu0  ;;  %v4950_v53 = vpop.f32.mrb[206].mxu1 }
 0x2c1   : > { %v4760_v41 = vpack.c.bf16 %v3196_v62, %v3195_v10  ;;  %v2656_v42 = vadd.f32 %v2655_v25, %v2288_v61  ;;  %v3021_v32 = vadd.f32 %v3020_v46, %v2653_v50  ;;  %v2657_v52 = vpop.f32.mrb[163].mxu0  ;;  %v3023_v12 = vpop.f32.mrb[207].mxu1 }
 0x2c2   : > { %4804 = vst [vmem:[%s6426_s12 + $0x130] sm:$0xff] %v4755_v55  }
 0x2c3   : > { %4805 = vst [vmem:[%s6426_s12 + $0x138] sm:$0xff] %v4760_v41   ;;  %v3114_v6 = vmul.f32 0.1, %v3021_v32  ;;  %v3024_v7 = vadd.f32 %v3023_v12, %v2656_v42 }
 0x2c5   : > { %v3115_v3 = vmul.f32 0.1, %v3024_v7  ;;  %v3197_v0 = vmax.f32 %v3021_v32, %v3114_v6 }
 0x2c6   : > { %v2660_v40 = vpop.f32.mrb[164].mxu0 }
 0x2c7   : > { %v3198_v2 = vmax.f32 %v3024_v7, %v3115_v3  ;;  %v2661_v22 = vadd.f32 %v2660_v40, %v2293_v9  ;;  %v2662_v59 = vpop.f32.mrb[165].mxu0 }
 0x2c8   : > { %v2663_v23 = vpop.f32.mrb[166].mxu0 }
 0x2c9   : > { %v4765_v45 = vpack.c.bf16 %v3198_v2, %v3197_v0  ;;  %v3029_v15 = vadd.f32 %v4949_v38, %v2661_v22  ;;  %v2664_v19 = vpop.f32.mrb[167].mxu0 }
 0x2cb   : > { %4806 = vst [vmem:[%s6426_s12 + $0x140] sm:$0xff] %v4765_v45   ;;  %v3116_v54 = vmul.f32 0.1, %v3029_v15  ;;  %3622 = sbr.rel (!%p5726_p4) target bundleno = 813 (0x32d), region = 36 }
 0x2cd   : > { %v3199_v29 = vmax.f32 %v3029_v15, %v3116_v54 }
 0x2cf   : > { %v4558_v17 = vpack.c.bf16 %v3199_v29, %v3199_v29 }
 0x2d1   : > { %3615 = vst [vmem:[%s6426_s12 + $0x148] sm:$0xf] %v4558_v17 }
 0x2d2   : > { %s6968_s4 = smov (!%p3625_p8, %s3624_s4), 83 }
 0x2d3   : > { %s4461_s10 = sshll.u32 %s6968_s4, 6 }
 0x2d4   : > { %p4464_p9 = scmp.eq.s32.totalorder %s4461_s10, 0 }
 0x2d5   : > { %s6696_s11 = sshrl.u32 (!%p4464_p9), %s6968_s4, 6 }
 0x2d6   : > { %3633 = sbr.rel (%p4464_p9) target bundleno = 813 (0x32d), region = 40  ;;  %p4465_p10 = scmp.le.s32.totalorder (!%p4464_p9), %s6696_s11, 0 }
 0x2dd   : > { %4038 = sbr.rel (%p4465_p10) target bundleno = 792 (0x318), region = 112  ;;  %s6961_s15 = smov (!%p4465_p10), %s6690_s8 }
 0x2de   : > { %s6962_s20 = smov (!%p4465_p10), %s6426_s12  ;;  %s6705_s23 = smov (!%p4465_p10), 0  }
 0x2df   : > { %s6707_s14 = smov (!%p4465_p10), 0  }
 0x2e4 LB: >> { %v3649_v26 = vld [vmem:[%s5654_s20] sm:$0xf]  ;;  %v3651_v49 = vld [vmem:[%s5654_s20 + $0x4] sm:$0xf]  ;;  %v3653_v24 = vld [vmem:[%s5654_s20 + $0x8] sm:$0xf]  ;;  %s5662_s14 = sphi %s6707_s14, %s3643_s14   ;;  %s5658_s23 = sphi %s6705_s23, %s6963_s23   ;;  %s5654_s20 = sphi %s6962_s20, %s3782_s20   ;;  %s5650_s15 = sphi %s6961_s15, %s3783_s15  }
 0x2e5   : >> { %3650 = vst [vmem:[%s5650_s15] sm:$0xf] %v3649_v26  ;;  %3652 = vst [vmem:[%s5650_s15 + $0x4] sm:$0xf] %v3651_v49  ;;  %v3655_v20 = vld [vmem:[%s5654_s20 + $0xc] sm:$0xf]  ;;  %s3777_s17 = sadd.s32 1, %s5658_s23 }
 0x2e6   : >> { %3654 = vst [vmem:[%s5650_s15 + $0x8] sm:$0xf] %v3653_v24  ;;  %v3657_v11 = vld [vmem:[%s5654_s20 + $0x10] sm:$0xf]  ;;  %v3659_v43 = vld [vmem:[%s5654_s20 + $0x14] sm:$0xf]  ;;  %p3778_p11 = scmp.ge.s32.totalorder %s3777_s17, %s6696_s11 }
 0x2e7   : >> { %3656 = vst [vmem:[%s5650_s15 + $0xc] sm:$0xf] %v3655_v20  ;;  %3658 = vst [vmem:[%s5650_s15 + $0x10] sm:$0xf] %v3657_v11  ;;  %v3661_v44 = vld [vmem:[%s5654_s20 + $0x18] sm:$0xf] }
 0x2e8   : >> { %3660 = vst [vmem:[%s5650_s15 + $0x14] sm:$0xf] %v3659_v43  ;;  %v3663_v1 = vld [vmem:[%s5654_s20 + $0x1c] sm:$0xf]  ;;  %v3665_v21 = vld [vmem:[%s5654_s20 + $0x20] sm:$0xf] }
 0x2e9   : >> { %3662 = vst [vmem:[%s5650_s15 + $0x18] sm:$0xf] %v3661_v44  ;;  %3664 = vst [vmem:[%s5650_s15 + $0x1c] sm:$0xf] %v3663_v1  ;;  %v3667_v28 = vld [vmem:[%s5654_s20 + $0x24] sm:$0xf] }
 0x2ea   : >> { %3666 = vst [vmem:[%s5650_s15 + $0x20] sm:$0xf] %v3665_v21  ;;  %v3669_v4 = vld [vmem:[%s5654_s20 + $0x28] sm:$0xf]  ;;  %v3671_v60 = vld [vmem:[%s5654_s20 + $0x2c] sm:$0xf] }
 0x2eb   : >> { %3668 = vst [vmem:[%s5650_s15 + $0x24] sm:$0xf] %v3667_v28  ;;  %3670 = vst [vmem:[%s5650_s15 + $0x28] sm:$0xf] %v3669_v4  ;;  %v3673_v58 = vld [vmem:[%s5654_s20 + $0x30] sm:$0xf] }
 0x2ec   : >> { %3672 = vst [vmem:[%s5650_s15 + $0x2c] sm:$0xf] %v3671_v60  ;;  %v3675_v36 = vld [vmem:[%s5654_s20 + $0x34] sm:$0xf]  ;;  %v3677_v31 = vld [vmem:[%s5654_s20 + $0x38] sm:$0xf] }
 0x2ed   : >> { %3674 = vst [vmem:[%s5650_s15 + $0x30] sm:$0xf] %v3673_v58  ;;  %3676 = vst [vmem:[%s5650_s15 + $0x34] sm:$0xf] %v3675_v36  ;;  %v3679_v14 = vld [vmem:[%s5654_s20 + $0x3c] sm:$0xf] }
 0x2ee   : >> { %3678 = vst [vmem:[%s5650_s15 + $0x38] sm:$0xf] %v3677_v31  ;;  %v3681_v34 = vld [vmem:[%s5654_s20 + $0x40] sm:$0xf]  ;;  %v3683_v57 = vld [vmem:[%s5654_s20 + $0x44] sm:$0xf] }
 0x2ef   : >> { %3680 = vst [vmem:[%s5650_s15 + $0x3c] sm:$0xf] %v3679_v14  ;;  %3682 = vst [vmem:[%s5650_s15 + $0x40] sm:$0xf] %v3681_v34  ;;  %v3685_v51 = vld [vmem:[%s5654_s20 + $0x48] sm:$0xf] }
 0x2f0   : >> { %3684 = vst [vmem:[%s5650_s15 + $0x44] sm:$0xf] %v3683_v57  ;;  %v3687_v16 = vld [vmem:[%s5654_s20 + $0x4c] sm:$0xf]  ;;  %v3689_v18 = vld [vmem:[%s5654_s20 + $0x50] sm:$0xf] }
 0x2f1   : >> { %3686 = vst [vmem:[%s5650_s15 + $0x48] sm:$0xf] %v3685_v51  ;;  %3688 = vst [vmem:[%s5650_s15 + $0x4c] sm:$0xf] %v3687_v16  ;;  %v3691_v37 = vld [vmem:[%s5654_s20 + $0x54] sm:$0xf] }
 0x2f2   : >> { %3690 = vst [vmem:[%s5650_s15 + $0x50] sm:$0xf] %v3689_v18  ;;  %v3693_v8 = vld [vmem:[%s5654_s20 + $0x58] sm:$0xf]  ;;  %v3695_v33 = vld [vmem:[%s5654_s20 + $0x5c] sm:$0xf] }
 0x2f3   : >> { %3692 = vst [vmem:[%s5650_s15 + $0x54] sm:$0xf] %v3691_v37  ;;  %3694 = vst [vmem:[%s5650_s15 + $0x58] sm:$0xf] %v3693_v8  ;;  %v3697_v5 = vld [vmem:[%s5654_s20 + $0x60] sm:$0xf] }
 0x2f4   : >> { %3696 = vst [vmem:[%s5650_s15 + $0x5c] sm:$0xf] %v3695_v33  ;;  %v3699_v63 = vld [vmem:[%s5654_s20 + $0x64] sm:$0xf]  ;;  %v3701_v39 = vld [vmem:[%s5654_s20 + $0x68] sm:$0xf] }
 0x2f5   : >> { %3698 = vst [vmem:[%s5650_s15 + $0x60] sm:$0xf] %v3697_v5  ;;  %3700 = vst [vmem:[%s5650_s15 + $0x64] sm:$0xf] %v3699_v63  ;;  %v3703_v27 = vld [vmem:[%s5654_s20 + $0x6c] sm:$0xf] }
 0x2f6   : >> { %3702 = vst [vmem:[%s5650_s15 + $0x68] sm:$0xf] %v3701_v39  ;;  %v3705_v13 = vld [vmem:[%s5654_s20 + $0x70] sm:$0xf]  ;;  %v3707_v35 = vld [vmem:[%s5654_s20 + $0x74] sm:$0xf] }
 0x2f7   : >> { %3704 = vst [vmem:[%s5650_s15 + $0x6c] sm:$0xf] %v3703_v27  ;;  %3706 = vst [vmem:[%s5650_s15 + $0x70] sm:$0xf] %v3705_v13  ;;  %v3709_v56 = vld [vmem:[%s5654_s20 + $0x78] sm:$0xf] }
 0x2f8   : >> { %3708 = vst [vmem:[%s5650_s15 + $0x74] sm:$0xf] %v3707_v35  ;;  %v3711_v38 = vld [vmem:[%s5654_s20 + $0x7c] sm:$0xf]  ;;  %v3713_v30 = vld [vmem:[%s5654_s20 + $0x80] sm:$0xf] }
 0x2f9   : >> { %3710 = vst [vmem:[%s5650_s15 + $0x78] sm:$0xf] %v3709_v56  ;;  %3712 = vst [vmem:[%s5650_s15 + $0x7c] sm:$0xf] %v3711_v38  ;;  %v3715_v61 = vld [vmem:[%s5654_s20 + $0x84] sm:$0xf] }
 0x2fa   : >> { %3714 = vst [vmem:[%s5650_s15 + $0x80] sm:$0xf] %v3713_v30  ;;  %v3717_v10 = vld [vmem:[%s5654_s20 + $0x88] sm:$0xf]  ;;  %v3719_v62 = vld [vmem:[%s5654_s20 + $0x8c] sm:$0xf] }
 0x2fb   : >> { %3716 = vst [vmem:[%s5650_s15 + $0x84] sm:$0xf] %v3715_v61  ;;  %3718 = vst [vmem:[%s5650_s15 + $0x88] sm:$0xf] %v3717_v10  ;;  %v3721_v50 = vld [vmem:[%s5654_s20 + $0x90] sm:$0xf] }
 0x2fc   : >> { %3720 = vst [vmem:[%s5650_s15 + $0x8c] sm:$0xf] %v3719_v62  ;;  %v3723_v48 = vld [vmem:[%s5654_s20 + $0x94] sm:$0xf]  ;;  %v3725_v46 = vld [vmem:[%s5654_s20 + $0x98] sm:$0xf] }
 0x2fd   : >> { %3722 = vst [vmem:[%s5650_s15 + $0x90] sm:$0xf] %v3721_v50  ;;  %3724 = vst [vmem:[%s5650_s15 + $0x94] sm:$0xf] %v3723_v48  ;;  %v3727_v55 = vld [vmem:[%s5654_s20 + $0x9c] sm:$0xf] }
 0x2fe   : >> { %3726 = vst [vmem:[%s5650_s15 + $0x98] sm:$0xf] %v3725_v46  ;;  %v3729_v25 = vld [vmem:[%s5654_s20 + $0xa0] sm:$0xf]  ;;  %v3731_v53 = vld [vmem:[%s5654_s20 + $0xa4] sm:$0xf] }
 0x2ff   : >> { %3728 = vst [vmem:[%s5650_s15 + $0x9c] sm:$0xf] %v3727_v55  ;;  %3730 = vst [vmem:[%s5650_s15 + $0xa0] sm:$0xf] %v3729_v25  ;;  %v3733_v41 = vld [vmem:[%s5654_s20 + $0xa8] sm:$0xf] }
 0x300   : >> { %3732 = vst [vmem:[%s5650_s15 + $0xa4] sm:$0xf] %v3731_v53  ;;  %v3735_v42 = vld [vmem:[%s5654_s20 + $0xac] sm:$0xf]  ;;  %v3737_v32 = vld [vmem:[%s5654_s20 + $0xb0] sm:$0xf] }
 0x301   : >> { %3734 = vst [vmem:[%s5650_s15 + $0xa8] sm:$0xf] %v3733_v41  ;;  %3736 = vst [vmem:[%s5650_s15 + $0xac] sm:$0xf] %v3735_v42  ;;  %v3739_v52 = vld [vmem:[%s5654_s20 + $0xb4] sm:$0xf] }
 0x302   : >> { %3738 = vst [vmem:[%s5650_s15 + $0xb0] sm:$0xf] %v3737_v32  ;;  %v3741_v12 = vld [vmem:[%s5654_s20 + $0xb8] sm:$0xf]  ;;  %v3743_v6 = vld [vmem:[%s5654_s20 + $0xbc] sm:$0xf] }
 0x303   : >> { %3740 = vst [vmem:[%s5650_s15 + $0xb4] sm:$0xf] %v3739_v52  ;;  %3742 = vst [vmem:[%s5650_s15 + $0xb8] sm:$0xf] %v3741_v12  ;;  %v3745_v7 = vld [vmem:[%s5654_s20 + $0xc0] sm:$0xf] }
 0x304   : >> { %3744 = vst [vmem:[%s5650_s15 + $0xbc] sm:$0xf] %v3743_v6  ;;  %v3747_v47 = vld [vmem:[%s5654_s20 + $0xc4] sm:$0xf]  ;;  %v3749_v9 = vld [vmem:[%s5654_s20 + $0xc8] sm:$0xf] }
 0x305   : >> { %3746 = vst [vmem:[%s5650_s15 + $0xc0] sm:$0xf] %v3745_v7  ;;  %3748 = vst [vmem:[%s5650_s15 + $0xc4] sm:$0xf] %v3747_v47  ;;  %v3751_v3 = vld [vmem:[%s5654_s20 + $0xcc] sm:$0xf] }
 0x306   : >> { %3750 = vst [vmem:[%s5650_s15 + $0xc8] sm:$0xf] %v3749_v9  ;;  %v3753_v40 = vld [vmem:[%s5654_s20 + $0xd0] sm:$0xf]  ;;  %v3755_v0 = vld [vmem:[%s5654_s20 + $0xd4] sm:$0xf] }
 0x307   : >> { %3752 = vst [vmem:[%s5650_s15 + $0xcc] sm:$0xf] %v3751_v3  ;;  %3754 = vst [vmem:[%s5650_s15 + $0xd0] sm:$0xf] %v3753_v40  ;;  %v3757_v2 = vld [vmem:[%s5654_s20 + $0xd8] sm:$0xf] }
 0x308   : >> { %3756 = vst [vmem:[%s5650_s15 + $0xd4] sm:$0xf] %v3755_v0  ;;  %v3759_v22 = vld [vmem:[%s5654_s20 + $0xdc] sm:$0xf]  ;;  %v3761_v59 = vld [vmem:[%s5654_s20 + $0xe0] sm:$0xf] }
 0x309   : >> { %3758 = vst [vmem:[%s5650_s15 + $0xd8] sm:$0xf] %v3757_v2  ;;  %3760 = vst [vmem:[%s5650_s15 + $0xdc] sm:$0xf] %v3759_v22  ;;  %v3763_v23 = vld [vmem:[%s5654_s20 + $0xe4] sm:$0xf] }
 0x30a   : >> { %3762 = vst [vmem:[%s5650_s15 + $0xe0] sm:$0xf] %v3761_v59  ;;  %v3765_v45 = vld [vmem:[%s5654_s20 + $0xe8] sm:$0xf]  ;;  %v3767_v15 = vld [vmem:[%s5654_s20 + $0xec] sm:$0xf] }
 0x30b   : >> { %3764 = vst [vmem:[%s5650_s15 + $0xe4] sm:$0xf] %v3763_v23  ;;  %3766 = vst [vmem:[%s5650_s15 + $0xe8] sm:$0xf] %v3765_v45  ;;  %v3769_v19 = vld [vmem:[%s5654_s20 + $0xf0] sm:$0xf] }
 0x30c   : >> { %3768 = vst [vmem:[%s5650_s15 + $0xec] sm:$0xf] %v3767_v15  ;;  %v3771_v54 = vld [vmem:[%s5654_s20 + $0xf4] sm:$0xf]  ;;  %v3773_v29 = vld [vmem:[%s5654_s20 + $0xf8] sm:$0xf] }
 0x30d   : >> { %3770 = vst [vmem:[%s5650_s15 + $0xf0] sm:$0xf] %v3769_v19  ;;  %3772 = vst [vmem:[%s5650_s15 + $0xf4] sm:$0xf] %v3771_v54  ;;  %v3775_v17 = vld [vmem:[%s5654_s20 + $0xfc] sm:$0xf] }
 0x30e   : >> { %3774 = vst [vmem:[%s5650_s15 + $0xf8] sm:$0xf] %v3773_v29  ;;  %3776 = vst [vmem:[%s5650_s15 + $0xfc] sm:$0xf] %v3775_v17  ;;  %s6970_s17 = smov (%p3778_p11, %s3777_s17), 0  ;;  %s3643_s14 = sadd.s32 1, %s5662_s14  }
 0x30f   : >> { %s4466_s18 = sshll.u32 %s6970_s17, 8  ;;  %p3642_p12 = scmp.ge.s32.totalorder %s3643_s14, %s6696_s11 }
 0x310   : >> { %s3782_s20 = scalar_lea.vmem %s6426_s12, %s4466_s18 [#allocation2]   ;;  %s3783_s15 = scalar_lea.vmem %s6690_s8, %s4466_s18  }
 0x311   : >> { %s6963_s23 = smov %s6970_s17  ;;  %3645 = sbr.rel (!%p3642_p12) target bundleno = 740 (0x2e4), region = 118 }
 0x318 PF: > { %s6864_s21 = sand.u32 63, %s6968_s4   ;;  %s4560_s22 = sshll.u32 %s6696_s11, 8 }
 0x319   : > { %s3788_s24 = scalar_lea.vmem %s6426_s12, %s4560_s22 [#allocation2]   ;;  %s3790_s25 = scalar_lea.vmem %s6690_s8, %s4560_s22  }
 0x31a   : > { %p4471_p13 = scmp.le.s32.totalorder %s6864_s21, 0 }
 0x31b   : > { %s5664_s26 = smov (!%p4471_p13), %s3790_s25   ;;  %s5668_s27 = smov (!%p4471_p13), %s3788_s24  }
 0x31c   : > { %4052 = sbr.rel (%p4471_p13) target bundleno = 813 (0x32d), region = 123  ;;  %s5672_s9 = smov (!%p4471_p13), 0  }
 0x31d   : > { %s5676_s28 = smov (!%p4471_p13), 0  }
 0x323 LB: >> { %v3800_v26 = vld [vmem:[%s5670_s27] sm:$0xf]  ;;  %s3802_s29 = sadd.s32 1, %s5674_s9  ;;  %s3794_s28 = sadd.s32 1, %s5678_s28   ;;  %s5678_s28 = sphi %s5676_s28, %s3794_s28   ;;  %s5674_s9 = sphi %s5672_s9, %s5673_s9   ;;  %s5670_s27 = sphi %s5668_s27, %s3807_s27   ;;  %s5666_s26 = sphi %s5664_s26, %s3808_s26  }
 0x324   : >> { %3801 = vst [vmem:[%s5666_s26] sm:$0xf] %v3800_v26  ;;  %p3803_p0 = scmp.ge.s32.totalorder %s3802_s29, %s6864_s21  ;;  %p3793_p1 = scmp.ge.s32.totalorder %s3794_s28, %s6864_s21 }
 0x326   : >> { %s6972_s29 = smov (%p3803_p0, %s3802_s29), 0  ;;  %3796 = sbr.rel (!%p3793_p1) target bundleno = 803 (0x323), region = 129 }
 0x327   : >> { %s4472_s12 = sshll.u32 %s6972_s29, 2  ;;  %s5673_s9 = smov %s6972_s29  }
 0x328   : >> { %s3807_s27 = scalar_lea.vmem %s3788_s24, %s4472_s12 [#allocation2]   ;;  %s3808_s26 = scalar_lea.vmem %s3790_s25, %s4472_s12  }
 0x32d PF: > { %p10_p2 = scmp.ge.s32.totalorder %s5716_s16, 4   ;;  %s6964_s12 = smov %s5642_s13 }
 0x32e   : > { %s6965_s13 = smov %s5724_s19  ;;  %s6966_s14 = smov %s5716_s16 }
 0x32f   :  { %12 = sbr.rel (!%p10_p2) target bundleno = 2 (0x2), region = 140 }

// kernel: smodel_forward.8
= control target key start
LH: loop header
LB: loop body
LE: loop exit
PB: predicated region body
PF: predicated region fallthrough
CT: control target
= control target key end

     0   :  { %s1972_s12 = smov 0   ;;  %s2310_s0 = inlined_call_operand.vmem [shape: bf16[220,900], index: 0, kind: input, shape index: {}]   ;;  %s2311_s1 = inlined_call_operand.vmem [shape: bf16[900,128], index: 1, kind: input, shape index: {}]   ;;  %s2312_s2 = inlined_call_operand.vmem [shape: f32[1,128], index: 2, kind: input, shape index: {}]   ;;  %s2313_s3 = inlined_call_operand.vmem [shape: bf16[220,128], index: 3, kind: output, shape index: {}]  }
   0x1 LB: > { %s1502_s13 = sadd.s32 4294967295, %s1949_s12   ;;  %p1506_p0 = scmp.ge.s32.totalorder %s1949_s12, 1  ;;  %s1949_s12 = sphi %s1972_s12, %s13_s12  }
   0x2   : > { %p139_p1 = scmp.lt.s32.totalorder %s1949_s12, 3 }
   0x4   : > { %p140_p2 = pnand %p1506_p0, %p139_p1 }
   0x5   : > { %v1886_v0 = vld [vmem:[%s2311_s1 + $0x40] sm:$0xff] (!%p140_p2)   ;;  %v1890_v4 = vld [vmem:[%s2311_s1 + $0x48] sm:$0xff] (!%p140_p2)   ;;  %v1894_v8 = vld [vmem:[%s2311_s1 + $0x50] sm:$0xff] (!%p140_p2)   ;;  %s164_s17 = smul.u32 (!%p140_p2), 14, %s1502_s13  ;;  %v1951_v42 = vmov (!%p140_p2), 0   ;;  %vm988_vm0 = vcmask (!%p140_p2), 1041408  }
   0x6   : > { %143 = sbr.rel (%p140_p2) target bundleno = 370 (0x172), region = 32  ;;  %v1887_v1 = vld [vmem:[%s2311_s1] sm:$0xff] (!%p140_p2)   ;;  %1703 = vmatprep.subr.bf16.mxu0 (!%p140_p2), %v1886_v0  ;;  %v1891_v5 = vld [vmem:[%s2311_s1 + $0x8] sm:$0xff] (!%p140_p2)   ;;  %v1895_v9 = vld [vmem:[%s2311_s1 + $0x10] sm:$0xff] (!%p140_p2)   ;;  %vm966_vm1 = vcmask (!%p140_p2), 31744  }
   0x7   : > { %v1888_v2 = vld [vmem:[%s2311_s1 + $0xc0] sm:$0xff] (!%p140_p2)   ;;  %1704 = vmatpush3.bf16.msra.mxu0 (!%p140_p2), %v1887_v1  ;;  %v1892_v6 = vld [vmem:[%s2311_s1 + $0xc8] sm:$0xff] (!%p140_p2)   ;;  %v1896_v10 = vld [vmem:[%s2311_s1 + $0xd0] sm:$0xff] (!%p140_p2)   ;;  %p165_p3 = scmp.lt.s32.totalorder (!%p140_p2), %s164_s17, 27 }
   0x8   : > { %v1889_v3 = vld [vmem:[%s2311_s1 + $0x80] sm:$0xff] (!%p140_p2)   ;;  %1761 = vmatprep.subr.bf16.mxu1 (!%p140_p2), %v1888_v2  ;;  %1705 = vmatprep.subr.bf16.mxu0 (!%p140_p2), %v1890_v4  ;;  %v1893_v7 = vld [vmem:[%s2311_s1 + $0x88] sm:$0xff] (!%p140_p2)   ;;  %v1897_v11 = vld [vmem:[%s2311_s1 + $0x90] sm:$0xff] (!%p140_p2)  }
   0x9   : > { %1762 = vmatpush3.bf16.msra.mxu1 (!%p140_p2), %v1889_v3  ;;  %v1898_v12 = vld [vmem:[%s2311_s1 + $0x58] sm:$0xff] (!%p140_p2)   ;;  %v1902_v16 = vld [vmem:[%s2311_s1 + $0x60] sm:$0xff] (!%p140_p2)   ;;  %v1906_v20 = vld [vmem:[%s2311_s1 + $0x68] sm:$0xff] (!%p140_p2)  }
   0xa   : > { %1763 = vmatprep.subr.bf16.mxu1 (!%p140_p2), %v1892_v6  ;;  %v1899_v13 = vld [vmem:[%s2311_s1 + $0x18] sm:$0xff] (!%p140_p2)   ;;  %v1903_v17 = vld [vmem:[%s2311_s1 + $0x20] sm:$0xff] (!%p140_p2)   ;;  %v1907_v21 = vld [vmem:[%s2311_s1 + $0x28] sm:$0xff] (!%p140_p2)  }
   0xb   : > { %1706 = vmatpush3.bf16.msra.mxu0 (!%p140_p2), %v1891_v5  ;;  %v1900_v14 = vld [vmem:[%s2311_s1 + $0xd8] sm:$0xff] (!%p140_p2)   ;;  %v1904_v18 = vld [vmem:[%s2311_s1 + $0xe0] sm:$0xff] (!%p140_p2)   ;;  %v1908_v22 = vld [vmem:[%s2311_s1 + $0xe8] sm:$0xff] (!%p140_p2)  }
   0xc   : > { %1707 = vmatprep.subr.bf16.mxu0 (!%p140_p2), %v1894_v8  ;;  %v1901_v15 = vld [vmem:[%s2311_s1 + $0x98] sm:$0xff] (!%p140_p2)   ;;  %v1905_v19 = vld [vmem:[%s2311_s1 + $0xa0] sm:$0xff] (!%p140_p2)   ;;  %v1909_v23 = vld [vmem:[%s2311_s1 + $0xa8] sm:$0xff] (!%p140_p2)  }
   0xd   : > { %1764 = vmatpush3.bf16.msra.mxu1 %v1893_v7  ;;  %s2315_s17 = smov (!%p165_p3, %s164_s17), 27  ;;  %v1910_v24 = vld [vmem:[%s2311_s1 + $0x70] sm:$0xff]   ;;  %v1914_v28 = vld [vmem:[%s2311_s1 + $0x78] sm:$0xff]   ;;  %v1918_v36 = vld [vmem:[%s2311_s1 + $0x140] sm:$0xff]  }
   0xe   : > { %1765 = vmatprep.subr.bf16.mxu1 %v1896_v10  ;;  %v1911_v25 = vld [vmem:[%s2311_s1 + $0x30] sm:$0xff]   ;;  %s1647_s16 = sshll.u32 %s2315_s17, 5  ;;  %v1915_v29 = vld [vmem:[%s2311_s1 + $0x38] sm:$0xff]   ;;  %v1919_v41 = vld [vmem:[%s2311_s1 + $0x100] sm:$0xff]  }
   0xf   : > { %1708 = vmatpush3.bf16.msra.mxu0 %v1895_v9  ;;  %v1912_v26 = vld [vmem:[%s2311_s1 + $0xf0] sm:$0xff]   ;;  %s2075_s13 = scalar_lea.vmem %s2310_s0, %s1647_s16  ;;  %v1916_v30 = vld [vmem:[%s2311_s1 + $0xf8] sm:$0xff]   ;;  %v1920_v43 = vld [vmem:[%s2311_s1 + $0x180] sm:$0xff]  }
  0x10   : > { %1709 = vmatprep.subr.bf16.mxu0 %v1898_v12  ;;  %v1913_v27 = vld [vmem:[%s2311_s1 + $0xb0] sm:$0xff]   ;;  %v178_v31 = vld [vmem:[%s2075_s13] sm:$0xff]  ;;  %v1917_v35 = vld [vmem:[%s2311_s1 + $0xb8] sm:$0xff]  }
  0x11   : > { %1766 = vmatpush3.bf16.msra.mxu1 %v1897_v11  ;;  %v182_v32 = vld [vmem:[%s2075_s13 + $0x20] sm:$0xff]  ;;  %v179_v37 = vld [vmem:[%s2075_s13 + $0x8] sm:$0xff]  ;;  %v1924_v54 = vld [vmem:[%s2311_s1 + $0x150] sm:$0xff]  }
  0x12   : > { %1767 = vmatprep.subr.bf16.mxu1 %v1900_v14  ;;  %v1511_v33 = vcombine.low %v178_v31, %v182_v32  ;;  %v1512_v34 = vcombine.high %v178_v31, %v182_v32  ;;  %v183_v38 = vld [vmem:[%s2075_s13 + $0x28] sm:$0xff]  ;;  %v186_v44 = vld [vmem:[%s2075_s13 + $0x40] sm:$0xff]  ;;  %v1925_v59 = vld [vmem:[%s2311_s1 + $0x110] sm:$0xff]  }
  0x13   : > { %1710 = vmatpush3.bf16.msra.mxu0 %v1899_v13  ;;  %v1513_v39 = vcombine.low %v179_v37, %v183_v38  ;;  %v1514_v40 = vcombine.high %v179_v37, %v183_v38  ;;  %v190_v45 = vld [vmem:[%s2075_s13 + $0x60] sm:$0xff]  ;;  %v1921_v47 = vld [vmem:[%s2311_s1 + $0x148] sm:$0xff]   ;;  %v1926_v63 = vld [vmem:[%s2311_s1 + $0x190] sm:$0xff]  }
  0x14   : > { %1711 = vmatprep.subr.bf16.mxu0 %v1902_v16  ;;  %1024 = vmatprep.mubr.bf16.mxu0 %v1512_v34  ;;  %v1520_v46 = vcombine.high %v186_v44, %v190_v45  ;;  %v1922_v48 = vld [vmem:[%s2311_s1 + $0x108] sm:$0xff]   ;;  %v1519_v49 = vcombine.low %v186_v44, %v190_v45  ;;  %v194_v55 = vld [vmem:[%s2075_s13 + $0x80] sm:$0xff]  ;;  %v1927_v0 = vld [vmem:[%s2311_s1 + $0x158] sm:$0xff]  }
  0x15   : > { %1768 = vmatpush3.bf16.msra.mxu1 %v1901_v15  ;;  %1113 = vmatprep.mubr.bf16.mxu1 %v1514_v40  ;;  %v187_v50 = vld [vmem:[%s2075_s13 + $0x48] sm:$0xff]  ;;  %v198_v57 = vld [vmem:[%s2075_s13 + $0xa0] sm:$0xff]  ;;  %v1928_v1 = vld [vmem:[%s2311_s1 + $0x118] sm:$0xff]  }
  0x16   : > { %1769 = vmatprep.subr.bf16.mxu1 %v1904_v18  ;;  %v191_v51 = vld [vmem:[%s2075_s13 + $0x68] sm:$0xff]  ;;  %v1528_v58 = vcombine.high %v194_v55, %v198_v57  ;;  %v1527_v2 = vcombine.low %v194_v55, %v198_v57  ;;  %v202_v3 = vld [vmem:[%s2075_s13 + $0xc0] sm:$0xff]  ;;  %v1929_v8 = vld [vmem:[%s2311_s1 + $0x198] sm:$0xff]  }
  0x17   : > { %1712 = vmatpush3.bf16.msra.mxu0 %v1903_v17  ;;  %v1522_v52 = vcombine.high %v187_v50, %v191_v51  ;;  %v1923_v53 = vld [vmem:[%s2311_s1 + $0x188] sm:$0xff]   ;;  %v1521_v56 = vcombine.low %v187_v50, %v191_v51  ;;  %v206_v4 = vld [vmem:[%s2075_s13 + $0xe0] sm:$0xff]  ;;  %v184_v50 = vld [vmem:[%s2075_s13 + $0x30] sm:$0xff] }
  0x18   : > { %1713 = vmatprep.subr.bf16.mxu0 %v1906_v20  ;;  %v195_v60 = vld [vmem:[%s2075_s13 + $0x88] sm:$0xff]  ;;  %v1536_v6 = vcombine.high %v202_v3, %v206_v4  ;;  %v1930_v10 = vld [vmem:[%s2311_s1 + $0x160] sm:$0xff]   ;;  %v1535_v18 = vcombine.low %v202_v3, %v206_v4  ;;  %v188_v57 = vld [vmem:[%s2075_s13 + $0x50] sm:$0xff] }
  0x19   : > { %1770 = vmatpush3.bf16.msra.mxu1 %v1905_v19  ;;  %v199_v61 = vld [vmem:[%s2075_s13 + $0xa8] sm:$0xff]  ;;  %v1931_v12 = vld [vmem:[%s2311_s1 + $0x120] sm:$0xff]  }
  0x1a   : > { %1771 = vmatprep.subr.bf16.mxu1 %v1908_v22  ;;  %v1530_v62 = vcombine.high %v195_v60, %v199_v61  ;;  %v203_v5 = vld [vmem:[%s2075_s13 + $0xc8] sm:$0xff]  ;;  %v1529_v9 = vcombine.low %v195_v60, %v199_v61  ;;  %v1932_v13 = vld [vmem:[%s2311_s1 + $0x1a0] sm:$0xff]   ;;  %v189_v61 = vld [vmem:[%s2075_s13 + $0x58] sm:$0xff] }
  0x1b   : > { %1714 = vmatpush3.bf16.msra.mxu0 %v1907_v21  ;;  %v207_v7 = vld [vmem:[%s2075_s13 + $0xe8] sm:$0xff]  ;;  %v210_v14 = vld [vmem:[%s2075_s13 + $0x100] sm:$0xff] }
  0x1c   : > { %1715 = vmatprep.subr.bf16.mxu0 %v1910_v24  ;;  %v1538_v11 = vcombine.high %v203_v5, %v207_v7  ;;  %v214_v15 = vld [vmem:[%s2075_s13 + $0x120] sm:$0xff]  ;;  %v211_v16 = vld [vmem:[%s2075_s13 + $0x108] sm:$0xff]  ;;  %v1936_v24 = vld [vmem:[%s2311_s1 + $0x170] sm:$0xff]  }
  0x1d   : > { %1772 = vmatpush3.bf16.msra.mxu1 %v1909_v23  ;;  %v1933_v17 = vld [vmem:[%s2311_s1 + $0x168] sm:$0xff]   ;;  %v1544_v20 = vcombine.high %v210_v14, %v214_v15  ;;  %v1537_v23 = vcombine.low %v203_v5, %v207_v7  ;;  %v1543_v32 = vcombine.low %v210_v14, %v214_v15  ;;  %v1942_v38 = vld [vmem:[%s2311_s1 + $0x1c0] ss:$0 sps:$4 sm:$0x33]   ;;  %v197_v5 = vld [vmem:[%s2075_s13 + $0x98] sm:$0xff] }
  0x1e   : > { %1773 = vmatprep.subr.bf16.mxu1 %v1912_v26  ;;  %v1934_v19 = vld [vmem:[%s2311_s1 + $0x128] sm:$0xff]   ;;  %v1937_v26 = vld [vmem:[%s2311_s1 + $0x130] sm:$0xff]   ;;  %v990_v40 = vsel %vm988_vm0, %v1942_v38, 0  ;;  %v209_v14 = vld [vmem:[%s2075_s13 + $0xf8] sm:$0xff] }
  0x1f   : > { %1716 = vmatpush3.bf16.msra.mxu0 %v1911_v25  ;;  %v215_v21 = vld [vmem:[%s2075_s13 + $0x128] sm:$0xff]  ;;  %v233_v38 = vld [vmem:[%s2075_s13 + $0x1b8] sm:$0xff] }
  0x20   : > { %1717 = vmatprep.subr.bf16.mxu0 %v1914_v28  ;;  %v1935_v22 = vld [vmem:[%s2311_s1 + $0x1a8] sm:$0xff]   ;;  %v1546_v25 = vcombine.high %v211_v16, %v215_v21  ;;  %v218_v28 = vld [vmem:[%s2075_s13 + $0x140] sm:$0xff]  ;;  %v1545_v37 = vcombine.low %v211_v16, %v215_v21  ;;  %v213_v21 = vld [vmem:[%s2075_s13 + $0x118] sm:$0xff] }
  0x21   : > { %1774 = vmatpush3.bf16.msra.mxu1 %v1913_v27  ;;  %v1938_v27 = vld [vmem:[%s2311_s1 + $0x1b0] sm:$0xff]   ;;  %v223_v31 = vld [vmem:[%s2075_s13 + $0x168] sm:$0xff] }
  0x22   : > { %1775 = vmatprep.subr.bf16.mxu1 %v1916_v30  ;;  %v219_v30 = vld [vmem:[%s2075_s13 + $0x148] sm:$0xff] }
  0x23   : > { %1718 = vmatpush3.bf16.msra.mxu0 %v1915_v29  ;;  %v222_v29 = vld [vmem:[%s2075_s13 + $0x160] sm:$0xff] }
  0x24   : > { %1819 = vmatprep.subr.bf16.mxu0 %v1918_v36  ;;  %v1552_v34 = vcombine.high %v218_v28, %v222_v29  ;;  %v1941_v36 = vld [vmem:[%s2311_s1 + $0x1b8] sm:$0xff]   ;;  %v1551_v44 = vcombine.low %v218_v28, %v222_v29 }
  0x25   : > { %1776 = vmatpush3.bf16.msra.mxu1 %v1917_v35  ;;  %v1940_v35 = vld [vmem:[%s2311_s1 + $0x138] sm:$0xff]  }
  0x26   : > { %1025 = vmatmul.mubr.bf16.vlgmr.msra.gmra.mrb[0].mxu0 %v1511_v33  ;;  %1259 = vmatprep.subr.bf16.mxu1 %v1951_v42  ;;  %v1939_v33 = vld [vmem:[%s2311_s1 + $0x178] sm:$0xff]  }
  0x27   : > { %1820 = vmatpush3.bf16.msra.mxu0 %v1919_v41  ;;  %1032 = vmatprep.mubr.bf16.mxu0 %v1520_v46  ;;  %v226_v41 = vld [vmem:[%s2075_s13 + $0x180] sm:$0xff]  ;;  %v227_v46 = vld [vmem:[%s2075_s13 + $0x188] sm:$0xff]  ;;  %v221_v29 = vld [vmem:[%s2075_s13 + $0x158] sm:$0xff] }
  0x28   : > { %1114 = vmatmul.mubr.bf16.vlgmr.msra.gmra.mrb[0].mxu1 %v1513_v39  ;;  %1821 = vmatprep.subr.bf16.mxu0 %v1921_v47  ;;  %v1554_v39 = vcombine.high %v219_v30, %v223_v31  ;;  %v231_v47 = vld [vmem:[%s2075_s13 + $0x1a8] sm:$0xff] }
  0x29   : > { %1260 = vmatpush1.bf16.msra.mxu1 %v1920_v43  ;;  %1121 = vmatprep.mubr.bf16.mxu1 %v1522_v52  ;;  %v230_v43 = vld [vmem:[%s2075_s13 + $0x1a0] sm:$0xff]  ;;  %v1561_v55 = vcombine.low %v227_v46, %v231_v47 }
  0x2a   : > { %1261 = vmatprep.subr.bf16.mxu1 %v1951_v42  ;;  %v1560_v45 = vcombine.high %v226_v41, %v230_v43  ;;  %v1559_v51 = vcombine.low %v226_v41, %v230_v43 }
  0x2b   : > { %1822 = vmatpush3.bf16.msra.mxu0 %v1922_v48  ;;  %v1553_v48 = vcombine.low %v219_v30, %v223_v31  ;;  %v225_v30 = vld [vmem:[%s2075_s13 + $0x178] sm:$0xff] }
  0x2c   : > { %1823 = vmatprep.subr.bf16.mxu0 %v1924_v54  ;;  %v185_v54 = vld [vmem:[%s2075_s13 + $0x38] sm:$0xff] }
  0x2d   : > { %1262 = vmatpush1.bf16.msra.mxu1 %v1923_v53  ;;  %v181_v53 = vld [vmem:[%s2075_s13 + $0x18] sm:$0xff] }
  0x2e   : > { %1033 = vmatmul.mubr.bf16.gmra.mrb[4].mxu0 %v1519_v49  ;;  %1263 = vmatprep.subr.bf16.mxu1 %v1951_v42  ;;  %v1562_v49 = vcombine.high %v227_v46, %v231_v47 }
  0x2f   : > { %1040 = vmatprep.mubr.bf16.mxu0 %v1528_v58  ;;  %1824 = vmatpush3.bf16.msra.mxu0 %v1925_v59  ;;  %v192_v58 = vld [vmem:[%s2075_s13 + $0x70] sm:$0xff] }
  0x30   : > { %1122 = vmatmul.mubr.bf16.gmra.mrb[4].mxu1 %v1521_v56  ;;  %1825 = vmatprep.subr.bf16.mxu0 %v1927_v0  ;;  %v1518_v56 = vcombine.high %v181_v53, %v185_v54  ;;  %v1524_v60 = vcombine.high %v188_v57, %v192_v58  ;;  %v1523_v3 = vcombine.low %v188_v57, %v192_v58 }
  0x31   : > { %1129 = vmatprep.mubr.bf16.mxu1 %v1530_v62  ;;  %1264 = vmatpush1.bf16.msra.mxu1 %v1926_v63  ;;  %v193_v62 = vld [vmem:[%s2075_s13 + $0x78] sm:$0xff]  ;;  %v1517_v63 = vcombine.low %v181_v53, %v185_v54 }
  0x32   : > { %1265 = vmatprep.subr.bf16.mxu1 %v1951_v42  ;;  %v1526_v0 = vcombine.high %v189_v61, %v193_v62  ;;  %v1525_v7 = vcombine.low %v189_v61, %v193_v62 }
  0x33   : > { %1826 = vmatpush3.bf16.msra.mxu0 %v1928_v1  ;;  %v196_v1 = vld [vmem:[%s2075_s13 + $0x90] sm:$0xff] }
  0x34   : > { %1827 = vmatprep.subr.bf16.mxu0 %v1930_v10  ;;  %v208_v10 = vld [vmem:[%s2075_s13 + $0xf0] sm:$0xff] }
  0x35   : > { %1266 = vmatpush1.bf16.msra.mxu1 %v1929_v8 }
  0x36   : > { %1041 = vmatmul.mubr.bf16.gmra.mrb[8].mxu0 %v1527_v2  ;;  %1267 = vmatprep.subr.bf16.mxu1 %v1951_v42  ;;  %v200_v2 = vld [vmem:[%s2075_s13 + $0xb0] sm:$0xff] }
  0x37   : > { %1048 = vmatprep.mubr.bf16.mxu0 %v1536_v6  ;;  %1828 = vmatpush3.bf16.msra.mxu0 %v1931_v12  ;;  %v1532_v4 = vcombine.high %v196_v1, %v200_v2  ;;  %v201_v6 = vld [vmem:[%s2075_s13 + $0xb8] sm:$0xff] }
  0x38   : > { %1130 = vmatmul.mubr.bf16.gmra.mrb[8].mxu1 %v1529_v9  ;;  %1829 = vmatprep.subr.bf16.mxu0 %v1933_v17  ;;  %v1534_v8 = vcombine.high %v197_v5, %v201_v6  ;;  %v204_v9 = vld [vmem:[%s2075_s13 + $0xd0] sm:$0xff]  ;;  %v1533_v15 = vcombine.low %v197_v5, %v201_v6 }
  0x39   : > { %1137 = vmatprep.mubr.bf16.mxu1 %v1538_v11  ;;  %1268 = vmatpush1.bf16.msra.mxu1 %v1932_v13  ;;  %v1531_v11 = vcombine.low %v196_v1, %v200_v2  ;;  %v1540_v12 = vcombine.high %v204_v9, %v208_v10  ;;  %v205_v13 = vld [vmem:[%s2075_s13 + $0xd8] sm:$0xff]  ;;  %v212_v17 = vld [vmem:[%s2075_s13 + $0x110] sm:$0xff] }
  0x3a   : > { %1269 = vmatprep.subr.bf16.mxu1 %v1951_v42  ;;  %v1542_v16 = vcombine.high %v205_v13, %v209_v14 }
  0x3b   : > { %1830 = vmatpush3.bf16.msra.mxu0 %v1934_v19  ;;  %v1539_v19 = vcombine.low %v204_v9, %v208_v10 }
  0x3c   : > { %1831 = vmatprep.subr.bf16.mxu0 %v1936_v24 }
  0x3d   : > { %1270 = vmatpush1.bf16.msra.mxu1 %v1935_v22  ;;  %v217_v22 = vld [vmem:[%s2075_s13 + $0x138] sm:$0xff] }
  0x3e   : > { %1049 = vmatmul.mubr.bf16.gmra.mrb[12].mxu0 %v1535_v18  ;;  %1271 = vmatprep.subr.bf16.mxu1 %v1951_v42  ;;  %v216_v18 = vld [vmem:[%s2075_s13 + $0x130] sm:$0xff]  ;;  %v1550_v24 = vcombine.high %v213_v21, %v217_v22  ;;  %v1549_v31 = vcombine.low %v213_v21, %v217_v22 }
  0x3f   : > { %1056 = vmatprep.mubr.bf16.mxu0 %v1544_v20  ;;  %1832 = vmatpush3.bf16.msra.mxu0 %v1937_v26  ;;  %v1548_v20 = vcombine.high %v212_v17, %v216_v18  ;;  %v224_v26 = vld [vmem:[%s2075_s13 + $0x170] sm:$0xff] }
  0x40   : > { %1138 = vmatmul.mubr.bf16.gmra.mrb[12].mxu1 %v1537_v23  ;;  %1833 = vmatprep.subr.bf16.mxu0 %v1939_v33  ;;  %v1541_v23 = vcombine.low %v205_v13, %v209_v14  ;;  %v228_v33 = vld [vmem:[%s2075_s13 + $0x190] sm:$0xff] }
  0x41   : > { %1145 = vmatprep.mubr.bf16.mxu1 %v1546_v25  ;;  %1272 = vmatpush1.bf16.msra.mxu1 %v1938_v27  ;;  %v220_v25 = vld [vmem:[%s2075_s13 + $0x150] sm:$0xff]  ;;  %v1547_v27 = vcombine.low %v212_v17, %v216_v18 }
  0x42   : > { %1273 = vmatprep.subr.bf16.mxu1 %v1951_v42  ;;  %v1556_v28 = vcombine.high %v220_v25, %v224_v26 }
  0x43   : > { %1834 = vmatpush3.bf16.msra.mxu0 %v1940_v35  ;;  %v1555_v35 = vcombine.low %v220_v25, %v224_v26 }
  0x45   : > { %1274 = vmatpush1.bf16.msra.mxu1 %v1941_v36 }
  0x46   : > { %1057 = vmatmul.mubr.bf16.gmra.mrb[16].mxu0 %v1543_v32  ;;  %1275 = vmatprep.subr.bf16.mxu1 %v1951_v42  ;;  %v180_v42 = vld [vmem:[%s2075_s13 + $0x10] sm:$0xff]  ;;  %v1558_v32 = vcombine.high %v221_v29, %v225_v30 }
  0x47   : > { %1064 = vmatprep.mubr.bf16.mxu0 %v1552_v34  ;;  %v1516_v52 = vcombine.high %v180_v42, %v184_v50  ;;  %v1515_v59 = vcombine.low %v180_v42, %v184_v50  ;;  %v232_v34 = vld [vmem:[%s2075_s13 + $0x1b0] sm:$0xff] }
  0x48   : > { %1146 = vmatmul.mubr.bf16.gmra.mrb[16].mxu1 %v1545_v37  ;;  %v1564_v36 = vcombine.high %v228_v33, %v232_v34  ;;  %v229_v37 = vld [vmem:[%s2075_s13 + $0x198] sm:$0xff]  ;;  %v1563_v41 = vcombine.low %v228_v33, %v232_v34  ;;  %s1509_s13 = sshll.u32 %s2315_s17, 2 }
  0x49   : > { %1153 = vmatprep.mubr.bf16.mxu1 %v1554_v39  ;;  %1276 = vmatpush1.bf16.msra.mxu1 %v990_v40  ;;  %v1557_v39 = vcombine.low %v221_v29, %v225_v30  ;;  %v1566_v40 = vcombine.high %v229_v37, %v233_v38  ;;  %v1565_v43 = vcombine.low %v229_v37, %v233_v38  ;;  %s2287_s11 = scalar_lea.vmem %s2313_s3, %s1509_s13 }
  0x4e   : > { %1065 = vmatmul.mubr.bf16.gmra.mrb[20].mxu0 %v1551_v44 }
  0x4f   : > { %1072 = vmatprep.mubr.bf16.mxu0 %v1560_v45  ;;  %v2236_v45 = vld [vmem:[%s2312_s2] ss:$0 sm:$0xff] }
  0x50   : > { %1154 = vmatmul.mubr.bf16.gmra.mrb[20].mxu1 %v1553_v48 }
  0x51   : > { %1161 = vmatprep.mubr.bf16.mxu1 %v1562_v49 }
  0x56   : > { %1073 = vmatmul.mubr.bf16.gmra.mrb[24].mxu0 %v1559_v51 }
  0x57   : > { %1202 = vmatprep.mubr.bf16.mxu0 %v1516_v52 }
  0x58   : > { %1162 = vmatmul.mubr.bf16.gmra.mrb[24].mxu1 %v1561_v55 }
  0x59   : > { %1624 = vmatprep.mubr.msk.bf16.mxu1 %vm966_vm1, %v1518_v56 }
  0x5e   : > { %1203 = vmatmul.mubr.bf16.vlgmr.msra.gmra.mrb[28].mxu0 %v1515_v59 }
  0x5f   : > { %1210 = vmatprep.mubr.bf16.mxu0 %v1524_v60 }
  0x60   : > { %1292 = vmatmul.mubr.bf16.vlgmr.msra.gmra.mrb[28].mxu1 %v1517_v63 }
  0x61   : > { %1625 = vmatprep.mubr.msk.bf16.mxu1 %vm966_vm1, %v1526_v0 }
  0x66   : > { %1211 = vmatmul.mubr.bf16.gmra.mrb[32].mxu0 %v1523_v3 }
  0x67   : > { %1218 = vmatprep.mubr.bf16.mxu0 %v1532_v4 }
  0x68   : > { %1300 = vmatmul.mubr.bf16.gmra.mrb[32].mxu1 %v1525_v7 }
  0x69   : > { %1626 = vmatprep.mubr.msk.bf16.mxu1 %vm966_vm1, %v1534_v8 }
  0x6e   : > { %1219 = vmatmul.mubr.bf16.gmra.mrb[36].mxu0 %v1531_v11 }
  0x6f   : > { %1226 = vmatprep.mubr.bf16.mxu0 %v1540_v12 }
  0x70   : > { %1308 = vmatmul.mubr.bf16.gmra.mrb[36].mxu1 %v1533_v15 }
  0x71   : > { %1627 = vmatprep.mubr.msk.bf16.mxu1 %vm966_vm1, %v1542_v16 }
  0x76   : > { %1227 = vmatmul.mubr.bf16.gmra.mrb[40].mxu0 %v1539_v19 }
  0x77   : > { %1234 = vmatprep.mubr.bf16.mxu0 %v1548_v20 }
  0x78   : > { %1316 = vmatmul.mubr.bf16.gmra.mrb[40].mxu1 %v1541_v23 }
  0x79   : > { %1628 = vmatprep.mubr.msk.bf16.mxu1 %vm966_vm1, %v1550_v24 }
  0x7e   : > { %1235 = vmatmul.mubr.bf16.gmra.mrb[44].mxu0 %v1547_v27 }
  0x7f   : > { %1242 = vmatprep.mubr.bf16.mxu0 %v1556_v28 }
  0x80   : > { %1324 = vmatmul.mubr.bf16.gmra.mrb[44].mxu1 %v1549_v31 }
  0x81   : > { %1629 = vmatprep.mubr.msk.bf16.mxu1 %vm966_vm1, %v1558_v32 }
  0x86   : > { %1243 = vmatmul.mubr.bf16.gmra.mrb[48].mxu0 %v1555_v35 }
  0x87   : > { %1250 = vmatprep.mubr.bf16.mxu0 %v1564_v36 }
  0x88   : > { %1332 = vmatmul.mubr.bf16.gmra.mrb[48].mxu1 %v1557_v39 }
  0x89   : > { %1630 = vmatprep.mubr.msk.bf16.mxu1 %vm966_vm1, %v1566_v40 }
  0x8e   : > { %1251 = vmatmul.mubr.bf16.gmra.mrb[52].mxu0 %v1563_v41 }
  0x90   : > { %1340 = vmatmul.mubr.bf16.gmra.mrb[52].mxu1 %v1565_v43 }
  0xf9   : > { %v1719_v44 = vpop.f32.mrb[0].mxu0 }
  0xfa   : > { %v1720_v46 = vpop.f32.mrb[1].mxu0 }
  0xfb   : > { %v1721_v47 = vadd.f32 %v1720_v46, %v1719_v44  ;;  %v1722_v48 = vpop.f32.mrb[2].mxu0  ;;  %v1777_v49 = vpop.f32.mrb[0].mxu1 }
  0xfc   : > { %v1723_v42 = vpop.f32.mrb[3].mxu0  ;;  %v1778_v52 = vpop.f32.mrb[1].mxu1 }
  0xfd   : > { %v1027_v50 = vadd.f32 %v1721_v47, %v2236_v45  ;;  %v1724_v51 = vadd.f32 %v1723_v42, %v1722_v48  ;;  %v1779_v53 = vadd.f32 %v1778_v52, %v1777_v49  ;;  %v1780_v54 = vpop.f32.mrb[2].mxu1 }
  0xfe   : > { %v1781_v56 = vpop.f32.mrb[3].mxu1 }
  0xff   : > { %v1030_v55 = vadd.f32 %v1724_v51, %v2236_v45  ;;  %v2240_v57 = vadd.f32 %v1779_v53, %v1027_v50  ;;  %v1782_v58 = vadd.f32 %v1781_v56, %v1780_v54 }
 0x101   : > { %v1725_v59 = vpop.f32.mrb[4].mxu0  ;;  %v2242_v60 = vadd.f32 %v1782_v58, %v1030_v55 }
 0x102   : > { %v1726_v61 = vpop.f32.mrb[5].mxu0 }
 0x103   : > { %v1727_v62 = vadd.f32 %v1726_v61, %v1725_v59  ;;  %v1728_v63 = vpop.f32.mrb[6].mxu0  ;;  %v1783_v0 = vpop.f32.mrb[4].mxu1 }
 0x104   : > { %v1729_v1 = vpop.f32.mrb[7].mxu0  ;;  %v1784_v4 = vpop.f32.mrb[5].mxu1 }
 0x105   : > { %v1035_v2 = vadd.f32 %v1727_v62, %v2236_v45  ;;  %v1730_v3 = vadd.f32 %v1729_v1, %v1728_v63  ;;  %v1785_v5 = vadd.f32 %v1784_v4, %v1783_v0  ;;  %v1786_v6 = vpop.f32.mrb[6].mxu1 }
 0x106   : > { %v1787_v8 = vpop.f32.mrb[7].mxu1 }
 0x107   : > { %v1038_v7 = vadd.f32 %v1730_v3, %v2236_v45  ;;  %v2246_v9 = vadd.f32 %v1785_v5, %v1035_v2  ;;  %v1788_v10 = vadd.f32 %v1787_v8, %v1786_v6 }
 0x109   : > { %v1731_v11 = vpop.f32.mrb[8].mxu0  ;;  %v2248_v12 = vadd.f32 %v1788_v10, %v1038_v7 }
 0x10a   : > { %v1732_v13 = vpop.f32.mrb[9].mxu0 }
 0x10b   : > { %v1733_v14 = vadd.f32 %v1732_v13, %v1731_v11  ;;  %v1734_v15 = vpop.f32.mrb[10].mxu0  ;;  %v1789_v16 = vpop.f32.mrb[8].mxu1 }
 0x10c   : > { %v1735_v17 = vpop.f32.mrb[11].mxu0  ;;  %v1790_v20 = vpop.f32.mrb[9].mxu1 }
 0x10d   : > { %v1043_v18 = vadd.f32 %v1733_v14, %v2236_v45  ;;  %v1736_v19 = vadd.f32 %v1735_v17, %v1734_v15  ;;  %v1791_v21 = vadd.f32 %v1790_v20, %v1789_v16  ;;  %v1792_v22 = vpop.f32.mrb[10].mxu1 }
 0x10e   : > { %v1793_v24 = vpop.f32.mrb[11].mxu1 }
 0x10f   : > { %v1046_v23 = vadd.f32 %v1736_v19, %v2236_v45  ;;  %v2252_v25 = vadd.f32 %v1791_v21, %v1043_v18  ;;  %v1794_v26 = vadd.f32 %v1793_v24, %v1792_v22 }
 0x111   : > { %v1737_v27 = vpop.f32.mrb[12].mxu0  ;;  %v2254_v28 = vadd.f32 %v1794_v26, %v1046_v23 }
 0x112   : > { %v1738_v29 = vpop.f32.mrb[13].mxu0 }
 0x113   : > { %v1739_v30 = vadd.f32 %v1738_v29, %v1737_v27  ;;  %v1740_v31 = vpop.f32.mrb[14].mxu0  ;;  %v1795_v32 = vpop.f32.mrb[12].mxu1 }
 0x114   : > { %v1741_v33 = vpop.f32.mrb[15].mxu0  ;;  %v1796_v36 = vpop.f32.mrb[13].mxu1 }
 0x115   : > { %v1051_v34 = vadd.f32 %v1739_v30, %v2236_v45  ;;  %v1742_v35 = vadd.f32 %v1741_v33, %v1740_v31  ;;  %v1797_v37 = vadd.f32 %v1796_v36, %v1795_v32  ;;  %v1798_v38 = vpop.f32.mrb[14].mxu1 }
 0x116   : > { %v1799_v40 = vpop.f32.mrb[15].mxu1 }
 0x117   : > { %v1054_v39 = vadd.f32 %v1742_v35, %v2236_v45  ;;  %v2258_v41 = vadd.f32 %v1797_v37, %v1051_v34  ;;  %v1800_v43 = vadd.f32 %v1799_v40, %v1798_v38 }
 0x119   : > { %v1743_v44 = vpop.f32.mrb[16].mxu0  ;;  %v2260_v46 = vadd.f32 %v1800_v43, %v1054_v39 }
 0x11a   : > { %v1744_v47 = vpop.f32.mrb[17].mxu0 }
 0x11b   : > { %v1745_v48 = vadd.f32 %v1744_v47, %v1743_v44  ;;  %v1746_v49 = vpop.f32.mrb[18].mxu0  ;;  %v1801_v42 = vpop.f32.mrb[16].mxu1 }
 0x11c   : > { %v1747_v50 = vpop.f32.mrb[19].mxu0  ;;  %v1802_v53 = vpop.f32.mrb[17].mxu1 }
 0x11d   : > { %v1059_v51 = vadd.f32 %v1745_v48, %v2236_v45  ;;  %v1748_v52 = vadd.f32 %v1747_v50, %v1746_v49  ;;  %v1803_v54 = vadd.f32 %v1802_v53, %v1801_v42  ;;  %v1804_v55 = vpop.f32.mrb[18].mxu1 }
 0x11e   : > { %v1805_v58 = vpop.f32.mrb[19].mxu1 }
 0x11f   : > { %v1062_v56 = vadd.f32 %v1748_v52, %v2236_v45  ;;  %v2264_v59 = vadd.f32 %v1803_v54, %v1059_v51  ;;  %v1806_v61 = vadd.f32 %v1805_v58, %v1804_v55 }
 0x121   : > { %v1749_v62 = vpop.f32.mrb[20].mxu0  ;;  %v2266_v63 = vadd.f32 %v1806_v61, %v1062_v56 }
 0x122   : > { %v1750_v0 = vpop.f32.mrb[21].mxu0 }
 0x123   : > { %v1751_v1 = vadd.f32 %v1750_v0, %v1749_v62  ;;  %v1752_v2 = vpop.f32.mrb[22].mxu0  ;;  %v1807_v3 = vpop.f32.mrb[20].mxu1 }
 0x124   : > { %v1753_v4 = vpop.f32.mrb[23].mxu0  ;;  %v1808_v7 = vpop.f32.mrb[21].mxu1 }
 0x125   : > { %v1067_v5 = vadd.f32 %v1751_v1, %v2236_v45  ;;  %v1754_v6 = vadd.f32 %v1753_v4, %v1752_v2  ;;  %v1809_v8 = vadd.f32 %v1808_v7, %v1807_v3  ;;  %v1810_v10 = vpop.f32.mrb[22].mxu1 }
 0x126   : > { %v1811_v13 = vpop.f32.mrb[23].mxu1 }
 0x127   : > { %v1070_v11 = vadd.f32 %v1754_v6, %v2236_v45  ;;  %v2270_v14 = vadd.f32 %v1809_v8, %v1067_v5  ;;  %v1812_v15 = vadd.f32 %v1811_v13, %v1810_v10 }
 0x129   : > { %v1755_v16 = vpop.f32.mrb[24].mxu0  ;;  %v2272_v17 = vadd.f32 %v1812_v15, %v1070_v11 }
 0x12a   : > { %v1756_v18 = vpop.f32.mrb[25].mxu0 }
 0x12b   : > { %v1757_v19 = vadd.f32 %v1756_v18, %v1755_v16  ;;  %v1758_v20 = vpop.f32.mrb[26].mxu0  ;;  %v1813_v21 = vpop.f32.mrb[24].mxu1 }
 0x12c   : > { %v1759_v22 = vpop.f32.mrb[27].mxu0  ;;  %v1814_v26 = vpop.f32.mrb[25].mxu1 }
 0x12d   : > { %v1075_v23 = vadd.f32 %v1757_v19, %v2236_v45  ;;  %v1760_v24 = vadd.f32 %v1759_v22, %v1758_v20  ;;  %v1815_v27 = vadd.f32 %v1814_v26, %v1813_v21  ;;  %v1816_v29 = vpop.f32.mrb[26].mxu1 }
 0x12e   : > { %v1817_v31 = vpop.f32.mrb[27].mxu1 }
 0x12f   : > { %v1078_v30 = vadd.f32 %v1760_v24, %v2236_v45  ;;  %v2276_v32 = vadd.f32 %v1815_v27, %v1075_v23  ;;  %v1818_v33 = vadd.f32 %v1817_v31, %v1816_v29 }
 0x131   : > { %v1835_v34 = vpop.f32.mrb[28].mxu0  ;;  %v2278_v35 = vadd.f32 %v1818_v33, %v1078_v30 }
 0x132   : > { %v1836_v36 = vpop.f32.mrb[29].mxu0 }
 0x133   : > { %v1837_v37 = vadd.f32 %v1836_v36, %v1835_v34  ;;  %v1838_v38 = vpop.f32.mrb[30].mxu0  ;;  %v1293_v40 = vpop.f32.mrb[28].mxu1 }
 0x134   : > { %v1839_v39 = vpop.f32.mrb[31].mxu0  ;;  %v1295_v47 = vpop.f32.mrb[29].mxu1 }
 0x135   : > { %v1840_v43 = vadd.f32 %v1839_v39, %v1838_v38  ;;  %v1205_v44 = vadd.f32 %v1837_v37, %v2240_v57  ;;  %v1296_v48 = vpop.f32.mrb[30].mxu1 }
 0x136   : > { %v1298_v42 = vpop.f32.mrb[31].mxu1 }
 0x137   : > { %v1294_v49 = vadd.f32 %v1293_v40, %v1205_v44  ;;  %v1208_v45 = vadd.f32 %v1840_v43, %v2242_v60 }
 0x139   : > { %v1348_v50 = vmul.f32 0.1, %v1294_v49  ;;  %v1297_v51 = vadd.f32 %v1296_v48, %v1208_v45  ;;  %v1841_v52 = vpop.f32.mrb[32].mxu0 }
 0x13a   : > { %v1842_v53 = vpop.f32.mrb[33].mxu0 }
 0x13b   : > { %v1349_v54 = vmul.f32 0.1, %v1297_v51  ;;  %v1843_v55 = vadd.f32 %v1842_v53, %v1841_v52  ;;  %v1844_v56 = vpop.f32.mrb[34].mxu0  ;;  %v1301_v61 = vpop.f32.mrb[32].mxu1  ;;  %v1362_v62 = vmax.f32 %v1294_v49, %v1348_v50 }
 0x13c   : > { %v1845_v58 = vpop.f32.mrb[35].mxu0  ;;  %v1303_v2 = vpop.f32.mrb[33].mxu1 }
 0x13d   : > { %v1363_v0 = vmax.f32 %v1297_v51, %v1349_v54  ;;  %v1846_v1 = vadd.f32 %v1845_v58, %v1844_v56  ;;  %v1213_v57 = vadd.f32 %v1843_v55, %v2246_v9  ;;  %v1304_v60 = vpop.f32.mrb[34].mxu1 }
 0x13e   : > { %v1306_v6 = vpop.f32.mrb[35].mxu1 }
 0x13f   : > { %v1665_v3 = vpack.c.bf16 %v1363_v0, %v1362_v62  ;;  %v1302_v4 = vadd.f32 %v1301_v61, %v1213_v57  ;;  %v1216_v5 = vadd.f32 %v1846_v1, %v2248_v12 }
 0x141   : > { %1666 = vst [vmem:[%s2287_s11] sm:$0xff] %v1665_v3   ;;  %v1350_v7 = vmul.f32 0.1, %v1302_v4  ;;  %v1305_v8 = vadd.f32 %v1304_v60, %v1216_v5  ;;  %v1847_v10 = vpop.f32.mrb[36].mxu0 }
 0x142   : > { %v1848_v11 = vpop.f32.mrb[37].mxu0 }
 0x143   : > { %v1351_v9 = vmul.f32 0.1, %v1305_v8  ;;  %v1849_v13 = vadd.f32 %v1848_v11, %v1847_v10  ;;  %v1850_v15 = vpop.f32.mrb[38].mxu0  ;;  %v1309_v18 = vpop.f32.mrb[36].mxu1  ;;  %v1364_v19 = vmax.f32 %v1302_v4, %v1350_v7 }
 0x144   : > { %v1851_v16 = vpop.f32.mrb[39].mxu0  ;;  %v1311_v23 = vpop.f32.mrb[37].mxu1 }
 0x145   : > { %v1365_v20 = vmax.f32 %v1305_v8, %v1351_v9  ;;  %v1852_v21 = vadd.f32 %v1851_v16, %v1850_v15  ;;  %v1221_v22 = vadd.f32 %v1849_v13, %v2252_v25  ;;  %v1312_v24 = vpop.f32.mrb[38].mxu1 }
 0x146   : > { %v1314_v29 = vpop.f32.mrb[39].mxu1 }
 0x147   : > { %v1670_v12 = vpack.c.bf16 %v1365_v20, %v1364_v19  ;;  %v1310_v26 = vadd.f32 %v1309_v18, %v1221_v22  ;;  %v1224_v27 = vadd.f32 %v1852_v21, %v2254_v28 }
 0x149   : > { %1697 = vst [vmem:[%s2287_s11 + $0x8] sm:$0xff] %v1670_v12   ;;  %v1352_v30 = vmul.f32 0.1, %v1310_v26  ;;  %v1313_v31 = vadd.f32 %v1312_v24, %v1224_v27  ;;  %v1853_v33 = vpop.f32.mrb[40].mxu0 }
 0x14a   : > { %v1854_v34 = vpop.f32.mrb[41].mxu0 }
 0x14b   : > { %v1353_v36 = vmul.f32 0.1, %v1313_v31  ;;  %v1855_v37 = vadd.f32 %v1854_v34, %v1853_v33  ;;  %v1856_v38 = vpop.f32.mrb[42].mxu0  ;;  %v1317_v40 = vpop.f32.mrb[40].mxu1  ;;  %v1366_v43 = vmax.f32 %v1310_v26, %v1352_v30 }
 0x14c   : > { %v1857_v39 = vpop.f32.mrb[43].mxu0  ;;  %v1319_v48 = vpop.f32.mrb[41].mxu1 }
 0x14d   : > { %v1367_v25 = vmax.f32 %v1313_v31, %v1353_v36  ;;  %v1858_v44 = vadd.f32 %v1857_v39, %v1856_v38  ;;  %v1229_v47 = vadd.f32 %v1855_v37, %v2258_v41  ;;  %v1320_v49 = vpop.f32.mrb[42].mxu1 }
 0x14e   : > { %v1322_v50 = vpop.f32.mrb[43].mxu1 }
 0x14f   : > { %v1675_v28 = vpack.c.bf16 %v1367_v25, %v1366_v43  ;;  %v1318_v45 = vadd.f32 %v1317_v40, %v1229_v47  ;;  %v1232_v42 = vadd.f32 %v1858_v44, %v2260_v46 }
 0x151   : > { %1698 = vst [vmem:[%s2287_s11 + $0x10] sm:$0xff] %v1675_v28   ;;  %v1354_v51 = vmul.f32 0.1, %v1318_v45  ;;  %v1321_v52 = vadd.f32 %v1320_v49, %v1232_v42  ;;  %v1859_v53 = vpop.f32.mrb[44].mxu0 }
 0x152   : > { %v1860_v54 = vpop.f32.mrb[45].mxu0 }
 0x153   : > { %v1355_v55 = vmul.f32 0.1, %v1321_v52  ;;  %v1861_v56 = vadd.f32 %v1860_v54, %v1859_v53  ;;  %v1862_v58 = vpop.f32.mrb[46].mxu0  ;;  %v1325_v62 = vpop.f32.mrb[44].mxu1  ;;  %v1368_v0 = vmax.f32 %v1318_v45, %v1354_v51 }
 0x154   : > { %v1863_v61 = vpop.f32.mrb[47].mxu0  ;;  %v1327_v2 = vpop.f32.mrb[45].mxu1 }
 0x155   : > { %v1369_v41 = vmax.f32 %v1321_v52, %v1355_v55  ;;  %v1864_v1 = vadd.f32 %v1863_v61, %v1862_v58  ;;  %v1237_v57 = vadd.f32 %v1861_v56, %v2264_v59  ;;  %v1328_v60 = vpop.f32.mrb[46].mxu1 }
 0x156   : > { %v1330_v5 = vpop.f32.mrb[47].mxu1 }
 0x157   : > { %v1680_v46 = vpack.c.bf16 %v1369_v41, %v1368_v0  ;;  %v1326_v3 = vadd.f32 %v1325_v62, %v1237_v57  ;;  %v1240_v4 = vadd.f32 %v1864_v1, %v2266_v63 }
 0x159   : > { %1699 = vst [vmem:[%s2287_s11 + $0x18] sm:$0xff] %v1680_v46   ;;  %v1356_v6 = vmul.f32 0.1, %v1326_v3  ;;  %v1329_v7 = vadd.f32 %v1328_v60, %v1240_v4  ;;  %v1865_v8 = vpop.f32.mrb[48].mxu0 }
 0x15a   : > { %v1866_v10 = vpop.f32.mrb[49].mxu0 }
 0x15b   : > { %v1357_v11 = vmul.f32 0.1, %v1329_v7  ;;  %v1867_v9 = vadd.f32 %v1866_v10, %v1865_v8  ;;  %v1868_v13 = vpop.f32.mrb[50].mxu0  ;;  %v1333_v16 = vpop.f32.mrb[48].mxu1  ;;  %v1370_v18 = vmax.f32 %v1326_v3, %v1356_v6 }
 0x15c   : > { %v1869_v15 = vpop.f32.mrb[51].mxu0  ;;  %v1335_v21 = vpop.f32.mrb[49].mxu1 }
 0x15d   : > { %v1371_v59 = vmax.f32 %v1329_v7, %v1357_v11  ;;  %v1870_v19 = vadd.f32 %v1869_v15, %v1868_v13  ;;  %v1245_v20 = vadd.f32 %v1867_v9, %v2270_v14  ;;  %v1336_v22 = vpop.f32.mrb[50].mxu1 }
 0x15e   : > { %v1338_v12 = vpop.f32.mrb[51].mxu1 }
 0x15f   : > { %v1685_v63 = vpack.c.bf16 %v1371_v59, %v1370_v18  ;;  %v1334_v23 = vadd.f32 %v1333_v16, %v1245_v20  ;;  %v1248_v24 = vadd.f32 %v1870_v19, %v2272_v17 }
 0x161   : > { %1700 = vst [vmem:[%s2287_s11 + $0x20] sm:$0xff] %v1685_v63   ;;  %v1358_v26 = vmul.f32 0.1, %v1334_v23  ;;  %v1337_v27 = vadd.f32 %v1336_v22, %v1248_v24  ;;  %v1871_v29 = vpop.f32.mrb[52].mxu0 }
 0x162   : > { %v1872_v30 = vpop.f32.mrb[53].mxu0 }
 0x163   : > { %v1359_v31 = vmul.f32 0.1, %v1337_v27  ;;  %v1873_v33 = vadd.f32 %v1872_v30, %v1871_v29  ;;  %v1874_v34 = vpop.f32.mrb[54].mxu0  ;;  %v1341_v37 = vpop.f32.mrb[52].mxu1  ;;  %v1372_v38 = vmax.f32 %v1334_v23, %v1358_v26 }
 0x164   : > { %v1875_v36 = vpop.f32.mrb[55].mxu0  ;;  %v1343_v43 = vpop.f32.mrb[53].mxu1 }
 0x165   : > { %v1373_v14 = vmax.f32 %v1337_v27, %v1359_v31  ;;  %v1876_v39 = vadd.f32 %v1875_v36, %v1874_v34  ;;  %v1253_v40 = vadd.f32 %v1873_v33, %v2276_v32  ;;  %v1344_v17 = vpop.f32.mrb[54].mxu1 }
 0x166   : > { %v1346_v48 = vpop.f32.mrb[55].mxu1 }
 0x167   : > { %v1690_v25 = vpack.c.bf16 %v1373_v14, %v1372_v38  ;;  %v1342_v44 = vadd.f32 %v1341_v37, %v1253_v40  ;;  %v1256_v47 = vadd.f32 %v1876_v39, %v2278_v35 }
 0x169   : > { %1701 = vst [vmem:[%s2287_s11 + $0x28] sm:$0xff] %v1690_v25   ;;  %v1360_v49 = vmul.f32 0.1, %v1342_v44  ;;  %v1345_v28 = vadd.f32 %v1344_v17, %v1256_v47 }
 0x16b   : > { %v1361_v45 = vmul.f32 0.1, %v1345_v28  ;;  %v1374_v42 = vmax.f32 %v1342_v44, %v1360_v49 }
 0x16d   : > { %v1375_v50 = vmax.f32 %v1345_v28, %v1361_v45 }
 0x16f   : > { %v1695_v51 = vpack.c.bf16 %v1375_v50, %v1374_v42 }
 0x171   : > { %1702 = vst [vmem:[%s2287_s11 + $0x30] sm:$0xff] %v1695_v51  }
 0x172 PF: > { %s13_s12 = sadd.s32 1, %s1949_s12  }
 0x173   : > { %p10_p4 = scmp.ge.s32.totalorder %s13_s12, 4  }
 0x175   :  { %12 = sbr.rel (!%p10_p4) target bundleno = 1 (0x1), region = 62 }

// kernel: smodel_forward.9
= control target key start
LH: loop header
LB: loop body
LE: loop exit
PB: predicated region body
PF: predicated region fallthrough
CT: control target
= control target key end

     0   :  { %s1362_s12 = smov 0   ;;  %s1364_s13 = smov 0   ;;  %s1594_s0 = inlined_call_operand.vmem [shape: bf16[120,432], index: 0, kind: input, shape index: {}]   ;;  %s1595_s1 = inlined_call_operand.vmem [shape: bf16[432,128], index: 1, kind: input, shape index: {}]   ;;  %s1596_s2 = inlined_call_operand.vmem [shape: f32[1,128], index: 2, kind: input, shape index: {}]   ;;  %s1597_s3 = inlined_call_operand.vmem [shape: bf16[120,128], index: 3, kind: output, shape index: {}]  }
   0x1   :  { %s1366_s14 = smov 0  }
   0x2 LB: > { %s1375_s15 = sadd.s32 4294967295, %s1307_s14   ;;  %s1377_s16 = sadd.s32 1, %s1307_s14   ;;  %s1307_s14 = sphi %s1366_s14, %s1604_s14   ;;  %s1303_s13 = sphi %s1364_s13, %s1603_s13   ;;  %s1299_s12 = sphi %s1362_s12, %s1602_s12  }
   0x3   : > { %s85_s17 = ssub.s32 %s1307_s14, %s1377_s16  ;;  %s88_s18 = sadd.s32 1, %s1303_s13 }
   0x4   : > { %p86_p0 = scmp.eq.s32.totalorder %s85_s17, 0  ;;  %p98_p1 = scmp.ne.s32.totalorder %s1303_s13, %s1299_s12 }
   0x5   : > { %p99_p2 = scmp.eq.s32.totalorder %s1375_s15, 1  ;;  %p960_p3 = scmp.ge.s32.totalorder %s1307_s14, 1 }
   0x6   : > { %s1385_s19 = scalar_select %p86_p0, %s1303_s13, %s88_s18  }
   0x7   : > { %p1387_p4 = por %p99_p2, %p98_p1  ;;  %p149_p5 = scmp.lt.s32.totalorder %s1307_s14, 3 }
   0x9   : > { %p150_p6 = pnand %p960_p3, %p149_p5 }
   0xa   : > { %v1202_v0 = vld [vmem:[%s1595_s1 + $0x80] sm:$0xff] (!%p150_p6)   ;;  %v1341_v1 = vmov (!%p150_p6), 0   ;;  %v1205_v4 = vld [vmem:[%s1595_s1 + $0x88] sm:$0xff] (!%p150_p6)   ;;  %v1208_v7 = vld [vmem:[%s1595_s1 + $0x90] sm:$0xff] (!%p150_p6)   ;;  %s1425_s18 = sshll.u32 (!%p150_p6), %s1375_s15, 3  ;;  %vm516_vm0 = vcmask (!%p150_p6), 392192  }
   0xb   : > { %153 = sbr.rel (%p150_p6) target bundleno = 356 (0x164), region = 32  ;;  %594 = vmatprep.subr.bf16.mxu1 (!%p150_p6), %v1341_v1  ;;  %v1203_v2 = vld [vmem:[%s1595_s1 + $0x40] sm:$0xff] (!%p150_p6)   ;;  %v1206_v5 = vld [vmem:[%s1595_s1 + $0x48] sm:$0xff] (!%p150_p6)   ;;  %v1209_v8 = vld [vmem:[%s1595_s1 + $0x50] sm:$0xff] (!%p150_p6)   ;;  %p184_p7 = scmp.lt.s32.totalorder (!%p150_p6), %s1425_s18, 14 }
   0xc   : > { %595 = vmatpush1.bf16.msra.mxu1 (!%p150_p6), %v1202_v0  ;;  %v1204_v3 = vld [vmem:[%s1595_s1] sm:$0xff] (!%p150_p6)   ;;  %1073 = vmatprep.subr.bf16.mxu0 (!%p150_p6), %v1203_v2  ;;  %v1207_v6 = vld [vmem:[%s1595_s1 + $0x8] sm:$0xff] (!%p150_p6)   ;;  %v1210_v9 = vld [vmem:[%s1595_s1 + $0x10] sm:$0xff] (!%p150_p6)   ;;  %s175_s22 = sand.u32 (!%p150_p6), 1, %s1299_s12  }
   0xd   : > { %596 = vmatprep.subr.bf16.mxu1 (!%p150_p6), %v1341_v1  ;;  %1074 = vmatpush3.bf16.msra.mxu0 (!%p150_p6), %v1204_v3  ;;  %v1211_v10 = vld [vmem:[%s1595_s1 + $0x98] sm:$0xff] (!%p150_p6)   ;;  %v1215_v13 = vld [vmem:[%s1595_s1 + $0x60] sm:$0xff] (!%p150_p6)   ;;  %v1218_v16 = vld [vmem:[%s1595_s1 + $0x68] sm:$0xff] (!%p150_p6)   ;;  %s961_s23 = sshll.u32 (!%p150_p6), %s175_s22, 5 }
   0xe   : > { %1075 = vmatprep.subr.bf16.mxu0 (!%p150_p6), %v1206_v5  ;;  %v1212_v11 = vld [vmem:[%s1595_s1 + $0x58] sm:$0xff] (!%p150_p6)   ;;  %v1214_v14 = vld [vmem:[%s1595_s1 + $0xa0] sm:$0xff] (!%p150_p6)   ;;  %v1217_v17 = vld [vmem:[%s1595_s1 + $0xa8] sm:$0xff] (!%p150_p6)   ;;  %s1523_s12 = scalar_lea.vmem (!%p150_p6), [#allocation2], %s961_s23  }
   0xf   : > { %v1213_v12 = vld [vmem:[%s1595_s1 + $0x18] sm:$0xff] (!%p150_p6)   ;;  %v1216_v15 = vld [vmem:[%s1595_s1 + $0x20] sm:$0xff] (!%p150_p6)   ;;  %v1219_v18 = vld [vmem:[%s1595_s1 + $0x28] sm:$0xff] (!%p150_p6)  }
  0x10   : > { %597 = vmatpush1.bf16.msra.mxu1 (!%p150_p6), %v1205_v4  ;;  %v1221_v19 = vld [vmem:[%s1595_s1 + $0x70] sm:$0xff] (!%p150_p6)   ;;  %v1223_v22 = vld [vmem:[%s1595_s1 + $0xb8] sm:$0xff] (!%p150_p6)   ;;  %v1226_v26 = vld [vmem:[%s1595_s1 + $0xc0] sm:$0xff] (!%p150_p6)  }
  0x11   : > { %598 = vmatprep.subr.bf16.mxu1 (!%p150_p6), %v1341_v1  ;;  %1076 = vmatpush3.bf16.msra.mxu0 (!%p150_p6), %v1207_v6  ;;  %v1220_v20 = vld [vmem:[%s1595_s1 + $0xb0] sm:$0xff] (!%p150_p6)   ;;  %v1224_v23 = vld [vmem:[%s1595_s1 + $0x78] sm:$0xff] (!%p150_p6)   ;;  %v1230_v30 = vld [vmem:[%s1595_s1 + $0xc8] sm:$0xff] (!%p150_p6)  }
  0x12   : > { %1077 = vmatprep.subr.bf16.mxu0 %v1209_v8  ;;  %s185_s4 = scalar_select %p184_p7, %s1425_s18, 14  ;;  %v1222_v21 = vld [vmem:[%s1595_s1 + $0x30] sm:$0xff]   ;;  %v1225_v25 = vld [vmem:[%s1595_s1 + $0x38] sm:$0xff]   ;;  %v1516_v50 = vld [vmem:[%s1596_s2] ss:$0 sm:$0xff] }
  0x13   : > { %v1231_v31 = vld [vmem:[%s1595_s1 + $0xd0] sm:$0xff]   ;;  %s723_s24 = ssub.s32 (%p1387_p4), 15, %s1425_s18  ;;  %s1047_s25 = sshll.u32 (%p1387_p4), %s1375_s15, 5 }
  0x14   : > { %599 = vmatpush1.bf16.msra.mxu1 %v1208_v7  ;;  %s1038_s11 = sshll.u32 %s185_s4, 4  ;;  %p724_p8 = scmp.lt.s32.totalorder (%p1387_p4), %s723_s24, 8 }
  0x15   : > { %600 = vmatprep.subr.bf16.mxu1 %v1341_v1  ;;  %1078 = vmatpush3.bf16.msra.mxu0 %v1210_v9  ;;  %s1469_s27 = scalar_lea.vmem %s1594_s0, %s1038_s11  ;;  %s1540_s28 = scalar_lea.vmem (%p1387_p4), %s1597_s3, %s1047_s25  }
  0x16   : > { %1079 = vmatprep.subr.bf16.mxu0 %v1212_v11  ;;  %v1229_v24 = vld [vmem:[%s1469_s27 + $0x4] ss:$16 sps:$4 sm:$0xff]   ;;  %v1236_v27 = vld [vmem:[%s1469_s27 + $0xc] ss:$16 sps:$4 sm:$0xff]   ;;  %v1227_v28 = vld [vmem:[%s1469_s27] ss:$16 sps:$4 sm:$0xff]  }
  0x17   : > { %561 = vmatprep.mubr.bf16.mxu0 %v1229_v24  ;;  %v1232_v29 = vld [vmem:[%s1469_s27 + $0x24] ss:$16 sps:$4 sm:$0xff]   ;;  %1009 = vmatprep.mubr.msk.bf16.mxu1 %vm516_vm0, %v1236_v27  ;;  %v1237_v32 = vld [vmem:[%s1469_s27 + $0x20] ss:$16 sps:$4 sm:$0xff]   ;;  %v1234_v34 = vld [vmem:[%s1469_s27 + $0x8] ss:$16 sps:$4 sm:$0xff]  }
  0x18   : > { %601 = vmatpush1.bf16.msra.mxu1 %v1211_v10  ;;  %v1238_v33 = vld [vmem:[%s1469_s27 + $0x44] ss:$16 sps:$4 sm:$0xff]   ;;  %v1240_v35 = vld [vmem:[%s1469_s27 + $0x2c] ss:$16 sps:$4 sm:$0xff]   ;;  %v1242_v36 = vld [vmem:[%s1469_s27 + $0x40] ss:$16 sps:$4 sm:$0xff]  }
  0x19   : > { %602 = vmatprep.subr.bf16.mxu1 %v1341_v1  ;;  %1080 = vmatpush3.bf16.msra.mxu0 %v1213_v12  ;;  %v1244_v37 = vld [vmem:[%s1469_s27 + $0x64] ss:$16 sps:$4 sm:$0xff]   ;;  %v1243_v38 = vld [vmem:[%s1469_s27 + $0x28] ss:$16 sps:$4 sm:$0xff]   ;;  %v1246_v39 = vld [vmem:[%s1469_s27 + $0x4c] ss:$16 sps:$4 sm:$0xff]  }
  0x1a   : > { %1081 = vmatprep.subr.bf16.mxu0 %v1215_v13  ;;  %v1248_v40 = vld [vmem:[%s1469_s27 + $0x60] ss:$16 sps:$4 sm:$0xff]   ;;  %v1249_v41 = vld [vmem:[%s1469_s27 + $0x48] ss:$16 sps:$4 sm:$0xff]   ;;  %v1250_v42 = vld [vmem:[%s1469_s27 + $0x6c] ss:$16 sps:$4 sm:$0xff]  }
  0x1b   : > { %v1252_v43 = vld [vmem:[%s1469_s27 + $0x68] ss:$16 sps:$4 sm:$0xff]  }
  0x1c   : > { %603 = vmatpush1.bf16.msra.mxu1 %v1214_v14 }
  0x1d   : > { %604 = vmatprep.subr.bf16.mxu1 %v1341_v1  ;;  %1082 = vmatpush3.bf16.msra.mxu0 %v1216_v15 }
  0x1e   : > { %1083 = vmatprep.subr.bf16.mxu0 %v1218_v16 }
  0x20   : > { %605 = vmatpush1.bf16.msra.mxu1 %v1217_v17 }
  0x21   : > { %606 = vmatprep.subr.bf16.mxu1 %v1341_v1  ;;  %1084 = vmatpush3.bf16.msra.mxu0 %v1219_v18 }
  0x22   : > { %1085 = vmatprep.subr.bf16.mxu0 %v1221_v19 }
  0x24   : > { %607 = vmatpush1.bf16.msra.mxu1 %v1220_v20 }
  0x25   : > { %608 = vmatprep.subr.bf16.mxu1 %v1341_v1  ;;  %1086 = vmatpush3.bf16.msra.mxu0 %v1222_v21 }
  0x26   : > { %1087 = vmatprep.subr.bf16.mxu0 %v1224_v23 }
  0x28   : > { %609 = vmatpush1.bf16.msra.mxu1 %v1223_v22 }
  0x29   : > { %610 = vmatprep.subr.bf16.mxu1 %v1341_v1  ;;  %1088 = vmatpush3.bf16.msra.mxu0 %v1225_v25 }
  0x2c   : > { %611 = vmatpush1.bf16.msra.mxu1 %v1226_v26  ;;  %562 = vmatmul.mubr.bf16.vlgmr.msra.gmra.mrb[0].mxu0 %v1227_v28 }
  0x2d   : > { %612 = vmatprep.subr.bf16.mxu1 %v1341_v1  ;;  %569 = vmatprep.mubr.bf16.mxu0 %v1232_v29 }
  0x30   : > { %613 = vmatpush1.bf16.msra.mxu1 %v1230_v30 }
  0x31   : > { %614 = vmatprep.subr.bf16.mxu1 %v1341_v1 }
  0x34   : > { %615 = vmatpush1.bf16.msra.mxu1 %v1231_v31  ;;  %570 = vmatmul.mubr.bf16.gmra.mrb[4].mxu0 %v1237_v32 }
  0x35   : > { %577 = vmatprep.mubr.bf16.mxu0 %v1238_v33 }
  0x37   : > { %627 = vmatmul.mubr.bf16.vlgmr.msra.gmra.mrb[0].mxu1 %v1234_v34 }
  0x38   : > { %1010 = vmatprep.mubr.msk.bf16.mxu1 %vm516_vm0, %v1240_v35 }
  0x3c   : > { %578 = vmatmul.mubr.bf16.gmra.mrb[8].mxu0 %v1242_v36 }
  0x3d   : > { %585 = vmatprep.mubr.bf16.mxu0 %v1244_v37 }
  0x3f   : > { %635 = vmatmul.mubr.bf16.gmra.mrb[4].mxu1 %v1243_v38 }
  0x40   : > { %1011 = vmatprep.mubr.msk.bf16.mxu1 %vm516_vm0, %v1246_v39 }
  0x44   : > { %586 = vmatmul.mubr.bf16.gmra.mrb[12].mxu0 %v1248_v40 }
  0x47   : > { %643 = vmatmul.mubr.bf16.gmra.mrb[8].mxu1 %v1249_v41 }
  0x48   : > { %1012 = vmatprep.mubr.msk.bf16.mxu1 %vm516_vm0, %v1250_v42 }
  0x4f   : > { %651 = vmatmul.mubr.bf16.gmra.mrb[12].mxu1 %v1252_v43 }
  0xff   : > { %v1089_v44 = vpop.f32.mrb[0].mxu0 }
 0x100   : > { %v1090_v45 = vpop.f32.mrb[1].mxu0 }
 0x101   : > { %v1091_v46 = vadd.f32 %v1090_v45, %v1089_v44  ;;  %v1092_v47 = vpop.f32.mrb[2].mxu0 }
 0x102   : > { %v1093_v48 = vpop.f32.mrb[3].mxu0 }
 0x103   : > { %v1094_v49 = vadd.f32 %v1093_v48, %v1092_v47  ;;  %v564_v51 = vadd.f32 %v1091_v46, %v1516_v50 }
 0x105   : > { %v567_v59 = vadd.f32 %v1094_v49, %v1516_v50 }
 0x107   : > { %v1095_v52 = vpop.f32.mrb[4].mxu0 }
 0x108   : > { %v1096_v53 = vpop.f32.mrb[5].mxu0 }
 0x109   : > { %v1097_v55 = vadd.f32 %v1096_v53, %v1095_v52  ;;  %v1098_v56 = vpop.f32.mrb[6].mxu0 }
 0x10a   : > { %v628_v54 = vpop.f32.mrb[0].mxu1  ;;  %v1099_v60 = vpop.f32.mrb[7].mxu0 }
 0x10b   : > { %v629_v57 = vadd.f32 %v628_v54, %v564_v51  ;;  %v630_v58 = vpop.f32.mrb[1].mxu1  ;;  %v1100_v62 = vadd.f32 %v1099_v60, %v1098_v56  ;;  %v572_v3 = vadd.f32 %v1097_v55, %v1516_v50 }
 0x10c   : > { %v631_v61 = vpop.f32.mrb[2].mxu1 }
 0x10d   : > { %v659_v63 = vmul.f32 0.1, %v629_v57  ;;  %v632_v0 = vadd.f32 %v631_v61, %v567_v59  ;;  %v633_v1 = vpop.f32.mrb[3].mxu1  ;;  %v575_v14 = vadd.f32 %v1100_v62, %v1516_v50 }
 0x10f   : > { %v660_v2 = vmul.f32 0.1, %v632_v0  ;;  %v1101_v4 = vpop.f32.mrb[8].mxu0  ;;  %v667_v5 = vmax.f32 %v629_v57, %v659_v63 }
 0x110   : > { %v1102_v7 = vpop.f32.mrb[9].mxu0 }
 0x111   : > { %v668_v6 = vmax.f32 %v632_v0, %v660_v2  ;;  %v1103_v9 = vadd.f32 %v1102_v7, %v1101_v4  ;;  %v1104_v10 = vpop.f32.mrb[10].mxu0 }
 0x112   : > { %v636_v8 = vpop.f32.mrb[4].mxu1  ;;  %v1105_v15 = vpop.f32.mrb[11].mxu0 }
 0x113   : > { %v1053_v11 = vpack.c.bf16 %v668_v6, %v667_v5  ;;  %v637_v12 = vadd.f32 %v636_v8, %v572_v3  ;;  %v638_v13 = vpop.f32.mrb[5].mxu1  ;;  %v1106_v17 = vadd.f32 %v1105_v15, %v1104_v10  ;;  %v580_v22 = vadd.f32 %v1103_v9, %v1516_v50 }
 0x114   : > { %v639_v16 = vpop.f32.mrb[6].mxu1 }
 0x115   : > { %1054 = vst [vmem:[%s1523_s12] sm:$0xff] %v1053_v11   ;;  %v661_v18 = vmul.f32 0.1, %v637_v12  ;;  %v640_v19 = vadd.f32 %v639_v16, %v575_v14  ;;  %v641_v20 = vpop.f32.mrb[7].mxu1  ;;  %v583_v33 = vadd.f32 %v1106_v17, %v1516_v50 }
 0x117   : > { %v662_v21 = vmul.f32 0.1, %v640_v19  ;;  %v1107_v23 = vpop.f32.mrb[12].mxu0  ;;  %v669_v24 = vmax.f32 %v637_v12, %v661_v18 }
 0x118   : > { %v1108_v26 = vpop.f32.mrb[13].mxu0 }
 0x119   : > { %v670_v25 = vmax.f32 %v640_v19, %v662_v21  ;;  %v1109_v28 = vadd.f32 %v1108_v26, %v1107_v23  ;;  %v1110_v29 = vpop.f32.mrb[14].mxu0 }
 0x11a   : > { %v644_v27 = vpop.f32.mrb[8].mxu1  ;;  %v1111_v34 = vpop.f32.mrb[15].mxu0 }
 0x11b   : > { %v1058_v30 = vpack.c.bf16 %v670_v25, %v669_v24  ;;  %v645_v31 = vadd.f32 %v644_v27, %v580_v22  ;;  %v646_v32 = vpop.f32.mrb[9].mxu1  ;;  %v1112_v36 = vadd.f32 %v1111_v34, %v1110_v29  ;;  %v588_v41 = vadd.f32 %v1109_v28, %v1516_v50 }
 0x11c   : > { %v647_v35 = vpop.f32.mrb[10].mxu1 }
 0x11d   : > { %1070 = vst [vmem:[%s1523_s12 + $0x8] sm:$0xff] %v1058_v30   ;;  %v663_v37 = vmul.f32 0.1, %v645_v31  ;;  %v648_v38 = vadd.f32 %v647_v35, %v583_v33  ;;  %v649_v39 = vpop.f32.mrb[11].mxu1  ;;  %v591_v48 = vadd.f32 %v1112_v36, %v1516_v50 }
 0x11f   : > { %v664_v40 = vmul.f32 0.1, %v648_v38  ;;  %v671_v42 = vmax.f32 %v645_v31, %v663_v37 }
 0x121   : > { %v672_v43 = vmax.f32 %v648_v38, %v664_v40 }
 0x122   : > { %v652_v44 = vpop.f32.mrb[12].mxu1 }
 0x123   : > { %v1063_v45 = vpack.c.bf16 %v672_v43, %v671_v42  ;;  %v653_v46 = vadd.f32 %v652_v44, %v588_v41  ;;  %v654_v47 = vpop.f32.mrb[13].mxu1 }
 0x124   : > { %v655_v49 = vpop.f32.mrb[14].mxu1 }
 0x125   : > { %1071 = vst [vmem:[%s1523_s12 + $0x10] sm:$0xff] %v1063_v45   ;;  %v665_v51 = vmul.f32 0.1, %v653_v46  ;;  %v656_v52 = vadd.f32 %v655_v49, %v591_v48  ;;  %v657_v53 = vpop.f32.mrb[15].mxu1 }
 0x127   : > { %v666_v54 = vmul.f32 0.1, %v656_v52  ;;  %v673_v55 = vmax.f32 %v653_v46, %v665_v51  ;;  %721 = sbr.rel (!%p1387_p4) target bundleno = 356 (0x164), region = 36 }
 0x129   : > { %v674_v56 = vmax.f32 %v656_v52, %v666_v54 }
 0x12b   : > { %v1068_v57 = vpack.c.bf16 %v674_v56, %v673_v55 }
 0x12d   : > { %1072 = vst [vmem:[%s1523_s12 + $0x18] sm:$0xff] %v1068_v57  }
 0x12e   : > { %s1606_s24 = smov (!%p724_p8, %s723_s24), 8 }
 0x12f   : > { %s1023_s29 = sshll.u32 %s1606_s24, 6 }
 0x130   : > { %p1026_p9 = scmp.eq.s32.totalorder %s1023_s29, 0 }
 0x131   : > { %s1546_s30 = sshrl.u32 (!%p1026_p9), %s1606_s24, 3 }
 0x132   : > { %732 = sbr.rel (%p1026_p9) target bundleno = 356 (0x164), region = 40  ;;  %p1027_p10 = scmp.le.s32.totalorder (!%p1026_p9), %s1546_s30, 0 }
 0x139   : > { %913 = sbr.rel (%p1027_p10) target bundleno = 335 (0x14f), region = 112  ;;  %s1599_s15 = smov (!%p1027_p10), %s1540_s28 }
 0x13a   : > { %s1600_s20 = smov (!%p1027_p10), %s1523_s12  ;;  %s1555_s18 = smov (!%p1027_p10), 0  }
 0x13b   : > { %s1557_s4 = smov (!%p1027_p10), 0  }
 0x140 LB: >> { %v748_v50 = vld [vmem:[%s1315_s20] sm:$0xf]  ;;  %v750_v58 = vld [vmem:[%s1315_s20 + $0x4] sm:$0xf]  ;;  %v752_v59 = vld [vmem:[%s1315_s20 + $0x8] sm:$0xf]  ;;  %s1323_s4 = sphi %s1557_s4, %s742_s4   ;;  %s1319_s18 = sphi %s1555_s18, %s1601_s18   ;;  %s1315_s20 = sphi %s1600_s20, %s769_s20   ;;  %s1311_s15 = sphi %s1599_s15, %s770_s15  }
 0x141   : >> { %749 = vst [vmem:[%s1311_s15] sm:$0xf] %v748_v50  ;;  %751 = vst [vmem:[%s1311_s15 + $0x4] sm:$0xf] %v750_v58  ;;  %v754_v60 = vld [vmem:[%s1315_s20 + $0xc] sm:$0xf]  ;;  %s764_s5 = sadd.s32 1, %s1319_s18 }
 0x142   : >> { %753 = vst [vmem:[%s1311_s15 + $0x8] sm:$0xf] %v752_v59  ;;  %v756_v61 = vld [vmem:[%s1315_s20 + $0x10] sm:$0xf]  ;;  %v758_v62 = vld [vmem:[%s1315_s20 + $0x14] sm:$0xf]  ;;  %p765_p11 = scmp.ge.s32.totalorder %s764_s5, %s1546_s30 }
 0x143   : >> { %755 = vst [vmem:[%s1311_s15 + $0xc] sm:$0xf] %v754_v60  ;;  %757 = vst [vmem:[%s1311_s15 + $0x10] sm:$0xf] %v756_v61  ;;  %v760_v63 = vld [vmem:[%s1315_s20 + $0x18] sm:$0xf] }
 0x144   : >> { %759 = vst [vmem:[%s1311_s15 + $0x14] sm:$0xf] %v758_v62  ;;  %v762_v0 = vld [vmem:[%s1315_s20 + $0x1c] sm:$0xf]  ;;  %761 = vst [vmem:[%s1311_s15 + $0x18] sm:$0xf] %v760_v63 }
 0x145   : >> { %763 = vst [vmem:[%s1311_s15 + $0x1c] sm:$0xf] %v762_v0  ;;  %s1608_s5 = smov (%p765_p11, %s764_s5), 0  ;;  %s742_s4 = sadd.s32 1, %s1323_s4  }
 0x146   : >> { %s1028_s6 = sshll.u32 %s1608_s5, 5  ;;  %p741_p12 = scmp.ge.s32.totalorder %s742_s4, %s1546_s30 }
 0x147   : >> { %s769_s20 = scalar_lea.vmem %s1523_s12, %s1028_s6 [#allocation2]   ;;  %s770_s15 = scalar_lea.vmem %s1540_s28, %s1028_s6  }
 0x148   : >> { %s1601_s18 = smov %s1608_s5  ;;  %744 = sbr.rel (!%p741_p12) target bundleno = 320 (0x140), region = 118 }
 0x14f PF: > { %s1576_s7 = sand.u32 7, %s1606_s24   ;;  %s1048_s8 = sshll.u32 %s1546_s30, 5 }
 0x150   : > { %s775_s9 = scalar_lea.vmem %s1523_s12, %s1048_s8 [#allocation2]   ;;  %s777_s10 = scalar_lea.vmem %s1540_s28, %s1048_s8  }
 0x151   : > { %p1033_p13 = scmp.le.s32.totalorder %s1576_s7, 0 }
 0x152   : > { %s1325_s11 = smov (!%p1033_p13), %s777_s10   ;;  %s1329_s14 = smov (!%p1033_p13), %s775_s9  }
 0x153   : > { %927 = sbr.rel (%p1033_p13) target bundleno = 356 (0x164), region = 123  ;;  %s1333_s17 = smov (!%p1033_p13), 0  }
 0x154   : > { %s1337_s21 = smov (!%p1033_p13), 0  }
 0x15a LB: >> { %v787_v1 = vld [vmem:[%s1331_s14] sm:$0xf]  ;;  %s789_s22 = sadd.s32 1, %s1335_s17  ;;  %s781_s21 = sadd.s32 1, %s1339_s21   ;;  %s1339_s21 = sphi %s1337_s21, %s781_s21   ;;  %s1335_s17 = sphi %s1333_s17, %s1334_s17   ;;  %s1331_s14 = sphi %s1329_s14, %s794_s14   ;;  %s1327_s11 = sphi %s1325_s11, %s795_s11  }
 0x15b   : >> { %788 = vst [vmem:[%s1327_s11] sm:$0xf] %v787_v1  ;;  %p790_p0 = scmp.ge.s32.totalorder %s789_s22, %s1576_s7  ;;  %p780_p1 = scmp.ge.s32.totalorder %s781_s21, %s1576_s7 }
 0x15d   : >> { %s1610_s22 = smov (%p790_p0, %s789_s22), 0  ;;  %783 = sbr.rel (!%p780_p1) target bundleno = 346 (0x15a), region = 129 }
 0x15e   : >> { %s1034_s23 = sshll.u32 %s1610_s22, 2  ;;  %s1334_s17 = smov %s1610_s22  }
 0x15f   : >> { %s794_s14 = scalar_lea.vmem %s775_s9, %s1034_s23 [#allocation2]   ;;  %s795_s11 = scalar_lea.vmem %s777_s10, %s1034_s23  }
 0x164 PF: > { %p10_p2 = scmp.ge.s32.totalorder %s1377_s16, 4   ;;  %s1602_s12 = smov %s1303_s13 }
 0x165   : > { %s1603_s13 = smov %s1385_s19  ;;  %s1604_s14 = smov %s1377_s16 }
 0x166   :  { %12 = sbr.rel (!%p10_p2) target bundleno = 2 (0x2), region = 140 }

// kernel: smodel_forward.10
= control target key start
LH: loop header
LB: loop body
LE: loop exit
PB: predicated region body
PF: predicated region fallthrough
CT: control target
= control target key end

     0   :  { %s1347_s12 = smov 0   ;;  %s1349_s13 = smov 0   ;;  %s1546_s0 = inlined_call_operand.vmem [shape: bf16[36,576], index: 0, kind: input, shape index: {}]   ;;  %s1547_s1 = inlined_call_operand.vmem [shape: bf16[576,128], index: 1, kind: input, shape index: {}]   ;;  %s1548_s2 = inlined_call_operand.vmem [shape: f32[1,128], index: 2, kind: input, shape index: {}]   ;;  %s1549_s3 = inlined_call_operand.vmem [shape: bf16[36,128], index: 3, kind: output, shape index: {}]  }
   0x1   :  { %s1351_s14 = smov 0  }
   0x2 LB: > { %s1360_s15 = sadd.s32 4294967295, %s1293_s14   ;;  %s1362_s16 = sadd.s32 1, %s1293_s14   ;;  %s1293_s14 = sphi %s1351_s14, %s1553_s14   ;;  %s1289_s13 = sphi %s1349_s13, %s1552_s13   ;;  %s1285_s12 = sphi %s1347_s12, %s1551_s12  }
   0x3   : > { %s85_s17 = ssub.s32 %s1293_s14, %s1362_s16  ;;  %s88_s18 = sadd.s32 1, %s1289_s13 }
   0x4   : > { %p86_p0 = scmp.eq.s32.totalorder %s85_s17, 0  ;;  %p98_p1 = scmp.ne.s32.totalorder %s1289_s13, %s1285_s12 }
   0x5   : > { %p99_p2 = scmp.eq.s32.totalorder %s1360_s15, 1  ;;  %p947_p3 = scmp.ge.s32.totalorder %s1293_s14, 1 }
   0x6   : > { %s1370_s19 = scalar_select %p86_p0, %s1289_s13, %s88_s18  }
   0x7   : > { %p1372_p4 = por %p99_p2, %p98_p1  ;;  %p149_p5 = scmp.lt.s32.totalorder %s1293_s14, 3 }
   0x9   : > { %p150_p6 = pnand %p947_p3, %p149_p5 }
   0xa   : > { %v1187_v0 = vld [vmem:[%s1547_s1 + $0x40] sm:$0xff] (!%p150_p6)   ;;  %v1191_v4 = vld [vmem:[%s1547_s1 + $0x48] sm:$0xff] (!%p150_p6)   ;;  %v1195_v8 = vld [vmem:[%s1547_s1 + $0x50] sm:$0xff] (!%p150_p6)   ;;  %s1416_s26 = smul.u32 (!%p150_p6), 3, %s1360_s15  ;;  %vm547_vm0 = vcmask (!%p150_p6), 523264   ;;  %s175_s17 = sand.u32 (!%p150_p6), 1, %s1285_s12  }
   0xb   : > { %153 = sbr.rel (%p150_p6) target bundleno = 345 (0x159), region = 32  ;;  %v1188_v1 = vld [vmem:[%s1547_s1] sm:$0xff] (!%p150_p6)   ;;  %1022 = vmatprep.subr.bf16.mxu0 (!%p150_p6), %v1187_v0  ;;  %v1192_v5 = vld [vmem:[%s1547_s1 + $0x8] sm:$0xff] (!%p150_p6)   ;;  %v1196_v9 = vld [vmem:[%s1547_s1 + $0x10] sm:$0xff] (!%p150_p6)  }
   0xc   : > { %v1189_v2 = vld [vmem:[%s1547_s1 + $0xc0] sm:$0xff] (!%p150_p6)   ;;  %1023 = vmatpush3.bf16.msra.mxu0 (!%p150_p6), %v1188_v1  ;;  %v1193_v6 = vld [vmem:[%s1547_s1 + $0xc8] sm:$0xff] (!%p150_p6)   ;;  %v1197_v10 = vld [vmem:[%s1547_s1 + $0xd0] sm:$0xff] (!%p150_p6)   ;;  %p184_p7 = scmp.lt.s32.totalorder (!%p150_p6), %s1416_s26, 4  ;;  %s1096_s18 = smul.u32 (!%p150_p6), 12, %s175_s17 }
   0xd   : > { %v1190_v3 = vld [vmem:[%s1547_s1 + $0x80] sm:$0xff] (!%p150_p6)   ;;  %1050 = vmatprep.subr.bf16.mxu1 (!%p150_p6), %v1189_v2  ;;  %1024 = vmatprep.subr.bf16.mxu0 (!%p150_p6), %v1191_v4  ;;  %v1194_v7 = vld [vmem:[%s1547_s1 + $0x88] sm:$0xff] (!%p150_p6)   ;;  %v1198_v11 = vld [vmem:[%s1547_s1 + $0x90] sm:$0xff] (!%p150_p6)  }
   0xe   : > { %1051 = vmatpush3.bf16.msra.mxu1 (!%p150_p6), %v1190_v3  ;;  %v1199_v12 = vld [vmem:[%s1547_s1 + $0x58] sm:$0xff] (!%p150_p6)   ;;  %v1203_v16 = vld [vmem:[%s1547_s1 + $0x60] sm:$0xff] (!%p150_p6)   ;;  %v1207_v20 = vld [vmem:[%s1547_s1 + $0x68] sm:$0xff] (!%p150_p6)   ;;  %s1506_s21 = scalar_lea.vmem (!%p150_p6), [#allocation2], %s1096_s18  }
   0xf   : > { %1052 = vmatprep.subr.bf16.mxu1 (!%p150_p6), %v1193_v6  ;;  %v1200_v13 = vld [vmem:[%s1547_s1 + $0x18] sm:$0xff] (!%p150_p6)   ;;  %v1204_v17 = vld [vmem:[%s1547_s1 + $0x20] sm:$0xff] (!%p150_p6)   ;;  %v1208_v21 = vld [vmem:[%s1547_s1 + $0x28] sm:$0xff] (!%p150_p6)  }
  0x10   : > { %1025 = vmatpush3.bf16.msra.mxu0 (!%p150_p6), %v1192_v5  ;;  %v1201_v14 = vld [vmem:[%s1547_s1 + $0xd8] sm:$0xff] (!%p150_p6)   ;;  %v1205_v18 = vld [vmem:[%s1547_s1 + $0xe0] sm:$0xff] (!%p150_p6)   ;;  %v1209_v22 = vld [vmem:[%s1547_s1 + $0xe8] sm:$0xff] (!%p150_p6)  }
  0x11   : > { %1026 = vmatprep.subr.bf16.mxu0 (!%p150_p6), %v1195_v8  ;;  %v1202_v15 = vld [vmem:[%s1547_s1 + $0x98] sm:$0xff] (!%p150_p6)   ;;  %v1206_v19 = vld [vmem:[%s1547_s1 + $0xa0] sm:$0xff] (!%p150_p6)   ;;  %v1210_v23 = vld [vmem:[%s1547_s1 + $0xa8] sm:$0xff] (!%p150_p6)  }
  0x12   : > { %1053 = vmatpush3.bf16.msra.mxu1 %v1194_v7  ;;  %s185_s22 = scalar_select %p184_p7, %s1416_s26, 4  ;;  %v1211_v24 = vld [vmem:[%s1547_s1 + $0x70] sm:$0xff]   ;;  %v1215_v28 = vld [vmem:[%s1547_s1 + $0x78] sm:$0xff]   ;;  %v1222_v34 = vld [vmem:[%s1547_s1 + $0x100] sm:$0xff]  }
  0x13   : > { %1054 = vmatprep.subr.bf16.mxu1 %v1197_v10  ;;  %v1212_v25 = vld [vmem:[%s1547_s1 + $0x30] sm:$0xff]   ;;  %v1216_v29 = vld [vmem:[%s1547_s1 + $0x38] sm:$0xff]   ;;  %v1226_v37 = vld [vmem:[%s1547_s1 + $0x108] sm:$0xff]   ;;  %s728_s12 = ssub.s32 (%p1372_p4), 5, %s1416_s26 }
  0x14   : > { %1027 = vmatpush3.bf16.msra.mxu0 %v1196_v9  ;;  %s1097_s5 = smul.u32 20, %s185_s22  ;;  %v1213_v26 = vld [vmem:[%s1547_s1 + $0xf0] sm:$0xff]   ;;  %v1217_v30 = vld [vmem:[%s1547_s1 + $0xf8] sm:$0xff]   ;;  %v949_v49 = vld [vmem:[%s1548_s2] ss:$0 sm:$0xff]  ;;  %p729_p8 = scmp.lt.s32.totalorder (%p1372_p4), %s728_s12, 3 }
  0x15   : > { %1028 = vmatprep.subr.bf16.mxu0 %v1199_v12  ;;  %v1214_v27 = vld [vmem:[%s1547_s1 + $0xb0] sm:$0xff]   ;;  %v1221_v33 = vld [vmem:[%s1547_s1 + $0xb8] sm:$0xff]  }
  0x16   : > { %1055 = vmatpush3.bf16.msra.mxu1 %v1198_v11  ;;  %s1471_s22 = scalar_lea.vmem %s1546_s0, %s1097_s5  ;;  %v1229_v40 = vld [vmem:[%s1547_s1 + $0x110] sm:$0xff]   ;;  %v1232_v46 = vld [vmem:[%s1547_s1 + $0x118] sm:$0xff]  }
  0x17   : > { %1056 = vmatprep.subr.bf16.mxu1 %v1201_v14  ;;  %v1218_v31 = vld [vmem:[%s1471_s22] ss:$20 sps:$4 sm:$0xff]   ;;  %v1220_v32 = vld [vmem:[%s1471_s22 + $0x4] ss:$20 sps:$4 sm:$0xff]   ;;  %v1223_v35 = vld [vmem:[%s1471_s22 + $0x8] ss:$20 sps:$4 sm:$0xff]  }
  0x18   : > { %1029 = vmatpush3.bf16.msra.mxu0 %v1200_v13  ;;  %586 = vmatprep.mubr.bf16.mxu0 %v1220_v32  ;;  %v1225_v36 = vld [vmem:[%s1471_s22 + $0xc] ss:$20 sps:$4 sm:$0xff]   ;;  %v208_v41 = vld [vmem:[%s1471_s22 + $0x30] sm:$0xff]  ;;  %v1234_v47 = vld [vmem:[%s1471_s22 + $0x38] ss:$0 sps:$4 sm:$0xff]  }
  0x19   : > { %1030 = vmatprep.subr.bf16.mxu0 %v1203_v16  ;;  %v207_v38 = vld [vmem:[%s1471_s22 + $0x28] sm:$0xff]  ;;  %634 = vmatprep.mubr.bf16.mxu1 %v1225_v36  ;;  %v958_v43 = vcombine.high %v208_v41, %v208_v41  ;;  %v1233_v44 = vld [vmem:[%s1471_s22 + $0x10] ss:$20 sps:$4 sm:$0xff]   ;;  %v957_v45 = vcombine.low %v208_v41, %v208_v41  ;;  %s1016_s22 = smul.u32 (%p1372_p4), 12, %s1360_s15 }
  0x1a   : > { %1057 = vmatpush3.bf16.msra.mxu1 %v1202_v15  ;;  %v956_v39 = vcombine.high %v207_v38, %v207_v38  ;;  %v955_v42 = vcombine.low %v207_v38, %v207_v38 }
  0x1b   : > { %1058 = vmatprep.subr.bf16.mxu1 %v1205_v18  ;;  %s1517_s25 = scalar_lea.vmem (%p1372_p4), %s1549_s3, %s1016_s22  }
  0x1c   : > { %1031 = vmatpush3.bf16.msra.mxu0 %v1204_v17 }
  0x1d   : > { %1032 = vmatprep.subr.bf16.mxu0 %v1207_v20 }
  0x1e   : > { %1059 = vmatpush3.bf16.msra.mxu1 %v1206_v19 }
  0x1f   : > { %1060 = vmatprep.subr.bf16.mxu1 %v1209_v22 }
  0x20   : > { %1033 = vmatpush3.bf16.msra.mxu0 %v1208_v21 }
  0x21   : > { %1034 = vmatprep.subr.bf16.mxu0 %v1211_v24 }
  0x22   : > { %1061 = vmatpush3.bf16.msra.mxu1 %v1210_v23 }
  0x23   : > { %1062 = vmatprep.subr.bf16.mxu1 %v1213_v26 }
  0x24   : > { %1035 = vmatpush3.bf16.msra.mxu0 %v1212_v25 }
  0x25   : > { %1036 = vmatprep.subr.bf16.mxu0 %v1215_v28 }
  0x26   : > { %1063 = vmatpush3.bf16.msra.mxu1 %v1214_v27 }
  0x27   : > { %1064 = vmatprep.subr.bf16.mxu1 %v1217_v30 }
  0x28   : > { %1037 = vmatpush3.bf16.msra.mxu0 %v1216_v29 }
  0x29   : > { %1084 = vmatprep.subr.bf16.mxu0 %v1222_v34 }
  0x2a   : > { %1065 = vmatpush3.bf16.msra.mxu1 %v1221_v33 }
  0x2b   : > { %587 = vmatmul.mubr.bf16.vlgmr.msra.gmra.mrb[0].mxu0 %v1218_v31 }
  0x2c   : > { %1085 = vmatpush3.bf16.msra.mxu0 %v1222_v34  ;;  %594 = vmatprep.mubr.bf16.mxu0 %v956_v39 }
  0x2d   : > { %635 = vmatmul.mubr.bf16.vlgmr.msra.gmra.mrb[0].mxu1 %v1223_v35  ;;  %1086 = vmatprep.subr.bf16.mxu0 %v1226_v37 }
  0x2e   : > { %642 = vmatprep.mubr.bf16.mxu1 %v958_v43 }
  0x30   : > { %1087 = vmatpush3.bf16.msra.mxu0 %v1226_v37 }
  0x31   : > { %1088 = vmatprep.subr.bf16.mxu0 %v1229_v40 }
  0x33   : > { %595 = vmatmul.mubr.bf16.gmra.mrb[4].mxu0 %v955_v42 }
  0x34   : > { %1092 = vmatprep.mubr.msk.bf16.mxu0 %vm547_vm0, %v1233_v44  ;;  %1089 = vmatpush3.bf16.msra.mxu0 %v1229_v40 }
  0x35   : > { %643 = vmatmul.mubr.bf16.gmra.mrb[4].mxu1 %v957_v45  ;;  %1090 = vmatprep.subr.bf16.mxu0 %v1232_v46 }
  0x38   : > { %1091 = vmatpush3.bf16.msra.mxu0 %v1232_v46 }
  0x3b   : > { %1093 = vmatmul.mubr.msk.bf16.vlgmr.msra.gmra.mrb[8].mxu0 %vm547_vm0, %v1234_v47 }
  0xfe   : > { %v1038_v48 = vpop.f32.mrb[0].mxu0 }
  0xff   : > { %v1039_v50 = vpop.f32.mrb[1].mxu0 }
 0x100   : > { %v1040_v51 = vadd.f32 %v1039_v50, %v1038_v48  ;;  %v1041_v52 = vpop.f32.mrb[2].mxu0  ;;  %v1066_v53 = vpop.f32.mrb[0].mxu1 }
 0x101   : > { %v1042_v54 = vpop.f32.mrb[3].mxu0  ;;  %v1067_v57 = vpop.f32.mrb[1].mxu1 }
 0x102   : > { %v589_v55 = vadd.f32 %v1040_v51, %v949_v49  ;;  %v1043_v56 = vadd.f32 %v1042_v54, %v1041_v52  ;;  %v1068_v58 = vadd.f32 %v1067_v57, %v1066_v53  ;;  %v1069_v59 = vpop.f32.mrb[2].mxu1 }
 0x103   : > { %v1070_v61 = vpop.f32.mrb[3].mxu1 }
 0x104   : > { %v592_v60 = vadd.f32 %v1043_v56, %v949_v49  ;;  %v1071_v62 = vadd.f32 %v1070_v61, %v1069_v59  ;;  %v637_v63 = vadd.f32 %v1068_v58, %v589_v55 }
 0x106   : > { %v1044_v0 = vpop.f32.mrb[4].mxu0  ;;  %v640_v2 = vadd.f32 %v1071_v62, %v592_v60 }
 0x107   : > { %v1045_v1 = vpop.f32.mrb[5].mxu0 }
 0x108   : > { %v1046_v3 = vadd.f32 %v1045_v1, %v1044_v0  ;;  %v1047_v4 = vpop.f32.mrb[6].mxu0  ;;  %v1072_v5 = vpop.f32.mrb[4].mxu1 }
 0x109   : > { %v1048_v6 = vpop.f32.mrb[7].mxu0  ;;  %v1073_v8 = vpop.f32.mrb[5].mxu1 }
 0x10a   : > { %v597_v7 = vadd.f32 %v1046_v3, %v949_v49  ;;  %v1074_v9 = vadd.f32 %v1073_v8, %v1072_v5  ;;  %v1075_v10 = vpop.f32.mrb[6].mxu1 }
 0x10b   : > { %v1076_v11 = vpop.f32.mrb[7].mxu1 }
 0x10c   : > { %v645_v12 = vadd.f32 %v1074_v9, %v597_v7 }
 0x10e   : > { %v1094_v13 = vpop.f32.mrb[8].mxu0 }
 0x10f   : > { %v693_v14 = vadd.f32 %v1094_v13, %v645_v12  ;;  %v684_v15 = vpop.f32.mrb[9].mxu0 }
 0x110   : > { %v685_v16 = vadd.f32 %v684_v15, %v637_v63  ;;  %v1095_v17 = vpop.f32.mrb[10].mxu0 }
 0x111   : > { %v700_v18 = vmul.f32 0.1, %v693_v14  ;;  %v687_v19 = vpop.f32.mrb[11].mxu0 }
 0x112   : > { %v698_v20 = vmul.f32 0.1, %v685_v16  ;;  %v688_v21 = vadd.f32 %v687_v19, %v640_v2 }
 0x113   : > { %v703_v22 = vmax.f32 %v693_v14, %v700_v18 }
 0x114   : > { %v699_v23 = vmul.f32 0.1, %v688_v21  ;;  %v701_v25 = vmax.f32 %v685_v16, %v698_v20  ;;  %726 = sbr.rel (!%p1372_p4) target bundleno = 345 (0x159), region = 36 }
 0x115   : > { %v1015_v24 = vpack.c.bf16 %v703_v22, %v703_v22 }
 0x116   : > { %v702_v26 = vmax.f32 %v688_v21, %v699_v23 }
 0x117   : > { %719 = vst [vmem:[%s1506_s21 + $0x8] sm:$0xf] %v1015_v24 }
 0x118   : > { %v1020_v27 = vpack.c.bf16 %v702_v26, %v701_v25 }
 0x11a   : > { %1021 = vst [vmem:[%s1506_s21] sm:$0xff] %v1020_v27  }
 0x11b   : > { %s1555_s12 = smov (!%p729_p8, %s728_s12), 3 }
 0x11c   : > { %s1001_s27 = sshll.u32 %s1555_s12, 6 }
 0x11d   : > { %p1004_p9 = scmp.eq.s32.totalorder %s1001_s27, 0 }
 0x11e   : > { %1235 = sdivrem.u32 (!%p1004_p9), %s1555_s12, 3 }
 0x11f   : > { %737 = sbr.rel (%p1004_p9) target bundleno = 345 (0x159), region = 40 }
 0x127   : > { %s1523_s20 = spop.drf %1235 }
 0x128   : > { %p1005_p10 = scmp.le.s32.totalorder %s1523_s20, 0 }
 0x129   : > { %s1295_s15 = smov (!%p1005_p10), %s1517_s25   ;;  %s1299_s26 = smov (!%p1005_p10), %s1506_s21  }
 0x12a   : > { %900 = sbr.rel (%p1005_p10) target bundleno = 316 (0x13c), region = 112  ;;  %s1303_s28 = smov (!%p1005_p10), 0  }
 0x12b   : > { %s1307_s29 = smov (!%p1005_p10), 0  }
 0x131 LB: >> { %v754_v28 = vld [vmem:[%s1301_s26] sm:$0xf]  ;;  %v756_v29 = vld [vmem:[%s1301_s26 + $0x4] sm:$0xf]  ;;  %v758_v30 = vld [vmem:[%s1301_s26 + $0x8] sm:$0xf]  ;;  %s1309_s29 = sphi %s1307_s29, %s748_s29   ;;  %s1305_s28 = sphi %s1303_s28, %s1304_s28   ;;  %s1301_s26 = sphi %s1299_s26, %s765_s26   ;;  %s1297_s15 = sphi %s1295_s15, %s766_s15  }
 0x132   : >> { %755 = vst [vmem:[%s1297_s15] sm:$0xf] %v754_v28  ;;  %757 = vst [vmem:[%s1297_s15 + $0x4] sm:$0xf] %v756_v29  ;;  %s760_s30 = sadd.s32 1, %s1305_s28  ;;  %s748_s29 = sadd.s32 1, %s1309_s29  }
 0x133   : >> { %759 = vst [vmem:[%s1297_s15 + $0x8] sm:$0xf] %v758_v30  ;;  %p761_p11 = scmp.ge.s32.totalorder %s760_s30, %s1523_s20  ;;  %p747_p12 = scmp.ge.s32.totalorder %s748_s29, %s1523_s20 }
 0x135   : >> { %s1557_s30 = smov (%p761_p11, %s760_s30), 0  ;;  %750 = sbr.rel (!%p747_p12) target bundleno = 305 (0x131), region = 118 }
 0x136   : >> { %s763_s4 = smul.u32 12, %s1557_s30  ;;  %s1304_s28 = smov %s1557_s30  }
 0x138   : >> { %s765_s26 = scalar_lea.vmem %s1506_s21, %s763_s4 [#allocation2]   ;;  %s766_s15 = scalar_lea.vmem %s1517_s25, %s763_s4  }
 0x13c PF: > { %1237 = sdivrem.u32 %s1555_s12, 3 }
 0x13d   : > { %s1006_s5 = smul.u32 12, %s1523_s20 }
 0x13f   : > { %s771_s6 = scalar_lea.vmem %s1506_s21, %s1006_s5 [#allocation2]   ;;  %s773_s7 = scalar_lea.vmem %s1517_s25, %s1006_s5  }
 0x145   : > { %s1238_s8 = spop.drf %1237 }
 0x146   : > { %p1008_p13 = scmp.le.s32.totalorder %s1238_s8, 0 }
 0x147   : > { %s1311_s9 = smov (!%p1008_p13), %s773_s7   ;;  %s1315_s10 = smov (!%p1008_p13), %s771_s6  }
 0x148   : > { %914 = sbr.rel (%p1008_p13) target bundleno = 345 (0x159), region = 123  ;;  %s1319_s11 = smov (!%p1008_p13), 0  }
 0x149   : > { %s1323_s14 = smov (!%p1008_p13), 0  }
 0x14f LB: >> { %v783_v31 = vld [vmem:[%s1317_s10] sm:$0xf]  ;;  %s785_s17 = sadd.s32 1, %s1321_s11  ;;  %s777_s14 = sadd.s32 1, %s1325_s14   ;;  %s1325_s14 = sphi %s1323_s14, %s777_s14   ;;  %s1321_s11 = sphi %s1319_s11, %s1320_s11   ;;  %s1317_s10 = sphi %s1315_s10, %s790_s10   ;;  %s1313_s9 = sphi %s1311_s9, %s791_s9  }
 0x150   : >> { %784 = vst [vmem:[%s1313_s9] sm:$0xf] %v783_v31  ;;  %p786_p0 = scmp.ge.s32.totalorder %s785_s17, %s1238_s8  ;;  %p776_p1 = scmp.ge.s32.totalorder %s777_s14, %s1238_s8 }
 0x152   : >> { %s1559_s17 = smov (%p786_p0, %s785_s17), 0  ;;  %779 = sbr.rel (!%p776_p1) target bundleno = 335 (0x14f), region = 129 }
 0x153   : >> { %s1009_s18 = sshll.u32 %s1559_s17, 2  ;;  %s1320_s11 = smov %s1559_s17  }
 0x154   : >> { %s790_s10 = scalar_lea.vmem %s771_s6, %s1009_s18 [#allocation2]   ;;  %s791_s9 = scalar_lea.vmem %s773_s7, %s1009_s18  }
 0x159 PF: > { %p10_p2 = scmp.ge.s32.totalorder %s1362_s16, 4   ;;  %s1551_s12 = smov %s1289_s13 }
 0x15a   : > { %s1552_s13 = smov %s1370_s19  ;;  %s1553_s14 = smov %s1362_s16 }
 0x15b   :  { %12 = sbr.rel (!%p10_p2) target bundleno = 2 (0x2), region = 140 }

// kernel: smodel_forward.11
= control target key start
LH: loop header
LB: loop body
LE: loop exit
PB: predicated region body
PF: predicated region fallthrough
CT: control target
= control target key end

     0   :  { %v765_v36 = vlaneseq  ;;  %v9043_v37 = vmov 1966171168   ;;  %vm9046_vm0 = vmmov 0   ;;  %s11775_s1 = inlined_call_operand.vmem [shape: bf16[1152,1280], index: 1, kind: input, shape index: {}]   ;;  %s11776_s0 = inlined_call_operand.vmem [shape: bf16[2,1152], index: 0, kind: input, shape index: {}]   ;;  %s11777_s3 = inlined_call_operand.vmem [shape: bf16[1280,128], index: 3, kind: input, shape index: {}]   ;;  %s11778_s2 = inlined_call_operand.vmem [shape: f32[1,1280], index: 2, kind: input, shape index: {}]   ;;  %s11779_s4 = inlined_call_operand.vmem [shape: f32[1,128], index: 4, kind: input, shape index: {}]   ;;  %s11780_s5 = inlined_call_operand.vmem [shape: bf16[128,128], index: 5, kind: input, shape index: {}]   ;;  %s11781_s7 = inlined_call_operand.vmem [shape: bf16[128,128], index: 7, kind: input, shape index: {}]   ;;  %s11782_s9 = inlined_call_operand.vmem [shape: bf16[128,128], index: 9, kind: input, shape index: {}]   ;;  %s11783_s6 = inlined_call_operand.vmem [shape: f32[1,128], index: 6, kind: input, shape index: {}]   ;;  %s11784_s8 = inlined_call_operand.vmem [shape: f32[1,128], index: 8, kind: input, shape index: {}]   ;;  %s11785_s10 = inlined_call_operand.vmem [shape: f32[1,128], index: 10, kind: input, shape index: {}]   ;;  %s11786_s11 = inlined_call_operand.vmem [shape: f32[2,128], index: 11, kind: output, shape index: {}]  }
   0x1   :  { %v7858_v0 = vld [vmem:[%s11775_s1 + $0x4] ss:$40 sps:$4 sm:$0xff]   ;;  %v7862_v2 = vld [vmem:[%s11775_s1] ss:$40 sps:$4 sm:$0xff]   ;;  %v7864_v4 = vld [vmem:[%s11775_s1 + $0x54] ss:$40 sps:$4 sm:$0xff]   ;;  %v819_v38 = vunpack.c.l.s4 %v9043_v37 }
   0x2   :  { %v7860_v1 = vld [vmem:[%s11775_s1 + $0xc] ss:$40 sps:$4 sm:$0xff]   ;;  %4489 = vmatprep.subr.bf16.mxu0 %v7858_v0  ;;  %v7863_v3 = vld [vmem:[%s11775_s1 + $0x8] ss:$40 sps:$4 sm:$0xff]   ;;  %v7866_v5 = vld [vmem:[%s11775_s1 + $0x5c] ss:$40 sps:$4 sm:$0xff]  }
   0x3   :  { %4694 = vmatprep.subr.bf16.mxu1 %v7860_v1  ;;  %4490 = vmatpush1.bf16.msra.mxu0 %v7862_v2  ;;  %v7868_v6 = vld [vmem:[%s11775_s1 + $0x50] ss:$40 sps:$4 sm:$0xff]   ;;  %v7870_v8 = vld [vmem:[%s11775_s1 + $0xa4] ss:$40 sps:$4 sm:$0xff]   ;;  %v7874_v10 = vld [vmem:[%s11775_s1 + $0xa0] ss:$40 sps:$4 sm:$0xff]   ;;  %v820_v43 = vunpack.c.0.s8 %v819_v38 }
   0x4   :  { %4695 = vmatpush1.bf16.msra.mxu1 %v7863_v3  ;;  %4491 = vmatprep.subr.bf16.mxu0 %v7864_v4  ;;  %v7869_v7 = vld [vmem:[%s11775_s1 + $0x58] ss:$40 sps:$4 sm:$0xff]   ;;  %v7872_v9 = vld [vmem:[%s11775_s1 + $0xac] ss:$40 sps:$4 sm:$0xff]   ;;  %v7875_v11 = vld [vmem:[%s11775_s1 + $0xa8] ss:$40 sps:$4 sm:$0xff]  }
   0x5   :  { %4696 = vmatprep.subr.bf16.mxu1 %v7866_v5  ;;  %v7876_v12 = vld [vmem:[%s11775_s1 + $0xf4] ss:$40 sps:$4 sm:$0xff]   ;;  %v7880_v14 = vld [vmem:[%s11775_s1 + $0xf0] ss:$40 sps:$4 sm:$0xff]   ;;  %v7882_v16 = vld [vmem:[%s11775_s1 + $0x144] ss:$40 sps:$4 sm:$0xff]  }
   0x6   :  { %v7878_v13 = vld [vmem:[%s11775_s1 + $0xfc] ss:$40 sps:$4 sm:$0xff]   ;;  %v7881_v15 = vld [vmem:[%s11775_s1 + $0xf8] ss:$40 sps:$4 sm:$0xff]   ;;  %v7884_v17 = vld [vmem:[%s11775_s1 + $0x14c] ss:$40 sps:$4 sm:$0xff]  }
   0x7   :  { %4492 = vmatpush1.bf16.msra.mxu0 %v7868_v6  ;;  %v7886_v18 = vld [vmem:[%s11775_s1 + $0x140] ss:$40 sps:$4 sm:$0xff]   ;;  %v7888_v20 = vld [vmem:[%s11775_s1 + $0x194] ss:$40 sps:$4 sm:$0xff]   ;;  %v7892_v22 = vld [vmem:[%s11775_s1 + $0x190] ss:$40 sps:$4 sm:$0xff]  }
   0x8   :  { %4697 = vmatpush1.bf16.msra.mxu1 %v7869_v7  ;;  %4493 = vmatprep.subr.bf16.mxu0 %v7870_v8  ;;  %v7887_v19 = vld [vmem:[%s11775_s1 + $0x148] ss:$40 sps:$4 sm:$0xff]   ;;  %v7890_v21 = vld [vmem:[%s11775_s1 + $0x19c] ss:$40 sps:$4 sm:$0xff]   ;;  %v7893_v23 = vld [vmem:[%s11775_s1 + $0x198] ss:$40 sps:$4 sm:$0xff]  }
   0x9   :  { %4698 = vmatprep.subr.bf16.mxu1 %v7872_v9  ;;  %v7894_v24 = vld [vmem:[%s11775_s1 + $0x1e4] ss:$40 sps:$4 sm:$0xff]   ;;  %v7898_v26 = vld [vmem:[%s11775_s1 + $0x1e0] ss:$40 sps:$4 sm:$0xff]   ;;  %v7900_v28 = vld [vmem:[%s11775_s1 + $0x234] ss:$40 sps:$4 sm:$0xff]  }
   0xa   :  { %v7896_v25 = vld [vmem:[%s11775_s1 + $0x1ec] ss:$40 sps:$4 sm:$0xff]   ;;  %v7899_v27 = vld [vmem:[%s11775_s1 + $0x1e8] ss:$40 sps:$4 sm:$0xff]   ;;  %v7902_v29 = vld [vmem:[%s11775_s1 + $0x23c] ss:$40 sps:$4 sm:$0xff]  }
   0xb   :  { %4494 = vmatpush1.bf16.msra.mxu0 %v7874_v10  ;;  %v7904_v30 = vld [vmem:[%s11775_s1 + $0x230] ss:$40 sps:$4 sm:$0xff]   ;;  %v7906_v32 = vld [vmem:[%s11775_s1 + $0x284] ss:$40 sps:$4 sm:$0xff]   ;;  %v7910_v34 = vld [vmem:[%s11775_s1 + $0x280] ss:$40 sps:$4 sm:$0xff]  }
   0xc   :  { %4699 = vmatpush1.bf16.msra.mxu1 %v7875_v11  ;;  %4495 = vmatprep.subr.bf16.mxu0 %v7876_v12  ;;  %v7905_v31 = vld [vmem:[%s11775_s1 + $0x238] ss:$40 sps:$4 sm:$0xff]   ;;  %v7908_v33 = vld [vmem:[%s11775_s1 + $0x28c] ss:$40 sps:$4 sm:$0xff]   ;;  %v7911_v35 = vld [vmem:[%s11775_s1 + $0x288] ss:$40 sps:$4 sm:$0xff]  }
   0xd   :  { %4700 = vmatprep.subr.bf16.mxu1 %v7878_v13  ;;  %v7912_v39 = vld [vmem:[%s11775_s1 + $0x2d4] ss:$40 sps:$4 sm:$0xff]   ;;  %v7916_v41 = vld [vmem:[%s11775_s1 + $0x2d0] ss:$40 sps:$4 sm:$0xff]   ;;  %v9224_v42 = vshrl.u32 %v765_v36, 7  ;;  %v9253_v52 = vld [vmem:[%s11776_s0] sm:$0xff] }
   0xe   :  { %v7914_v40 = vld [vmem:[%s11775_s1 + $0x2dc] ss:$40 sps:$4 sm:$0xff]   ;;  %v7917_v44 = vld [vmem:[%s11775_s1 + $0x2d8] ss:$40 sps:$4 sm:$0xff]   ;;  %v7920_v46 = vld [vmem:[%s11775_s1 + $0x32c] ss:$40 sps:$4 sm:$0xff]  }
   0xf   :  { %4496 = vmatpush1.bf16.msra.mxu0 %v7880_v14  ;;  %v7918_v45 = vld [vmem:[%s11775_s1 + $0x324] ss:$40 sps:$4 sm:$0xff]   ;;  %v7922_v47 = vld [vmem:[%s11775_s1 + $0x320] ss:$40 sps:$4 sm:$0xff]   ;;  %v9242_v49 = vsub.s32 %v820_v43, %v9224_v42  ;;  %v7924_v50 = vld [vmem:[%s11775_s1 + $0x374] ss:$40 sps:$4 sm:$0xff]  }
  0x10   :  { %4701 = vmatpush1.bf16.msra.mxu1 %v7881_v15  ;;  %4497 = vmatprep.subr.bf16.mxu0 %v7882_v16  ;;  %v7923_v48 = vld [vmem:[%s11775_s1 + $0x328] ss:$40 sps:$4 sm:$0xff]   ;;  %v7926_v51 = vld [vmem:[%s11775_s1 + $0x37c] ss:$40 sps:$4 sm:$0xff]   ;;  %v7929_v55 = vld [vmem:[%s11775_s1 + $0x378] ss:$40 sps:$4 sm:$0xff]  }
  0x11   :  { %4702 = vmatprep.subr.bf16.mxu1 %v7884_v17  ;;  %v7928_v53 = vld [vmem:[%s11775_s1 + $0x370] ss:$40 sps:$4 sm:$0xff]   ;;  %v824_v54 = vrot.slane %v9253_v52, %v9242_v49  ;;  %v7930_v56 = vld [vmem:[%s11775_s1 + $0x3c4] ss:$40 sps:$4 sm:$0xff]   ;;  %v7934_v59 = vld [vmem:[%s11775_s1 + $0x3c0] ss:$40 sps:$4 sm:$0xff]  }
  0x12   :  { %v7932_v57 = vld [vmem:[%s11775_s1 + $0x3cc] ss:$40 sps:$4 sm:$0xff]   ;;  %v7935_v61 = vld [vmem:[%s11775_s1 + $0x3c8] ss:$40 sps:$4 sm:$0xff]   ;;  %v7938_v63 = vld [vmem:[%s11775_s1 + $0x41c] ss:$40 sps:$4 sm:$0xff]  }
  0x13   :  { %4498 = vmatpush1.bf16.msra.mxu0 %v7886_v18  ;;  %v832_v58 = vcombine.high %v824_v54, %v824_v54  ;;  %v7936_v62 = vld [vmem:[%s11775_s1 + $0x414] ss:$40 sps:$4 sm:$0xff]   ;;  %v7940_v0 = vld [vmem:[%s11775_s1 + $0x410] ss:$40 sps:$4 sm:$0xff]   ;;  %v7942_v2 = vld [vmem:[%s11775_s1 + $0x464] ss:$40 sps:$4 sm:$0xff]   ;;  %v9326_v13 = vrot.slane %v824_v54, %v9242_v49 }
  0x14   :  { %4703 = vmatpush1.bf16.msra.mxu1 %v7887_v19  ;;  %4499 = vmatprep.subr.bf16.mxu0 %v7888_v20  ;;  %v7941_v1 = vld [vmem:[%s11775_s1 + $0x418] ss:$40 sps:$4 sm:$0xff]   ;;  %v7944_v3 = vld [vmem:[%s11775_s1 + $0x46c] ss:$40 sps:$4 sm:$0xff]   ;;  %v7947_v5 = vld [vmem:[%s11775_s1 + $0x468] ss:$40 sps:$4 sm:$0xff]  }
  0x15   :  { %4704 = vmatprep.subr.bf16.mxu1 %v7890_v21  ;;  %v9273_v60 = vrot.slane %v832_v58, %v9242_v49  ;;  %v7946_v4 = vld [vmem:[%s11775_s1 + $0x460] ss:$40 sps:$4 sm:$0xff]   ;;  %v7948_v6 = vld [vmem:[%s11775_s1 + $0x4b4] ss:$40 sps:$4 sm:$0xff]   ;;  %v7952_v8 = vld [vmem:[%s11775_s1 + $0x4b0] ss:$40 sps:$4 sm:$0xff]  }
  0x16   :  { %v7950_v7 = vld [vmem:[%s11775_s1 + $0x4bc] ss:$40 sps:$4 sm:$0xff]   ;;  %v7953_v9 = vld [vmem:[%s11775_s1 + $0x4b8] ss:$40 sps:$4 sm:$0xff]   ;;  %v7959_v11 = vld [vmem:[%s11775_s1 + $0x50c] ss:$40 sps:$4 sm:$0xff]  }
  0x17   :  { %4500 = vmatpush1.bf16.msra.mxu0 %v7892_v22  ;;  %4521 = vmatprep.mubr.bf16.mxu0 %v9273_v60  ;;  %v7956_v10 = vld [vmem:[%s11775_s1 + $0x504] ss:$40 sps:$4 sm:$0xff]   ;;  %v7954_v12 = vld [vmem:[%s11775_s1 + $0x500] ss:$40 sps:$4 sm:$0xff]   ;;  %v7962_v15 = vld [vmem:[%s11775_s1 + $0x554] ss:$40 sps:$4 sm:$0xff]   ;;  %v9339_v17 = vcombine.high %v9273_v60, %v9273_v60 }
  0x18   :  { %4705 = vmatpush1.bf16.msra.mxu1 %v7893_v23  ;;  %4501 = vmatprep.subr.bf16.mxu0 %v7894_v24  ;;  %v7957_v14 = vld [vmem:[%s11775_s1 + $0x508] ss:$40 sps:$4 sm:$0xff]   ;;  %v7965_v16 = vld [vmem:[%s11775_s1 + $0x55c] ss:$40 sps:$4 sm:$0xff]   ;;  %v7963_v19 = vld [vmem:[%s11775_s1 + $0x558] ss:$40 sps:$4 sm:$0xff]  }
  0x19   :  { %4706 = vmatprep.subr.bf16.mxu1 %v7896_v25  ;;  %4726 = vmatprep.mubr.bf16.mxu1 %v9273_v60  ;;  %v7960_v18 = vld [vmem:[%s11775_s1 + $0x550] ss:$40 sps:$4 sm:$0xff]   ;;  %v7968_v20 = vld [vmem:[%s11775_s1 + $0x5a4] ss:$40 sps:$4 sm:$0xff]   ;;  %v7966_v22 = vld [vmem:[%s11775_s1 + $0x5a0] ss:$40 sps:$4 sm:$0xff]  }
  0x1a   :  { %v7971_v21 = vld [vmem:[%s11775_s1 + $0x5ac] ss:$40 sps:$4 sm:$0xff]   ;;  %v7969_v23 = vld [vmem:[%s11775_s1 + $0x5a8] ss:$40 sps:$4 sm:$0xff]   ;;  %v7977_v25 = vld [vmem:[%s11775_s1 + $0x5fc] ss:$40 sps:$4 sm:$0xff]  }
  0x1b   :  { %4502 = vmatpush1.bf16.msra.mxu0 %v7898_v26  ;;  %v7974_v24 = vld [vmem:[%s11775_s1 + $0x5f4] ss:$40 sps:$4 sm:$0xff]   ;;  %v7972_v26 = vld [vmem:[%s11775_s1 + $0x5f0] ss:$40 sps:$4 sm:$0xff]   ;;  %v7992_v36 = vld [vmem:[%s11775_s1 + $0x6e4] ss:$40 sps:$4 sm:$0xff]  }
  0x1c   :  { %4707 = vmatpush1.bf16.msra.mxu1 %v7899_v27  ;;  %4503 = vmatprep.subr.bf16.mxu0 %v7900_v28  ;;  %v7975_v27 = vld [vmem:[%s11775_s1 + $0x5f8] ss:$40 sps:$4 sm:$0xff]   ;;  %v7980_v28 = vld [vmem:[%s11775_s1 + $0x644] ss:$40 sps:$4 sm:$0xff]   ;;  %v8017_v58 = vld [vmem:[%s11775_s1 + $0x828] ss:$40 sps:$4 sm:$0xff]  }
  0x1d   :  { %4708 = vmatprep.subr.bf16.mxu1 %v7902_v29  ;;  %v7983_v29 = vld [vmem:[%s11775_s1 + $0x64c] ss:$40 sps:$4 sm:$0xff]   ;;  %v7990_v38 = vld [vmem:[%s11775_s1 + $0x6e0] ss:$40 sps:$4 sm:$0xff]   ;;  %v7996_v43 = vld [vmem:[%s11775_s1 + $0x730] ss:$40 sps:$4 sm:$0xff]  }
  0x1e   :  { %v7995_v37 = vld [vmem:[%s11775_s1 + $0x6ec] ss:$40 sps:$4 sm:$0xff]   ;;  %v8011_v54 = vld [vmem:[%s11775_s1 + $0x7d8] ss:$40 sps:$4 sm:$0xff]  }
  0x1f   :  { %4504 = vmatpush1.bf16.msra.mxu0 %v7904_v30  ;;  %v7978_v30 = vld [vmem:[%s11775_s1 + $0x640] ss:$40 sps:$4 sm:$0xff]  }
  0x20   :  { %4709 = vmatpush1.bf16.msra.mxu1 %v7905_v31  ;;  %4505 = vmatprep.subr.bf16.mxu0 %v7906_v32  ;;  %v7981_v31 = vld [vmem:[%s11775_s1 + $0x648] ss:$40 sps:$4 sm:$0xff]   ;;  %v7986_v32 = vld [vmem:[%s11775_s1 + $0x694] ss:$40 sps:$4 sm:$0xff]  }
  0x21   :  { %4710 = vmatprep.subr.bf16.mxu1 %v7908_v33  ;;  %v7989_v33 = vld [vmem:[%s11775_s1 + $0x69c] ss:$40 sps:$4 sm:$0xff]  }
  0x23   :  { %4506 = vmatpush1.bf16.msra.mxu0 %v7910_v34  ;;  %v7984_v34 = vld [vmem:[%s11775_s1 + $0x690] ss:$40 sps:$4 sm:$0xff]  }
  0x24   :  { %4711 = vmatpush1.bf16.msra.mxu1 %v7911_v35  ;;  %4507 = vmatprep.subr.bf16.mxu0 %v7912_v39  ;;  %v7987_v35 = vld [vmem:[%s11775_s1 + $0x698] ss:$40 sps:$4 sm:$0xff]   ;;  %v7993_v39 = vld [vmem:[%s11775_s1 + $0x6e8] ss:$40 sps:$4 sm:$0xff]  }
  0x25   :  { %4712 = vmatprep.subr.bf16.mxu1 %v7914_v40  ;;  %v7998_v40 = vld [vmem:[%s11775_s1 + $0x734] ss:$40 sps:$4 sm:$0xff]  }
  0x27   :  { %4508 = vmatpush1.bf16.msra.mxu0 %v7916_v41  ;;  %v8001_v41 = vld [vmem:[%s11775_s1 + $0x73c] ss:$40 sps:$4 sm:$0xff]  }
  0x28   :  { %4713 = vmatpush1.bf16.msra.mxu1 %v7917_v44  ;;  %4509 = vmatprep.subr.bf16.mxu0 %v7918_v45  ;;  %v7999_v44 = vld [vmem:[%s11775_s1 + $0x738] ss:$40 sps:$4 sm:$0xff]   ;;  %v8004_v45 = vld [vmem:[%s11775_s1 + $0x784] ss:$40 sps:$4 sm:$0xff]  }
  0x29   :  { %4714 = vmatprep.subr.bf16.mxu1 %v7920_v46  ;;  %v8007_v46 = vld [vmem:[%s11775_s1 + $0x78c] ss:$40 sps:$4 sm:$0xff]  }
  0x2b   :  { %4510 = vmatpush1.bf16.msra.mxu0 %v7922_v47  ;;  %v8002_v47 = vld [vmem:[%s11775_s1 + $0x780] ss:$40 sps:$4 sm:$0xff]  }
  0x2c   :  { %4715 = vmatpush1.bf16.msra.mxu1 %v7923_v48  ;;  %4511 = vmatprep.subr.bf16.mxu0 %v7924_v50  ;;  %v8005_v48 = vld [vmem:[%s11775_s1 + $0x788] ss:$40 sps:$4 sm:$0xff]   ;;  %v8010_v50 = vld [vmem:[%s11775_s1 + $0x7d4] ss:$40 sps:$4 sm:$0xff]  }
  0x2d   :  { %4716 = vmatprep.subr.bf16.mxu1 %v7926_v51  ;;  %v8013_v51 = vld [vmem:[%s11775_s1 + $0x7dc] ss:$40 sps:$4 sm:$0xff]  }
  0x2f   :  { %4512 = vmatpush1.bf16.msra.mxu0 %v7928_v53  ;;  %v8008_v53 = vld [vmem:[%s11775_s1 + $0x7d0] ss:$40 sps:$4 sm:$0xff]  }
  0x30   :  { %4717 = vmatpush1.bf16.msra.mxu1 %v7929_v55  ;;  %4513 = vmatprep.subr.bf16.mxu0 %v7930_v56  ;;  %v8016_v55 = vld [vmem:[%s11775_s1 + $0x824] ss:$40 sps:$4 sm:$0xff]  }
  0x31   :  { %4718 = vmatprep.subr.bf16.mxu1 %v7932_v57  ;;  %v8019_v56 = vld [vmem:[%s11775_s1 + $0x82c] ss:$40 sps:$4 sm:$0xff]   ;;  %v8014_v57 = vld [vmem:[%s11775_s1 + $0x820] ss:$40 sps:$4 sm:$0xff]  }
  0x33   :  { %4514 = vmatpush1.bf16.msra.mxu0 %v7934_v59  ;;  %v8022_v59 = vld [vmem:[%s11775_s1 + $0x874] ss:$40 sps:$4 sm:$0xff]  }
  0x34   :  { %4719 = vmatpush1.bf16.msra.mxu1 %v7935_v61  ;;  %4515 = vmatprep.subr.bf16.mxu0 %v7936_v62  ;;  %v8025_v61 = vld [vmem:[%s11775_s1 + $0x87c] ss:$40 sps:$4 sm:$0xff]   ;;  %v8020_v62 = vld [vmem:[%s11775_s1 + $0x870] ss:$40 sps:$4 sm:$0xff]  }
  0x35   :  { %4720 = vmatprep.subr.bf16.mxu1 %v7938_v63  ;;  %v8023_v63 = vld [vmem:[%s11775_s1 + $0x878] ss:$40 sps:$4 sm:$0xff]  }
  0x37   :  { %4516 = vmatpush1.bf16.msra.mxu0 %v7940_v0  ;;  %v8028_v0 = vld [vmem:[%s11775_s1 + $0x8c4] ss:$40 sps:$4 sm:$0xff]  }
  0x38   :  { %4721 = vmatpush1.bf16.msra.mxu1 %v7941_v1  ;;  %4517 = vmatprep.subr.bf16.mxu0 %v7942_v2  ;;  %v8031_v1 = vld [vmem:[%s11775_s1 + $0x8cc] ss:$40 sps:$4 sm:$0xff]   ;;  %v8026_v2 = vld [vmem:[%s11775_s1 + $0x8c0] ss:$40 sps:$4 sm:$0xff]  }
  0x39   :  { %4722 = vmatprep.subr.bf16.mxu1 %v7944_v3  ;;  %v8029_v3 = vld [vmem:[%s11775_s1 + $0x8c8] ss:$40 sps:$4 sm:$0xff]  }
  0x3b   :  { %4518 = vmatpush1.bf16.msra.mxu0 %v7946_v4  ;;  %v8034_v4 = vld [vmem:[%s11775_s1 + $0x914] ss:$40 sps:$4 sm:$0xff]  }
  0x3c   :  { %4723 = vmatpush1.bf16.msra.mxu1 %v7947_v5  ;;  %4519 = vmatprep.subr.bf16.mxu0 %v7948_v6  ;;  %v8037_v5 = vld [vmem:[%s11775_s1 + $0x91c] ss:$40 sps:$4 sm:$0xff]   ;;  %v8032_v6 = vld [vmem:[%s11775_s1 + $0x910] ss:$40 sps:$4 sm:$0xff]  }
  0x3d   :  { %4724 = vmatprep.subr.bf16.mxu1 %v7950_v7  ;;  %v8035_v7 = vld [vmem:[%s11775_s1 + $0x918] ss:$40 sps:$4 sm:$0xff]  }
  0x3f   :  { %4520 = vmatpush1.bf16.msra.mxu0 %v7952_v8  ;;  %v8040_v8 = vld [vmem:[%s11775_s1 + $0x964] ss:$40 sps:$4 sm:$0xff]  }
  0x40   :  { %4725 = vmatpush1.bf16.msra.mxu1 %v7953_v9  ;;  %4530 = vmatprep.subr.bf16.mxu0 %v7956_v10  ;;  %v8043_v9 = vld [vmem:[%s11775_s1 + $0x96c] ss:$40 sps:$4 sm:$0xff]   ;;  %v817_v10 = vcombine.high %v9253_v52, %v9253_v52  ;;  %v8049_v52 = vld [vmem:[%s11775_s1 + $0x9bc] ss:$40 sps:$4 sm:$0xff]  }
  0x41   :  { %4735 = vmatprep.subr.bf16.mxu1 %v7959_v11  ;;  %v8038_v11 = vld [vmem:[%s11775_s1 + $0x960] ss:$40 sps:$4 sm:$0xff]  }
  0x42   :  { %4522 = vmatmul.mubr.bf16.vlgmr.msra.gmra.mrb[0].mxu0 %v9326_v13 }
  0x43   :  { %4727 = vmatmul.mubr.bf16.vlgmr.msra.gmra.mrb[0].mxu1 %v9326_v13  ;;  %4531 = vmatpush1.bf16.msra.mxu0 %v7954_v12  ;;  %v8041_v12 = vld [vmem:[%s11775_s1 + $0x968] ss:$40 sps:$4 sm:$0xff]  }
  0x44   :  { %4736 = vmatpush1.bf16.msra.mxu1 %v7957_v14  ;;  %4532 = vmatprep.subr.bf16.mxu0 %v7962_v15  ;;  %v8046_v14 = vld [vmem:[%s11775_s1 + $0x9b4] ss:$40 sps:$4 sm:$0xff]   ;;  %v9516_v15 = vrot.slane %v817_v10, %v9242_v49  ;;  %v8124_v10 = vld [vmem:[%s11775_s1 + $0xdc4] ss:$40 sps:$4 sm:$0xff]  }
  0x45   :  { %4737 = vmatprep.subr.bf16.mxu1 %v7965_v16  ;;  %4562 = vmatprep.mubr.bf16.mxu0 %v9339_v17  ;;  %v8044_v16 = vld [vmem:[%s11775_s1 + $0x9b0] ss:$40 sps:$4 sm:$0xff]  }
  0x46   :  { %4767 = vmatprep.mubr.bf16.mxu1 %v9339_v17 }
  0x47   :  { %4533 = vmatpush1.bf16.msra.mxu0 %v7960_v18  ;;  %v8047_v18 = vld [vmem:[%s11775_s1 + $0x9b8] ss:$40 sps:$4 sm:$0xff]  }
  0x48   :  { %4738 = vmatpush1.bf16.msra.mxu1 %v7963_v19  ;;  %4534 = vmatprep.subr.bf16.mxu0 %v7968_v20  ;;  %v8052_v19 = vld [vmem:[%s11775_s1 + $0xa04] ss:$40 sps:$4 sm:$0xff]  }
  0x49   :  { %4739 = vmatprep.subr.bf16.mxu1 %v7971_v21  ;;  %v8055_v20 = vld [vmem:[%s11775_s1 + $0xa0c] ss:$40 sps:$4 sm:$0xff]   ;;  %v833_v21 = vcombine.high %v9516_v15, %v9516_v15 }
  0x4b   :  { %4535 = vmatpush1.bf16.msra.mxu0 %v7966_v22  ;;  %v8050_v22 = vld [vmem:[%s11775_s1 + $0xa00] ss:$40 sps:$4 sm:$0xff]  }
  0x4c   :  { %4740 = vmatpush1.bf16.msra.mxu1 %v7969_v23  ;;  %4536 = vmatprep.subr.bf16.mxu0 %v7974_v24  ;;  %v9537_v23 = vcombine.high %v9326_v13, %v9326_v13  ;;  %v8053_v24 = vld [vmem:[%s11775_s1 + $0xa08] ss:$40 sps:$4 sm:$0xff]  }
  0x4d   :  { %4741 = vmatprep.subr.bf16.mxu1 %v7977_v25  ;;  %v8058_v25 = vld [vmem:[%s11775_s1 + $0xa54] ss:$40 sps:$4 sm:$0xff]  }
  0x4f   :  { %4537 = vmatpush1.bf16.msra.mxu0 %v7972_v26  ;;  %v8061_v26 = vld [vmem:[%s11775_s1 + $0xa5c] ss:$40 sps:$4 sm:$0xff]  }
  0x50   :  { %4742 = vmatpush1.bf16.msra.mxu1 %v7975_v27  ;;  %4538 = vmatprep.subr.bf16.mxu0 %v7980_v28  ;;  %v9549_v27 = vrot.slane %v833_v21, %v9242_v49  ;;  %v8056_v28 = vld [vmem:[%s11775_s1 + $0xa50] ss:$40 sps:$4 sm:$0xff]   ;;  %v8139_v21 = vld [vmem:[%s11775_s1 + $0xe6c] ss:$40 sps:$4 sm:$0xff]  }
  0x51   :  { %4743 = vmatprep.subr.bf16.mxu1 %v7983_v29  ;;  %v8059_v29 = vld [vmem:[%s11775_s1 + $0xa58] ss:$40 sps:$4 sm:$0xff]  }
  0x53   :  { %4539 = vmatpush1.bf16.msra.mxu0 %v7978_v30  ;;  %v8064_v30 = vld [vmem:[%s11775_s1 + $0xaa4] ss:$40 sps:$4 sm:$0xff]  }
  0x54   :  { %4744 = vmatpush1.bf16.msra.mxu1 %v7981_v31  ;;  %4540 = vmatprep.subr.bf16.mxu0 %v7986_v32  ;;  %v8067_v31 = vld [vmem:[%s11775_s1 + $0xaac] ss:$40 sps:$4 sm:$0xff]   ;;  %v8062_v32 = vld [vmem:[%s11775_s1 + $0xaa0] ss:$40 sps:$4 sm:$0xff]  }
  0x55   :  { %4745 = vmatprep.subr.bf16.mxu1 %v7989_v33  ;;  %v8065_v33 = vld [vmem:[%s11775_s1 + $0xaa8] ss:$40 sps:$4 sm:$0xff]  }
  0x57   :  { %4541 = vmatpush1.bf16.msra.mxu0 %v7984_v34  ;;  %v8070_v34 = vld [vmem:[%s11775_s1 + $0xaf4] ss:$40 sps:$4 sm:$0xff]  }
  0x58   :  { %4746 = vmatpush1.bf16.msra.mxu1 %v7987_v35  ;;  %4542 = vmatprep.subr.bf16.mxu0 %v7992_v36  ;;  %v8073_v35 = vld [vmem:[%s11775_s1 + $0xafc] ss:$40 sps:$4 sm:$0xff]   ;;  %v8068_v36 = vld [vmem:[%s11775_s1 + $0xaf0] ss:$40 sps:$4 sm:$0xff]  }
  0x59   :  { %4747 = vmatprep.subr.bf16.mxu1 %v7995_v37  ;;  %v8071_v37 = vld [vmem:[%s11775_s1 + $0xaf8] ss:$40 sps:$4 sm:$0xff]  }
  0x5b   :  { %4543 = vmatpush1.bf16.msra.mxu0 %v7990_v38  ;;  %v8076_v38 = vld [vmem:[%s11775_s1 + $0xb44] ss:$40 sps:$4 sm:$0xff]  }
  0x5c   :  { %4748 = vmatpush1.bf16.msra.mxu1 %v7993_v39  ;;  %4544 = vmatprep.subr.bf16.mxu0 %v7998_v40  ;;  %v8079_v39 = vld [vmem:[%s11775_s1 + $0xb4c] ss:$40 sps:$4 sm:$0xff]   ;;  %v8074_v40 = vld [vmem:[%s11775_s1 + $0xb40] ss:$40 sps:$4 sm:$0xff]  }
  0x5d   :  { %4749 = vmatprep.subr.bf16.mxu1 %v8001_v41  ;;  %v8077_v41 = vld [vmem:[%s11775_s1 + $0xb48] ss:$40 sps:$4 sm:$0xff]  }
  0x5f   :  { %4545 = vmatpush1.bf16.msra.mxu0 %v7996_v43  ;;  %v8082_v43 = vld [vmem:[%s11775_s1 + $0xb94] ss:$40 sps:$4 sm:$0xff]  }
  0x60   :  { %4750 = vmatpush1.bf16.msra.mxu1 %v7999_v44  ;;  %4546 = vmatprep.subr.bf16.mxu0 %v8004_v45  ;;  %v8085_v44 = vld [vmem:[%s11775_s1 + $0xb9c] ss:$40 sps:$4 sm:$0xff]   ;;  %v8080_v45 = vld [vmem:[%s11775_s1 + $0xb90] ss:$40 sps:$4 sm:$0xff]  }
  0x61   :  { %4751 = vmatprep.subr.bf16.mxu1 %v8007_v46  ;;  %v8083_v46 = vld [vmem:[%s11775_s1 + $0xb98] ss:$40 sps:$4 sm:$0xff]  }
  0x63   :  { %4547 = vmatpush1.bf16.msra.mxu0 %v8002_v47  ;;  %v8088_v47 = vld [vmem:[%s11775_s1 + $0xbe4] ss:$40 sps:$4 sm:$0xff]  }
  0x64   :  { %4752 = vmatpush1.bf16.msra.mxu1 %v8005_v48  ;;  %4548 = vmatprep.subr.bf16.mxu0 %v8010_v50  ;;  %v8091_v48 = vld [vmem:[%s11775_s1 + $0xbec] ss:$40 sps:$4 sm:$0xff]   ;;  %v8086_v50 = vld [vmem:[%s11775_s1 + $0xbe0] ss:$40 sps:$4 sm:$0xff]  }
  0x65   :  { %4753 = vmatprep.subr.bf16.mxu1 %v8013_v51  ;;  %v8089_v51 = vld [vmem:[%s11775_s1 + $0xbe8] ss:$40 sps:$4 sm:$0xff]  }
  0x67   :  { %4549 = vmatpush1.bf16.msra.mxu0 %v8008_v53  ;;  %v8094_v53 = vld [vmem:[%s11775_s1 + $0xc34] ss:$40 sps:$4 sm:$0xff]  }
  0x68   :  { %4754 = vmatpush1.bf16.msra.mxu1 %v8011_v54  ;;  %4550 = vmatprep.subr.bf16.mxu0 %v8016_v55  ;;  %v8097_v54 = vld [vmem:[%s11775_s1 + $0xc3c] ss:$40 sps:$4 sm:$0xff]   ;;  %v8092_v55 = vld [vmem:[%s11775_s1 + $0xc30] ss:$40 sps:$4 sm:$0xff]  }
  0x69   :  { %4755 = vmatprep.subr.bf16.mxu1 %v8019_v56  ;;  %v8095_v56 = vld [vmem:[%s11775_s1 + $0xc38] ss:$40 sps:$4 sm:$0xff]  }
  0x6b   :  { %4551 = vmatpush1.bf16.msra.mxu0 %v8014_v57  ;;  %v8100_v57 = vld [vmem:[%s11775_s1 + $0xc84] ss:$40 sps:$4 sm:$0xff]  }
  0x6c   :  { %4756 = vmatpush1.bf16.msra.mxu1 %v8017_v58  ;;  %4552 = vmatprep.subr.bf16.mxu0 %v8022_v59  ;;  %v8103_v58 = vld [vmem:[%s11775_s1 + $0xc8c] ss:$40 sps:$4 sm:$0xff]   ;;  %v8098_v59 = vld [vmem:[%s11775_s1 + $0xc80] ss:$40 sps:$4 sm:$0xff]  }
  0x6d   :  { %4757 = vmatprep.subr.bf16.mxu1 %v8025_v61  ;;  %v8101_v61 = vld [vmem:[%s11775_s1 + $0xc88] ss:$40 sps:$4 sm:$0xff]  }
  0x6f   :  { %4553 = vmatpush1.bf16.msra.mxu0 %v8020_v62  ;;  %v8106_v62 = vld [vmem:[%s11775_s1 + $0xcd4] ss:$40 sps:$4 sm:$0xff]  }
  0x70   :  { %4758 = vmatpush1.bf16.msra.mxu1 %v8023_v63  ;;  %4554 = vmatprep.subr.bf16.mxu0 %v8028_v0  ;;  %v8109_v63 = vld [vmem:[%s11775_s1 + $0xcdc] ss:$40 sps:$4 sm:$0xff]   ;;  %v8104_v0 = vld [vmem:[%s11775_s1 + $0xcd0] ss:$40 sps:$4 sm:$0xff]  }
  0x71   :  { %4759 = vmatprep.subr.bf16.mxu1 %v8031_v1  ;;  %v8107_v1 = vld [vmem:[%s11775_s1 + $0xcd8] ss:$40 sps:$4 sm:$0xff]  }
  0x73   :  { %4555 = vmatpush1.bf16.msra.mxu0 %v8026_v2  ;;  %v8112_v2 = vld [vmem:[%s11775_s1 + $0xd24] ss:$40 sps:$4 sm:$0xff]  }
  0x74   :  { %4760 = vmatpush1.bf16.msra.mxu1 %v8029_v3  ;;  %4556 = vmatprep.subr.bf16.mxu0 %v8034_v4  ;;  %v8115_v3 = vld [vmem:[%s11775_s1 + $0xd2c] ss:$40 sps:$4 sm:$0xff]   ;;  %v8110_v4 = vld [vmem:[%s11775_s1 + $0xd20] ss:$40 sps:$4 sm:$0xff]  }
  0x75   :  { %4761 = vmatprep.subr.bf16.mxu1 %v8037_v5  ;;  %v8113_v5 = vld [vmem:[%s11775_s1 + $0xd28] ss:$40 sps:$4 sm:$0xff]  }
  0x77   :  { %4557 = vmatpush1.bf16.msra.mxu0 %v8032_v6  ;;  %v8118_v6 = vld [vmem:[%s11775_s1 + $0xd74] ss:$40 sps:$4 sm:$0xff]  }
  0x78   :  { %4762 = vmatpush1.bf16.msra.mxu1 %v8035_v7  ;;  %4558 = vmatprep.subr.bf16.mxu0 %v8040_v8  ;;  %v8121_v7 = vld [vmem:[%s11775_s1 + $0xd7c] ss:$40 sps:$4 sm:$0xff]   ;;  %v8116_v8 = vld [vmem:[%s11775_s1 + $0xd70] ss:$40 sps:$4 sm:$0xff]  }
  0x79   :  { %4763 = vmatprep.subr.bf16.mxu1 %v8043_v9  ;;  %v8119_v9 = vld [vmem:[%s11775_s1 + $0xd78] ss:$40 sps:$4 sm:$0xff]  }
  0x7b   :  { %4559 = vmatpush1.bf16.msra.mxu0 %v8038_v11  ;;  %v8127_v11 = vld [vmem:[%s11775_s1 + $0xdcc] ss:$40 sps:$4 sm:$0xff]  }
  0x7c   :  { %4764 = vmatpush1.bf16.msra.mxu1 %v8041_v12  ;;  %4560 = vmatprep.subr.bf16.mxu0 %v8046_v14  ;;  %v8122_v12 = vld [vmem:[%s11775_s1 + $0xdc0] ss:$40 sps:$4 sm:$0xff]  }
  0x7d   :  { %4765 = vmatprep.subr.bf16.mxu1 %v8049_v52  ;;  %v8125_v14 = vld [vmem:[%s11775_s1 + $0xdc8] ss:$40 sps:$4 sm:$0xff]   ;;  %v8130_v52 = vld [vmem:[%s11775_s1 + $0xe14] ss:$40 sps:$4 sm:$0xff]  }
  0x7f   :  { %4561 = vmatpush1.bf16.msra.mxu0 %v8044_v16  ;;  %v8133_v16 = vld [vmem:[%s11775_s1 + $0xe1c] ss:$40 sps:$4 sm:$0xff]  }
  0x80   :  { %4766 = vmatpush1.bf16.msra.mxu1 %v8047_v18  ;;  %4571 = vmatprep.subr.bf16.mxu0 %v8052_v19  ;;  %v8128_v18 = vld [vmem:[%s11775_s1 + $0xe10] ss:$40 sps:$4 sm:$0xff]  }
  0x81   :  { %4776 = vmatprep.subr.bf16.mxu1 %v8055_v20  ;;  %v8131_v19 = vld [vmem:[%s11775_s1 + $0xe18] ss:$40 sps:$4 sm:$0xff]   ;;  %v8136_v20 = vld [vmem:[%s11775_s1 + $0xe64] ss:$40 sps:$4 sm:$0xff]  }
  0x82   :  { %4563 = vmatmul.mubr.bf16.vlgmr.msra.gmra.mrb[0].mxu0 %v9537_v23 }
  0x83   :  { %4768 = vmatmul.mubr.bf16.vlgmr.msra.gmra.mrb[0].mxu1 %v9537_v23  ;;  %4572 = vmatpush1.bf16.msra.mxu0 %v8050_v22  ;;  %v8134_v22 = vld [vmem:[%s11775_s1 + $0xe60] ss:$40 sps:$4 sm:$0xff]  }
  0x84   :  { %4777 = vmatpush1.bf16.msra.mxu1 %v8053_v24  ;;  %4573 = vmatprep.subr.bf16.mxu0 %v8058_v25  ;;  %v8137_v24 = vld [vmem:[%s11775_s1 + $0xe68] ss:$40 sps:$4 sm:$0xff]   ;;  %v8142_v25 = vld [vmem:[%s11775_s1 + $0xeb4] ss:$40 sps:$4 sm:$0xff]  }
  0x85   :  { %4778 = vmatprep.subr.bf16.mxu1 %v8061_v26  ;;  %4603 = vmatprep.mubr.bf16.mxu0 %v9549_v27  ;;  %v8145_v26 = vld [vmem:[%s11775_s1 + $0xebc] ss:$40 sps:$4 sm:$0xff]  }
  0x86   :  { %4808 = vmatprep.mubr.bf16.mxu1 %v9549_v27 }
  0x87   :  { %4574 = vmatpush1.bf16.msra.mxu0 %v8056_v28  ;;  %v8140_v28 = vld [vmem:[%s11775_s1 + $0xeb0] ss:$40 sps:$4 sm:$0xff]  }
  0x88   :  { %4779 = vmatpush1.bf16.msra.mxu1 %v8059_v29  ;;  %4575 = vmatprep.subr.bf16.mxu0 %v8064_v30  ;;  %v8143_v29 = vld [vmem:[%s11775_s1 + $0xeb8] ss:$40 sps:$4 sm:$0xff]   ;;  %v8149_v30 = vld [vmem:[%s11775_s1 + $0xf04] ss:$40 sps:$4 sm:$0xff]  }
  0x89   :  { %4780 = vmatprep.subr.bf16.mxu1 %v8067_v31  ;;  %v8152_v31 = vld [vmem:[%s11775_s1 + $0xf0c] ss:$40 sps:$4 sm:$0xff]  }
  0x8b   :  { %4576 = vmatpush1.bf16.msra.mxu0 %v8062_v32  ;;  %v9737_v32 = vrot.slane %v9516_v15, %v9242_v49  ;;  %v8158_v15 = vld [vmem:[%s11775_s1 + $0xf5c] ss:$40 sps:$4 sm:$0xff]  }
  0x8c   :  { %4781 = vmatpush1.bf16.msra.mxu1 %v8065_v33  ;;  %4577 = vmatprep.subr.bf16.mxu0 %v8070_v34  ;;  %v8147_v33 = vld [vmem:[%s11775_s1 + $0xf00] ss:$40 sps:$4 sm:$0xff]  }
  0x8d   :  { %4782 = vmatprep.subr.bf16.mxu1 %v8073_v35  ;;  %v8150_v34 = vld [vmem:[%s11775_s1 + $0xf08] ss:$40 sps:$4 sm:$0xff]   ;;  %v8155_v35 = vld [vmem:[%s11775_s1 + $0xf54] ss:$40 sps:$4 sm:$0xff]  }
  0x8f   :  { %4578 = vmatpush1.bf16.msra.mxu0 %v8068_v36  ;;  %v9753_v36 = vcombine.high %v9549_v27, %v9549_v27 }
  0x90   :  { %4783 = vmatpush1.bf16.msra.mxu1 %v8071_v37  ;;  %4579 = vmatprep.subr.bf16.mxu0 %v8076_v38  ;;  %v8153_v37 = vld [vmem:[%s11775_s1 + $0xf50] ss:$40 sps:$4 sm:$0xff]  }
  0x91   :  { %4784 = vmatprep.subr.bf16.mxu1 %v8079_v39  ;;  %v8156_v38 = vld [vmem:[%s11775_s1 + $0xf58] ss:$40 sps:$4 sm:$0xff]   ;;  %v8161_v39 = vld [vmem:[%s11775_s1 + $0xfa4] ss:$40 sps:$4 sm:$0xff]  }
  0x93   :  { %4580 = vmatpush1.bf16.msra.mxu0 %v8074_v40  ;;  %v8164_v40 = vld [vmem:[%s11775_s1 + $0xfac] ss:$40 sps:$4 sm:$0xff]  }
  0x94   :  { %4785 = vmatpush1.bf16.msra.mxu1 %v8077_v41  ;;  %4581 = vmatprep.subr.bf16.mxu0 %v8082_v43  ;;  %v8159_v41 = vld [vmem:[%s11775_s1 + $0xfa0] ss:$40 sps:$4 sm:$0xff]  }
  0x95   :  { %4786 = vmatprep.subr.bf16.mxu1 %v8085_v44  ;;  %v8162_v43 = vld [vmem:[%s11775_s1 + $0xfa8] ss:$40 sps:$4 sm:$0xff]   ;;  %v8167_v44 = vld [vmem:[%s11775_s1 + $0xff4] ss:$40 sps:$4 sm:$0xff]  }
  0x97   :  { %4582 = vmatpush1.bf16.msra.mxu0 %v8080_v45  ;;  %v8170_v45 = vld [vmem:[%s11775_s1 + $0xffc] ss:$40 sps:$4 sm:$0xff]  }
  0x98   :  { %4787 = vmatpush1.bf16.msra.mxu1 %v8083_v46  ;;  %4583 = vmatprep.subr.bf16.mxu0 %v8088_v47  ;;  %v8165_v46 = vld [vmem:[%s11775_s1 + $0xff0] ss:$40 sps:$4 sm:$0xff]  }
  0x99   :  { %4788 = vmatprep.subr.bf16.mxu1 %v8091_v48  ;;  %v8168_v47 = vld [vmem:[%s11775_s1 + $0xff8] ss:$40 sps:$4 sm:$0xff]   ;;  %v8173_v48 = vld [vmem:[%s11775_s1 + $0x1044] ss:$40 sps:$4 sm:$0xff]  }
  0x9b   :  { %4584 = vmatpush1.bf16.msra.mxu0 %v8086_v50  ;;  %v8176_v50 = vld [vmem:[%s11775_s1 + $0x104c] ss:$40 sps:$4 sm:$0xff]  }
  0x9c   :  { %4789 = vmatpush1.bf16.msra.mxu1 %v8089_v51  ;;  %4585 = vmatprep.subr.bf16.mxu0 %v8094_v53  ;;  %v8171_v51 = vld [vmem:[%s11775_s1 + $0x1040] ss:$40 sps:$4 sm:$0xff]  }
  0x9d   :  { %4790 = vmatprep.subr.bf16.mxu1 %v8097_v54  ;;  %v8174_v53 = vld [vmem:[%s11775_s1 + $0x1048] ss:$40 sps:$4 sm:$0xff]   ;;  %v8179_v54 = vld [vmem:[%s11775_s1 + $0x1094] ss:$40 sps:$4 sm:$0xff]  }
  0x9f   :  { %4586 = vmatpush1.bf16.msra.mxu0 %v8092_v55  ;;  %v8182_v55 = vld [vmem:[%s11775_s1 + $0x109c] ss:$40 sps:$4 sm:$0xff]  }
  0xa0   :  { %4791 = vmatpush1.bf16.msra.mxu1 %v8095_v56  ;;  %4587 = vmatprep.subr.bf16.mxu0 %v8100_v57  ;;  %v8177_v56 = vld [vmem:[%s11775_s1 + $0x1090] ss:$40 sps:$4 sm:$0xff]  }
  0xa1   :  { %4792 = vmatprep.subr.bf16.mxu1 %v8103_v58  ;;  %v8180_v57 = vld [vmem:[%s11775_s1 + $0x1098] ss:$40 sps:$4 sm:$0xff]   ;;  %v8185_v58 = vld [vmem:[%s11775_s1 + $0x10e4] ss:$40 sps:$4 sm:$0xff]  }
  0xa3   :  { %4588 = vmatpush1.bf16.msra.mxu0 %v8098_v59  ;;  %v8188_v59 = vld [vmem:[%s11775_s1 + $0x10ec] ss:$40 sps:$4 sm:$0xff]  }
  0xa4   :  { %4793 = vmatpush1.bf16.msra.mxu1 %v8101_v61  ;;  %4589 = vmatprep.subr.bf16.mxu0 %v8106_v62  ;;  %v8183_v61 = vld [vmem:[%s11775_s1 + $0x10e0] ss:$40 sps:$4 sm:$0xff]  }
  0xa5   :  { %4794 = vmatprep.subr.bf16.mxu1 %v8109_v63  ;;  %v8186_v62 = vld [vmem:[%s11775_s1 + $0x10e8] ss:$40 sps:$4 sm:$0xff]   ;;  %v8191_v63 = vld [vmem:[%s11775_s1 + $0x1134] ss:$40 sps:$4 sm:$0xff]  }
  0xa7   :  { %4590 = vmatpush1.bf16.msra.mxu0 %v8104_v0  ;;  %v8194_v0 = vld [vmem:[%s11775_s1 + $0x113c] ss:$40 sps:$4 sm:$0xff]  }
  0xa8   :  { %4795 = vmatpush1.bf16.msra.mxu1 %v8107_v1  ;;  %4591 = vmatprep.subr.bf16.mxu0 %v8112_v2  ;;  %v8189_v1 = vld [vmem:[%s11775_s1 + $0x1130] ss:$40 sps:$4 sm:$0xff]  }
  0xa9   :  { %4796 = vmatprep.subr.bf16.mxu1 %v8115_v3  ;;  %v8192_v2 = vld [vmem:[%s11775_s1 + $0x1138] ss:$40 sps:$4 sm:$0xff]   ;;  %v8197_v3 = vld [vmem:[%s11775_s1 + $0x1184] ss:$40 sps:$4 sm:$0xff]  }
  0xab   :  { %4592 = vmatpush1.bf16.msra.mxu0 %v8110_v4  ;;  %v8200_v4 = vld [vmem:[%s11775_s1 + $0x118c] ss:$40 sps:$4 sm:$0xff]  }
  0xac   :  { %4797 = vmatpush1.bf16.msra.mxu1 %v8113_v5  ;;  %4593 = vmatprep.subr.bf16.mxu0 %v8118_v6  ;;  %v8195_v5 = vld [vmem:[%s11775_s1 + $0x1180] ss:$40 sps:$4 sm:$0xff]  }
  0xad   :  { %4798 = vmatprep.subr.bf16.mxu1 %v8121_v7  ;;  %v8198_v6 = vld [vmem:[%s11775_s1 + $0x1188] ss:$40 sps:$4 sm:$0xff]   ;;  %v8203_v7 = vld [vmem:[%s11775_s1 + $0x11d4] ss:$40 sps:$4 sm:$0xff]  }
  0xaf   :  { %4594 = vmatpush1.bf16.msra.mxu0 %v8116_v8  ;;  %v8206_v8 = vld [vmem:[%s11775_s1 + $0x11dc] ss:$40 sps:$4 sm:$0xff]  }
  0xb0   :  { %4799 = vmatpush1.bf16.msra.mxu1 %v8119_v9  ;;  %4595 = vmatprep.subr.bf16.mxu0 %v8124_v10  ;;  %v8201_v9 = vld [vmem:[%s11775_s1 + $0x11d0] ss:$40 sps:$4 sm:$0xff]  }
  0xb1   :  { %4800 = vmatprep.subr.bf16.mxu1 %v8127_v11  ;;  %v8204_v10 = vld [vmem:[%s11775_s1 + $0x11d8] ss:$40 sps:$4 sm:$0xff]   ;;  %v8209_v11 = vld [vmem:[%s11775_s1 + $0x1224] ss:$40 sps:$4 sm:$0xff]  }
  0xb3   :  { %4596 = vmatpush1.bf16.msra.mxu0 %v8122_v12  ;;  %v8212_v12 = vld [vmem:[%s11775_s1 + $0x122c] ss:$40 sps:$4 sm:$0xff]  }
  0xb4   :  { %4801 = vmatpush1.bf16.msra.mxu1 %v8125_v14  ;;  %4597 = vmatprep.subr.bf16.mxu0 %v8130_v52  ;;  %v8207_v14 = vld [vmem:[%s11775_s1 + $0x1220] ss:$40 sps:$4 sm:$0xff]  }
  0xb5   :  { %4802 = vmatprep.subr.bf16.mxu1 %v8133_v16  ;;  %v8210_v52 = vld [vmem:[%s11775_s1 + $0x1228] ss:$40 sps:$4 sm:$0xff]   ;;  %v8215_v16 = vld [vmem:[%s11775_s1 + $0x1274] ss:$40 sps:$4 sm:$0xff]  }
  0xb7   :  { %4598 = vmatpush1.bf16.msra.mxu0 %v8128_v18  ;;  %v8218_v18 = vld [vmem:[%s11775_s1 + $0x127c] ss:$40 sps:$4 sm:$0xff]  }
  0xb8   :  { %4803 = vmatpush1.bf16.msra.mxu1 %v8131_v19  ;;  %4599 = vmatprep.subr.bf16.mxu0 %v8136_v20  ;;  %v8213_v19 = vld [vmem:[%s11775_s1 + $0x1270] ss:$40 sps:$4 sm:$0xff]  }
  0xb9   :  { %4804 = vmatprep.subr.bf16.mxu1 %v8139_v21  ;;  %v8216_v20 = vld [vmem:[%s11775_s1 + $0x1278] ss:$40 sps:$4 sm:$0xff]   ;;  %v8221_v21 = vld [vmem:[%s11775_s1 + $0x12c4] ss:$40 sps:$4 sm:$0xff]  }
  0xbb   :  { %4600 = vmatpush1.bf16.msra.mxu0 %v8134_v22  ;;  %v8224_v22 = vld [vmem:[%s11775_s1 + $0x12cc] ss:$40 sps:$4 sm:$0xff]  }
  0xbc   :  { %4805 = vmatpush1.bf16.msra.mxu1 %v8137_v24  ;;  %4601 = vmatprep.subr.bf16.mxu0 %v8142_v25  ;;  %v8219_v24 = vld [vmem:[%s11775_s1 + $0x12c0] ss:$40 sps:$4 sm:$0xff]  }
  0xbd   :  { %4806 = vmatprep.subr.bf16.mxu1 %v8145_v26  ;;  %v8222_v25 = vld [vmem:[%s11775_s1 + $0x12c8] ss:$40 sps:$4 sm:$0xff]   ;;  %v8227_v26 = vld [vmem:[%s11775_s1 + $0x1314] ss:$40 sps:$4 sm:$0xff]  }
  0xbf   :  { %4602 = vmatpush1.bf16.msra.mxu0 %v8140_v28  ;;  %v8230_v28 = vld [vmem:[%s11775_s1 + $0x131c] ss:$40 sps:$4 sm:$0xff]  }
  0xc0   :  { %4807 = vmatpush1.bf16.msra.mxu1 %v8143_v29  ;;  %4612 = vmatprep.subr.bf16.mxu0 %v8149_v30  ;;  %v8225_v29 = vld [vmem:[%s11775_s1 + $0x1310] ss:$40 sps:$4 sm:$0xff]  }
  0xc1   :  { %4817 = vmatprep.subr.bf16.mxu1 %v8152_v31  ;;  %v8228_v30 = vld [vmem:[%s11775_s1 + $0x1318] ss:$40 sps:$4 sm:$0xff]   ;;  %v8233_v31 = vld [vmem:[%s11775_s1 + $0x1364] ss:$40 sps:$4 sm:$0xff]  }
  0xc2   :  { %4604 = vmatmul.mubr.bf16.vlgmr.msra.gmra.mrb[0].mxu0 %v9737_v32 }
  0xc3   :  { %4809 = vmatmul.mubr.bf16.vlgmr.msra.gmra.mrb[0].mxu1 %v9737_v32  ;;  %4613 = vmatpush1.bf16.msra.mxu0 %v8147_v33  ;;  %v8236_v33 = vld [vmem:[%s11775_s1 + $0x136c] ss:$40 sps:$4 sm:$0xff]  }
  0xc4   :  { %4818 = vmatpush1.bf16.msra.mxu1 %v8150_v34  ;;  %4614 = vmatprep.subr.bf16.mxu0 %v8155_v35  ;;  %v8231_v34 = vld [vmem:[%s11775_s1 + $0x1360] ss:$40 sps:$4 sm:$0xff]  }
  0xc5   :  { %4819 = vmatprep.subr.bf16.mxu1 %v8158_v15  ;;  %4644 = vmatprep.mubr.bf16.mxu0 %v9753_v36  ;;  %v8234_v35 = vld [vmem:[%s11775_s1 + $0x1368] ss:$40 sps:$4 sm:$0xff]   ;;  %v8239_v15 = vld [vmem:[%s11775_s1 + $0x13b4] ss:$40 sps:$4 sm:$0xff]  }
  0xc6   :  { %4849 = vmatprep.mubr.bf16.mxu1 %v9753_v36 }
  0xc7   :  { %4615 = vmatpush1.bf16.msra.mxu0 %v8153_v37  ;;  %v8242_v37 = vld [vmem:[%s11775_s1 + $0x13bc] ss:$40 sps:$4 sm:$0xff]  }
  0xc8   :  { %4820 = vmatpush1.bf16.msra.mxu1 %v8156_v38  ;;  %4616 = vmatprep.subr.bf16.mxu0 %v8161_v39  ;;  %v8237_v38 = vld [vmem:[%s11775_s1 + $0x13b0] ss:$40 sps:$4 sm:$0xff]  }
  0xc9   :  { %4821 = vmatprep.subr.bf16.mxu1 %v8164_v40  ;;  %v8240_v39 = vld [vmem:[%s11775_s1 + $0x13b8] ss:$40 sps:$4 sm:$0xff]   ;;  %v8245_v40 = vld [vmem:[%s11775_s1 + $0x1404] ss:$40 sps:$4 sm:$0xff]  }
  0xcb   :  { %4617 = vmatpush1.bf16.msra.mxu0 %v8159_v41  ;;  %v8248_v41 = vld [vmem:[%s11775_s1 + $0x140c] ss:$40 sps:$4 sm:$0xff]  }
  0xcc   :  { %4822 = vmatpush1.bf16.msra.mxu1 %v8162_v43  ;;  %4618 = vmatprep.subr.bf16.mxu0 %v8167_v44  ;;  %v8243_v43 = vld [vmem:[%s11775_s1 + $0x1400] ss:$40 sps:$4 sm:$0xff]   ;;  %v9944_v44 = vcombine.high %v9737_v32, %v9737_v32 }
  0xcd   :  { %4823 = vmatprep.subr.bf16.mxu1 %v8170_v45  ;;  %v8246_v45 = vld [vmem:[%s11775_s1 + $0x1408] ss:$40 sps:$4 sm:$0xff]  }
  0xcf   :  { %4619 = vmatpush1.bf16.msra.mxu0 %v8165_v46  ;;  %v8251_v46 = vld [vmem:[%s11775_s1 + $0x1454] ss:$40 sps:$4 sm:$0xff]  }
  0xd0   :  { %4824 = vmatpush1.bf16.msra.mxu1 %v8168_v47  ;;  %4620 = vmatprep.subr.bf16.mxu0 %v8173_v48  ;;  %v8254_v47 = vld [vmem:[%s11775_s1 + $0x145c] ss:$40 sps:$4 sm:$0xff]   ;;  %v8249_v48 = vld [vmem:[%s11775_s1 + $0x1450] ss:$40 sps:$4 sm:$0xff]  }
  0xd1   :  { %4825 = vmatprep.subr.bf16.mxu1 %v8176_v50  ;;  %v8252_v50 = vld [vmem:[%s11775_s1 + $0x1458] ss:$40 sps:$4 sm:$0xff]  }
  0xd3   :  { %4621 = vmatpush1.bf16.msra.mxu0 %v8171_v51  ;;  %v8257_v51 = vld [vmem:[%s11775_s1 + $0x14a4] ss:$40 sps:$4 sm:$0xff]  }
  0xd4   :  { %4826 = vmatpush1.bf16.msra.mxu1 %v8174_v53  ;;  %4622 = vmatprep.subr.bf16.mxu0 %v8179_v54  ;;  %v8260_v53 = vld [vmem:[%s11775_s1 + $0x14ac] ss:$40 sps:$4 sm:$0xff]   ;;  %v9044_v54 = vmov 0  }
  0xd5   :  { %4827 = vmatprep.subr.bf16.mxu1 %v8182_v55  ;;  %v8255_v55 = vld [vmem:[%s11775_s1 + $0x14a0] ss:$40 sps:$4 sm:$0xff]  }
  0xd7   :  { %4623 = vmatpush1.bf16.msra.mxu0 %v8177_v56  ;;  %v8258_v56 = vld [vmem:[%s11775_s1 + $0x14a8] ss:$40 sps:$4 sm:$0xff]  }
  0xd8   :  { %4828 = vmatpush1.bf16.msra.mxu1 %v8180_v57  ;;  %4624 = vmatprep.subr.bf16.mxu0 %v8185_v58  ;;  %v8263_v57 = vld [vmem:[%s11775_s1 + $0x14f4] ss:$40 sps:$4 sm:$0xff]  }
  0xd9   :  { %4829 = vmatprep.subr.bf16.mxu1 %v8188_v59  ;;  %v8266_v58 = vld [vmem:[%s11775_s1 + $0x14fc] ss:$40 sps:$4 sm:$0xff]   ;;  %v8261_v59 = vld [vmem:[%s11775_s1 + $0x14f0] ss:$40 sps:$4 sm:$0xff]  }
  0xdb   :  { %4625 = vmatpush1.bf16.msra.mxu0 %v8183_v61  ;;  %v8264_v61 = vld [vmem:[%s11775_s1 + $0x14f8] ss:$40 sps:$4 sm:$0xff]  }
  0xdc   :  { %4830 = vmatpush1.bf16.msra.mxu1 %v8186_v62  ;;  %4626 = vmatprep.subr.bf16.mxu0 %v8191_v63  ;;  %v8269_v62 = vld [vmem:[%s11775_s1 + $0x1544] ss:$40 sps:$4 sm:$0xff]  }
  0xdd   :  { %4831 = vmatprep.subr.bf16.mxu1 %v8194_v0  ;;  %v8272_v63 = vld [vmem:[%s11775_s1 + $0x154c] ss:$40 sps:$4 sm:$0xff]   ;;  %v8267_v0 = vld [vmem:[%s11775_s1 + $0x1540] ss:$40 sps:$4 sm:$0xff]  }
  0xdf   :  { %4627 = vmatpush1.bf16.msra.mxu0 %v8189_v1  ;;  %v8270_v1 = vld [vmem:[%s11775_s1 + $0x1548] ss:$40 sps:$4 sm:$0xff]  }
  0xe0   :  { %4832 = vmatpush1.bf16.msra.mxu1 %v8192_v2  ;;  %4628 = vmatprep.subr.bf16.mxu0 %v8197_v3  ;;  %v8275_v2 = vld [vmem:[%s11775_s1 + $0x1594] ss:$40 sps:$4 sm:$0xff]  }
  0xe1   :  { %4833 = vmatprep.subr.bf16.mxu1 %v8200_v4  ;;  %v8278_v3 = vld [vmem:[%s11775_s1 + $0x159c] ss:$40 sps:$4 sm:$0xff]   ;;  %v8273_v4 = vld [vmem:[%s11775_s1 + $0x1590] ss:$40 sps:$4 sm:$0xff]  }
  0xe3   :  { %4629 = vmatpush1.bf16.msra.mxu0 %v8195_v5  ;;  %v8276_v5 = vld [vmem:[%s11775_s1 + $0x1598] ss:$40 sps:$4 sm:$0xff]  }
  0xe4   :  { %4834 = vmatpush1.bf16.msra.mxu1 %v8198_v6  ;;  %4630 = vmatprep.subr.bf16.mxu0 %v8203_v7  ;;  %v8281_v6 = vld [vmem:[%s11775_s1 + $0x15e4] ss:$40 sps:$4 sm:$0xff]  }
  0xe5   :  { %4835 = vmatprep.subr.bf16.mxu1 %v8206_v8  ;;  %v8284_v7 = vld [vmem:[%s11775_s1 + $0x15ec] ss:$40 sps:$4 sm:$0xff]   ;;  %v8279_v8 = vld [vmem:[%s11775_s1 + $0x15e0] ss:$40 sps:$4 sm:$0xff]  }
  0xe7   :  { %4631 = vmatpush1.bf16.msra.mxu0 %v8201_v9  ;;  %v8282_v9 = vld [vmem:[%s11775_s1 + $0x15e8] ss:$40 sps:$4 sm:$0xff]  }
  0xe8   :  { %4836 = vmatpush1.bf16.msra.mxu1 %v8204_v10  ;;  %4632 = vmatprep.subr.bf16.mxu0 %v8209_v11  ;;  %v8287_v10 = vld [vmem:[%s11775_s1 + $0x1634] ss:$40 sps:$4 sm:$0xff]  }
  0xe9   :  { %4837 = vmatprep.subr.bf16.mxu1 %v8212_v12  ;;  %v8290_v11 = vld [vmem:[%s11775_s1 + $0x163c] ss:$40 sps:$4 sm:$0xff]   ;;  %v8285_v12 = vld [vmem:[%s11775_s1 + $0x1630] ss:$40 sps:$4 sm:$0xff]  }
  0xeb   :  { %4633 = vmatpush1.bf16.msra.mxu0 %v8207_v14  ;;  %v8288_v14 = vld [vmem:[%s11775_s1 + $0x1638] ss:$40 sps:$4 sm:$0xff]  }
  0xec   :  { %4838 = vmatpush1.bf16.msra.mxu1 %v8210_v52  ;;  %4634 = vmatprep.subr.bf16.mxu0 %v8215_v16  ;;  %v6738_v52 = vld.sshfl [vmem:[%s11776_s0 + $0x8] sm:$0x1 pattern:$0x75316420]  ;;  %v8293_v16 = vld [vmem:[%s11775_s1 + $0x14] ss:$40 sps:$4 sm:$0xff]  }
  0xed   :  { %4839 = vmatprep.subr.bf16.mxu1 %v8218_v18  ;;  %v8296_v18 = vld [vmem:[%s11775_s1 + $0x1c] ss:$40 sps:$4 sm:$0xff]  }
  0xef   :  { %4635 = vmatpush1.bf16.msra.mxu0 %v8213_v19  ;;  %v10047_v19 = vrot.slane %v6738_v52, %v9242_v49  ;;  %v8302_v49 = vld [vmem:[%s11775_s1 + $0x6c] ss:$40 sps:$4 sm:$0xff]  }
  0xf0   :  { %4840 = vmatpush1.bf16.msra.mxu1 %v8216_v20  ;;  %4636 = vmatprep.subr.bf16.mxu0 %v8221_v21  ;;  %v8291_v20 = vld [vmem:[%s11775_s1 + $0x10] ss:$40 sps:$4 sm:$0xff]   ;;  %v8371_v52 = vld [vmem:[%s11775_s1 + $0x424] ss:$40 sps:$4 sm:$0xff]  }
  0xf1   :  { %4841 = vmatprep.subr.bf16.mxu1 %v8224_v22  ;;  %v8294_v21 = vld [vmem:[%s11775_s1 + $0x18] ss:$40 sps:$4 sm:$0xff]   ;;  %v8299_v22 = vld [vmem:[%s11775_s1 + $0x64] ss:$40 sps:$4 sm:$0xff]  }
  0xf3   :  { %4637 = vmatpush1.bf16.msra.mxu0 %v8219_v24  ;;  %v8297_v24 = vld [vmem:[%s11775_s1 + $0x60] ss:$40 sps:$4 sm:$0xff]  }
  0xf4   :  { %4842 = vmatpush1.bf16.msra.mxu1 %v8222_v25  ;;  %4638 = vmatprep.subr.bf16.mxu0 %v8227_v26  ;;  %v8300_v25 = vld [vmem:[%s11775_s1 + $0x68] ss:$40 sps:$4 sm:$0xff]   ;;  %v8305_v26 = vld [vmem:[%s11775_s1 + $0xb4] ss:$40 sps:$4 sm:$0xff]  }
  0xf5   :  { %4843 = vmatprep.subr.bf16.mxu1 %v8230_v28  ;;  %v8308_v28 = vld [vmem:[%s11775_s1 + $0xbc] ss:$40 sps:$4 sm:$0xff]  }
  0xf7   :  { %4639 = vmatpush1.bf16.msra.mxu0 %v8225_v29  ;;  %v8303_v29 = vld [vmem:[%s11775_s1 + $0xb0] ss:$40 sps:$4 sm:$0xff]  }
  0xf8   :  { %4844 = vmatpush1.bf16.msra.mxu1 %v8228_v30  ;;  %4640 = vmatprep.subr.bf16.mxu0 %v8233_v31  ;;  %v8306_v30 = vld [vmem:[%s11775_s1 + $0xb8] ss:$40 sps:$4 sm:$0xff]   ;;  %v8311_v31 = vld [vmem:[%s11775_s1 + $0x104] ss:$40 sps:$4 sm:$0xff]  }
  0xf9   :  { %4845 = vmatprep.subr.bf16.mxu1 %v8236_v33  ;;  %v8314_v33 = vld [vmem:[%s11775_s1 + $0x10c] ss:$40 sps:$4 sm:$0xff]  }
  0xfb   :  { %4641 = vmatpush1.bf16.msra.mxu0 %v8231_v34  ;;  %v8309_v34 = vld [vmem:[%s11775_s1 + $0x100] ss:$40 sps:$4 sm:$0xff]  }
  0xfc   :  { %4846 = vmatpush1.bf16.msra.mxu1 %v8234_v35  ;;  %4642 = vmatprep.subr.bf16.mxu0 %v8239_v15  ;;  %v8312_v35 = vld [vmem:[%s11775_s1 + $0x108] ss:$40 sps:$4 sm:$0xff]   ;;  %v8317_v15 = vld [vmem:[%s11775_s1 + $0x154] ss:$40 sps:$4 sm:$0xff]  }
  0xfd   :  { %4847 = vmatprep.subr.bf16.mxu1 %v8242_v37  ;;  %v8320_v37 = vld [vmem:[%s11775_s1 + $0x15c] ss:$40 sps:$4 sm:$0xff]  }
  0xff   :  { %4643 = vmatpush1.bf16.msra.mxu0 %v8237_v38  ;;  %v8315_v38 = vld [vmem:[%s11775_s1 + $0x150] ss:$40 sps:$4 sm:$0xff]  }
 0x100   :  { %4848 = vmatpush1.bf16.msra.mxu1 %v8240_v39  ;;  %4653 = vmatprep.subr.bf16.mxu0 %v8245_v40  ;;  %v8318_v39 = vld [vmem:[%s11775_s1 + $0x158] ss:$40 sps:$4 sm:$0xff]   ;;  %v8323_v40 = vld [vmem:[%s11775_s1 + $0x1a4] ss:$40 sps:$4 sm:$0xff]  }
 0x101   :  { %4858 = vmatprep.subr.bf16.mxu1 %v8248_v41  ;;  %v8326_v41 = vld [vmem:[%s11775_s1 + $0x1ac] ss:$40 sps:$4 sm:$0xff]  }
 0x102   :  { %4645 = vmatmul.mubr.bf16.vlgmr.msra.gmra.mrb[0].mxu0 %v9944_v44 }
 0x103   :  { %4850 = vmatmul.mubr.bf16.vlgmr.msra.gmra.mrb[0].mxu1 %v9944_v44  ;;  %4654 = vmatpush1.bf16.msra.mxu0 %v8243_v43  ;;  %v8321_v43 = vld [vmem:[%s11775_s1 + $0x1a0] ss:$40 sps:$4 sm:$0xff]  }
 0x104   :  { %4859 = vmatpush1.bf16.msra.mxu1 %v8246_v45  ;;  %4655 = vmatprep.subr.bf16.mxu0 %v8251_v46  ;;  %v8324_v45 = vld [vmem:[%s11775_s1 + $0x1a8] ss:$40 sps:$4 sm:$0xff]   ;;  %v8329_v46 = vld [vmem:[%s11775_s1 + $0x1f4] ss:$40 sps:$4 sm:$0xff]  }
 0x105   :  { %4860 = vmatprep.subr.bf16.mxu1 %v8254_v47  ;;  %4685 = vmatprep.mubr.bf16.mxu0 %v9044_v54  ;;  %v8332_v47 = vld [vmem:[%s11775_s1 + $0x1fc] ss:$40 sps:$4 sm:$0xff]  }
 0x106   :  { %4890 = vmatprep.mubr.bf16.mxu1 %v9044_v54 }
 0x107   :  { %4656 = vmatpush1.bf16.msra.mxu0 %v8249_v48  ;;  %v8327_v48 = vld [vmem:[%s11775_s1 + $0x1f0] ss:$40 sps:$4 sm:$0xff]  }
 0x108   :  { %4861 = vmatpush1.bf16.msra.mxu1 %v8252_v50  ;;  %4657 = vmatprep.subr.bf16.mxu0 %v8257_v51  ;;  %v8330_v50 = vld [vmem:[%s11775_s1 + $0x1f8] ss:$40 sps:$4 sm:$0xff]   ;;  %v8335_v51 = vld [vmem:[%s11775_s1 + $0x244] ss:$40 sps:$4 sm:$0xff]  }
 0x109   :  { %4862 = vmatprep.subr.bf16.mxu1 %v8260_v53  ;;  %v8338_v53 = vld [vmem:[%s11775_s1 + $0x24c] ss:$40 sps:$4 sm:$0xff]  }
 0x10b   :  { %4658 = vmatpush1.bf16.msra.mxu0 %v8255_v55  ;;  %v8333_v55 = vld [vmem:[%s11775_s1 + $0x240] ss:$40 sps:$4 sm:$0xff]  }
 0x10c   :  { %4863 = vmatpush1.bf16.msra.mxu1 %v8258_v56  ;;  %4659 = vmatprep.subr.bf16.mxu0 %v8263_v57  ;;  %v8336_v56 = vld [vmem:[%s11775_s1 + $0x248] ss:$40 sps:$4 sm:$0xff]   ;;  %v8341_v57 = vld [vmem:[%s11775_s1 + $0x294] ss:$40 sps:$4 sm:$0xff]  }
 0x10d   :  { %4864 = vmatprep.subr.bf16.mxu1 %v8266_v58  ;;  %v8344_v58 = vld [vmem:[%s11775_s1 + $0x29c] ss:$40 sps:$4 sm:$0xff]  }
 0x10f   :  { %4660 = vmatpush1.bf16.msra.mxu0 %v8261_v59  ;;  %v8339_v59 = vld [vmem:[%s11775_s1 + $0x290] ss:$40 sps:$4 sm:$0xff]  }
 0x110   :  { %4865 = vmatpush1.bf16.msra.mxu1 %v8264_v61  ;;  %4661 = vmatprep.subr.bf16.mxu0 %v8269_v62  ;;  %v8342_v61 = vld [vmem:[%s11775_s1 + $0x298] ss:$40 sps:$4 sm:$0xff]   ;;  %v8347_v62 = vld [vmem:[%s11775_s1 + $0x2e4] ss:$40 sps:$4 sm:$0xff]  }
 0x111   :  { %4866 = vmatprep.subr.bf16.mxu1 %v8272_v63  ;;  %v8350_v63 = vld [vmem:[%s11775_s1 + $0x2ec] ss:$40 sps:$4 sm:$0xff]  }
 0x113   :  { %4662 = vmatpush1.bf16.msra.mxu0 %v8267_v0  ;;  %v8345_v0 = vld [vmem:[%s11775_s1 + $0x2e0] ss:$40 sps:$4 sm:$0xff]  }
 0x114   :  { %4867 = vmatpush1.bf16.msra.mxu1 %v8270_v1  ;;  %4663 = vmatprep.subr.bf16.mxu0 %v8275_v2  ;;  %v8348_v1 = vld [vmem:[%s11775_s1 + $0x2e8] ss:$40 sps:$4 sm:$0xff]   ;;  %v8353_v2 = vld [vmem:[%s11775_s1 + $0x334] ss:$40 sps:$4 sm:$0xff]  }
 0x115   :  { %4868 = vmatprep.subr.bf16.mxu1 %v8278_v3  ;;  %v8356_v3 = vld [vmem:[%s11775_s1 + $0x33c] ss:$40 sps:$4 sm:$0xff]  }
 0x117   :  { %4664 = vmatpush1.bf16.msra.mxu0 %v8273_v4  ;;  %v8351_v4 = vld [vmem:[%s11775_s1 + $0x330] ss:$40 sps:$4 sm:$0xff]  }
 0x118   :  { %4869 = vmatpush1.bf16.msra.mxu1 %v8276_v5  ;;  %4665 = vmatprep.subr.bf16.mxu0 %v8281_v6  ;;  %v8354_v5 = vld [vmem:[%s11775_s1 + $0x338] ss:$40 sps:$4 sm:$0xff]   ;;  %v8359_v6 = vld [vmem:[%s11775_s1 + $0x384] ss:$40 sps:$4 sm:$0xff]  }
 0x119   :  { %4870 = vmatprep.subr.bf16.mxu1 %v8284_v7  ;;  %v8362_v7 = vld [vmem:[%s11775_s1 + $0x38c] ss:$40 sps:$4 sm:$0xff]  }
 0x11b   :  { %4666 = vmatpush1.bf16.msra.mxu0 %v8279_v8  ;;  %v8357_v8 = vld [vmem:[%s11775_s1 + $0x380] ss:$40 sps:$4 sm:$0xff]  }
 0x11c   :  { %4871 = vmatpush1.bf16.msra.mxu1 %v8282_v9  ;;  %4667 = vmatprep.subr.bf16.mxu0 %v8287_v10  ;;  %v8360_v9 = vld [vmem:[%s11775_s1 + $0x388] ss:$40 sps:$4 sm:$0xff]   ;;  %v8365_v10 = vld [vmem:[%s11775_s1 + $0x3d4] ss:$40 sps:$4 sm:$0xff]  }
 0x11d   :  { %4872 = vmatprep.subr.bf16.mxu1 %v8290_v11  ;;  %v8368_v11 = vld [vmem:[%s11775_s1 + $0x3dc] ss:$40 sps:$4 sm:$0xff]  }
 0x11f   :  { %4668 = vmatpush1.bf16.msra.mxu0 %v8285_v12  ;;  %v8363_v12 = vld [vmem:[%s11775_s1 + $0x3d0] ss:$40 sps:$4 sm:$0xff]  }
 0x120   :  { %4873 = vmatpush1.bf16.msra.mxu1 %v8288_v14  ;;  %4899 = vmatprep.subr.bf16.mxu0 %v8293_v16  ;;  %v8366_v14 = vld [vmem:[%s11775_s1 + $0x3d8] ss:$40 sps:$4 sm:$0xff]   ;;  %v8374_v16 = vld [vmem:[%s11775_s1 + $0x42c] ss:$40 sps:$4 sm:$0xff]  }
 0x121   :  { %5104 = vmatprep.subr.bf16.mxu1 %v8296_v18  ;;  %v8369_v18 = vld [vmem:[%s11775_s1 + $0x420] ss:$40 sps:$4 sm:$0xff]  }
 0x122   :  { %4686 = vmatmul.mubr.bf16.vlgmr.msra.gmra.mrb[0].mxu0 %v10047_v19 }
 0x123   :  { %4891 = vmatmul.mubr.bf16.vlgmr.msra.gmra.mrb[0].mxu1 %v10047_v19  ;;  %4900 = vmatpush1.bf16.msra.mxu0 %v8291_v20  ;;  %v8372_v20 = vld [vmem:[%s11775_s1 + $0x428] ss:$40 sps:$4 sm:$0xff]  }
 0x124   :  { %5105 = vmatpush1.bf16.msra.mxu1 %v8294_v21  ;;  %4901 = vmatprep.subr.bf16.mxu0 %v8299_v22  ;;  %v8377_v21 = vld [vmem:[%s11775_s1 + $0x474] ss:$40 sps:$4 sm:$0xff]  }
 0x125   :  { %5106 = vmatprep.subr.bf16.mxu1 %v8302_v49  ;;  %4931 = vmatprep.mubr.bf16.mxu0 %v9273_v60  ;;  %v8380_v22 = vld [vmem:[%s11775_s1 + $0x47c] ss:$40 sps:$4 sm:$0xff]   ;;  %v8375_v49 = vld [vmem:[%s11775_s1 + $0x470] ss:$40 sps:$4 sm:$0xff]  }
 0x126   :  { %5136 = vmatprep.mubr.bf16.mxu1 %v9273_v60 }
 0x127   :  { %4902 = vmatpush1.bf16.msra.mxu0 %v8297_v24  ;;  %v8378_v24 = vld [vmem:[%s11775_s1 + $0x478] ss:$40 sps:$4 sm:$0xff]  }
 0x128   :  { %5107 = vmatpush1.bf16.msra.mxu1 %v8300_v25  ;;  %4903 = vmatprep.subr.bf16.mxu0 %v8305_v26  ;;  %v8383_v25 = vld [vmem:[%s11775_s1 + $0x4c4] ss:$40 sps:$4 sm:$0xff]  }
 0x129   :  { %5108 = vmatprep.subr.bf16.mxu1 %v8308_v28  ;;  %v8386_v26 = vld [vmem:[%s11775_s1 + $0x4cc] ss:$40 sps:$4 sm:$0xff]   ;;  %v8381_v28 = vld [vmem:[%s11775_s1 + $0x4c0] ss:$40 sps:$4 sm:$0xff]  }
 0x12b   :  { %4904 = vmatpush1.bf16.msra.mxu0 %v8303_v29  ;;  %v8384_v29 = vld [vmem:[%s11775_s1 + $0x4c8] ss:$40 sps:$4 sm:$0xff]  }
 0x12c   :  { %5109 = vmatpush1.bf16.msra.mxu1 %v8306_v30  ;;  %4905 = vmatprep.subr.bf16.mxu0 %v8311_v31  ;;  %v8389_v30 = vld [vmem:[%s11775_s1 + $0x514] ss:$40 sps:$4 sm:$0xff]  }
 0x12d   :  { %5110 = vmatprep.subr.bf16.mxu1 %v8314_v33  ;;  %v8392_v31 = vld [vmem:[%s11775_s1 + $0x51c] ss:$40 sps:$4 sm:$0xff]   ;;  %v8387_v33 = vld [vmem:[%s11775_s1 + $0x510] ss:$40 sps:$4 sm:$0xff]  }
 0x12f   :  { %4906 = vmatpush1.bf16.msra.mxu0 %v8309_v34  ;;  %v8390_v34 = vld [vmem:[%s11775_s1 + $0x518] ss:$40 sps:$4 sm:$0xff]  }
 0x130   :  { %5111 = vmatpush1.bf16.msra.mxu1 %v8312_v35  ;;  %4907 = vmatprep.subr.bf16.mxu0 %v8317_v15  ;;  %v8395_v35 = vld [vmem:[%s11775_s1 + $0x564] ss:$40 sps:$4 sm:$0xff]  }
 0x131   :  { %5112 = vmatprep.subr.bf16.mxu1 %v8320_v37  ;;  %v8398_v15 = vld [vmem:[%s11775_s1 + $0x56c] ss:$40 sps:$4 sm:$0xff]   ;;  %v8393_v37 = vld [vmem:[%s11775_s1 + $0x560] ss:$40 sps:$4 sm:$0xff]  }
 0x133   :  { %4908 = vmatpush1.bf16.msra.mxu0 %v8315_v38  ;;  %v8396_v38 = vld [vmem:[%s11775_s1 + $0x568] ss:$40 sps:$4 sm:$0xff]  }
 0x134   :  { %5113 = vmatpush1.bf16.msra.mxu1 %v8318_v39  ;;  %4909 = vmatprep.subr.bf16.mxu0 %v8323_v40  ;;  %v8401_v39 = vld [vmem:[%s11775_s1 + $0x5b4] ss:$40 sps:$4 sm:$0xff]  }
 0x135   :  { %5114 = vmatprep.subr.bf16.mxu1 %v8326_v41  ;;  %v8404_v40 = vld [vmem:[%s11775_s1 + $0x5bc] ss:$40 sps:$4 sm:$0xff]   ;;  %v8399_v41 = vld [vmem:[%s11775_s1 + $0x5b0] ss:$40 sps:$4 sm:$0xff]  }
 0x137   :  { %4910 = vmatpush1.bf16.msra.mxu0 %v8321_v43  ;;  %v8402_v43 = vld [vmem:[%s11775_s1 + $0x5b8] ss:$40 sps:$4 sm:$0xff]  }
 0x138   :  { %5115 = vmatpush1.bf16.msra.mxu1 %v8324_v45  ;;  %4911 = vmatprep.subr.bf16.mxu0 %v8329_v46  ;;  %v8407_v45 = vld [vmem:[%s11775_s1 + $0x604] ss:$40 sps:$4 sm:$0xff]  }
 0x139   :  { %5116 = vmatprep.subr.bf16.mxu1 %v8332_v47  ;;  %v8410_v46 = vld [vmem:[%s11775_s1 + $0x60c] ss:$40 sps:$4 sm:$0xff]   ;;  %v8405_v47 = vld [vmem:[%s11775_s1 + $0x600] ss:$40 sps:$4 sm:$0xff]  }
 0x13b   :  { %4912 = vmatpush1.bf16.msra.mxu0 %v8327_v48  ;;  %v8408_v48 = vld [vmem:[%s11775_s1 + $0x608] ss:$40 sps:$4 sm:$0xff]  }
 0x13c   :  { %5117 = vmatpush1.bf16.msra.mxu1 %v8330_v50  ;;  %4913 = vmatprep.subr.bf16.mxu0 %v8335_v51  ;;  %v8413_v50 = vld [vmem:[%s11775_s1 + $0x654] ss:$40 sps:$4 sm:$0xff]  }
 0x13d   :  { %5118 = vmatprep.subr.bf16.mxu1 %v8338_v53  ;;  %v8416_v51 = vld [vmem:[%s11775_s1 + $0x65c] ss:$40 sps:$4 sm:$0xff]   ;;  %v8411_v53 = vld [vmem:[%s11775_s1 + $0x650] ss:$40 sps:$4 sm:$0xff]  }
 0x13f   :  { %4914 = vmatpush1.bf16.msra.mxu0 %v8333_v55  ;;  %v8414_v55 = vld [vmem:[%s11775_s1 + $0x658] ss:$40 sps:$4 sm:$0xff]  }
 0x140   :  { %5119 = vmatpush1.bf16.msra.mxu1 %v8336_v56  ;;  %4915 = vmatprep.subr.bf16.mxu0 %v8341_v57  ;;  %v8419_v56 = vld [vmem:[%s11775_s1 + $0x6a4] ss:$40 sps:$4 sm:$0xff]  }
 0x141   :  { %5120 = vmatprep.subr.bf16.mxu1 %v8344_v58  ;;  %v8422_v57 = vld [vmem:[%s11775_s1 + $0x6ac] ss:$40 sps:$4 sm:$0xff]   ;;  %v8417_v58 = vld [vmem:[%s11775_s1 + $0x6a0] ss:$40 sps:$4 sm:$0xff]  }
 0x143   :  { %4916 = vmatpush1.bf16.msra.mxu0 %v8339_v59  ;;  %v8420_v59 = vld [vmem:[%s11775_s1 + $0x6a8] ss:$40 sps:$4 sm:$0xff]  }
 0x144   :  { %5121 = vmatpush1.bf16.msra.mxu1 %v8342_v61  ;;  %4917 = vmatprep.subr.bf16.mxu0 %v8347_v62  ;;  %v8425_v61 = vld [vmem:[%s11775_s1 + $0x6f4] ss:$40 sps:$4 sm:$0xff]  }
 0x145   :  { %5122 = vmatprep.subr.bf16.mxu1 %v8350_v63  ;;  %v8428_v62 = vld [vmem:[%s11775_s1 + $0x6fc] ss:$40 sps:$4 sm:$0xff]   ;;  %v8423_v63 = vld [vmem:[%s11775_s1 + $0x6f0] ss:$40 sps:$4 sm:$0xff]  }
 0x147   :  { %4918 = vmatpush1.bf16.msra.mxu0 %v8345_v0  ;;  %v8426_v0 = vld [vmem:[%s11775_s1 + $0x6f8] ss:$40 sps:$4 sm:$0xff]  }
 0x148   :  { %5123 = vmatpush1.bf16.msra.mxu1 %v8348_v1  ;;  %4919 = vmatprep.subr.bf16.mxu0 %v8353_v2  ;;  %v8431_v1 = vld [vmem:[%s11775_s1 + $0x744] ss:$40 sps:$4 sm:$0xff]  }
 0x149   :  { %5124 = vmatprep.subr.bf16.mxu1 %v8356_v3  ;;  %v8434_v2 = vld [vmem:[%s11775_s1 + $0x74c] ss:$40 sps:$4 sm:$0xff]   ;;  %v8429_v3 = vld [vmem:[%s11775_s1 + $0x740] ss:$40 sps:$4 sm:$0xff]  }
 0x14b   :  { %4920 = vmatpush1.bf16.msra.mxu0 %v8351_v4  ;;  %v8432_v4 = vld [vmem:[%s11775_s1 + $0x748] ss:$40 sps:$4 sm:$0xff]  }
 0x14c   :  { %5125 = vmatpush1.bf16.msra.mxu1 %v8354_v5  ;;  %4921 = vmatprep.subr.bf16.mxu0 %v8359_v6  ;;  %v8437_v5 = vld [vmem:[%s11775_s1 + $0x794] ss:$40 sps:$4 sm:$0xff]  }
 0x14d   :  { %5126 = vmatprep.subr.bf16.mxu1 %v8362_v7  ;;  %v8440_v6 = vld [vmem:[%s11775_s1 + $0x79c] ss:$40 sps:$4 sm:$0xff]   ;;  %v8435_v7 = vld [vmem:[%s11775_s1 + $0x790] ss:$40 sps:$4 sm:$0xff]  }
 0x14f   :  { %4922 = vmatpush1.bf16.msra.mxu0 %v8357_v8  ;;  %v8438_v8 = vld [vmem:[%s11775_s1 + $0x798] ss:$40 sps:$4 sm:$0xff]  }
 0x150   :  { %5127 = vmatpush1.bf16.msra.mxu1 %v8360_v9  ;;  %4923 = vmatprep.subr.bf16.mxu0 %v8365_v10  ;;  %v8443_v9 = vld [vmem:[%s11775_s1 + $0x7e4] ss:$40 sps:$4 sm:$0xff]  }
 0x151   :  { %5128 = vmatprep.subr.bf16.mxu1 %v8368_v11  ;;  %v8446_v10 = vld [vmem:[%s11775_s1 + $0x7ec] ss:$40 sps:$4 sm:$0xff]   ;;  %v8441_v11 = vld [vmem:[%s11775_s1 + $0x7e0] ss:$40 sps:$4 sm:$0xff]  }
 0x153   :  { %4924 = vmatpush1.bf16.msra.mxu0 %v8363_v12  ;;  %v8444_v12 = vld [vmem:[%s11775_s1 + $0x7e8] ss:$40 sps:$4 sm:$0xff]  }
 0x154   :  { %5129 = vmatpush1.bf16.msra.mxu1 %v8366_v14  ;;  %4925 = vmatprep.subr.bf16.mxu0 %v8371_v52  ;;  %v8449_v14 = vld [vmem:[%s11775_s1 + $0x834] ss:$40 sps:$4 sm:$0xff]  }
 0x155   :  { %5130 = vmatprep.subr.bf16.mxu1 %v8374_v16  ;;  %v8452_v52 = vld [vmem:[%s11775_s1 + $0x83c] ss:$40 sps:$4 sm:$0xff]   ;;  %v8447_v16 = vld [vmem:[%s11775_s1 + $0x830] ss:$40 sps:$4 sm:$0xff]  }
 0x157   :  { %4926 = vmatpush1.bf16.msra.mxu0 %v8369_v18  ;;  %v8450_v18 = vld [vmem:[%s11775_s1 + $0x838] ss:$40 sps:$4 sm:$0xff]  }
 0x158   :  { %5131 = vmatpush1.bf16.msra.mxu1 %v8372_v20  ;;  %4927 = vmatprep.subr.bf16.mxu0 %v8377_v21  ;;  %v8455_v20 = vld [vmem:[%s11775_s1 + $0x884] ss:$40 sps:$4 sm:$0xff]  }
 0x159   :  { %5132 = vmatprep.subr.bf16.mxu1 %v8380_v22  ;;  %v8458_v21 = vld [vmem:[%s11775_s1 + $0x88c] ss:$40 sps:$4 sm:$0xff]   ;;  %v8453_v22 = vld [vmem:[%s11775_s1 + $0x880] ss:$40 sps:$4 sm:$0xff]  }
 0x15b   :  { %4928 = vmatpush1.bf16.msra.mxu0 %v8375_v49  ;;  %v8456_v49 = vld [vmem:[%s11775_s1 + $0x888] ss:$40 sps:$4 sm:$0xff]  }
 0x15c   :  { %5133 = vmatpush1.bf16.msra.mxu1 %v8378_v24  ;;  %4929 = vmatprep.subr.bf16.mxu0 %v8383_v25  ;;  %v8461_v24 = vld [vmem:[%s11775_s1 + $0x8d4] ss:$40 sps:$4 sm:$0xff]  }
 0x15d   :  { %5134 = vmatprep.subr.bf16.mxu1 %v8386_v26  ;;  %v8464_v25 = vld [vmem:[%s11775_s1 + $0x8dc] ss:$40 sps:$4 sm:$0xff]   ;;  %v8459_v26 = vld [vmem:[%s11775_s1 + $0x8d0] ss:$40 sps:$4 sm:$0xff]  }
 0x15f   :  { %4930 = vmatpush1.bf16.msra.mxu0 %v8381_v28  ;;  %v8462_v28 = vld [vmem:[%s11775_s1 + $0x8d8] ss:$40 sps:$4 sm:$0xff]  }
 0x160   :  { %5135 = vmatpush1.bf16.msra.mxu1 %v8384_v29  ;;  %4940 = vmatprep.subr.bf16.mxu0 %v8389_v30  ;;  %v8467_v29 = vld [vmem:[%s11775_s1 + $0x924] ss:$40 sps:$4 sm:$0xff]  }
 0x161   :  { %5145 = vmatprep.subr.bf16.mxu1 %v8392_v31  ;;  %v8470_v30 = vld [vmem:[%s11775_s1 + $0x92c] ss:$40 sps:$4 sm:$0xff]   ;;  %v8465_v31 = vld [vmem:[%s11775_s1 + $0x920] ss:$40 sps:$4 sm:$0xff]  }
 0x162   :  { %4932 = vmatmul.mubr.bf16.vlgmr.msra.gmra.mrb[4].mxu0 %v9326_v13 }
 0x163   :  { %5137 = vmatmul.mubr.bf16.vlgmr.msra.gmra.mrb[4].mxu1 %v9326_v13  ;;  %4941 = vmatpush1.bf16.msra.mxu0 %v8387_v33  ;;  %v8468_v33 = vld [vmem:[%s11775_s1 + $0x928] ss:$40 sps:$4 sm:$0xff]  }
 0x164   :  { %5146 = vmatpush1.bf16.msra.mxu1 %v8390_v34  ;;  %4942 = vmatprep.subr.bf16.mxu0 %v8395_v35  ;;  %v8473_v34 = vld [vmem:[%s11775_s1 + $0x974] ss:$40 sps:$4 sm:$0xff]  }
 0x165   :  { %5147 = vmatprep.subr.bf16.mxu1 %v8398_v15  ;;  %4972 = vmatprep.mubr.bf16.mxu0 %v9339_v17  ;;  %v8476_v35 = vld [vmem:[%s11775_s1 + $0x97c] ss:$40 sps:$4 sm:$0xff]   ;;  %v8471_v15 = vld [vmem:[%s11775_s1 + $0x970] ss:$40 sps:$4 sm:$0xff]  }
 0x166   :  { %5177 = vmatprep.mubr.bf16.mxu1 %v9339_v17 }
 0x167   :  { %4943 = vmatpush1.bf16.msra.mxu0 %v8393_v37  ;;  %v8474_v37 = vld [vmem:[%s11775_s1 + $0x978] ss:$40 sps:$4 sm:$0xff]  }
 0x168   :  { %5148 = vmatpush1.bf16.msra.mxu1 %v8396_v38  ;;  %4944 = vmatprep.subr.bf16.mxu0 %v8401_v39  ;;  %v8479_v38 = vld [vmem:[%s11775_s1 + $0x9c4] ss:$40 sps:$4 sm:$0xff]  }
 0x169   :  { %5149 = vmatprep.subr.bf16.mxu1 %v8404_v40  ;;  %v8482_v39 = vld [vmem:[%s11775_s1 + $0x9cc] ss:$40 sps:$4 sm:$0xff]   ;;  %v8477_v40 = vld [vmem:[%s11775_s1 + $0x9c0] ss:$40 sps:$4 sm:$0xff]  }
 0x16b   :  { %4945 = vmatpush1.bf16.msra.mxu0 %v8399_v41  ;;  %v8480_v41 = vld [vmem:[%s11775_s1 + $0x9c8] ss:$40 sps:$4 sm:$0xff]  }
 0x16c   :  { %5150 = vmatpush1.bf16.msra.mxu1 %v8402_v43  ;;  %4946 = vmatprep.subr.bf16.mxu0 %v8407_v45  ;;  %v8485_v43 = vld [vmem:[%s11775_s1 + $0xa14] ss:$40 sps:$4 sm:$0xff]  }
 0x16d   :  { %5151 = vmatprep.subr.bf16.mxu1 %v8410_v46  ;;  %v8488_v45 = vld [vmem:[%s11775_s1 + $0xa1c] ss:$40 sps:$4 sm:$0xff]   ;;  %v8483_v46 = vld [vmem:[%s11775_s1 + $0xa10] ss:$40 sps:$4 sm:$0xff]  }
 0x16f   :  { %4947 = vmatpush1.bf16.msra.mxu0 %v8405_v47  ;;  %v8486_v47 = vld [vmem:[%s11775_s1 + $0xa18] ss:$40 sps:$4 sm:$0xff]  }
 0x170   :  { %5152 = vmatpush1.bf16.msra.mxu1 %v8408_v48  ;;  %4948 = vmatprep.subr.bf16.mxu0 %v8413_v50  ;;  %v8491_v48 = vld [vmem:[%s11775_s1 + $0xa64] ss:$40 sps:$4 sm:$0xff]  }
 0x171   :  { %5153 = vmatprep.subr.bf16.mxu1 %v8416_v51  ;;  %v8494_v50 = vld [vmem:[%s11775_s1 + $0xa6c] ss:$40 sps:$4 sm:$0xff]   ;;  %v8489_v51 = vld [vmem:[%s11775_s1 + $0xa60] ss:$40 sps:$4 sm:$0xff]  }
 0x173   :  { %4949 = vmatpush1.bf16.msra.mxu0 %v8411_v53  ;;  %v8492_v53 = vld [vmem:[%s11775_s1 + $0xa68] ss:$40 sps:$4 sm:$0xff]  }
 0x174   :  { %5154 = vmatpush1.bf16.msra.mxu1 %v8414_v55  ;;  %4950 = vmatprep.subr.bf16.mxu0 %v8419_v56  ;;  %v8497_v55 = vld [vmem:[%s11775_s1 + $0xab4] ss:$40 sps:$4 sm:$0xff]  }
 0x175   :  { %5155 = vmatprep.subr.bf16.mxu1 %v8422_v57  ;;  %v8500_v56 = vld [vmem:[%s11775_s1 + $0xabc] ss:$40 sps:$4 sm:$0xff]   ;;  %v8495_v57 = vld [vmem:[%s11775_s1 + $0xab0] ss:$40 sps:$4 sm:$0xff]  }
 0x177   :  { %4951 = vmatpush1.bf16.msra.mxu0 %v8417_v58  ;;  %v8498_v58 = vld [vmem:[%s11775_s1 + $0xab8] ss:$40 sps:$4 sm:$0xff]  }
 0x178   :  { %5156 = vmatpush1.bf16.msra.mxu1 %v8420_v59  ;;  %4952 = vmatprep.subr.bf16.mxu0 %v8425_v61  ;;  %v8503_v59 = vld [vmem:[%s11775_s1 + $0xb04] ss:$40 sps:$4 sm:$0xff]  }
 0x179   :  { %5157 = vmatprep.subr.bf16.mxu1 %v8428_v62  ;;  %v8506_v61 = vld [vmem:[%s11775_s1 + $0xb0c] ss:$40 sps:$4 sm:$0xff]   ;;  %v8501_v62 = vld [vmem:[%s11775_s1 + $0xb00] ss:$40 sps:$4 sm:$0xff]  }
 0x17b   :  { %4953 = vmatpush1.bf16.msra.mxu0 %v8423_v63  ;;  %v8504_v63 = vld [vmem:[%s11775_s1 + $0xb08] ss:$40 sps:$4 sm:$0xff]  }
 0x17c   :  { %5158 = vmatpush1.bf16.msra.mxu1 %v8426_v0  ;;  %4954 = vmatprep.subr.bf16.mxu0 %v8431_v1  ;;  %v8509_v0 = vld [vmem:[%s11775_s1 + $0xb54] ss:$40 sps:$4 sm:$0xff]  }
 0x17d   :  { %5159 = vmatprep.subr.bf16.mxu1 %v8434_v2  ;;  %v8512_v1 = vld [vmem:[%s11775_s1 + $0xb5c] ss:$40 sps:$4 sm:$0xff]   ;;  %v8507_v2 = vld [vmem:[%s11775_s1 + $0xb50] ss:$40 sps:$4 sm:$0xff]  }
 0x17f   :  { %4955 = vmatpush1.bf16.msra.mxu0 %v8429_v3  ;;  %v8510_v3 = vld [vmem:[%s11775_s1 + $0xb58] ss:$40 sps:$4 sm:$0xff]  }
 0x180   :  { %5160 = vmatpush1.bf16.msra.mxu1 %v8432_v4  ;;  %4956 = vmatprep.subr.bf16.mxu0 %v8437_v5  ;;  %v8515_v4 = vld [vmem:[%s11775_s1 + $0xba4] ss:$40 sps:$4 sm:$0xff]  }
 0x181   :  { %5161 = vmatprep.subr.bf16.mxu1 %v8440_v6  ;;  %v8518_v5 = vld [vmem:[%s11775_s1 + $0xbac] ss:$40 sps:$4 sm:$0xff]   ;;  %v8513_v6 = vld [vmem:[%s11775_s1 + $0xba0] ss:$40 sps:$4 sm:$0xff]  }
 0x183   :  { %4957 = vmatpush1.bf16.msra.mxu0 %v8435_v7  ;;  %v8516_v7 = vld [vmem:[%s11775_s1 + $0xba8] ss:$40 sps:$4 sm:$0xff]  }
 0x184   :  { %5162 = vmatpush1.bf16.msra.mxu1 %v8438_v8  ;;  %4958 = vmatprep.subr.bf16.mxu0 %v8443_v9  ;;  %v8521_v8 = vld [vmem:[%s11775_s1 + $0xbf4] ss:$40 sps:$4 sm:$0xff]  }
 0x185   :  { %5163 = vmatprep.subr.bf16.mxu1 %v8446_v10  ;;  %v8524_v9 = vld [vmem:[%s11775_s1 + $0xbfc] ss:$40 sps:$4 sm:$0xff]   ;;  %v8519_v10 = vld [vmem:[%s11775_s1 + $0xbf0] ss:$40 sps:$4 sm:$0xff]  }
 0x187   :  { %4959 = vmatpush1.bf16.msra.mxu0 %v8441_v11  ;;  %v8522_v11 = vld [vmem:[%s11775_s1 + $0xbf8] ss:$40 sps:$4 sm:$0xff]  }
 0x188   :  { %5164 = vmatpush1.bf16.msra.mxu1 %v8444_v12  ;;  %4960 = vmatprep.subr.bf16.mxu0 %v8449_v14  ;;  %v8527_v12 = vld [vmem:[%s11775_s1 + $0xc44] ss:$40 sps:$4 sm:$0xff]  }
 0x189   :  { %5165 = vmatprep.subr.bf16.mxu1 %v8452_v52  ;;  %v8530_v14 = vld [vmem:[%s11775_s1 + $0xc4c] ss:$40 sps:$4 sm:$0xff]   ;;  %v8525_v52 = vld [vmem:[%s11775_s1 + $0xc40] ss:$40 sps:$4 sm:$0xff]  }
 0x18b   :  { %4961 = vmatpush1.bf16.msra.mxu0 %v8447_v16  ;;  %v8528_v16 = vld [vmem:[%s11775_s1 + $0xc48] ss:$40 sps:$4 sm:$0xff]  }
 0x18c   :  { %5166 = vmatpush1.bf16.msra.mxu1 %v8450_v18  ;;  %4962 = vmatprep.subr.bf16.mxu0 %v8455_v20  ;;  %v8533_v18 = vld [vmem:[%s11775_s1 + $0xc94] ss:$40 sps:$4 sm:$0xff]  }
 0x18d   :  { %5167 = vmatprep.subr.bf16.mxu1 %v8458_v21  ;;  %v8536_v20 = vld [vmem:[%s11775_s1 + $0xc9c] ss:$40 sps:$4 sm:$0xff]   ;;  %v8531_v21 = vld [vmem:[%s11775_s1 + $0xc90] ss:$40 sps:$4 sm:$0xff]  }
 0x18f   :  { %4963 = vmatpush1.bf16.msra.mxu0 %v8453_v22  ;;  %v8534_v22 = vld [vmem:[%s11775_s1 + $0xc98] ss:$40 sps:$4 sm:$0xff]  }
 0x190   :  { %5168 = vmatpush1.bf16.msra.mxu1 %v8456_v49  ;;  %4964 = vmatprep.subr.bf16.mxu0 %v8461_v24  ;;  %v8539_v49 = vld [vmem:[%s11775_s1 + $0xce4] ss:$40 sps:$4 sm:$0xff]  }
 0x191   :  { %5169 = vmatprep.subr.bf16.mxu1 %v8464_v25  ;;  %v8542_v24 = vld [vmem:[%s11775_s1 + $0xcec] ss:$40 sps:$4 sm:$0xff]   ;;  %v8537_v25 = vld [vmem:[%s11775_s1 + $0xce0] ss:$40 sps:$4 sm:$0xff]  }
 0x193   :  { %4965 = vmatpush1.bf16.msra.mxu0 %v8459_v26  ;;  %v8540_v26 = vld [vmem:[%s11775_s1 + $0xce8] ss:$40 sps:$4 sm:$0xff]  }
 0x194   :  { %5170 = vmatpush1.bf16.msra.mxu1 %v8462_v28  ;;  %4966 = vmatprep.subr.bf16.mxu0 %v8467_v29  ;;  %v8545_v28 = vld [vmem:[%s11775_s1 + $0xd34] ss:$40 sps:$4 sm:$0xff]  }
 0x195   :  { %5171 = vmatprep.subr.bf16.mxu1 %v8470_v30  ;;  %v8548_v29 = vld [vmem:[%s11775_s1 + $0xd3c] ss:$40 sps:$4 sm:$0xff]   ;;  %v8543_v30 = vld [vmem:[%s11775_s1 + $0xd30] ss:$40 sps:$4 sm:$0xff]  }
 0x197   :  { %4967 = vmatpush1.bf16.msra.mxu0 %v8465_v31  ;;  %v8546_v31 = vld [vmem:[%s11775_s1 + $0xd38] ss:$40 sps:$4 sm:$0xff]  }
 0x198   :  { %5172 = vmatpush1.bf16.msra.mxu1 %v8468_v33  ;;  %4968 = vmatprep.subr.bf16.mxu0 %v8473_v34  ;;  %v8551_v33 = vld [vmem:[%s11775_s1 + $0xd84] ss:$40 sps:$4 sm:$0xff]  }
 0x199   :  { %5173 = vmatprep.subr.bf16.mxu1 %v8476_v35  ;;  %v8554_v34 = vld [vmem:[%s11775_s1 + $0xd8c] ss:$40 sps:$4 sm:$0xff]   ;;  %v8549_v35 = vld [vmem:[%s11775_s1 + $0xd80] ss:$40 sps:$4 sm:$0xff]  }
 0x19b   :  { %4969 = vmatpush1.bf16.msra.mxu0 %v8471_v15  ;;  %v8552_v15 = vld [vmem:[%s11775_s1 + $0xd88] ss:$40 sps:$4 sm:$0xff]  }
 0x19c   :  { %5174 = vmatpush1.bf16.msra.mxu1 %v8474_v37  ;;  %4970 = vmatprep.subr.bf16.mxu0 %v8479_v38  ;;  %v8557_v37 = vld [vmem:[%s11775_s1 + $0xdd4] ss:$40 sps:$4 sm:$0xff]  }
 0x19d   :  { %5175 = vmatprep.subr.bf16.mxu1 %v8482_v39  ;;  %v8560_v38 = vld [vmem:[%s11775_s1 + $0xddc] ss:$40 sps:$4 sm:$0xff]   ;;  %v8555_v39 = vld [vmem:[%s11775_s1 + $0xdd0] ss:$40 sps:$4 sm:$0xff]  }
 0x19f   :  { %4971 = vmatpush1.bf16.msra.mxu0 %v8477_v40  ;;  %v8558_v40 = vld [vmem:[%s11775_s1 + $0xdd8] ss:$40 sps:$4 sm:$0xff]  }
 0x1a0   :  { %5176 = vmatpush1.bf16.msra.mxu1 %v8480_v41  ;;  %4981 = vmatprep.subr.bf16.mxu0 %v8485_v43  ;;  %v8563_v41 = vld [vmem:[%s11775_s1 + $0xe24] ss:$40 sps:$4 sm:$0xff]  }
 0x1a1   :  { %5186 = vmatprep.subr.bf16.mxu1 %v8488_v45  ;;  %v8566_v43 = vld [vmem:[%s11775_s1 + $0xe2c] ss:$40 sps:$4 sm:$0xff]   ;;  %v8561_v45 = vld [vmem:[%s11775_s1 + $0xe20] ss:$40 sps:$4 sm:$0xff]  }
 0x1a2   :  { %4973 = vmatmul.mubr.bf16.vlgmr.msra.gmra.mrb[4].mxu0 %v9537_v23 }
 0x1a3   :  { %5178 = vmatmul.mubr.bf16.vlgmr.msra.gmra.mrb[4].mxu1 %v9537_v23  ;;  %4982 = vmatpush1.bf16.msra.mxu0 %v8483_v46  ;;  %v8564_v46 = vld [vmem:[%s11775_s1 + $0xe28] ss:$40 sps:$4 sm:$0xff]  }
 0x1a4   :  { %5187 = vmatpush1.bf16.msra.mxu1 %v8486_v47  ;;  %4983 = vmatprep.subr.bf16.mxu0 %v8491_v48  ;;  %v8569_v47 = vld [vmem:[%s11775_s1 + $0xe74] ss:$40 sps:$4 sm:$0xff]  }
 0x1a5   :  { %5188 = vmatprep.subr.bf16.mxu1 %v8494_v50  ;;  %5013 = vmatprep.mubr.bf16.mxu0 %v9549_v27  ;;  %v8572_v48 = vld [vmem:[%s11775_s1 + $0xe7c] ss:$40 sps:$4 sm:$0xff]   ;;  %v8567_v50 = vld [vmem:[%s11775_s1 + $0xe70] ss:$40 sps:$4 sm:$0xff]  }
 0x1a6   :  { %5218 = vmatprep.mubr.bf16.mxu1 %v9549_v27 }
 0x1a7   :  { %4984 = vmatpush1.bf16.msra.mxu0 %v8489_v51  ;;  %v8570_v51 = vld [vmem:[%s11775_s1 + $0xe78] ss:$40 sps:$4 sm:$0xff]  }
 0x1a8   :  { %5189 = vmatpush1.bf16.msra.mxu1 %v8492_v53  ;;  %4985 = vmatprep.subr.bf16.mxu0 %v8497_v55  ;;  %v8575_v53 = vld [vmem:[%s11775_s1 + $0xec4] ss:$40 sps:$4 sm:$0xff]  }
 0x1a9   :  { %5190 = vmatprep.subr.bf16.mxu1 %v8500_v56  ;;  %v8578_v55 = vld [vmem:[%s11775_s1 + $0xecc] ss:$40 sps:$4 sm:$0xff]   ;;  %v8573_v56 = vld [vmem:[%s11775_s1 + $0xec0] ss:$40 sps:$4 sm:$0xff]  }
 0x1ab   :  { %4986 = vmatpush1.bf16.msra.mxu0 %v8495_v57  ;;  %v8576_v57 = vld [vmem:[%s11775_s1 + $0xec8] ss:$40 sps:$4 sm:$0xff]  }
 0x1ac   :  { %5191 = vmatpush1.bf16.msra.mxu1 %v8498_v58  ;;  %4987 = vmatprep.subr.bf16.mxu0 %v8503_v59  ;;  %v8581_v58 = vld [vmem:[%s11775_s1 + $0xf14] ss:$40 sps:$4 sm:$0xff]  }
 0x1ad   :  { %5192 = vmatprep.subr.bf16.mxu1 %v8506_v61  ;;  %v8584_v59 = vld [vmem:[%s11775_s1 + $0xf1c] ss:$40 sps:$4 sm:$0xff]   ;;  %v8579_v61 = vld [vmem:[%s11775_s1 + $0xf10] ss:$40 sps:$4 sm:$0xff]  }
 0x1af   :  { %4988 = vmatpush1.bf16.msra.mxu0 %v8501_v62  ;;  %v8582_v62 = vld [vmem:[%s11775_s1 + $0xf18] ss:$40 sps:$4 sm:$0xff]  }
 0x1b0   :  { %5193 = vmatpush1.bf16.msra.mxu1 %v8504_v63  ;;  %4989 = vmatprep.subr.bf16.mxu0 %v8509_v0  ;;  %v8587_v63 = vld [vmem:[%s11775_s1 + $0xf64] ss:$40 sps:$4 sm:$0xff]  }
 0x1b1   :  { %5194 = vmatprep.subr.bf16.mxu1 %v8512_v1  ;;  %v8590_v0 = vld [vmem:[%s11775_s1 + $0xf6c] ss:$40 sps:$4 sm:$0xff]   ;;  %v8585_v1 = vld [vmem:[%s11775_s1 + $0xf60] ss:$40 sps:$4 sm:$0xff]  }
 0x1b3   :  { %4990 = vmatpush1.bf16.msra.mxu0 %v8507_v2  ;;  %v8588_v2 = vld [vmem:[%s11775_s1 + $0xf68] ss:$40 sps:$4 sm:$0xff]  }
 0x1b4   :  { %5195 = vmatpush1.bf16.msra.mxu1 %v8510_v3  ;;  %4991 = vmatprep.subr.bf16.mxu0 %v8515_v4  ;;  %v8593_v3 = vld [vmem:[%s11775_s1 + $0xfb4] ss:$40 sps:$4 sm:$0xff]  }
 0x1b5   :  { %5196 = vmatprep.subr.bf16.mxu1 %v8518_v5  ;;  %v8596_v4 = vld [vmem:[%s11775_s1 + $0xfbc] ss:$40 sps:$4 sm:$0xff]   ;;  %v8591_v5 = vld [vmem:[%s11775_s1 + $0xfb0] ss:$40 sps:$4 sm:$0xff]  }
 0x1b7   :  { %4992 = vmatpush1.bf16.msra.mxu0 %v8513_v6  ;;  %v8594_v6 = vld [vmem:[%s11775_s1 + $0xfb8] ss:$40 sps:$4 sm:$0xff]  }
 0x1b8   :  { %5197 = vmatpush1.bf16.msra.mxu1 %v8516_v7  ;;  %4993 = vmatprep.subr.bf16.mxu0 %v8521_v8  ;;  %v8599_v7 = vld [vmem:[%s11775_s1 + $0x1004] ss:$40 sps:$4 sm:$0xff]  }
 0x1b9   :  { %5198 = vmatprep.subr.bf16.mxu1 %v8524_v9  ;;  %v8602_v8 = vld [vmem:[%s11775_s1 + $0x100c] ss:$40 sps:$4 sm:$0xff]   ;;  %v8597_v9 = vld [vmem:[%s11775_s1 + $0x1000] ss:$40 sps:$4 sm:$0xff]  }
 0x1bb   :  { %4994 = vmatpush1.bf16.msra.mxu0 %v8519_v10  ;;  %v8600_v10 = vld [vmem:[%s11775_s1 + $0x1008] ss:$40 sps:$4 sm:$0xff]  }
 0x1bc   :  { %5199 = vmatpush1.bf16.msra.mxu1 %v8522_v11  ;;  %4995 = vmatprep.subr.bf16.mxu0 %v8527_v12  ;;  %v8605_v11 = vld [vmem:[%s11775_s1 + $0x1054] ss:$40 sps:$4 sm:$0xff]  }
 0x1bd   :  { %5200 = vmatprep.subr.bf16.mxu1 %v8530_v14  ;;  %v8608_v12 = vld [vmem:[%s11775_s1 + $0x105c] ss:$40 sps:$4 sm:$0xff]   ;;  %v8603_v14 = vld [vmem:[%s11775_s1 + $0x1050] ss:$40 sps:$4 sm:$0xff]  }
 0x1bf   :  { %4996 = vmatpush1.bf16.msra.mxu0 %v8525_v52  ;;  %v8606_v52 = vld [vmem:[%s11775_s1 + $0x1058] ss:$40 sps:$4 sm:$0xff]  }
 0x1c0   :  { %5201 = vmatpush1.bf16.msra.mxu1 %v8528_v16  ;;  %4997 = vmatprep.subr.bf16.mxu0 %v8533_v18  ;;  %v8611_v16 = vld [vmem:[%s11775_s1 + $0x10a4] ss:$40 sps:$4 sm:$0xff]  }
 0x1c1   :  { %5202 = vmatprep.subr.bf16.mxu1 %v8536_v20  ;;  %v8614_v18 = vld [vmem:[%s11775_s1 + $0x10ac] ss:$40 sps:$4 sm:$0xff]   ;;  %v8609_v20 = vld [vmem:[%s11775_s1 + $0x10a0] ss:$40 sps:$4 sm:$0xff]  }
 0x1c3   :  { %4998 = vmatpush1.bf16.msra.mxu0 %v8531_v21  ;;  %v8612_v21 = vld [vmem:[%s11775_s1 + $0x10a8] ss:$40 sps:$4 sm:$0xff]  }
 0x1c4   :  { %5203 = vmatpush1.bf16.msra.mxu1 %v8534_v22  ;;  %4999 = vmatprep.subr.bf16.mxu0 %v8539_v49  ;;  %v8617_v22 = vld [vmem:[%s11775_s1 + $0x10f4] ss:$40 sps:$4 sm:$0xff]  }
 0x1c5   :  { %5204 = vmatprep.subr.bf16.mxu1 %v8542_v24  ;;  %v8620_v49 = vld [vmem:[%s11775_s1 + $0x10fc] ss:$40 sps:$4 sm:$0xff]  }
 0x1c7   :  { %5000 = vmatpush1.bf16.msra.mxu0 %v8537_v25 }
 0x1c8   :  { %5205 = vmatpush1.bf16.msra.mxu1 %v8540_v26  ;;  %5001 = vmatprep.subr.bf16.mxu0 %v8545_v28 }
 0x1c9   :  { %5206 = vmatprep.subr.bf16.mxu1 %v8548_v29 }
 0x1cb   :  { %5002 = vmatpush1.bf16.msra.mxu0 %v8543_v30  ;;  %v8615_v30 = vld [vmem:[%s11775_s1 + $0x10f0] ss:$40 sps:$4 sm:$0xff]  }
 0x1cc   :  { %5207 = vmatpush1.bf16.msra.mxu1 %v8546_v31  ;;  %5003 = vmatprep.subr.bf16.mxu0 %v8551_v33  ;;  %v8618_v31 = vld [vmem:[%s11775_s1 + $0x10f8] ss:$40 sps:$4 sm:$0xff]  }
 0x1cd   :  { %5208 = vmatprep.subr.bf16.mxu1 %v8554_v34 }
 0x1cf   :  { %5004 = vmatpush1.bf16.msra.mxu0 %v8549_v35  ;;  %v8623_v35 = vld [vmem:[%s11775_s1 + $0x1144] ss:$40 sps:$4 sm:$0xff]  }
 0x1d0   :  { %5209 = vmatpush1.bf16.msra.mxu1 %v8552_v15  ;;  %5005 = vmatprep.subr.bf16.mxu0 %v8557_v37  ;;  %v8626_v15 = vld [vmem:[%s11775_s1 + $0x114c] ss:$40 sps:$4 sm:$0xff]  }
 0x1d1   :  { %5210 = vmatprep.subr.bf16.mxu1 %v8560_v38  ;;  %v8621_v38 = vld [vmem:[%s11775_s1 + $0x1140] ss:$40 sps:$4 sm:$0xff]  }
 0x1d3   :  { %5006 = vmatpush1.bf16.msra.mxu0 %v8555_v39  ;;  %v8624_v39 = vld [vmem:[%s11775_s1 + $0x1148] ss:$40 sps:$4 sm:$0xff]  }
 0x1d4   :  { %5211 = vmatpush1.bf16.msra.mxu1 %v8558_v40  ;;  %5007 = vmatprep.subr.bf16.mxu0 %v8563_v41  ;;  %v8629_v40 = vld [vmem:[%s11775_s1 + $0x1194] ss:$40 sps:$4 sm:$0xff]  }
 0x1d5   :  { %5212 = vmatprep.subr.bf16.mxu1 %v8566_v43  ;;  %v8632_v41 = vld [vmem:[%s11775_s1 + $0x119c] ss:$40 sps:$4 sm:$0xff]   ;;  %v8627_v43 = vld [vmem:[%s11775_s1 + $0x1190] ss:$40 sps:$4 sm:$0xff]  }
 0x1d7   :  { %5008 = vmatpush1.bf16.msra.mxu0 %v8561_v45  ;;  %v8630_v45 = vld [vmem:[%s11775_s1 + $0x1198] ss:$40 sps:$4 sm:$0xff]  }
 0x1d8   :  { %5213 = vmatpush1.bf16.msra.mxu1 %v8564_v46  ;;  %5009 = vmatprep.subr.bf16.mxu0 %v8569_v47  ;;  %v8635_v46 = vld [vmem:[%s11775_s1 + $0x11e4] ss:$40 sps:$4 sm:$0xff]  }
 0x1d9   :  { %5214 = vmatprep.subr.bf16.mxu1 %v8572_v48  ;;  %v8638_v47 = vld [vmem:[%s11775_s1 + $0x11ec] ss:$40 sps:$4 sm:$0xff]   ;;  %v8633_v48 = vld [vmem:[%s11775_s1 + $0x11e0] ss:$40 sps:$4 sm:$0xff]  }
 0x1db   :  { %5010 = vmatpush1.bf16.msra.mxu0 %v8567_v50  ;;  %v8636_v50 = vld [vmem:[%s11775_s1 + $0x11e8] ss:$40 sps:$4 sm:$0xff]  }
 0x1dc   :  { %5215 = vmatpush1.bf16.msra.mxu1 %v8570_v51  ;;  %5011 = vmatprep.subr.bf16.mxu0 %v8575_v53  ;;  %v8641_v51 = vld [vmem:[%s11775_s1 + $0x1234] ss:$40 sps:$4 sm:$0xff]  }
 0x1dd   :  { %5216 = vmatprep.subr.bf16.mxu1 %v8578_v55  ;;  %v8644_v53 = vld [vmem:[%s11775_s1 + $0x123c] ss:$40 sps:$4 sm:$0xff]   ;;  %v8639_v55 = vld [vmem:[%s11775_s1 + $0x1230] ss:$40 sps:$4 sm:$0xff]  }
 0x1df   :  { %5012 = vmatpush1.bf16.msra.mxu0 %v8573_v56  ;;  %v8642_v56 = vld [vmem:[%s11775_s1 + $0x1238] ss:$40 sps:$4 sm:$0xff]  }
 0x1e0   :  { %5217 = vmatpush1.bf16.msra.mxu1 %v8576_v57  ;;  %5022 = vmatprep.subr.bf16.mxu0 %v8581_v58  ;;  %v8647_v57 = vld [vmem:[%s11775_s1 + $0x1284] ss:$40 sps:$4 sm:$0xff]  }
 0x1e1   :  { %5227 = vmatprep.subr.bf16.mxu1 %v8584_v59  ;;  %v8650_v58 = vld [vmem:[%s11775_s1 + $0x128c] ss:$40 sps:$4 sm:$0xff]   ;;  %v8645_v59 = vld [vmem:[%s11775_s1 + $0x1280] ss:$40 sps:$4 sm:$0xff]  }
 0x1e2   :  { %5014 = vmatmul.mubr.bf16.vlgmr.msra.gmra.mrb[4].mxu0 %v9737_v32 }
 0x1e3   :  { %5219 = vmatmul.mubr.bf16.vlgmr.msra.gmra.mrb[4].mxu1 %v9737_v32  ;;  %5023 = vmatpush1.bf16.msra.mxu0 %v8579_v61  ;;  %v8648_v61 = vld [vmem:[%s11775_s1 + $0x1288] ss:$40 sps:$4 sm:$0xff]  }
 0x1e4   :  { %5228 = vmatpush1.bf16.msra.mxu1 %v8582_v62  ;;  %5024 = vmatprep.subr.bf16.mxu0 %v8587_v63  ;;  %v8653_v62 = vld [vmem:[%s11775_s1 + $0x12d4] ss:$40 sps:$4 sm:$0xff]  }
 0x1e5   :  { %5229 = vmatprep.subr.bf16.mxu1 %v8590_v0  ;;  %5054 = vmatprep.mubr.bf16.mxu0 %v9753_v36  ;;  %v8656_v63 = vld [vmem:[%s11775_s1 + $0x12dc] ss:$40 sps:$4 sm:$0xff]   ;;  %v8651_v0 = vld [vmem:[%s11775_s1 + $0x12d0] ss:$40 sps:$4 sm:$0xff]  }
 0x1e6   :  { %5259 = vmatprep.mubr.bf16.mxu1 %v9753_v36 }
 0x1e7   :  { %5025 = vmatpush1.bf16.msra.mxu0 %v8585_v1  ;;  %v8654_v1 = vld [vmem:[%s11775_s1 + $0x12d8] ss:$40 sps:$4 sm:$0xff]  }
 0x1e8   :  { %5230 = vmatpush1.bf16.msra.mxu1 %v8588_v2  ;;  %5026 = vmatprep.subr.bf16.mxu0 %v8593_v3  ;;  %v8659_v2 = vld [vmem:[%s11775_s1 + $0x1324] ss:$40 sps:$4 sm:$0xff]  }
 0x1e9   :  { %5231 = vmatprep.subr.bf16.mxu1 %v8596_v4  ;;  %v8662_v3 = vld [vmem:[%s11775_s1 + $0x132c] ss:$40 sps:$4 sm:$0xff]   ;;  %v8657_v4 = vld [vmem:[%s11775_s1 + $0x1320] ss:$40 sps:$4 sm:$0xff]  }
 0x1eb   :  { %5027 = vmatpush1.bf16.msra.mxu0 %v8591_v5  ;;  %v8660_v5 = vld [vmem:[%s11775_s1 + $0x1328] ss:$40 sps:$4 sm:$0xff]  }
 0x1ec   :  { %5232 = vmatpush1.bf16.msra.mxu1 %v8594_v6  ;;  %5028 = vmatprep.subr.bf16.mxu0 %v8599_v7  ;;  %v8665_v6 = vld [vmem:[%s11775_s1 + $0x1374] ss:$40 sps:$4 sm:$0xff]  }
 0x1ed   :  { %5233 = vmatprep.subr.bf16.mxu1 %v8602_v8  ;;  %v8668_v7 = vld [vmem:[%s11775_s1 + $0x137c] ss:$40 sps:$4 sm:$0xff]   ;;  %v8663_v8 = vld [vmem:[%s11775_s1 + $0x1370] ss:$40 sps:$4 sm:$0xff]  }
 0x1ef   :  { %5029 = vmatpush1.bf16.msra.mxu0 %v8597_v9  ;;  %v8666_v9 = vld [vmem:[%s11775_s1 + $0x1378] ss:$40 sps:$4 sm:$0xff]  }
 0x1f0   :  { %5234 = vmatpush1.bf16.msra.mxu1 %v8600_v10  ;;  %5030 = vmatprep.subr.bf16.mxu0 %v8605_v11  ;;  %v8671_v10 = vld [vmem:[%s11775_s1 + $0x13c4] ss:$40 sps:$4 sm:$0xff]  }
 0x1f1   :  { %5235 = vmatprep.subr.bf16.mxu1 %v8608_v12  ;;  %v8674_v11 = vld [vmem:[%s11775_s1 + $0x13cc] ss:$40 sps:$4 sm:$0xff]   ;;  %v8669_v12 = vld [vmem:[%s11775_s1 + $0x13c0] ss:$40 sps:$4 sm:$0xff]  }
 0x1f3   :  { %5031 = vmatpush1.bf16.msra.mxu0 %v8603_v14  ;;  %v8672_v14 = vld [vmem:[%s11775_s1 + $0x13c8] ss:$40 sps:$4 sm:$0xff]  }
 0x1f4   :  { %5236 = vmatpush1.bf16.msra.mxu1 %v8606_v52  ;;  %5032 = vmatprep.subr.bf16.mxu0 %v8611_v16  ;;  %v8677_v52 = vld [vmem:[%s11775_s1 + $0x1414] ss:$40 sps:$4 sm:$0xff]  }
 0x1f5   :  { %5237 = vmatprep.subr.bf16.mxu1 %v8614_v18  ;;  %v10713_v24 = vpop.f32.mrb[0].mxu0  ;;  %v8680_v16 = vld [vmem:[%s11775_s1 + $0x141c] ss:$40 sps:$4 sm:$0xff]   ;;  %v8675_v18 = vld [vmem:[%s11775_s1 + $0x1410] ss:$40 sps:$4 sm:$0xff]  }
 0x1f6   :  { %v10715_v25 = vpop.f32.mrb[0].mxu1  ;;  %v10717_v26 = vpop.f32.mrb[1].mxu0 }
 0x1f7   :  { %v10719_v28 = vpop.f32.mrb[1].mxu1  ;;  %v4691_v29 = vpop.f32.mrb[2].mxu0  ;;  %5033 = vmatpush1.bf16.msra.mxu0 %v8609_v20  ;;  %v8678_v20 = vld [vmem:[%s11775_s1 + $0x1418] ss:$40 sps:$4 sm:$0xff]  }
 0x1f8   :  { %5238 = vmatpush1.bf16.msra.mxu1 %v8612_v21  ;;  %v4896_v33 = vpop.f32.mrb[2].mxu1  ;;  %v4692_v34 = vpop.f32.mrb[3].mxu0  ;;  %5034 = vmatprep.subr.bf16.mxu0 %v8617_v22  ;;  %v8683_v21 = vld [vmem:[%s11775_s1 + $0x1464] ss:$40 sps:$4 sm:$0xff]   ;;  %v8684_v29 = vld [vmem:[%s11775_s1 + $0x1468] ss:$40 sps:$4 sm:$0xff]  }
 0x1f9   :  { %5239 = vmatprep.subr.bf16.mxu1 %v8620_v49  ;;  %v4897_v37 = vpop.f32.mrb[3].mxu1  ;;  %v8686_v22 = vld [vmem:[%s11775_s1 + $0x146c] ss:$40 sps:$4 sm:$0xff]   ;;  %v8681_v49 = vld [vmem:[%s11775_s1 + $0x1460] ss:$40 sps:$4 sm:$0xff]  }
 0x1fa   :  { %v8687_v33 = vld [vmem:[%s11775_s1 + $0x14b0] ss:$40 sps:$4 sm:$0xff]   ;;  %v8693_v37 = vld [vmem:[%s11775_s1 + $0x1500] ss:$40 sps:$4 sm:$0xff]  }
 0x1fb   :  { %5035 = vmatpush1.bf16.msra.mxu0 %v8615_v30  ;;  %v8689_v30 = vld [vmem:[%s11775_s1 + $0x14b4] ss:$40 sps:$4 sm:$0xff]   ;;  %v8690_v34 = vld [vmem:[%s11775_s1 + $0x14b8] ss:$40 sps:$4 sm:$0xff]  }
 0x1fc   :  { %5240 = vmatpush1.bf16.msra.mxu1 %v8618_v31  ;;  %5036 = vmatprep.subr.bf16.mxu0 %v8623_v35  ;;  %v8692_v31 = vld [vmem:[%s11775_s1 + $0x14bc] ss:$40 sps:$4 sm:$0xff]  }
 0x1fd   :  { %5241 = vmatprep.subr.bf16.mxu1 %v8626_v15  ;;  %v8695_v35 = vld [vmem:[%s11775_s1 + $0x1504] ss:$40 sps:$4 sm:$0xff]  }
 0x1fe   :  { %v8698_v15 = vld [vmem:[%s11775_s1 + $0x150c] ss:$40 sps:$4 sm:$0xff]  }
 0x1ff   :  { %5037 = vmatpush1.bf16.msra.mxu0 %v8621_v38  ;;  %v8696_v38 = vld [vmem:[%s11775_s1 + $0x1508] ss:$40 sps:$4 sm:$0xff]  }
 0x200   :  { %5242 = vmatpush1.bf16.msra.mxu1 %v8624_v39  ;;  %5038 = vmatprep.subr.bf16.mxu0 %v8629_v40  ;;  %v8701_v39 = vld [vmem:[%s11775_s1 + $0x1554] ss:$40 sps:$4 sm:$0xff]  }
 0x201   :  { %5243 = vmatprep.subr.bf16.mxu1 %v8632_v41  ;;  %v8704_v40 = vld [vmem:[%s11775_s1 + $0x155c] ss:$40 sps:$4 sm:$0xff]   ;;  %v771_v41 = vsub.s32 1, %v9224_v42 }
 0x203   :  { %5039 = vmatpush1.bf16.msra.mxu0 %v8627_v43  ;;  %v10897_v43 = vld [vmem:[%s11778_s2] sm:$0xff] }
 0x204   :  { %5244 = vmatpush1.bf16.msra.mxu1 %v8630_v45  ;;  %5040 = vmatprep.subr.bf16.mxu0 %v8635_v46  ;;  %v8699_v45 = vld [vmem:[%s11775_s1 + $0x1550] ss:$40 sps:$4 sm:$0xff]  }
 0x205   :  { %5245 = vmatprep.subr.bf16.mxu1 %v8638_v47  ;;  %v8702_v46 = vld [vmem:[%s11775_s1 + $0x1558] ss:$40 sps:$4 sm:$0xff]   ;;  %v8707_v47 = vld [vmem:[%s11775_s1 + $0x15a4] ss:$40 sps:$4 sm:$0xff]  }
 0x207   :  { %5041 = vmatpush1.bf16.msra.mxu0 %v8633_v48  ;;  %v8710_v48 = vld [vmem:[%s11775_s1 + $0x15ac] ss:$40 sps:$4 sm:$0xff]  }
 0x208   :  { %5246 = vmatpush1.bf16.msra.mxu1 %v8636_v50  ;;  %5042 = vmatprep.subr.bf16.mxu0 %v8641_v51  ;;  %v772_v50 = vrot.slane %v10897_v43, %v771_v41  ;;  %v8705_v51 = vld [vmem:[%s11775_s1 + $0x15a0] ss:$40 sps:$4 sm:$0xff]  }
 0x209   :  { %5247 = vmatprep.subr.bf16.mxu1 %v8644_v53  ;;  %v8708_v53 = vld [vmem:[%s11775_s1 + $0x15a8] ss:$40 sps:$4 sm:$0xff]  }
 0x20b   :  { %5043 = vmatpush1.bf16.msra.mxu0 %v8639_v55  ;;  %v8713_v55 = vld [vmem:[%s11775_s1 + $0x15f4] ss:$40 sps:$4 sm:$0xff]  }
 0x20c   :  { %5248 = vmatpush1.bf16.msra.mxu1 %v8642_v56  ;;  %5044 = vmatprep.subr.bf16.mxu0 %v8647_v57  ;;  %v8716_v56 = vld [vmem:[%s11775_s1 + $0x15fc] ss:$40 sps:$4 sm:$0xff]   ;;  %v7765_v57 = vadd.f32 %v10717_v26, %v772_v50  ;;  %v8722_v26 = vld [vmem:[%s11775_s1 + $0x164c] ss:$40 sps:$4 sm:$0xff]  }
 0x20d   :  { %5249 = vmatprep.subr.bf16.mxu1 %v8650_v58  ;;  %v8711_v58 = vld [vmem:[%s11775_s1 + $0x15f0] ss:$40 sps:$4 sm:$0xff]   ;;  %v8760_v50 = vld [vmem:[%s11775_s1 + $0x254] ss:$40 sps:$4 sm:$0xff]  }
 0x20f   :  { %5045 = vmatpush1.bf16.msra.mxu0 %v8645_v59  ;;  %v8714_v59 = vld [vmem:[%s11775_s1 + $0x15f8] ss:$40 sps:$4 sm:$0xff]  }
 0x210   :  { %5250 = vmatpush1.bf16.msra.mxu1 %v8648_v61  ;;  %5046 = vmatprep.subr.bf16.mxu0 %v8653_v62  ;;  %v8719_v61 = vld [vmem:[%s11775_s1 + $0x1644] ss:$40 sps:$4 sm:$0xff]   ;;  %v5515_v62 = vmul.f32 0.1, %v7765_v57 }
 0x211   :  { %5251 = vmatprep.subr.bf16.mxu1 %v8656_v63  ;;  %v8717_v63 = vld [vmem:[%s11775_s1 + $0x1640] ss:$40 sps:$4 sm:$0xff]  }
 0x213   :  { %5047 = vmatpush1.bf16.msra.mxu0 %v8651_v0  ;;  %v8720_v0 = vld [vmem:[%s11775_s1 + $0x1648] ss:$40 sps:$4 sm:$0xff]  }
 0x214   :  { %5252 = vmatpush1.bf16.msra.mxu1 %v8654_v1  ;;  %5048 = vmatprep.subr.bf16.mxu0 %v8659_v2  ;;  %v8725_v1 = vld [vmem:[%s11775_s1 + $0x24] ss:$40 sps:$4 sm:$0xff]  }
 0x215   :  { %5253 = vmatprep.subr.bf16.mxu1 %v8662_v3  ;;  %v8726_v2 = vld [vmem:[%s11777_s3 + $0x40] sm:$0xff]   ;;  %v5525_v3 = vmax.f32 %v7765_v57, %v5515_v62 }
 0x216   :  { %v8765_v57 = vld [vmem:[%s11775_s1 + $0x2a4] ss:$40 sps:$4 sm:$0xff]  }
 0x217   :  { %5049 = vmatpush1.bf16.msra.mxu0 %v8657_v4  ;;  %v8723_v4 = vld [vmem:[%s11775_s1 + $0x20] ss:$40 sps:$4 sm:$0xff]  }
 0x218   :  { %5254 = vmatpush1.bf16.msra.mxu1 %v8660_v5  ;;  %5050 = vmatprep.subr.bf16.mxu0 %v8665_v6  ;;  %v8727_v5 = vld [vmem:[%s11777_s3] sm:$0xff]   ;;  %v8730_v6 = vld [vmem:[%s11775_s1 + $0x74] ss:$40 sps:$4 sm:$0xff]  }
 0x219   :  { %5255 = vmatprep.subr.bf16.mxu1 %v8668_v7  ;;  %v8731_v7 = vld [vmem:[%s11777_s3 + $0x48] sm:$0xff]  }
 0x21b   :  { %5051 = vmatpush1.bf16.msra.mxu0 %v8663_v8  ;;  %v5535_v8 = vpack.c.bf16 %v5525_v3, %v5525_v3  ;;  %v8772_v3 = vld [vmem:[%s11777_s3 + $0x88] sm:$0xff]  }
 0x21c   :  { %5256 = vmatpush1.bf16.msra.mxu1 %v8666_v9  ;;  %5052 = vmatprep.subr.bf16.mxu0 %v8671_v10  ;;  %v8728_v9 = vld [vmem:[%s11775_s1 + $0x70] ss:$40 sps:$4 sm:$0xff]   ;;  %v8732_v10 = vld [vmem:[%s11777_s3 + $0x8] sm:$0xff]  }
 0x21d   :  { %5257 = vmatprep.subr.bf16.mxu1 %v8674_v11  ;;  %v8735_v11 = vld [vmem:[%s11775_s1 + $0xc4] ss:$40 sps:$4 sm:$0xff]  }
 0x21f   :  { %5053 = vmatpush1.bf16.msra.mxu0 %v8669_v12  ;;  %v8736_v12 = vld [vmem:[%s11777_s3 + $0x50] sm:$0xff]  }
 0x220   :  { %5258 = vmatpush1.bf16.msra.mxu1 %v8672_v14  ;;  %5063 = vmatprep.subr.bf16.mxu0 %v8677_v52  ;;  %v8733_v14 = vld [vmem:[%s11775_s1 + $0xc0] ss:$40 sps:$4 sm:$0xff]   ;;  %v8737_v52 = vld [vmem:[%s11777_s3 + $0x10] sm:$0xff]  }
 0x221   :  { %5268 = vmatprep.subr.bf16.mxu1 %v8680_v16  ;;  %v8740_v16 = vld [vmem:[%s11775_s1 + $0x114] ss:$40 sps:$4 sm:$0xff]  }
 0x222   :  { %5055 = vmatmul.mubr.bf16.vlgmr.msra.gmra.mrb[4].mxu0 %v9944_v44 }
 0x223   :  { %5260 = vmatmul.mubr.bf16.vlgmr.msra.gmra.mrb[4].mxu1 %v9944_v44  ;;  %5064 = vmatpush1.bf16.msra.mxu0 %v8675_v18  ;;  %v8738_v18 = vld [vmem:[%s11775_s1 + $0x110] ss:$40 sps:$4 sm:$0xff]  }
 0x224   :  { %5269 = vmatpush1.bf16.msra.mxu1 %v8678_v20  ;;  %5065 = vmatprep.subr.bf16.mxu0 %v8683_v21  ;;  %v8742_v20 = vld [vmem:[%s11777_s3 + $0x18] sm:$0xff]   ;;  %v767_v21 = vsub.s32 0, %v9224_v42 }
 0x225   :  { %5270 = vmatprep.subr.bf16.mxu1 %v8686_v22  ;;  %5095 = vmatprep.mubr.bf16.mxu0 %v9044_v54  ;;  %v8745_v22 = vld [vmem:[%s11775_s1 + $0x164] ss:$40 sps:$4 sm:$0xff]  }
 0x226   :  { %5300 = vmatprep.mubr.bf16.mxu1 %v9044_v54 }
 0x227   :  { %5066 = vmatpush1.bf16.msra.mxu0 %v8681_v49  ;;  %v8746_v49 = vld [vmem:[%s11777_s3 + $0x60] sm:$0xff]  }
 0x228   :  { %5271 = vmatpush1.bf16.msra.mxu1 %v8684_v29  ;;  %5067 = vmatprep.subr.bf16.mxu0 %v8689_v30  ;;  %v779_v29 = vsub.s32 3, %v9224_v42  ;;  %v8743_v30 = vld [vmem:[%s11775_s1 + $0x160] ss:$40 sps:$4 sm:$0xff]  }
 0x229   :  { %5272 = vmatprep.subr.bf16.mxu1 %v8692_v31  ;;  %v8747_v31 = vld [vmem:[%s11777_s3 + $0x20] sm:$0xff]  }
 0x22b   :  { %5068 = vmatpush1.bf16.msra.mxu0 %v8687_v33  ;;  %v768_v33 = vrot.slane %v10897_v43, %v767_v21 }
 0x22c   :  { %5273 = vmatpush1.bf16.msra.mxu1 %v8690_v34  ;;  %5069 = vmatprep.subr.bf16.mxu0 %v8695_v35  ;;  %v8750_v34 = vld [vmem:[%s11775_s1 + $0x1b4] ss:$40 sps:$4 sm:$0xff]   ;;  %v8751_v35 = vld [vmem:[%s11777_s3 + $0x68] sm:$0xff]  }
 0x22d   :  { %5274 = vmatprep.subr.bf16.mxu1 %v8698_v15  ;;  %v780_v15 = vrot.slane %v10897_v43, %v779_v29  ;;  %v8792_v29 = vld [vmem:[%s11777_s3 + $0xa8] sm:$0xff]  }
 0x22f   :  { %5070 = vmatpush1.bf16.msra.mxu0 %v8693_v37  ;;  %v8748_v37 = vld [vmem:[%s11775_s1 + $0x1b0] ss:$40 sps:$4 sm:$0xff]  }
 0x230   :  { %5275 = vmatpush1.bf16.msra.mxu1 %v8696_v38  ;;  %5071 = vmatprep.subr.bf16.mxu0 %v8701_v39  ;;  %v8752_v38 = vld [vmem:[%s11777_s3 + $0x28] sm:$0xff]   ;;  %v7764_v39 = vadd.f32 %v10713_v24, %v768_v33  ;;  %v8757_v24 = vld [vmem:[%s11777_s3 + $0x30] sm:$0xff]  }
 0x231   :  { %5276 = vmatprep.subr.bf16.mxu1 %v8704_v40  ;;  %v8755_v40 = vld [vmem:[%s11775_s1 + $0x204] ss:$40 sps:$4 sm:$0xff]   ;;  %v8796_v33 = vld [vmem:[%s11777_s3 + $0xf0] sm:$0xff]  }
 0x233   :  { %5072 = vmatpush1.bf16.msra.mxu0 %v8699_v45  ;;  %v8756_v45 = vld [vmem:[%s11777_s3 + $0x70] sm:$0xff]  }
 0x234   :  { %5277 = vmatpush1.bf16.msra.mxu1 %v8702_v46  ;;  %5073 = vmatprep.subr.bf16.mxu0 %v8707_v47  ;;  %v7767_v46 = vadd.f32 %v10719_v28, %v780_v15  ;;  %v8753_v47 = vld [vmem:[%s11775_s1 + $0x200] ss:$40 sps:$4 sm:$0xff]   ;;  %v8761_v28 = vld [vmem:[%s11777_s3 + $0x78] sm:$0xff]  }
 0x235   :  { %5278 = vmatprep.subr.bf16.mxu1 %v8710_v48  ;;  %v5514_v48 = vmul.f32 0.1, %v7764_v39  ;;  %v8800_v15 = vld [vmem:[%s11775_s1 + $0x4d4] ss:$40 sps:$4 sm:$0xff]  }
 0x237   :  { %5074 = vmatpush1.bf16.msra.mxu0 %v8705_v51  ;;  %v5517_v51 = vmul.f32 0.1, %v7767_v46 }
 0x238   :  { %5279 = vmatpush1.bf16.msra.mxu1 %v8708_v53  ;;  %5075 = vmatprep.subr.bf16.mxu0 %v8713_v55  ;;  %v8758_v53 = vld [vmem:[%s11775_s1 + $0x250] ss:$40 sps:$4 sm:$0xff]  }
 0x239   :  { %5280 = vmatprep.subr.bf16.mxu1 %v8716_v56  ;;  %v8762_v55 = vld [vmem:[%s11777_s3 + $0x38] sm:$0xff]   ;;  %v5524_v56 = vmax.f32 %v7764_v39, %v5514_v48 }
 0x23a   :  { %v8802_v39 = vld [vmem:[%s11777_s3 + $0xb8] sm:$0xff]  }
 0x23b   :  { %5076 = vmatpush1.bf16.msra.mxu0 %v8711_v58  ;;  %v8766_v58 = vld [vmem:[%s11777_s3 + $0xc0] sm:$0xff]   ;;  %v5534_v62 = vpack.c.bf16 %v5524_v56, %v5524_v56  ;;  %v8808_v48 = vld [vmem:[%s11775_s1 + $0x574] ss:$40 sps:$4 sm:$0xff]  }
 0x23c   :  { %5281 = vmatpush1.bf16.msra.mxu1 %v8714_v59  ;;  %5077 = vmatprep.subr.bf16.mxu0 %v8719_v61  ;;  %v5527_v59 = vmax.f32 %v7767_v46, %v5517_v51  ;;  %v8763_v61 = vld [vmem:[%s11775_s1 + $0x2a0] ss:$40 sps:$4 sm:$0xff]   ;;  %v8806_v51 = vld [vmem:[%s11775_s1 + $0x570] ss:$40 sps:$4 sm:$0xff]   ;;  %v8814_v56 = vld [vmem:[%s11775_s1 + $0x614] ss:$40 sps:$4 sm:$0xff]  }
 0x23d   :  { %5282 = vmatprep.subr.bf16.mxu1 %v8722_v26  ;;  %v8767_v26 = vld [vmem:[%s11777_s3 + $0x80] sm:$0xff]  }
 0x23e   :  { %v8899_v46 = vld [vmem:[%s11777_s3 + $0x140] sm:$0xff]  }
 0x23f   :  { %5078 = vmatpush1.bf16.msra.mxu0 %v8717_v63  ;;  %v8770_v63 = vld [vmem:[%s11775_s1 + $0x2f4] ss:$40 sps:$4 sm:$0xff]  }
 0x240   :  { %5283 = vmatpush1.bf16.msra.mxu1 %v8720_v0  ;;  %5309 = vmatprep.subr.bf16.mxu0 %v8725_v1  ;;  %v8771_v0 = vld [vmem:[%s11777_s3 + $0xc8] sm:$0xff]   ;;  %v5537_v1 = vpack.c.bf16 %v5527_v59, %v5527_v59  ;;  %v8812_v59 = vld [vmem:[%s11775_s1 + $0x610] ss:$40 sps:$4 sm:$0xff]  }
 0x241   :  { %7567 = vmatprep.subr.bf16.mxu1 %v8726_v2  ;;  %v8768_v2 = vld [vmem:[%s11775_s1 + $0x2f0] ss:$40 sps:$4 sm:$0xff]  }
 0x242   :  { %5096 = vmatmul.mubr.bf16.vlgmr.msra.gmra.mrb[4].mxu0 %v10047_v19 }
 0x243   :  { %5301 = vmatmul.mubr.bf16.vlgmr.msra.gmra.mrb[4].mxu1 %v10047_v19  ;;  %5310 = vmatpush1.bf16.msra.mxu0 %v8723_v4  ;;  %v8775_v4 = vld [vmem:[%s11775_s1 + $0x344] ss:$40 sps:$4 sm:$0xff]  }
 0x244   :  { %7568 = vmatpush3.bf16.msra.mxu1 %v8727_v5  ;;  %6223 = vmatprep.mubr.bf16.mxu1 %v5535_v8  ;;  %v8776_v5 = vld [vmem:[%s11777_s3 + $0xd0] sm:$0xff]  }
 0x245   :  { %5311 = vmatprep.subr.bf16.mxu0 %v8730_v6  ;;  %7569 = vmatprep.subr.bf16.mxu1 %v8731_v7  ;;  %v8773_v6 = vld [vmem:[%s11775_s1 + $0x340] ss:$40 sps:$4 sm:$0xff]   ;;  %v8777_v7 = vld [vmem:[%s11777_s3 + $0x90] sm:$0xff]  }
 0x246   :  { %5341 = vmatprep.mubr.bf16.mxu0 %v9273_v60  ;;  %v8741_v60 = vld [vmem:[%s11777_s3 + $0x58] sm:$0xff]  }
 0x247   :  { %5312 = vmatpush1.bf16.msra.mxu0 %v8728_v9  ;;  %v8780_v8 = vld [vmem:[%s11775_s1 + $0x394] ss:$40 sps:$4 sm:$0xff]  }
 0x248   :  { %7570 = vmatpush3.bf16.msra.mxu1 %v8732_v10  ;;  %5313 = vmatprep.subr.bf16.mxu0 %v8735_v11  ;;  %v8781_v9 = vld [vmem:[%s11777_s3 + $0xd8] sm:$0xff]  }
 0x249   :  { %7571 = vmatprep.subr.bf16.mxu1 %v8736_v12  ;;  %v8778_v10 = vld [vmem:[%s11775_s1 + $0x390] ss:$40 sps:$4 sm:$0xff]   ;;  %v775_v12 = vsub.s32 2, %v9224_v42 }
 0x24a   :  { %v8782_v11 = vld [vmem:[%s11777_s3 + $0x98] sm:$0xff]  }
 0x24b   :  { %5314 = vmatpush1.bf16.msra.mxu0 %v8733_v14  ;;  %v8785_v14 = vld [vmem:[%s11775_s1 + $0x3e4] ss:$40 sps:$4 sm:$0xff]  }
 0x24c   :  { %7572 = vmatpush3.bf16.msra.mxu1 %v8737_v52  ;;  %5315 = vmatprep.subr.bf16.mxu0 %v8740_v16  ;;  %v8786_v52 = vld [vmem:[%s11777_s3 + $0xe0] sm:$0xff]  }
 0x24d   :  { %7573 = vmatprep.subr.bf16.mxu1 %v8741_v60  ;;  %v8783_v16 = vld [vmem:[%s11775_s1 + $0x3e0] ss:$40 sps:$4 sm:$0xff]  }
 0x24e   :  { %v8787_v60 = vld [vmem:[%s11777_s3 + $0xa0] sm:$0xff]  }
 0x24f   :  { %5316 = vmatpush1.bf16.msra.mxu0 %v8738_v18  ;;  %v776_v18 = vrot.slane %v10897_v43, %v775_v12  ;;  %v8829_v12 = vld [vmem:[%s11775_s1 + $0x7a4] ss:$40 sps:$4 sm:$0xff]  }
 0x250   :  { %7574 = vmatpush3.bf16.msra.mxu1 %v8742_v20  ;;  %5317 = vmatprep.subr.bf16.mxu0 %v8745_v22  ;;  %v8790_v20 = vld [vmem:[%s11775_s1 + $0x434] ss:$40 sps:$4 sm:$0xff]   ;;  %v8791_v22 = vld [vmem:[%s11777_s3 + $0xe8] sm:$0xff]  }
 0x251   :  { %7575 = vmatprep.subr.bf16.mxu1 %v8746_v49  ;;  %v8788_v49 = vld [vmem:[%s11775_s1 + $0x430] ss:$40 sps:$4 sm:$0xff]  }
 0x253   :  { %5318 = vmatpush1.bf16.msra.mxu0 %v8743_v30  ;;  %v7766_v30 = vadd.f32 %v10715_v25, %v776_v18  ;;  %v8797_v25 = vld [vmem:[%s11777_s3 + $0xb0] sm:$0xff]  }
 0x254   :  { %7576 = vmatpush3.bf16.msra.mxu1 %v8747_v31  ;;  %5319 = vmatprep.subr.bf16.mxu0 %v8750_v34  ;;  %v8795_v31 = vld [vmem:[%s11775_s1 + $0x484] ss:$40 sps:$4 sm:$0xff]   ;;  %v8793_v34 = vld [vmem:[%s11775_s1 + $0x480] ss:$40 sps:$4 sm:$0xff]   ;;  %v8830_v18 = vld [vmem:[%s11775_s1 + $0x7f0] ss:$40 sps:$4 sm:$0xff]  }
 0x255   :  { %7577 = vmatprep.subr.bf16.mxu1 %v8751_v35  ;;  %v5516_v35 = vmul.f32 0.1, %v7766_v30 }
 0x257   :  { %5320 = vmatpush1.bf16.msra.mxu0 %v8748_v37  ;;  %v8801_v37 = vld [vmem:[%s11777_s3 + $0xf8] sm:$0xff]  }
 0x258   :  { %7578 = vmatpush3.bf16.msra.mxu1 %v8752_v38  ;;  %5321 = vmatprep.subr.bf16.mxu0 %v8755_v40  ;;  %v8798_v38 = vld [vmem:[%s11775_s1 + $0x4d0] ss:$40 sps:$4 sm:$0xff]   ;;  %v5526_v40 = vmax.f32 %v7766_v30, %v5516_v35  ;;  %v8841_v30 = vld [vmem:[%s11775_s1 + $0x8e4] ss:$40 sps:$4 sm:$0xff]   ;;  %v8845_v35 = vld [vmem:[%s11775_s1 + $0x980] ss:$40 sps:$4 sm:$0xff]  }
 0x259   :  { %7579 = vmatprep.subr.bf16.mxu1 %v8756_v45  ;;  %v8805_v45 = vld [vmem:[%s11775_s1 + $0x524] ss:$40 sps:$4 sm:$0xff]  }
 0x25b   :  { %5322 = vmatpush1.bf16.msra.mxu0 %v8753_v47  ;;  %v8803_v47 = vld [vmem:[%s11775_s1 + $0x520] ss:$40 sps:$4 sm:$0xff]  }
 0x25c   :  { %7580 = vmatpush3.bf16.msra.mxu1 %v8757_v24  ;;  %5323 = vmatprep.subr.bf16.mxu0 %v8760_v50  ;;  %v5536_v24 = vpack.c.bf16 %v5526_v40, %v5526_v40  ;;  %v8900_v50 = vld [vmem:[%s11777_s3 + $0x100] sm:$0xff]   ;;  %v8856_v40 = vld [vmem:[%s11775_s1 + $0xa74] ss:$40 sps:$4 sm:$0xff]  }
 0x25d   :  { %7581 = vmatprep.subr.bf16.mxu1 %v8761_v28  ;;  %v8904_v28 = vld [vmem:[%s11777_s3 + $0x148] sm:$0xff]  }
 0x25f   :  { %5324 = vmatpush1.bf16.msra.mxu0 %v8758_v53  ;;  %v8811_v53 = vld [vmem:[%s11775_s1 + $0x5c4] ss:$40 sps:$4 sm:$0xff]  }
 0x260   :  { %7582 = vmatpush3.bf16.msra.mxu1 %v8762_v55  ;;  %5325 = vmatprep.subr.bf16.mxu0 %v8765_v57  ;;  %v8909_v55 = vld [vmem:[%s11777_s3 + $0x150] sm:$0xff]  }
 0x261   :  { %7589 = vmatprep.subr.bf16.mxu1 %v8766_v58  ;;  %v8910_v57 = vld [vmem:[%s11777_s3 + $0x110] sm:$0xff]   ;;  %v8914_v58 = vld [vmem:[%s11777_s3 + $0x158] sm:$0xff]  }
 0x263   :  { %6224 = vmatmul.mubr.bf16.vlgmr.msra.gmra.mrb[8].mxu1 %v5534_v62  ;;  %5326 = vmatpush1.bf16.msra.mxu0 %v8763_v61  ;;  %v8817_v61 = vld [vmem:[%s11775_s1 + $0x664] ss:$40 sps:$4 sm:$0xff]  }
 0x264   :  { %7590 = vmatpush3.bf16.msra.mxu1 %v8767_v26  ;;  %6263 = vmatprep.mubr.bf16.mxu1 %v5537_v1  ;;  %v8915_v26 = vld [vmem:[%s11777_s3 + $0x118] sm:$0xff]   ;;  %v8919_v62 = vld [vmem:[%s11777_s3 + $0x160] sm:$0xff]  }
 0x265   :  { %5327 = vmatprep.subr.bf16.mxu0 %v8770_v63  ;;  %7591 = vmatprep.subr.bf16.mxu1 %v8771_v0  ;;  %v8815_v63 = vld [vmem:[%s11775_s1 + $0x660] ss:$40 sps:$4 sm:$0xff]   ;;  %v8820_v0 = vld [vmem:[%s11775_s1 + $0x6b4] ss:$40 sps:$4 sm:$0xff]  }
 0x266   :  { %v8920_v1 = vld [vmem:[%s11777_s3 + $0x120] sm:$0xff]  }
 0x267   :  { %5328 = vmatpush1.bf16.msra.mxu0 %v8768_v2  ;;  %v8924_v2 = vld [vmem:[%s11777_s3 + $0x168] sm:$0xff]  }
 0x268   :  { %7592 = vmatpush3.bf16.msra.mxu1 %v8772_v3  ;;  %5329 = vmatprep.subr.bf16.mxu0 %v8775_v4  ;;  %v8818_v3 = vld [vmem:[%s11775_s1 + $0x6b0] ss:$40 sps:$4 sm:$0xff]   ;;  %v8823_v4 = vld [vmem:[%s11775_s1 + $0x704] ss:$40 sps:$4 sm:$0xff]  }
 0x269   :  { %7593 = vmatprep.subr.bf16.mxu1 %v8776_v5  ;;  %v8925_v5 = vld [vmem:[%s11777_s3 + $0x128] sm:$0xff]  }
 0x26b   :  { %5330 = vmatpush1.bf16.msra.mxu0 %v8773_v6  ;;  %v8929_v6 = vld [vmem:[%s11777_s3 + $0x170] sm:$0xff]  }
 0x26c   :  { %7594 = vmatpush3.bf16.msra.mxu1 %v8777_v7  ;;  %5331 = vmatprep.subr.bf16.mxu0 %v8780_v8  ;;  %v8821_v7 = vld [vmem:[%s11775_s1 + $0x700] ss:$40 sps:$4 sm:$0xff]   ;;  %v8826_v8 = vld [vmem:[%s11775_s1 + $0x754] ss:$40 sps:$4 sm:$0xff]  }
 0x26d   :  { %7595 = vmatprep.subr.bf16.mxu1 %v8781_v9  ;;  %v8930_v9 = vld [vmem:[%s11777_s3 + $0x130] sm:$0xff]  }
 0x26f   :  { %5332 = vmatpush1.bf16.msra.mxu0 %v8778_v10  ;;  %v8934_v10 = vld [vmem:[%s11777_s3 + $0x178] sm:$0xff]  }
 0x270   :  { %7596 = vmatpush3.bf16.msra.mxu1 %v8782_v11  ;;  %5333 = vmatprep.subr.bf16.mxu0 %v8785_v14  ;;  %v8824_v11 = vld [vmem:[%s11775_s1 + $0x750] ss:$40 sps:$4 sm:$0xff]  }
 0x271   :  { %7597 = vmatprep.subr.bf16.mxu1 %v8786_v52  ;;  %v8935_v14 = vld [vmem:[%s11777_s3 + $0x138] sm:$0xff]   ;;  %v8939_v52 = vld [vmem:[%s11777_s3 + $0x1c0] sm:$0xff]  }
 0x273   :  { %5334 = vmatpush1.bf16.msra.mxu0 %v8783_v16  ;;  %v8827_v16 = vld [vmem:[%s11775_s1 + $0x7a0] ss:$40 sps:$4 sm:$0xff]  }
 0x274   :  { %7598 = vmatpush3.bf16.msra.mxu1 %v8787_v60  ;;  %5335 = vmatprep.subr.bf16.mxu0 %v8790_v20  ;;  %v8832_v60 = vld [vmem:[%s11775_s1 + $0x7f4] ss:$40 sps:$4 sm:$0xff]   ;;  %v8835_v20 = vld [vmem:[%s11775_s1 + $0x844] ss:$40 sps:$4 sm:$0xff]  }
 0x275   :  { %7599 = vmatprep.subr.bf16.mxu1 %v8791_v22  ;;  %v8833_v22 = vld [vmem:[%s11775_s1 + $0x840] ss:$40 sps:$4 sm:$0xff]  }
 0x277   :  { %5336 = vmatpush1.bf16.msra.mxu0 %v8788_v49  ;;  %v8838_v49 = vld [vmem:[%s11775_s1 + $0x894] ss:$40 sps:$4 sm:$0xff]  }
 0x278   :  { %7600 = vmatpush3.bf16.msra.mxu1 %v8792_v29  ;;  %5337 = vmatprep.subr.bf16.mxu0 %v8795_v31  ;;  %v8836_v29 = vld [vmem:[%s11775_s1 + $0x890] ss:$40 sps:$4 sm:$0xff]   ;;  %v8839_v31 = vld [vmem:[%s11775_s1 + $0x8e0] ss:$40 sps:$4 sm:$0xff]  }
 0x279   :  { %7601 = vmatprep.subr.bf16.mxu1 %v8796_v33  ;;  %v8844_v33 = vld [vmem:[%s11775_s1 + $0x934] ss:$40 sps:$4 sm:$0xff]  }
 0x27b   :  { %5338 = vmatpush1.bf16.msra.mxu0 %v8793_v34  ;;  %v8842_v34 = vld [vmem:[%s11775_s1 + $0x930] ss:$40 sps:$4 sm:$0xff]  }
 0x27c   :  { %7602 = vmatpush3.bf16.msra.mxu1 %v8797_v25  ;;  %5339 = vmatprep.subr.bf16.mxu0 %v8800_v15  ;;  %v8847_v25 = vld [vmem:[%s11775_s1 + $0x984] ss:$40 sps:$4 sm:$0xff]   ;;  %v8850_v15 = vld [vmem:[%s11775_s1 + $0x9d4] ss:$40 sps:$4 sm:$0xff]  }
 0x27d   :  { %7603 = vmatprep.subr.bf16.mxu1 %v8801_v37  ;;  %v8848_v37 = vld [vmem:[%s11775_s1 + $0x9d0] ss:$40 sps:$4 sm:$0xff]  }
 0x27f   :  { %5340 = vmatpush1.bf16.msra.mxu0 %v8798_v38  ;;  %v8853_v38 = vld [vmem:[%s11775_s1 + $0xa24] ss:$40 sps:$4 sm:$0xff]  }
 0x280   :  { %7604 = vmatpush3.bf16.msra.mxu1 %v8802_v39  ;;  %5350 = vmatprep.subr.bf16.mxu0 %v8805_v45  ;;  %v8851_v39 = vld [vmem:[%s11775_s1 + $0xa20] ss:$40 sps:$4 sm:$0xff]   ;;  %v8854_v45 = vld [vmem:[%s11775_s1 + $0xa70] ss:$40 sps:$4 sm:$0xff]  }
 0x281   :  { %7611 = vmatprep.subr.bf16.mxu1 %v8899_v46  ;;  %v8859_v46 = vld [vmem:[%s11775_s1 + $0xac4] ss:$40 sps:$4 sm:$0xff]  }
 0x282   :  { %5342 = vmatmul.mubr.bf16.vlgmr.msra.gmra.mrb[8].mxu0 %v9326_v13  ;;  %v8905_v13 = vld [vmem:[%s11777_s3 + $0x108] sm:$0xff]  }
 0x283   :  { %6264 = vmatmul.mubr.bf16.vlgmr.msra.gmra.mrb[12].mxu1 %v5536_v24  ;;  %5351 = vmatpush1.bf16.msra.mxu0 %v8803_v47  ;;  %v8857_v47 = vld [vmem:[%s11775_s1 + $0xac0] ss:$40 sps:$4 sm:$0xff]   ;;  %v8865_v24 = vld [vmem:[%s11775_s1 + $0xb64] ss:$40 sps:$4 sm:$0xff]  }
 0x284   :  { %5382 = vmatprep.mubr.bf16.mxu0 %v9339_v17  ;;  %5352 = vmatprep.subr.bf16.mxu0 %v8808_v48  ;;  %v8809_v17 = vld [vmem:[%s11775_s1 + $0x5c0] ss:$40 sps:$4 sm:$0xff]  }
 0x285   :  { %7612 = vmatpush3.bf16.msra.mxu1 %v8900_v50  ;;  %v8863_v48 = vld [vmem:[%s11775_s1 + $0xb60] ss:$40 sps:$4 sm:$0xff]   ;;  %v8868_v50 = vld [vmem:[%s11775_s1 + $0xbb4] ss:$40 sps:$4 sm:$0xff]  }
 0x286   :  { %7613 = vmatprep.subr.bf16.mxu1 %v8904_v28  ;;  %v8866_v28 = vld [vmem:[%s11775_s1 + $0xbb0] ss:$40 sps:$4 sm:$0xff]  }
 0x287   :  { %5353 = vmatpush1.bf16.msra.mxu0 %v8806_v51  ;;  %v8871_v51 = vld [vmem:[%s11775_s1 + $0xc04] ss:$40 sps:$4 sm:$0xff]  }
 0x288   :  { %5354 = vmatprep.subr.bf16.mxu0 %v8811_v53  ;;  %v8869_v53 = vld [vmem:[%s11775_s1 + $0xc00] ss:$40 sps:$4 sm:$0xff]  }
 0x289   :  { %7614 = vmatpush3.bf16.msra.mxu1 %v8905_v13  ;;  %v8874_v13 = vld [vmem:[%s11775_s1 + $0xc54] ss:$40 sps:$4 sm:$0xff]  }
 0x28a   :  { %7615 = vmatprep.subr.bf16.mxu1 %v8909_v55  ;;  %v8872_v55 = vld [vmem:[%s11775_s1 + $0xc50] ss:$40 sps:$4 sm:$0xff]  }
 0x28b   :  { %5355 = vmatpush1.bf16.msra.mxu0 %v8809_v17  ;;  %v8877_v17 = vld [vmem:[%s11775_s1 + $0xca4] ss:$40 sps:$4 sm:$0xff]  }
 0x28c   :  { %5356 = vmatprep.subr.bf16.mxu0 %v8814_v56  ;;  %v8875_v56 = vld [vmem:[%s11775_s1 + $0xca0] ss:$40 sps:$4 sm:$0xff]  }
 0x28d   :  { %7616 = vmatpush3.bf16.msra.mxu1 %v8910_v57  ;;  %v8880_v57 = vld [vmem:[%s11775_s1 + $0xcf4] ss:$40 sps:$4 sm:$0xff]  }
 0x28e   :  { %7617 = vmatprep.subr.bf16.mxu1 %v8914_v58  ;;  %v8878_v58 = vld [vmem:[%s11775_s1 + $0xcf0] ss:$40 sps:$4 sm:$0xff]  }
 0x28f   :  { %5357 = vmatpush1.bf16.msra.mxu0 %v8812_v59  ;;  %v8883_v59 = vld [vmem:[%s11775_s1 + $0xd44] ss:$40 sps:$4 sm:$0xff]  }
 0x290   :  { %5358 = vmatprep.subr.bf16.mxu0 %v8817_v61  ;;  %v8881_v61 = vld [vmem:[%s11775_s1 + $0xd40] ss:$40 sps:$4 sm:$0xff]  }
 0x291   :  { %7618 = vmatpush3.bf16.msra.mxu1 %v8915_v26  ;;  %v8886_v26 = vld [vmem:[%s11775_s1 + $0xd94] ss:$40 sps:$4 sm:$0xff]  }
 0x292   :  { %7619 = vmatprep.subr.bf16.mxu1 %v8919_v62  ;;  %v8884_v62 = vld [vmem:[%s11775_s1 + $0xd90] ss:$40 sps:$4 sm:$0xff]  }
 0x293   :  { %5359 = vmatpush1.bf16.msra.mxu0 %v8815_v63  ;;  %v8889_v63 = vld [vmem:[%s11775_s1 + $0xde4] ss:$40 sps:$4 sm:$0xff]  }
 0x294   :  { %5360 = vmatprep.subr.bf16.mxu0 %v8820_v0  ;;  %v8887_v0 = vld [vmem:[%s11775_s1 + $0xde0] ss:$40 sps:$4 sm:$0xff]  }
 0x295   :  { %7620 = vmatpush3.bf16.msra.mxu1 %v8920_v1  ;;  %v8892_v1 = vld [vmem:[%s11775_s1 + $0xe34] ss:$40 sps:$4 sm:$0xff]  }
 0x296   :  { %7621 = vmatprep.subr.bf16.mxu1 %v8924_v2  ;;  %v8890_v2 = vld [vmem:[%s11775_s1 + $0xe30] ss:$40 sps:$4 sm:$0xff]  }
 0x297   :  { %5361 = vmatpush1.bf16.msra.mxu0 %v8818_v3  ;;  %v8895_v3 = vld [vmem:[%s11775_s1 + $0xe84] ss:$40 sps:$4 sm:$0xff]  }
 0x298   :  { %5362 = vmatprep.subr.bf16.mxu0 %v8823_v4  ;;  %v8893_v4 = vld [vmem:[%s11775_s1 + $0xe80] ss:$40 sps:$4 sm:$0xff]  }
 0x299   :  { %7622 = vmatpush3.bf16.msra.mxu1 %v8925_v5  ;;  %v8898_v5 = vld [vmem:[%s11775_s1 + $0xed4] ss:$40 sps:$4 sm:$0xff]  }
 0x29a   :  { %7623 = vmatprep.subr.bf16.mxu1 %v8929_v6  ;;  %v8896_v6 = vld [vmem:[%s11775_s1 + $0xed0] ss:$40 sps:$4 sm:$0xff]  }
 0x29b   :  { %5363 = vmatpush1.bf16.msra.mxu0 %v8821_v7  ;;  %v8903_v7 = vld [vmem:[%s11775_s1 + $0xf24] ss:$40 sps:$4 sm:$0xff]  }
 0x29c   :  { %5364 = vmatprep.subr.bf16.mxu0 %v8826_v8  ;;  %v8901_v8 = vld [vmem:[%s11775_s1 + $0xf20] ss:$40 sps:$4 sm:$0xff]  }
 0x29d   :  { %7624 = vmatpush3.bf16.msra.mxu1 %v8930_v9  ;;  %v8908_v9 = vld [vmem:[%s11775_s1 + $0xf74] ss:$40 sps:$4 sm:$0xff]  }
 0x29e   :  { %7625 = vmatprep.subr.bf16.mxu1 %v8934_v10  ;;  %v8906_v10 = vld [vmem:[%s11775_s1 + $0xf70] ss:$40 sps:$4 sm:$0xff]  }
 0x29f   :  { %5365 = vmatpush1.bf16.msra.mxu0 %v8824_v11  ;;  %v8913_v11 = vld [vmem:[%s11775_s1 + $0xfc4] ss:$40 sps:$4 sm:$0xff]  }
 0x2a0   :  { %5366 = vmatprep.subr.bf16.mxu0 %v8829_v12  ;;  %v8911_v12 = vld [vmem:[%s11775_s1 + $0xfc0] ss:$40 sps:$4 sm:$0xff]  }
 0x2a1   :  { %7626 = vmatpush3.bf16.msra.mxu1 %v8935_v14  ;;  %v8923_v14 = vld [vmem:[%s11775_s1 + $0x1064] ss:$40 sps:$4 sm:$0xff]  }
 0x2a2   :  { %7633 = vmatprep.subr.bf16.mxu1 %v8939_v52  ;;  %v783_v52 = vsub.s32 4, %v9224_v42 }
 0x2a3   :  { %5367 = vmatpush1.bf16.msra.mxu0 %v8827_v16  ;;  %v8921_v16 = vld [vmem:[%s11775_s1 + $0x1060] ss:$40 sps:$4 sm:$0xff]  }
 0x2a4   :  { %5368 = vmatprep.subr.bf16.mxu0 %v8832_v60  ;;  %v787_v60 = vsub.s32 5, %v9224_v42 }
 0x2a7   :  { %5369 = vmatpush1.bf16.msra.mxu0 %v8830_v18  ;;  %v795_v18 = vsub.s32 7, %v9224_v42 }
 0x2a8   :  { %5370 = vmatprep.subr.bf16.mxu0 %v8835_v20  ;;  %v8928_v20 = vld [vmem:[%s11775_s1 + $0x10b4] ss:$40 sps:$4 sm:$0xff]  }
 0x2ab   :  { %5371 = vmatpush1.bf16.msra.mxu0 %v8833_v22  ;;  %v784_v22 = vrot.slane %v10897_v43, %v783_v52  ;;  %v8969_v52 = vld [vmem:[%s11777_s3 + $0x1f0] sm:$0xff]  }
 0x2ac   :  { %5372 = vmatprep.subr.bf16.mxu0 %v8838_v49  ;;  %v788_v49 = vrot.slane %v10897_v43, %v787_v60 }
 0x2af   :  { %5373 = vmatpush1.bf16.msra.mxu0 %v8836_v29  ;;  %v8926_v29 = vld [vmem:[%s11775_s1 + $0x10b0] ss:$40 sps:$4 sm:$0xff]  }
 0x2b0   :  { %5374 = vmatprep.subr.bf16.mxu0 %v8841_v30  ;;  %v796_v30 = vrot.slane %v10897_v43, %v795_v18  ;;  %v8973_v18 = vld [vmem:[%s11775_s1 + $0x1384] ss:$40 sps:$4 sm:$0xff]  }
 0x2b3   :  { %5375 = vmatpush1.bf16.msra.mxu0 %v8839_v31  ;;  %v8933_v31 = vld [vmem:[%s11775_s1 + $0x1104] ss:$40 sps:$4 sm:$0xff]  }
 0x2b4   :  { %5376 = vmatprep.subr.bf16.mxu0 %v8844_v33 }
 0x2b7   :  { %5377 = vmatpush1.bf16.msra.mxu0 %v8842_v34 }
 0x2b8   :  { %5378 = vmatprep.subr.bf16.mxu0 %v8847_v25 }
 0x2bb   :  { %5379 = vmatpush1.bf16.msra.mxu0 %v8845_v35 }
 0x2bc   :  { %5380 = vmatprep.subr.bf16.mxu0 %v8850_v15 }
 0x2bf   :  { %5381 = vmatpush1.bf16.msra.mxu0 %v8848_v37 }
 0x2c0   :  { %5391 = vmatprep.subr.bf16.mxu0 %v8853_v38 }
 0x2c2   :  { %5383 = vmatmul.mubr.bf16.vlgmr.msra.gmra.mrb[8].mxu0 %v9537_v23  ;;  %v8862_v23 = vld [vmem:[%s11775_s1 + $0xb14] ss:$40 sps:$4 sm:$0xff]  }
 0x2c3   :  { %5392 = vmatpush1.bf16.msra.mxu0 %v8851_v39  ;;  %5423 = vmatprep.mubr.bf16.mxu0 %v9549_v27  ;;  %v8860_v27 = vld [vmem:[%s11775_s1 + $0xb10] ss:$40 sps:$4 sm:$0xff]   ;;  %v8931_v39 = vld [vmem:[%s11775_s1 + $0x1100] ss:$40 sps:$4 sm:$0xff]  }
 0x2c4   :  { %5393 = vmatprep.subr.bf16.mxu0 %v8856_v40 }
 0x2c7   :  { %5394 = vmatpush1.bf16.msra.mxu0 %v8854_v45 }
 0x2c8   :  { %5395 = vmatprep.subr.bf16.mxu0 %v8859_v46 }
 0x2cb   :  { %5396 = vmatpush1.bf16.msra.mxu0 %v8857_v47 }
 0x2cc   :  { %5397 = vmatprep.subr.bf16.mxu0 %v8862_v23  ;;  %v8938_v23 = vld [vmem:[%s11775_s1 + $0x1154] ss:$40 sps:$4 sm:$0xff]  }
 0x2cf   :  { %5398 = vmatpush1.bf16.msra.mxu0 %v8860_v27 }
 0x2d0   :  { %5399 = vmatprep.subr.bf16.mxu0 %v8865_v24 }
 0x2d3   :  { %5400 = vmatpush1.bf16.msra.mxu0 %v8863_v48 }
 0x2d4   :  { %5401 = vmatprep.subr.bf16.mxu0 %v8868_v50 }
 0x2d7   :  { %5402 = vmatpush1.bf16.msra.mxu0 %v8866_v28 }
 0x2d8   :  { %5403 = vmatprep.subr.bf16.mxu0 %v8871_v51  ;;  %v8936_v51 = vld [vmem:[%s11775_s1 + $0x1150] ss:$40 sps:$4 sm:$0xff]  }
 0x2db   :  { %5404 = vmatpush1.bf16.msra.mxu0 %v8869_v53 }
 0x2dc   :  { %5405 = vmatprep.subr.bf16.mxu0 %v8874_v13  ;;  %v8943_v13 = vld [vmem:[%s11775_s1 + $0x11a4] ss:$40 sps:$4 sm:$0xff]  }
 0x2df   :  { %5406 = vmatpush1.bf16.msra.mxu0 %v8872_v55 }
 0x2e0   :  { %5407 = vmatprep.subr.bf16.mxu0 %v8877_v17  ;;  %v8940_v17 = vld [vmem:[%s11777_s3 + $0x180] sm:$0xff]  }
 0x2e3   :  { %5408 = vmatpush1.bf16.msra.mxu0 %v8875_v56 }
 0x2e4   :  { %5409 = vmatprep.subr.bf16.mxu0 %v8880_v57 }
 0x2e7   :  { %5410 = vmatpush1.bf16.msra.mxu0 %v8878_v58  ;;  %v8944_v58 = vld [vmem:[%s11777_s3 + $0x1c8] sm:$0xff]  }
 0x2e8   :  { %5411 = vmatprep.subr.bf16.mxu0 %v8883_v59  ;;  %v8941_v59 = vld [vmem:[%s11775_s1 + $0x11a0] ss:$40 sps:$4 sm:$0xff]  }
 0x2eb   :  { %5412 = vmatpush1.bf16.msra.mxu0 %v8881_v61  ;;  %v8948_v61 = vld [vmem:[%s11775_s1 + $0x11f4] ss:$40 sps:$4 sm:$0xff]  }
 0x2ec   :  { %5413 = vmatprep.subr.bf16.mxu0 %v8886_v26  ;;  %v8945_v26 = vld [vmem:[%s11777_s3 + $0x188] sm:$0xff]  }
 0x2ef   :  { %5414 = vmatpush1.bf16.msra.mxu0 %v8884_v62  ;;  %v8949_v62 = vld [vmem:[%s11777_s3 + $0x1d0] sm:$0xff]  }
 0x2f0   :  { %5415 = vmatprep.subr.bf16.mxu0 %v8889_v63  ;;  %v8946_v63 = vld [vmem:[%s11775_s1 + $0x11f0] ss:$40 sps:$4 sm:$0xff]  }
 0x2f3   :  { %5416 = vmatpush1.bf16.msra.mxu0 %v8887_v0  ;;  %v8953_v0 = vld [vmem:[%s11775_s1 + $0x1244] ss:$40 sps:$4 sm:$0xff]  }
 0x2f4   :  { %5417 = vmatprep.subr.bf16.mxu0 %v8892_v1  ;;  %v8950_v1 = vld [vmem:[%s11777_s3 + $0x190] sm:$0xff]  }
 0x2f7   :  { %5418 = vmatpush1.bf16.msra.mxu0 %v8890_v2  ;;  %v8954_v2 = vld [vmem:[%s11777_s3 + $0x1d8] sm:$0xff]  }
 0x2f8   :  { %5419 = vmatprep.subr.bf16.mxu0 %v8895_v3  ;;  %v8951_v3 = vld [vmem:[%s11775_s1 + $0x1240] ss:$40 sps:$4 sm:$0xff]  }
 0x2fb   :  { %5420 = vmatpush1.bf16.msra.mxu0 %v8893_v4  ;;  %v8958_v4 = vld [vmem:[%s11775_s1 + $0x1294] ss:$40 sps:$4 sm:$0xff]  }
 0x2fc   :  { %5421 = vmatprep.subr.bf16.mxu0 %v8898_v5  ;;  %v791_v5 = vsub.s32 6, %v9224_v42  ;;  %v9020_v42 = vld [vmem:[%s11780_s5 + $0x8] sm:$0xff]  }
 0x2ff   :  { %5422 = vmatpush1.bf16.msra.mxu0 %v8896_v6  ;;  %v8955_v6 = vld [vmem:[%s11777_s3 + $0x198] sm:$0xff]  }
 0x300   :  { %5432 = vmatprep.subr.bf16.mxu0 %v8903_v7  ;;  %v8959_v7 = vld [vmem:[%s11777_s3 + $0x1e0] sm:$0xff]  }
 0x302   :  { %5424 = vmatmul.mubr.bf16.vlgmr.msra.gmra.mrb[8].mxu0 %v9737_v32  ;;  %v8918_v32 = vld [vmem:[%s11775_s1 + $0x1014] ss:$40 sps:$4 sm:$0xff]  }
 0x303   :  { %5433 = vmatpush1.bf16.msra.mxu0 %v8901_v8  ;;  %5464 = vmatprep.mubr.bf16.mxu0 %v9753_v36  ;;  %v8916_v36 = vld [vmem:[%s11775_s1 + $0x1010] ss:$40 sps:$4 sm:$0xff]  }
 0x304   :  { %5434 = vmatprep.subr.bf16.mxu0 %v8908_v9  ;;  %v8956_v8 = vld [vmem:[%s11775_s1 + $0x1290] ss:$40 sps:$4 sm:$0xff]   ;;  %v792_v9 = vrot.slane %v10897_v43, %v791_v5  ;;  %v9011_v5 = vld [vmem:[%s11777_s3 + $0x260] sm:$0xff]  }
 0x307   :  { %5435 = vmatpush1.bf16.msra.mxu0 %v8906_v10  ;;  %v8963_v10 = vld [vmem:[%s11775_s1 + $0x12e4] ss:$40 sps:$4 sm:$0xff]  }
 0x308   :  { %5436 = vmatprep.subr.bf16.mxu0 %v8913_v11  ;;  %v8960_v11 = vld [vmem:[%s11777_s3 + $0x1a0] sm:$0xff]  }
 0x30b   :  { %5437 = vmatpush1.bf16.msra.mxu0 %v8911_v12  ;;  %v8964_v12 = vld [vmem:[%s11777_s3 + $0x1e8] sm:$0xff]  }
 0x30c   :  { %5438 = vmatprep.subr.bf16.mxu0 %v8918_v32  ;;  %v8961_v32 = vld [vmem:[%s11775_s1 + $0x12e0] ss:$40 sps:$4 sm:$0xff]  }
 0x30f   :  { %5439 = vmatpush1.bf16.msra.mxu0 %v8916_v36  ;;  %v8968_v36 = vld [vmem:[%s11775_s1 + $0x1334] ss:$40 sps:$4 sm:$0xff]  }
 0x310   :  { %5440 = vmatprep.subr.bf16.mxu0 %v8923_v14  ;;  %v8965_v14 = vld [vmem:[%s11777_s3 + $0x1a8] sm:$0xff]  }
 0x313   :  { %5441 = vmatpush1.bf16.msra.mxu0 %v8921_v16  ;;  %v8966_v16 = vld [vmem:[%s11775_s1 + $0x1330] ss:$40 sps:$4 sm:$0xff]  }
 0x314   :  { %5442 = vmatprep.subr.bf16.mxu0 %v8928_v20 }
 0x315   :  { %v5097_v33 = vpop.f32.mrb[4].mxu0 }
 0x316   :  { %v11445_v34 = vpop.f32.mrb[4].mxu1  ;;  %v7768_v25 = vadd.f32 %v5097_v33, %v784_v22  ;;  %v5099_v35 = vpop.f32.mrb[5].mxu0  ;;  %v8970_v22 = vld [vmem:[%s11777_s3 + $0x1b0] sm:$0xff]   ;;  %v8971_v33 = vld [vmem:[%s11775_s1 + $0x1380] ss:$40 sps:$4 sm:$0xff]  }
 0x317   :  { %v5304_v15 = vpop.f32.mrb[5].mxu1  ;;  %v7769_v37 = vadd.f32 %v5099_v35, %v788_v49  ;;  %v5101_v38 = vpop.f32.mrb[6].mxu0  ;;  %5443 = vmatpush1.bf16.msra.mxu0 %v8926_v29  ;;  %v7770_v43 = vadd.f32 %v11445_v34, %v792_v9  ;;  %v8974_v29 = vld [vmem:[%s11777_s3 + $0x1f8] sm:$0xff]   ;;  %v9015_v9 = vld [vmem:[%s11777_s3 + $0x270] sm:$0xff]  }
 0x318   :  { %v7771_v40 = vadd.f32 %v5304_v15, %v796_v30  ;;  %v5306_v45 = vpop.f32.mrb[6].mxu1  ;;  %v5518_v46 = vmul.f32 0.1, %v7768_v25  ;;  %v5102_v47 = vpop.f32.mrb[7].mxu0  ;;  %5444 = vmatprep.subr.bf16.mxu0 %v8933_v31  ;;  %v8978_v35 = vld [vmem:[%s11775_s1 + $0x13d4] ss:$40 sps:$4 sm:$0xff]  }
 0x319   :  { %v5307_v27 = vpop.f32.mrb[7].mxu1  ;;  %v5519_v24 = vmul.f32 0.1, %v7769_v37  ;;  %v5520_v60 = vmul.f32 0.1, %v7770_v43  ;;  %v8975_v15 = vld [vmem:[%s11777_s3 + $0x1b8] sm:$0xff]  }
 0x31a   :  { %v5521_v48 = vmul.f32 0.1, %v7771_v40  ;;  %v5528_v50 = vmax.f32 %v7768_v25, %v5518_v46  ;;  %v8984_v45 = vld [vmem:[%s11775_s1 + $0x1474] ss:$40 sps:$4 sm:$0xff]   ;;  %v8982_v46 = vld [vmem:[%s11775_s1 + $0x1470] ss:$40 sps:$4 sm:$0xff]  }
 0x31b   :  { %v5529_v28 = vmax.f32 %v7769_v37, %v5519_v24  ;;  %5445 = vmatpush1.bf16.msra.mxu0 %v8931_v39  ;;  %v5530_v34 = vmax.f32 %v7770_v43, %v5520_v60  ;;  %v8976_v37 = vld [vmem:[%s11775_s1 + $0x13d0] ss:$40 sps:$4 sm:$0xff]   ;;  %v8981_v39 = vld [vmem:[%s11775_s1 + $0x1424] ss:$40 sps:$4 sm:$0xff]   ;;  %v8991_v24 = vld [vmem:[%s11775_s1 + $0x1560] ss:$40 sps:$4 sm:$0xff]  }
 0x31c   :  { %v5531_v53 = vmax.f32 %v7771_v40, %v5521_v48  ;;  %5446 = vmatprep.subr.bf16.mxu0 %v8938_v23  ;;  %v5538_v57 = vpack.c.bf16 %v5528_v50, %v5528_v50  ;;  %v8979_v40 = vld [vmem:[%s11775_s1 + $0x1420] ss:$40 sps:$4 sm:$0xff]   ;;  %v8987_v47 = vld [vmem:[%s11775_s1 + $0x14c4] ss:$40 sps:$4 sm:$0xff]   ;;  %v8996_v48 = vld [vmem:[%s11775_s1 + $0x15b4] ss:$40 sps:$4 sm:$0xff]  }
 0x31d   :  { %v5539_v55 = vpack.c.bf16 %v5529_v28, %v5529_v28  ;;  %v5540_v38 = vpack.c.bf16 %v5530_v34, %v5530_v34  ;;  %v8985_v23 = vld [vmem:[%s11775_s1 + $0x14c0] ss:$40 sps:$4 sm:$0xff]   ;;  %v8993_v27 = vld [vmem:[%s11775_s1 + $0x1564] ss:$40 sps:$4 sm:$0xff]   ;;  %v8994_v50 = vld [vmem:[%s11775_s1 + $0x15b0] ss:$40 sps:$4 sm:$0xff]  }
 0x31e   :  { %v5541_v56 = vpack.c.bf16 %v5531_v53, %v5531_v53  ;;  %v7459_v28 = vld [vmem:[%s11779_s4] ss:$0 sm:$0xff] }
 0x31f   :  { %5447 = vmatpush1.bf16.msra.mxu0 %v8936_v51  ;;  %6303 = vmatprep.mubr.bf16.mxu1 %v5539_v55  ;;  %v8999_v51 = vld [vmem:[%s11775_s1 + $0x1604] ss:$40 sps:$4 sm:$0xff]  }
 0x320   :  { %6304 = vmatmul.mubr.bf16.vlgmr.msra.gmra.mrb[16].mxu1 %v5538_v57  ;;  %5448 = vmatprep.subr.bf16.mxu0 %v8943_v13  ;;  %v8997_v57 = vld [vmem:[%s11775_s1 + $0x1600] ss:$40 sps:$4 sm:$0xff]  }
 0x321   :  { %7634 = vmatpush3.bf16.msra.mxu1 %v8940_v17  ;;  %6343 = vmatprep.mubr.bf16.mxu1 %v5541_v56 }
 0x322   :  { %7635 = vmatprep.subr.bf16.mxu1 %v8944_v58 }
 0x323   :  { %5449 = vmatpush1.bf16.msra.mxu0 %v8941_v59  ;;  %v9002_v59 = vld [vmem:[%s11775_s1 + $0x1654] ss:$40 sps:$4 sm:$0xff]  }
 0x324   :  { %5450 = vmatprep.subr.bf16.mxu0 %v8948_v61 }
 0x325   :  { %7636 = vmatpush3.bf16.msra.mxu1 %v8945_v26  ;;  %v9000_v26 = vld [vmem:[%s11775_s1 + $0x1650] ss:$40 sps:$4 sm:$0xff]  }
 0x326   :  { %7637 = vmatprep.subr.bf16.mxu1 %v8949_v62  ;;  %v9003_v62 = vld [vmem:[%s11777_s3 + $0x240] sm:$0xff]  }
 0x327   :  { %5451 = vmatpush1.bf16.msra.mxu0 %v8946_v63  ;;  %v9004_v63 = vld [vmem:[%s11777_s3 + $0x200] sm:$0xff]  }
 0x328   :  { %5452 = vmatprep.subr.bf16.mxu0 %v8953_v0  ;;  %v9005_v0 = vld [vmem:[%s11777_s3 + $0x248] sm:$0xff]  }
 0x329   :  { %7638 = vmatpush3.bf16.msra.mxu1 %v8950_v1  ;;  %v9006_v1 = vld [vmem:[%s11777_s3 + $0x208] sm:$0xff]  }
 0x32a   :  { %7639 = vmatprep.subr.bf16.mxu1 %v8954_v2  ;;  %v9008_v2 = vld [vmem:[%s11777_s3 + $0x210] sm:$0xff]  }
 0x32b   :  { %5453 = vmatpush1.bf16.msra.mxu0 %v8951_v3  ;;  %v9009_v3 = vld [vmem:[%s11777_s3 + $0x258] sm:$0xff]  }
 0x32c   :  { %5454 = vmatprep.subr.bf16.mxu0 %v8958_v4  ;;  %v9010_v4 = vld [vmem:[%s11777_s3 + $0x218] sm:$0xff]  }
 0x32d   :  { %7640 = vmatpush3.bf16.msra.mxu1 %v8955_v6  ;;  %v9012_v6 = vld [vmem:[%s11777_s3 + $0x220] sm:$0xff]  }
 0x32e   :  { %7641 = vmatprep.subr.bf16.mxu1 %v8959_v7  ;;  %v9013_v7 = vld [vmem:[%s11777_s3 + $0x268] sm:$0xff]  }
 0x32f   :  { %5455 = vmatpush1.bf16.msra.mxu0 %v8956_v8  ;;  %v9014_v8 = vld [vmem:[%s11777_s3 + $0x228] sm:$0xff]  }
 0x330   :  { %5456 = vmatprep.subr.bf16.mxu0 %v8963_v10  ;;  %v9016_v10 = vld [vmem:[%s11777_s3 + $0x230] sm:$0xff]  }
 0x331   :  { %7642 = vmatpush3.bf16.msra.mxu1 %v8960_v11  ;;  %v9017_v11 = vld [vmem:[%s11777_s3 + $0x278] sm:$0xff]  }
 0x332   :  { %7643 = vmatprep.subr.bf16.mxu1 %v8964_v12  ;;  %v9018_v12 = vld [vmem:[%s11777_s3 + $0x238] sm:$0xff]  }
 0x333   :  { %5457 = vmatpush1.bf16.msra.mxu0 %v8961_v32  ;;  %v9045_v32 = vmov 0.0  }
 0x334   :  { %5458 = vmatprep.subr.bf16.mxu0 %v8968_v36 }
 0x335   :  { %7644 = vmatpush3.bf16.msra.mxu1 %v8965_v14 }
 0x336   :  { %v7583_v20 = vpop.f32.mrb[8].mxu1  ;;  %7645 = vmatprep.subr.bf16.mxu1 %v8969_v52 }
 0x337   :  { %v7584_v49 = vpop.f32.mrb[9].mxu1  ;;  %5459 = vmatpush1.bf16.msra.mxu0 %v8966_v16 }
 0x338   :  { %v7585_v30 = vadd.f32 %v7584_v49, %v7583_v20  ;;  %v7586_v31 = vpop.f32.mrb[10].mxu1  ;;  %5460 = vmatprep.subr.bf16.mxu0 %v8973_v18 }
 0x339   :  { %v7587_v25 = vpop.f32.mrb[11].mxu1  ;;  %7646 = vmatpush3.bf16.msra.mxu1 %v8970_v22  ;;  %v762_v31 = vld [vmem:[%s11778_s2 + $0x8] sm:$0x3] }
 0x33a   :  { %7647 = vmatprep.subr.bf16.mxu1 %v8974_v29  ;;  %v6226_v55 = vadd.f32 %v7585_v30, %v7459_v28  ;;  %v804_v34 = vrot.slane %v762_v31, %v771_v41  ;;  %v9021_v41 = vld [vmem:[%s11780_s5 + $0x10] sm:$0xff]  }
 0x33b   :  { %5461 = vmatpush1.bf16.msra.mxu0 %v8971_v33  ;;  %v800_v33 = vrot.slane %v762_v31, %v767_v21  ;;  %v9022_v21 = vld [vmem:[%s11780_s5 + $0x18] sm:$0xff]  }
 0x33c   :  { %5462 = vmatprep.subr.bf16.mxu0 %v8978_v35 }
 0x33d   :  { %7648 = vmatpush3.bf16.msra.mxu1 %v8975_v15 }
 0x33e   :  { %7655 = vmatprep.subr.bf16.mxu1 %v9003_v62  ;;  %v9030_v62 = vld [vmem:[%s11781_s7 + $0x18] sm:$0xff]  }
 0x33f   :  { %5463 = vmatpush1.bf16.msra.mxu0 %v8976_v37 }
 0x340   :  { %6344 = vmatmul.mubr.bf16.vlgmr.msra.gmra.mrb[20].mxu1 %v5540_v38  ;;  %5473 = vmatprep.subr.bf16.mxu0 %v8981_v39 }
 0x341   :  { %7656 = vmatpush3.bf16.msra.mxu1 %v9004_v63  ;;  %v9031_v63 = vld [vmem:[%s11781_s7 + $0x20] sm:$0xff]  }
 0x342   :  { %5465 = vmatmul.mubr.bf16.vlgmr.msra.gmra.mrb[8].mxu0 %v9944_v44  ;;  %v8990_v44 = vld [vmem:[%s11775_s1 + $0x1514] ss:$40 sps:$4 sm:$0xff]   ;;  %7657 = vmatprep.subr.bf16.mxu1 %v9005_v0  ;;  %v9032_v0 = vld [vmem:[%s11781_s7 + $0x28] sm:$0xff]  }
 0x343   :  { %5474 = vmatpush1.bf16.msra.mxu0 %v8979_v40  ;;  %5505 = vmatprep.mubr.bf16.mxu0 %v9044_v54  ;;  %v8988_v54 = vld [vmem:[%s11775_s1 + $0x1510] ss:$40 sps:$4 sm:$0xff]  }
 0x344   :  { %5475 = vmatprep.subr.bf16.mxu0 %v8984_v45 }
 0x345   :  { %7658 = vmatpush3.bf16.msra.mxu1 %v9006_v1  ;;  %v9033_v1 = vld [vmem:[%s11781_s7 + $0x30] sm:$0xff]  }
 0x347   :  { %5476 = vmatpush1.bf16.msra.mxu0 %v8982_v46 }
 0x348   :  { %5477 = vmatprep.subr.bf16.mxu0 %v8987_v47 }
 0x34b   :  { %5478 = vmatpush1.bf16.msra.mxu0 %v8985_v23 }
 0x34c   :  { %5479 = vmatprep.subr.bf16.mxu0 %v8990_v44  ;;  %v9019_v44 = vld [vmem:[%s11780_s5] sm:$0xff]  }
 0x34f   :  { %5480 = vmatpush1.bf16.msra.mxu0 %v8988_v54 }
 0x350   :  { %5481 = vmatprep.subr.bf16.mxu0 %v8993_v27  ;;  %v9023_v27 = vld [vmem:[%s11780_s5 + $0x20] sm:$0xff]  }
 0x353   :  { %5482 = vmatpush1.bf16.msra.mxu0 %v8991_v24  ;;  %v9024_v24 = vld [vmem:[%s11780_s5 + $0x28] sm:$0xff]  }
 0x354   :  { %5483 = vmatprep.subr.bf16.mxu0 %v8996_v48  ;;  %v9025_v48 = vld [vmem:[%s11780_s5 + $0x30] sm:$0xff]  }
 0x356   :  { %v7605_v53 = vpop.f32.mrb[12].mxu1 }
 0x357   :  { %v7606_v13 = vpop.f32.mrb[13].mxu1  ;;  %5484 = vmatpush1.bf16.msra.mxu0 %v8994_v50  ;;  %v9026_v50 = vld [vmem:[%s11780_s5 + $0x38] sm:$0xff]  }
 0x358   :  { %v7607_v17 = vadd.f32 %v7606_v13, %v7605_v53  ;;  %v7608_v56 = vpop.f32.mrb[14].mxu1  ;;  %5485 = vmatprep.subr.bf16.mxu0 %v8999_v51 }
 0x359   :  { %v7609_v58 = vpop.f32.mrb[15].mxu1 }
 0x35a   :  { %v6266_v61 = vadd.f32 %v7607_v17, %v6226_v55  ;;  %v9027_v58 = vld [vmem:[%s11781_s7] sm:$0xff]  }
 0x35b   :  { %5486 = vmatpush1.bf16.msra.mxu0 %v8997_v57 }
 0x35c   :  { %5487 = vmatprep.subr.bf16.mxu0 %v9002_v59 }
 0x35f   :  { %5488 = vmatpush1.bf16.msra.mxu0 %v9000_v26  ;;  %v9029_v26 = vld [vmem:[%s11781_s7 + $0x10] sm:$0xff]  }
 0x362   :  { %5506 = vmatmul.mubr.bf16.vlgmr.msra.gmra.mrb[8].mxu0 %v10047_v19  ;;  %v9007_v19 = vld [vmem:[%s11777_s3 + $0x250] sm:$0xff]  }
 0x363   :  { %7659 = vmatprep.subr.bf16.mxu1 %v9007_v19  ;;  %v9034_v19 = vld [vmem:[%s11781_s7 + $0x38] sm:$0xff]  }
 0x364   :  { %7660 = vmatpush3.bf16.msra.mxu1 %v9008_v2  ;;  %v7540_v2 = vld [vmem:[%s11783_s6] ss:$0 sm:$0xff] }
 0x365   :  { %7661 = vmatprep.subr.bf16.mxu1 %v9009_v3 }
 0x368   :  { %7662 = vmatpush3.bf16.msra.mxu1 %v9010_v4 }
 0x369   :  { %7663 = vmatprep.subr.bf16.mxu1 %v9011_v5 }
 0x36c   :  { %7664 = vmatpush3.bf16.msra.mxu1 %v9012_v6 }
 0x36d   :  { %7665 = vmatprep.subr.bf16.mxu1 %v9013_v7 }
 0x370   :  { %7666 = vmatpush3.bf16.msra.mxu1 %v9014_v8 }
 0x371   :  { %7667 = vmatprep.subr.bf16.mxu1 %v9015_v9 }
 0x374   :  { %7668 = vmatpush3.bf16.msra.mxu1 %v9016_v10  ;;  %v9035_v10 = vld [vmem:[%s11782_s9] sm:$0xff]  }
 0x375   :  { %7669 = vmatprep.subr.bf16.mxu1 %v9017_v11 }
 0x378   :  { %7670 = vmatpush3.bf16.msra.mxu1 %v9018_v12  ;;  %v9036_v12 = vld [vmem:[%s11782_s9 + $0x8] sm:$0xff]  }
 0x379   :  { %7704 = vmatprep.subr.bf16.mxu1 %v9045_v32 }
 0x3f3   :  { %v7627_v43 = vpop.f32.mrb[16].mxu1 }
 0x3f4   :  { %v7628_v36 = vpop.f32.mrb[17].mxu1 }
 0x3f5   :  { %v7629_v14 = vadd.f32 %v7628_v36, %v7627_v43  ;;  %v7630_v52 = vpop.f32.mrb[18].mxu1  ;;  %v9037_v43 = vld [vmem:[%s11782_s9 + $0x10] sm:$0xff]   ;;  %v9038_v36 = vld [vmem:[%s11782_s9 + $0x18] sm:$0xff]  }
 0x3f6   :  { %v7631_v16 = vpop.f32.mrb[19].mxu1  ;;  %v9040_v52 = vld [vmem:[%s11782_s9 + $0x28] sm:$0xff]  }
 0x3f7   :  { %v6306_v60 = vadd.f32 %v7629_v14, %v6266_v61  ;;  %v9028_v61 = vld [vmem:[%s11781_s7 + $0x8] sm:$0xff]   ;;  %v9039_v14 = vld [vmem:[%s11782_s9 + $0x20] sm:$0xff]   ;;  %v9041_v16 = vld [vmem:[%s11782_s9 + $0x30] sm:$0xff]  }
 0x413   :  { %v7649_v18 = vpop.f32.mrb[20].mxu1 }
 0x414   :  { %v7650_v20 = vpop.f32.mrb[21].mxu1 }
 0x415   :  { %v7651_v22 = vadd.f32 %v7650_v20, %v7649_v18  ;;  %v7652_v49 = vpop.f32.mrb[22].mxu1  ;;  %v7549_v18 = vld [vmem:[%s11784_s8] ss:$0 sm:$0xff] }
 0x416   :  { %v7653_v29 = vpop.f32.mrb[23].mxu1 }
 0x417   :  { %v6346_v30 = vadd.f32 %v7651_v22, %v6306_v60  ;;  %v9042_v60 = vld [vmem:[%s11782_s9 + $0x38] sm:$0xff]  }
 0x435   :  { %v5507_v25 = vpop.f32.mrb[8].mxu0 }
 0x436   :  { %v7772_v35 = vadd.f32 %v5507_v25, %v800_v33  ;;  %v5509_v15 = vpop.f32.mrb[9].mxu0 }
 0x437   :  { %v7773_v37 = vadd.f32 %v5509_v15, %v804_v34  ;;  %v5511_v38 = vpop.f32.mrb[10].mxu0 }
 0x438   :  { %v5522_v39 = vmul.f32 0.1, %v7772_v35  ;;  %v5512_v40 = vpop.f32.mrb[11].mxu0 }
 0x439   :  { %v5523_v45 = vmul.f32 0.1, %v7773_v37 }
 0x43a   :  { %v5532_v46 = vmax.f32 %v7772_v35, %v5522_v39 }
 0x43b   :  { %v5533_v47 = vmax.f32 %v7773_v37, %v5523_v45 }
 0x43c   :  { %v5542_v54 = vpack.c.bf16 %v5532_v46, %v5532_v46 }
 0x43d   :  { %v5543_v23 = vpack.c.bf16 %v5533_v47, %v5533_v47 }
 0x43f   :  { %6383 = vmatprep.mubr.bf16.mxu1 %v5543_v23 }
 0x440   :  { %6384 = vmatmul.mubr.bf16.vlgmr.msra.gmra.mrb[24].mxu1 %v5542_v54 }
 0x441   :  { %7705 = vmatpush3.bf16.msra.mxu1 %v9019_v44  ;;  %7720 = vmatprep.mubr.msk.bf16.mxu1 %vm9046_vm0, %v9045_v32 }
 0x442   :  { %7706 = vmatprep.subr.bf16.mxu1 %v9045_v32 }
 0x445   :  { %7707 = vmatpush3.bf16.msra.mxu1 %v9020_v42 }
 0x446   :  { %7708 = vmatprep.subr.bf16.mxu1 %v9045_v32 }
 0x449   :  { %7709 = vmatpush3.bf16.msra.mxu1 %v9021_v41 }
 0x44a   :  { %7710 = vmatprep.subr.bf16.mxu1 %v9045_v32 }
 0x44d   :  { %7711 = vmatpush3.bf16.msra.mxu1 %v9022_v21 }
 0x44e   :  { %7712 = vmatprep.subr.bf16.mxu1 %v9045_v32 }
 0x451   :  { %7713 = vmatpush3.bf16.msra.mxu1 %v9023_v27 }
 0x452   :  { %7714 = vmatprep.subr.bf16.mxu1 %v9045_v32 }
 0x455   :  { %7715 = vmatpush3.bf16.msra.mxu1 %v9024_v24 }
 0x456   :  { %7716 = vmatprep.subr.bf16.mxu1 %v9045_v32 }
 0x459   :  { %7717 = vmatpush3.bf16.msra.mxu1 %v9025_v48 }
 0x45a   :  { %7718 = vmatprep.subr.bf16.mxu1 %v9045_v32 }
 0x45d   :  { %7719 = vmatpush3.bf16.msra.mxu1 %v9026_v50 }
 0x45e   :  { %7724 = vmatprep.subr.bf16.mxu1 %v9045_v32 }
 0x513   :  { %v7671_v28 = vpop.f32.mrb[24].mxu1 }
 0x514   :  { %v7672_v51 = vpop.f32.mrb[25].mxu1 }
 0x515   :  { %v7673_v53 = vadd.f32 %v7672_v51, %v7671_v28  ;;  %v7674_v13 = vpop.f32.mrb[26].mxu1 }
 0x516   :  { %v7675_v55 = vpop.f32.mrb[27].mxu1 }
 0x517   :  { %v6386_v17 = vadd.f32 %v7673_v53, %v6346_v30 }
 0x519   :  { %v6391_v56 = vmul.f32 0.1, %v6386_v17 }
 0x51b   :  { %v6392_v57 = vmax.f32 %v6386_v17, %v6391_v56 }
 0x51d   :  { %v6393_v59 = vpack.c.bf16 %v6392_v57, %v6392_v57 }
 0x51f   :  { %7721 = vmatmul.mubr.bf16.vlgmr.msra.gmra.mrb[28].mxu1 %v6393_v59 }
 0x520   :  { %7725 = vmatpush3.bf16.msra.mxu1 %v9027_v58  ;;  %7740 = vmatprep.mubr.msk.bf16.mxu1 %vm9046_vm0, %v9045_v32 }
 0x521   :  { %7726 = vmatprep.subr.bf16.mxu1 %v9045_v32 }
 0x524   :  { %7727 = vmatpush3.bf16.msra.mxu1 %v9028_v61 }
 0x525   :  { %7728 = vmatprep.subr.bf16.mxu1 %v9045_v32 }
 0x528   :  { %7729 = vmatpush3.bf16.msra.mxu1 %v9029_v26 }
 0x529   :  { %7730 = vmatprep.subr.bf16.mxu1 %v9045_v32 }
 0x52c   :  { %7731 = vmatpush3.bf16.msra.mxu1 %v9030_v62 }
 0x52d   :  { %7732 = vmatprep.subr.bf16.mxu1 %v9045_v32 }
 0x530   :  { %7733 = vmatpush3.bf16.msra.mxu1 %v9031_v63 }
 0x531   :  { %7734 = vmatprep.subr.bf16.mxu1 %v9045_v32 }
 0x534   :  { %7735 = vmatpush3.bf16.msra.mxu1 %v9032_v0 }
 0x535   :  { %7736 = vmatprep.subr.bf16.mxu1 %v9045_v32 }
 0x538   :  { %7737 = vmatpush3.bf16.msra.mxu1 %v9033_v1 }
 0x539   :  { %7738 = vmatprep.subr.bf16.mxu1 %v9045_v32 }
 0x53c   :  { %7739 = vmatpush3.bf16.msra.mxu1 %v9034_v19 }
 0x53d   :  { %7744 = vmatprep.subr.bf16.mxu1 %v9045_v32 }
 0x5f2   :  { %v6499_v3 = vpop.f32.mrb[28].mxu1 }
 0x5f3   :  { %v6500_v4 = vadd.f32 %v7540_v2, %v6499_v3  ;;  %v7722_v5 = vpop.f32.mrb[29].mxu1 }
 0x5f4   :  { %v6502_v6 = vpop.f32.mrb[30].mxu1 }
 0x5f5   :  { %v6505_v7 = vmul.f32 0.1, %v6500_v4  ;;  %v7723_v8 = vpop.f32.mrb[31].mxu1 }
 0x5f7   :  { %v6506_v9 = vmax.f32 %v6500_v4, %v6505_v7 }
 0x5f9   :  { %v6507_v11 = vpack.c.bf16 %v6506_v9, %v6506_v9 }
 0x5fb   :  { %7741 = vmatmul.mubr.bf16.vlgmr.msra.gmra.mrb[32].mxu1 %v6507_v11 }
 0x5fc   :  { %7745 = vmatpush3.bf16.msra.mxu1 %v9035_v10  ;;  %7760 = vmatprep.mubr.msk.bf16.mxu1 %vm9046_vm0, %v9045_v32 }
 0x5fd   :  { %7746 = vmatprep.subr.bf16.mxu1 %v9045_v32 }
 0x600   :  { %7747 = vmatpush3.bf16.msra.mxu1 %v9036_v12 }
 0x601   :  { %7748 = vmatprep.subr.bf16.mxu1 %v9045_v32 }
 0x604   :  { %7749 = vmatpush3.bf16.msra.mxu1 %v9037_v43 }
 0x605   :  { %7750 = vmatprep.subr.bf16.mxu1 %v9045_v32 }
 0x608   :  { %7751 = vmatpush3.bf16.msra.mxu1 %v9038_v36 }
 0x609   :  { %7752 = vmatprep.subr.bf16.mxu1 %v9045_v32 }
 0x60c   :  { %7753 = vmatpush3.bf16.msra.mxu1 %v9039_v14 }
 0x60d   :  { %7754 = vmatprep.subr.bf16.mxu1 %v9045_v32 }
 0x610   :  { %7755 = vmatpush3.bf16.msra.mxu1 %v9040_v52 }
 0x611   :  { %7756 = vmatprep.subr.bf16.mxu1 %v9045_v32 }
 0x614   :  { %7757 = vmatpush3.bf16.msra.mxu1 %v9041_v16 }
 0x615   :  { %7758 = vmatprep.subr.bf16.mxu1 %v9045_v32  ;;  %v7558_v32 = vld [vmem:[%s11785_s10] ss:$0 sm:$0xff] }
 0x618   :  { %7759 = vmatpush3.bf16.msra.mxu1 %v9042_v60 }
 0x6ce   :  { %v6613_v20 = vpop.f32.mrb[32].mxu1 }
 0x6cf   :  { %v6614_v22 = vadd.f32 %v7549_v18, %v6613_v20  ;;  %v7742_v49 = vpop.f32.mrb[33].mxu1 }
 0x6d0   :  { %v6616_v29 = vpop.f32.mrb[34].mxu1 }
 0x6d1   :  { %v6619_v30 = vmul.f32 0.1, %v6614_v22  ;;  %v7743_v31 = vpop.f32.mrb[35].mxu1 }
 0x6d3   :  { %v6620_v33 = vmax.f32 %v6614_v22, %v6619_v30 }
 0x6d5   :  { %v6621_v34 = vpack.c.bf16 %v6620_v33, %v6620_v33 }
 0x6d7   :  { %7761 = vmatmul.mubr.bf16.vlgmr.msra.gmra.mrb[36].mxu1 %v6621_v34 }
 0x7aa   :  { %v6727_v25 = vpop.f32.mrb[36].mxu1 }
 0x7ab   :  { %v6728_v35 = vadd.f32 %v7558_v32, %v6727_v25  ;;  %v7762_v15 = vpop.f32.mrb[37].mxu1 }
 0x7ac   :  { %v6730_v37 = vpop.f32.mrb[38].mxu1 }
 0x7ad   :  { %6733 = vst [vmem:[%s11786_s11] sm:$0x3] %v6728_v35  ;;  %v7763_v38 = vpop.f32.mrb[39].mxu1 }

</bundles_post_ra>
